<compile_context>
chip_gen: v7x
topology: tpu7x:2x2x1
jax: 0.10.0
libtpu: 0.0.40
codegen_flags: <defaults>
</compile_context>

<pallas_src>
from functools import partial

import jax
import jax.numpy as jnp
from jax.experimental import pallas as pl
from jax.experimental.pallas import tpu as pltpu

DILATION_RATES = (6, 12, 18)
LANE = 128


# ----------------------------- small helpers ------------------------------

def _round_up(v, m):
    return ((v + m - 1) // m) * m


def _pad_to(a, shape):
    return jnp.pad(a, [(0, s - d) for d, s in zip(a.shape, shape)])


def _padv(v, n, fill=0.0):
    return jnp.concatenate([v, jnp.full((n - v.shape[0],), fill, jnp.float32)])


def _full_spec(shape):
    # whole-array block, constant index map -> resident in VMEM across the grid
    return pl.BlockSpec(shape, lambda *_: (0,) * len(shape))


def _aspp_taps(H, W):
    """Static list of spatial tap offsets for the fused ASPP conv matmul.

    Entry 0 is the combined 'center' tap (1x1 branch + the center tap of every dilated
    branch).  Off-center taps whose window lies entirely inside the zero padding at this
    (H, W) are dropped at pack/trace time (e.g. all rate-18 off-center taps at 16x16).
    Returns tuples (dh, dw, rate_index, tap_index); rate_index = -1 marks the center entry.
    """
    taps = [(0, 0, -1, -1)]
    for ri, r in enumerate(DILATION_RATES):
        for k in range(9):
            kh, kw = k // 3, k % 3
            if kh == 1 and kw == 1:
                continue                      # folded into the combined center tap
            dh, dw = (kh - 1) * r, (kw - 1) * r
            if (dh != 0 and abs(dh) >= H) or (dw != 0 and abs(dw) >= W):
                continue                      # window is all zero padding -> contributes 0
            taps.append((dh, dw, ri, k))
    return taps


# ----------------------------- fused Pallas kernel ------------------------------

def _fused_block_kernel(n1p_ref, x_ref, wslab_ref, brsh_ref, wproj_ref,
                        poolb_ref, projsh_ref, sepw_ref, sepb_ref,
                        w1_ref, b1_ref, w2_ref, b2_ref,
                        o_ref,
                        slab_ref, lbuf_ref, sepslab_ref,
                        *, H, W, P, taps):
    """Whole multilocalBlock for one batch image, entirely in VMEM.

    n1p_ref : (1, HPAD, WPAD, Cp) bf16 zero-padded bn1-normalized image
    x_ref   : (1, H, W, Cp) f32 residual input (aliased to the output HBM buffer)
    wslab   : (T*Cp, Zp) bf16 branch-packed, BN-scale-folded ASPP conv weights (one Cp block
              of K per spatial tap)
    sepw    : (9*Cp, Cp) bf16 depthwise-3x3-folded-into-pointwise weights
    """
    Cp = o_ref.shape[-1]
    R = H * W

    # ---------- Stage 1: ASPP conv branches as ONE big-K MXU matmul ----------
    for t, (dh, dw) in enumerate(taps):
        win = n1p_ref[0, pl.ds(P + dh, H), pl.ds(P + dw, W), :]
        slab_ref[:, pl.ds(t * Cp, Cp)] = win.reshape(R, Cp)

    z = jnp.dot(slab_ref[...], wslab_ref[...], preferred_element_type=jnp.float32)
    z = jnp.maximum(z + brsh_ref[...], 0.0)               # per-branch BN shift + ReLU

    # ASPP projection (branch-packed rows, proj-BN scale folded into columns)
    # + image-pooling branch bias + proj-BN shift + ReLU.  Dropout(0.5) -> eval identity.
    local = jnp.dot(z.astype(jnp.bfloat16), wproj_ref[...],
                    preferred_element_type=jnp.float32)
    local = jnp.maximum(local + poolb_ref[0] + projsh_ref[...], 0.0)
    local = local.astype(jnp.bfloat16).reshape(H, W, Cp)

    # ---------- Stage 2: pad_out (reflect, edge-excluding) + SeparableConvBN proj ----------
    # lbuf row/col 0 = conv zero pad, 1..H/W = local, H+1/W+1 = reflect row/col (index -2).
    lbuf_ref[...] = jnp.zeros_like(lbuf_ref)
    lbuf_ref[pl.ds(1, H), pl.ds(1, W), :] = local
    lbuf_ref[pl.ds(H + 1, 1), pl.ds(1, W), :] = local[H - 2:H - 1, :, :]
    lbuf_ref[pl.ds(1, H), pl.ds(W + 1, 1), :] = local[:, W - 2:W - 1, :]
    lbuf_ref[pl.ds(H + 1, 1), pl.ds(W + 1, 1), :] = local[H - 2:H - 1, W - 2:W - 1, :]

    # depthwise 3x3 (BN scale folded) merged into the pointwise 1x1 -> one (R, 9*Cp) matmul
    for t in range(9):
        kh, kw = t // 3, t % 3
        win = lbuf_ref[pl.ds(kh, H), pl.ds(kw, W), :]
        sepslab_ref[:, pl.ds(t * Cp, Cp)] = win.reshape(R, Cp)

    x0 = x_ref[...].reshape(R, Cp)
    x2 = jnp.dot(sepslab_ref[...], sepw_ref[...], preferred_element_type=jnp.float32)
    x2 = x2 + sepb_ref[...] + x0                           # x + attn(norm1(x))

    # ---------- Stage 3: MLP tail (norm2 folded into fc1) + residual ----------
    h = jnp.dot(x2.astype(jnp.bfloat16), w1_ref[...], preferred_element_type=jnp.float32)
    h = jnp.clip(h + b1_ref[...], 0.0, 6.0)                # ReLU6
    y = jnp.dot(h.astype(jnp.bfloat16), w2_ref[...], preferred_element_type=jnp.float32)
    y = y + b2_ref[...] + x2                               # x + mlp(norm2(x))

    o_ref[...] = y.reshape(1, H, W, Cp)


def fused_block(n1_pad, x_img, pool_bias, pk, *, B, H, W, Cp, P, taps):
    HPAD, WPAD = n1_pad.shape[1], n1_pad.shape[2]
    T = len(taps)
    kernel = partial(_fused_block_kernel, H=H, W=W, P=P, taps=taps)
    return pl.pallas_call(
        kernel,
        grid=(B,),
        in_specs=[
            pl.BlockSpec((1, HPAD, WPAD, Cp), lambda b: (b, 0, 0, 0)),   # padded n1 image
            pl.BlockSpec((1, H, W, Cp), lambda b: (b, 0, 0, 0)),          # residual x
            _full_spec(pk['aspp_slab_w'].shape),
            _full_spec(pk['aspp_br_shift'].shape),
            _full_spec(pk['aspp_wproj'].shape),
            pl.BlockSpec((1, 1, Cp), lambda b: (b, 0, 0)),                # per-batch pool bias
            _full_spec(pk['aspp_proj_shift'].shape),
            _full_spec(pk['sep_w'].shape),
            _full_spec(pk['sep_bias'].shape),
            _full_spec(pk['mlp_w1'].shape),
            _full_spec(pk['mlp_b1'].shape),
            _full_spec(pk['mlp_w2'].shape),
            _full_spec(pk['mlp_b2'].shape),
        ],
        out_specs=pl.BlockSpec((1, H, W, Cp), lambda b: (b, 0, 0, 0)),
        out_shape=jax.ShapeDtypeStruct((B, H, W, Cp), jnp.float32),
        scratch_shapes=[
            pltpu.VMEM((H * W, T * Cp), jnp.bfloat16),        # ASPP im2col slab
            pltpu.VMEM((H + 2, W + 2, Cp), jnp.bfloat16),     # reflect+zero padded 'local'
            pltpu.VMEM((H * W, 9 * Cp), jnp.bfloat16),        # sep-conv im2col slab
        ],
        input_output_aliases={1: 0},       # residual x buffer reused for the output
        compiler_params=pltpu.CompilerParams(
            dimension_semantics=("parallel",),
            vmem_limit_bytes=48 * 1024 * 1024),
    )(n1_pad, x_img, pk['aspp_slab_w'], pk['aspp_br_shift'], pk['aspp_wproj'],
      pool_bias, pk['aspp_proj_shift'], pk['sep_w'], pk['sep_bias'],
      pk['mlp_w1'], pk['mlp_b1'], pk['mlp_w2'], pk['mlp_b2'])


# ----------------------------- parameters ------------------------------

def _bn_params(key, c, eps=1e-5):
    k1, k2, k3, k4 = jax.random.split(key, 4)
    gamma = 1.0 + 0.1 * jax.random.normal(k1, (c,), jnp.float32)
    beta = 0.1 * jax.random.normal(k2, (c,), jnp.float32)
    mean = 0.1 * jax.random.normal(k3, (c,), jnp.float32)
    var = 0.5 + jax.random.uniform(k4, (c,), jnp.float32)
    scale = gamma / jnp.sqrt(var + eps)
    shift = beta - mean * scale
    return scale, shift


def init_params(key, dim, mlp_ratio=4.0):
    hidden = int(dim * mlp_ratio)
    keys = iter(jax.random.split(key, 64))
    std = 0.05
    p = {}
    p['bn1'] = _bn_params(next(keys), dim)
    # ASPP (torchvision-style): 1x1 branch, dilated 3x3 branches (tap, cin, cout),
    # pooling branch, projection split per branch
    p['aspp_w0'] = std * jax.random.normal(next(keys), (dim, dim), jnp.float32)
    p['aspp_bn0'] = _bn_params(next(keys), dim)
    for r in DILATION_RATES:
        p[f'aspp_w{r}'] = std * jax.random.normal(next(keys), (9, dim, dim), jnp.float32)
        p[f'aspp_bn{r}'] = _bn_params(next(keys), dim)
    p['aspp_wp'] = std * jax.random.normal(next(keys), (dim, dim), jnp.float32)
    p['aspp_bnp'] = _bn_params(next(keys), dim)
    p['aspp_wproj'] = std * jax.random.normal(next(keys), (5, dim, dim), jnp.float32)
    p['aspp_bnproj'] = _bn_params(next(keys), dim)
    # SeparableConvBN proj (kernel_size = window_size = 3)
    p['sep_dw_w'] = std * jax.random.normal(next(keys), (9, dim), jnp.float32)
    p['sep_bn'] = _bn_params(next(keys), dim)
    p['sep_pw_w'] = std * jax.random.normal(next(keys), (dim, dim), jnp.float32)
    p['bn2'] = _bn_params(next(keys), dim)
    # Mlp (1x1 convs with bias)
    p['fc1_w'] = std * jax.random.normal(next(keys), (dim, hidden), jnp.float32)
    p['fc1_b'] = 0.1 * jax.random.normal(next(keys), (hidden,), jnp.float32)
    p['fc2_w'] = std * jax.random.normal(next(keys), (hidden, dim), jnp.float32)
    p['fc2_b'] = 0.1 * jax.random.normal(next(keys), (dim,), jnp.float32)
    return p


def pack_params(p, dim, H, W, mlp_ratio=4.0):
    """Fold BNs into adjacent weights, branch-pack the ASPP convs, zero-pad channels to a
    lane-dense multiple of 128 and cast matmul weights to bf16 (epilogue math stays f32)."""
    C = dim
    Cp = _round_up(C, LANE)
    hid = int(dim * mlp_ratio)
    Hp = _round_up(hid, LANE)
    # branch-packed layout: the 4 conv-branch outputs share one 128-lane tile when they fit
    if 4 * C <= LANE:
        S, Zp = C, LANE
    else:
        # TODO(synk): large-dim fallback keeps each branch in its own lane group (correct
        # but wastes MXU work); per-branch dots would be the better layout there.
        S, Zp = Cp, 4 * Cp

    pk = {}
    s1, t1 = p['bn1']
    pk['bn1_scale'] = _padv(s1, Cp, 1.0)
    pk['bn1_shift'] = _padv(t1, Cp, 0.0)

    # --- ASPP conv branches: BN scales folded into output columns, branch-packed ---
    def branch_block(w, scale, bi):
        blk = jnp.zeros((Cp, Zp), jnp.float32)
        return blk.at[:C, bi * S:bi * S + C].set(w * scale[None, :])

    s0, t0 = p['aspp_bn0']
    rate_w, rate_scale, rate_shift = [], [], []
    center = branch_block(p['aspp_w0'], s0, 0)
    for ri, r in enumerate(DILATION_RATES):
        sr, tr = p[f'aspp_bn{r}']
        rate_w.append(p[f'aspp_w{r}'])
        rate_scale.append(sr)
        rate_shift.append(tr)
        center = center + branch_block(rate_w[ri][4], sr, 1 + ri)   # center tap of each rate

    taps = _aspp_taps(H, W)
    blocks = [center]
    for (_, _, ri, k) in taps[1:]:
        blocks.append(branch_block(rate_w[ri][k], rate_scale[ri], 1 + ri))
    pk['aspp_slab_w'] = jnp.concatenate(blocks, axis=0).astype(jnp.bfloat16)   # (T*Cp, Zp)

    brsh = jnp.zeros((Zp,), jnp.float32).at[0:C].set(t0)
    for ri in range(len(DILATION_RATES)):
        brsh = brsh.at[(1 + ri) * S:(1 + ri) * S + C].set(rate_shift[ri])
    pk['aspp_br_shift'] = brsh[None, :]

    # --- ASPP projection: proj-BN scale folded into columns; branch-packed rows ---
    psc, psh = p['aspp_bnproj']
    wproj = p['aspp_wproj']                                   # (5, C, C)
    wp_pack = jnp.zeros((Zp, Cp), jnp.float32)
    for bi in range(4):
        wp_pack = wp_pack.at[bi * S:bi * S + C, :C].set(wproj[bi] * psc[None, :])
    pk['aspp_wproj'] = wp_pack.astype(jnp.bfloat16)
    pk['aspp_proj_shift'] = _padv(psh, Cp, 0.0)[None, :]
    # pooling branch (evaluated on (B, C)-sized tensors in the XLA wrapper, f32)
    pk['aspp_pool_w'] = _pad_to(p['aspp_wp'], (Cp, Cp))
    spp, tpp = p['aspp_bnp']
    pk['aspp_bnp_scale'] = _padv(spp, Cp, 1.0)
    pk['aspp_bnp_shift'] = _padv(tpp, Cp, 0.0)
    pk['aspp_wproj_pool'] = _pad_to(wproj[4] * psc[None, :], (Cp, Cp))

    # --- SeparableConvBN proj: depthwise (BN scale folded) merged into the pointwise 1x1 ---
    sb, tb = p['sep_bn']
    sep_blocks = []
    for t in range(9):
        d = p['sep_dw_w'][t] * sb                             # (C,) per-channel weight
        sep_blocks.append(_pad_to(d[:, None] * p['sep_pw_w'], (Cp, Cp)))   # diag(d) @ Wpw
    pk['sep_w'] = jnp.concatenate(sep_blocks, axis=0).astype(jnp.bfloat16)  # (9*Cp, Cp)
    pk['sep_bias'] = _pad_to(tb @ p['sep_pw_w'], (Cp,))[None, :]

    # --- MLP: norm2 folded into fc1 ---
    s2, t2 = p['bn2']
    pk['mlp_w1'] = _pad_to(s2[:, None] * p['fc1_w'], (Cp, Hp)).astype(jnp.bfloat16)
    pk['mlp_b1'] = _pad_to(t2 @ p['fc1_w'] + p['fc1_b'], (Hp,))[None, :]
    pk['mlp_w2'] = _pad_to(p['fc2_w'], (Hp, Cp)).astype(jnp.bfloat16)
    pk['mlp_b2'] = _pad_to(p['fc2_b'], (Cp,))[None, :]
    return pk


# ----------------------------- forward ------------------------------

def multilocal_block_forward(x_nchw, pk):
    B, C, H, W = x_nchw.shape
    Cp = pk['mlp_w1'].shape[0]

    taps_full = _aspp_taps(H, W)
    taps = tuple((dh, dw) for (dh, dw, _, _) in taps_full)
    T = len(taps)
    assert pk['aspp_slab_w'].shape[0] == T * Cp, "pack_params must use the same H, W"
    P = max([0] + [max(abs(dh), abs(dw)) for dh, dw in taps])

    # ---- layout: NCHW -> NHWC, channels zero-padded to a lane-dense multiple of 128 ----
    x_img = jnp.transpose(x_nchw, (0, 2, 3, 1)).astype(jnp.float32)
    x_img = jnp.pad(x_img, ((0, 0), (0, 0), (0, 0), (0, Cp - C)))

    # ---- norm1 fused into the layout transform; zero pad for the dilated windows (bf16) ----
    n1 = x_img * pk['bn1_scale'] + pk['bn1_shift']
    WPAD = _round_up(W + 2 * P, 8)                       # sublane-friendly padded width
    n1_pad = jnp.pad(n1.astype(jnp.bfloat16),
                     ((0, 0), (P, P), (P, WPAD - W - P), (0, 0)))

    # ---- ASPP image-pooling branch folded to a per-batch bias (proj-BN scale folded) ----
    pooled = jnp.mean(n1, axis=(1, 2))                                        # (B, Cp)
    pooled = jnp.maximum((pooled @ pk['aspp_pool_w']) * pk['aspp_bnp_scale']
                         + pk['aspp_bnp_shift'], 0.0)
    pool_bias = (pooled @ pk['aspp_wproj_pool'])[:, None, :]                  # (B, 1, Cp)

    # ---- single fused kernel: ASPP + SeparableConvBN proj + residual + MLP + residual ----
    out = fused_block(n1_pad, x_img, pool_bias, pk,
                      B=B, H=H, W=W, Cp=Cp, P=P, taps=taps)

    out = out[..., :C]
    return jnp.transpose(out, (0, 3, 1, 2))               # back to NCHW


if __name__ == "__main__":
    key = jax.random.PRNGKey(0)
    kx, kp = jax.random.split(key)
    B, C, H, W = 2, 32, 16, 16                             # dim = outdim = 32, window_size = 3
    x = jax.random.normal(kx, (B, C, H, W), jnp.float32)
    params = init_params(kp, C, mlp_ratio=4.0)
    packed = pack_params(params, C, H, W, mlp_ratio=4.0)

    fwd = jax.jit(multilocal_block_forward)
    y = fwd(x, packed)
    jax.block_until_ready(y)
    assert y.shape == (B, C, H, W) and y.dtype == jnp.float32
    assert bool(jnp.isfinite(y).all())
    print("KERNEL_OK")
</pallas_src>

<mosaic_0001>
module attributes {stable_mosaic.version = 11 : i64} {
  func.func @_fused_block_kernel(%arg0: i32, %arg1: memref<1x40x40x128xbf16, #tpu.memory_space<vmem>>, %arg2: memref<1x16x16x128xf32, #tpu.memory_space<vmem>>, %arg3: memref<2176x128xbf16, #tpu.memory_space<vmem>>, %arg4: memref<1x128xf32, #tpu.memory_space<vmem>>, %arg5: memref<128x128xbf16, #tpu.memory_space<vmem>>, %arg6: memref<1x1x128xf32, #tpu.memory_space<vmem>>, %arg7: memref<1x128xf32, #tpu.memory_space<vmem>>, %arg8: memref<1152x128xbf16, #tpu.memory_space<vmem>>, %arg9: memref<1x128xf32, #tpu.memory_space<vmem>>, %arg10: memref<128x128xbf16, #tpu.memory_space<vmem>>, %arg11: memref<1x128xf32, #tpu.memory_space<vmem>>, %arg12: memref<128x128xbf16, #tpu.memory_space<vmem>>, %arg13: memref<1x128xf32, #tpu.memory_space<vmem>>, %arg14: memref<1x16x16x128xf32, #tpu.memory_space<vmem>>, %arg15: memref<256x2176xbf16, #tpu.memory_space<vmem>>, %arg16: memref<18x18x128xbf16, #tpu.memory_space<vmem>>, %arg17: memref<256x1152xbf16, #tpu.memory_space<vmem>>) attributes {dimension_semantics = [#tpu.dimension_semantics<parallel>], iteration_bounds = array<i64: 2>, scalar_prefetch = 0 : i64, scratch_operands = 3 : i64, tpu.core_type = #tpu.core_type<tc>, window_params = [{transform_indices = @transform_0, window_bounds = array<i64: 1, 40, 40, 128>}, {transform_indices = @transform_1, window_bounds = array<i64: 1, 16, 16, 128>}, {pipeline_mode = #tpu.pipeline_mode<synchronous>, transform_indices = @transform_2, window_bounds = array<i64: 2176, 128>}, {pipeline_mode = #tpu.pipeline_mode<synchronous>, transform_indices = @transform_3, window_bounds = array<i64: 1, 128>}, {pipeline_mode = #tpu.pipeline_mode<synchronous>, transform_indices = @transform_4, window_bounds = array<i64: 128, 128>}, {transform_indices = @transform_5, window_bounds = array<i64: 1, 1, 128>}, {pipeline_mode = #tpu.pipeline_mode<synchronous>, transform_indices = @transform_6, window_bounds = array<i64: 1, 128>}, {pipeline_mode = #tpu.pipeline_mode<synchronous>, transform_indices = @transform_7, window_bounds = array<i64: 1152, 128>}, {pipeline_mode = #tpu.pipeline_mode<synchronous>, transform_indices = @transform_8, window_bounds = array<i64: 1, 128>}, {pipeline_mode = #tpu.pipeline_mode<synchronous>, transform_indices = @transform_9, window_bounds = array<i64: 128, 128>}, {pipeline_mode = #tpu.pipeline_mode<synchronous>, transform_indices = @transform_10, window_bounds = array<i64: 1, 128>}, {pipeline_mode = #tpu.pipeline_mode<synchronous>, transform_indices = @transform_11, window_bounds = array<i64: 128, 128>}, {pipeline_mode = #tpu.pipeline_mode<synchronous>, transform_indices = @transform_12, window_bounds = array<i64: 1, 128>}, {transform_indices = @transform_13, window_bounds = array<i64: 1, 16, 16, 128>}]} {
    %c0 = arith.constant 0 : index
    %c12 = arith.constant 12 : index
    %c12_0 = arith.constant 12 : index
    %c0_1 = arith.constant 0 : index
    %0 = vector.load %arg1[%c0, %c12, %c12_0, %c0_1] : memref<1x40x40x128xbf16, #tpu.memory_space<vmem>>, vector<1x16x16x128xbf16>
    %1 = vector.shape_cast %0 : vector<1x16x16x128xbf16> to vector<16x16x128xbf16>
    %2 = vector.shape_cast %1 : vector<16x16x128xbf16> to vector<256x128xbf16>
    %c0_2 = arith.constant 0 : index
    %c0_3 = arith.constant 0 : index
    %3 = vector.load %arg15[%c0_2, %c0_3] : memref<256x2176xbf16, #tpu.memory_space<vmem>>, vector<256x128xbf16>
    tpu.vector_store %arg15[%c0_2, %c0_3], %2 {strides = array<i32>} : memref<256x2176xbf16, #tpu.memory_space<vmem>>, vector<256x128xbf16>,
    %c0_4 = arith.constant 0 : index
    %c6 = arith.constant 6 : index
    %c6_5 = arith.constant 6 : index
    %c0_6 = arith.constant 0 : index
    %4 = vector.load %arg1[%c0_4, %c6, %c6_5, %c0_6] : memref<1x40x40x128xbf16, #tpu.memory_space<vmem>>, vector<1x16x16x128xbf16>
    %5 = vector.shape_cast %4 : vector<1x16x16x128xbf16> to vector<16x16x128xbf16>
    %6 = vector.shape_cast %5 : vector<16x16x128xbf16> to vector<256x128xbf16>
    %c0_7 = arith.constant 0 : index
    %c128 = arith.constant 128 : index
    %7 = vector.load %arg15[%c0_7, %c128] : memref<256x2176xbf16, #tpu.memory_space<vmem>>, vector<256x128xbf16>
    tpu.vector_store %arg15[%c0_7, %c128], %6 {strides = array<i32>} : memref<256x2176xbf16, #tpu.memory_space<vmem>>, vector<256x128xbf16>,
    %c0_8 = arith.constant 0 : index
    %c6_9 = arith.constant 6 : index
    %c12_10 = arith.constant 12 : index
    %c0_11 = arith.constant 0 : index
    %8 = vector.load %arg1[%c0_8, %c6_9, %c12_10, %c0_11] : memref<1x40x40x128xbf16, #tpu.memory_space<vmem>>, vector<1x16x16x128xbf16>
    %9 = vector.shape_cast %8 : vector<1x16x16x128xbf16> to vector<16x16x128xbf16>
    %10 = vector.shape_cast %9 : vector<16x16x128xbf16> to vector<256x128xbf16>
    %c0_12 = arith.constant 0 : index
    %c256 = arith.constant 256 : index
    %11 = vector.load %arg15[%c0_12, %c256] : memref<256x2176xbf16, #tpu.memory_space<vmem>>, vector<256x128xbf16>
    tpu.vector_store %arg15[%c0_12, %c256], %10 {strides = array<i32>} : memref<256x2176xbf16, #tpu.memory_space<vmem>>, vector<256x128xbf16>,
    %c0_13 = arith.constant 0 : index
    %c6_14 = arith.constant 6 : index
    %c18 = arith.constant 18 : index
    %c0_15 = arith.constant 0 : index
    %12 = vector.load %arg1[%c0_13, %c6_14, %c18, %c0_15] : memref<1x40x40x128xbf16, #tpu.memory_space<vmem>>, vector<1x16x16x128xbf16>
    %13 = vector.shape_cast %12 : vector<1x16x16x128xbf16> to vector<16x16x128xbf16>
    %14 = vector.shape_cast %13 : vector<16x16x128xbf16> to vector<256x128xbf16>
    %c0_16 = arith.constant 0 : index
    %c384 = arith.constant 384 : index
    %15 = vector.load %arg15[%c0_16, %c384] : memref<256x2176xbf16, #tpu.memory_space<vmem>>, vector<256x128xbf16>
    tpu.vector_store %arg15[%c0_16, %c384], %14 {strides = array<i32>} : memref<256x2176xbf16, #tpu.memory_space<vmem>>, vector<256x128xbf16>,
    %c0_17 = arith.constant 0 : index
    %c12_18 = arith.constant 12 : index
    %c6_19 = arith.constant 6 : index
    %c0_20 = arith.constant 0 : index
    %16 = vector.load %arg1[%c0_17, %c12_18, %c6_19, %c0_20] : memref<1x40x40x128xbf16, #tpu.memory_space<vmem>>, vector<1x16x16x128xbf16>
    %17 = vector.shape_cast %16 : vector<1x16x16x128xbf16> to vector<16x16x128xbf16>
    %18 = vector.shape_cast %17 : vector<16x16x128xbf16> to vector<256x128xbf16>
    %c0_21 = arith.constant 0 : index
    %c512 = arith.constant 512 : index
    %19 = vector.load %arg15[%c0_21, %c512] : memref<256x2176xbf16, #tpu.memory_space<vmem>>, vector<256x128xbf16>
    tpu.vector_store %arg15[%c0_21, %c512], %18 {strides = array<i32>} : memref<256x2176xbf16, #tpu.memory_space<vmem>>, vector<256x128xbf16>,
    %c0_22 = arith.constant 0 : index
    %c12_23 = arith.constant 12 : index
    %c18_24 = arith.constant 18 : index
    %c0_25 = arith.constant 0 : index
    %20 = vector.load %arg1[%c0_22, %c12_23, %c18_24, %c0_25] : memref<1x40x40x128xbf16, #tpu.memory_space<vmem>>, vector<1x16x16x128xbf16>
    %21 = vector.shape_cast %20 : vector<1x16x16x128xbf16> to vector<16x16x128xbf16>
    %22 = vector.shape_cast %21 : vector<16x16x128xbf16> to vector<256x128xbf16>
    %c0_26 = arith.constant 0 : index
    %c640 = arith.constant 640 : index
    %23 = vector.load %arg15[%c0_26, %c640] : memref<256x2176xbf16, #tpu.memory_space<vmem>>, vector<256x128xbf16>
    tpu.vector_store %arg15[%c0_26, %c640], %22 {strides = array<i32>} : memref<256x2176xbf16, #tpu.memory_space<vmem>>, vector<256x128xbf16>,
    %c0_27 = arith.constant 0 : index
    %c18_28 = arith.constant 18 : index
    %c6_29 = arith.constant 6 : index
    %c0_30 = arith.constant 0 : index
    %24 = vector.load %arg1[%c0_27, %c18_28, %c6_29, %c0_30] : memref<1x40x40x128xbf16, #tpu.memory_space<vmem>>, vector<1x16x16x128xbf16>
    %25 = vector.shape_cast %24 : vector<1x16x16x128xbf16> to vector<16x16x128xbf16>
    %26 = vector.shape_cast %25 : vector<16x16x128xbf16> to vector<256x128xbf16>
    %c0_31 = arith.constant 0 : index
    %c768 = arith.constant 768 : index
    %27 = vector.load %arg15[%c0_31, %c768] : memref<256x2176xbf16, #tpu.memory_space<vmem>>, vector<256x128xbf16>
    tpu.vector_store %arg15[%c0_31, %c768], %26 {strides = array<i32>} : memref<256x2176xbf16, #tpu.memory_space<vmem>>, vector<256x128xbf16>,
    %c0_32 = arith.constant 0 : index
    %c18_33 = arith.constant 18 : index
    %c12_34 = arith.constant 12 : index
    %c0_35 = arith.constant 0 : index
    %28 = vector.load %arg1[%c0_32, %c18_33, %c12_34, %c0_35] : memref<1x40x40x128xbf16, #tpu.memory_space<vmem>>, vector<1x16x16x128xbf16>
    %29 = vector.shape_cast %28 : vector<1x16x16x128xbf16> to vector<16x16x128xbf16>
    %30 = vector.shape_cast %29 : vector<16x16x128xbf16> to vector<256x128xbf16>
    %c0_36 = arith.constant 0 : index
    %c896 = arith.constant 896 : index
    %31 = vector.load %arg15[%c0_36, %c896] : memref<256x2176xbf16, #tpu.memory_space<vmem>>, vector<256x128xbf16>
    tpu.vector_store %arg15[%c0_36, %c896], %30 {strides = array<i32>} : memref<256x2176xbf16, #tpu.memory_space<vmem>>, vector<256x128xbf16>,
    %c0_37 = arith.constant 0 : index
    %c18_38 = arith.constant 18 : index
    %c18_39 = arith.constant 18 : index
    %c0_40 = arith.constant 0 : index
    %32 = vector.load %arg1[%c0_37, %c18_38, %c18_39, %c0_40] : memref<1x40x40x128xbf16, #tpu.memory_space<vmem>>, vector<1x16x16x128xbf16>
    %33 = vector.shape_cast %32 : vector<1x16x16x128xbf16> to vector<16x16x128xbf16>
    %34 = vector.shape_cast %33 : vector<16x16x128xbf16> to vector<256x128xbf16>
    %c0_41 = arith.constant 0 : index
    %c1024 = arith.constant 1024 : index
    %35 = vector.load %arg15[%c0_41, %c1024] : memref<256x2176xbf16, #tpu.memory_space<vmem>>, vector<256x128xbf16>
    tpu.vector_store %arg15[%c0_41, %c1024], %34 {strides = array<i32>} : memref<256x2176xbf16, #tpu.memory_space<vmem>>, vector<256x128xbf16>,
    %c0_42 = arith.constant 0 : index
    %c0_43 = arith.constant 0 : index
    %c0_44 = arith.constant 0 : index
    %c0_45 = arith.constant 0 : index
    %36 = vector.load %arg1[%c0_42, %c0_43, %c0_44, %c0_45] : memref<1x40x40x128xbf16, #tpu.memory_space<vmem>>, vector<1x16x16x128xbf16>
    %37 = vector.shape_cast %36 : vector<1x16x16x128xbf16> to vector<16x16x128xbf16>
    %38 = vector.shape_cast %37 : vector<16x16x128xbf16> to vector<256x128xbf16>
    %c0_46 = arith.constant 0 : index
    %c1152 = arith.constant 1152 : index
    %39 = vector.load %arg15[%c0_46, %c1152] : memref<256x2176xbf16, #tpu.memory_space<vmem>>, vector<256x128xbf16>
    tpu.vector_store %arg15[%c0_46, %c1152], %38 {strides = array<i32>} : memref<256x2176xbf16, #tpu.memory_space<vmem>>, vector<256x128xbf16>,
    %c0_47 = arith.constant 0 : index
    %c0_48 = arith.constant 0 : index
    %c12_49 = arith.constant 12 : index
    %c0_50 = arith.constant 0 : index
    %40 = vector.load %arg1[%c0_47, %c0_48, %c12_49, %c0_50] : memref<1x40x40x128xbf16, #tpu.memory_space<vmem>>, vector<1x16x16x128xbf16>
    %41 = vector.shape_cast %40 : vector<1x16x16x128xbf16> to vector<16x16x128xbf16>
    %42 = vector.shape_cast %41 : vector<16x16x128xbf16> to vector<256x128xbf16>
    %c0_51 = arith.constant 0 : index
    %c1280 = arith.constant 1280 : index
    %43 = vector.load %arg15[%c0_51, %c1280] : memref<256x2176xbf16, #tpu.memory_space<vmem>>, vector<256x128xbf16>
    tpu.vector_store %arg15[%c0_51, %c1280], %42 {strides = array<i32>} : memref<256x2176xbf16, #tpu.memory_space<vmem>>, vector<256x128xbf16>,
    %c0_52 = arith.constant 0 : index
    %c0_53 = arith.constant 0 : index
    %c24 = arith.constant 24 : index
    %c0_54 = arith.constant 0 : index
    %44 = vector.load %arg1[%c0_52, %c0_53, %c24, %c0_54] : memref<1x40x40x128xbf16, #tpu.memory_space<vmem>>, vector<1x16x16x128xbf16>
    %45 = vector.shape_cast %44 : vector<1x16x16x128xbf16> to vector<16x16x128xbf16>
    %46 = vector.shape_cast %45 : vector<16x16x128xbf16> to vector<256x128xbf16>
    %c0_55 = arith.constant 0 : index
    %c1408 = arith.constant 1408 : index
    %47 = vector.load %arg15[%c0_55, %c1408] : memref<256x2176xbf16, #tpu.memory_space<vmem>>, vector<256x128xbf16>
    tpu.vector_store %arg15[%c0_55, %c1408], %46 {strides = array<i32>} : memref<256x2176xbf16, #tpu.memory_space<vmem>>, vector<256x128xbf16>,
    %c0_56 = arith.constant 0 : index
    %c12_57 = arith.constant 12 : index
    %c0_58 = arith.constant 0 : index
    %c0_59 = arith.constant 0 : index
    %48 = vector.load %arg1[%c0_56, %c12_57, %c0_58, %c0_59] : memref<1x40x40x128xbf16, #tpu.memory_space<vmem>>, vector<1x16x16x128xbf16>
    %49 = vector.shape_cast %48 : vector<1x16x16x128xbf16> to vector<16x16x128xbf16>
    %50 = vector.shape_cast %49 : vector<16x16x128xbf16> to vector<256x128xbf16>
    %c0_60 = arith.constant 0 : index
    %c1536 = arith.constant 1536 : index
    %51 = vector.load %arg15[%c0_60, %c1536] : memref<256x2176xbf16, #tpu.memory_space<vmem>>, vector<256x128xbf16>
    tpu.vector_store %arg15[%c0_60, %c1536], %50 {strides = array<i32>} : memref<256x2176xbf16, #tpu.memory_space<vmem>>, vector<256x128xbf16>,
    %c0_61 = arith.constant 0 : index
    %c12_62 = arith.constant 12 : index
    %c24_63 = arith.constant 24 : index
    %c0_64 = arith.constant 0 : index
    %52 = vector.load %arg1[%c0_61, %c12_62, %c24_63, %c0_64] : memref<1x40x40x128xbf16, #tpu.memory_space<vmem>>, vector<1x16x16x128xbf16>
    %53 = vector.shape_cast %52 : vector<1x16x16x128xbf16> to vector<16x16x128xbf16>
    %54 = vector.shape_cast %53 : vector<16x16x128xbf16> to vector<256x128xbf16>
    %c0_65 = arith.constant 0 : index
    %c1664 = arith.constant 1664 : index
    %55 = vector.load %arg15[%c0_65, %c1664] : memref<256x2176xbf16, #tpu.memory_space<vmem>>, vector<256x128xbf16>
    tpu.vector_store %arg15[%c0_65, %c1664], %54 {strides = array<i32>} : memref<256x2176xbf16, #tpu.memory_space<vmem>>, vector<256x128xbf16>,
    %c0_66 = arith.constant 0 : index
    %c24_67 = arith.constant 24 : index
    %c0_68 = arith.constant 0 : index
    %c0_69 = arith.constant 0 : index
    %56 = vector.load %arg1[%c0_66, %c24_67, %c0_68, %c0_69] : memref<1x40x40x128xbf16, #tpu.memory_space<vmem>>, vector<1x16x16x128xbf16>
    %57 = vector.shape_cast %56 : vector<1x16x16x128xbf16> to vector<16x16x128xbf16>
    %58 = vector.shape_cast %57 : vector<16x16x128xbf16> to vector<256x128xbf16>
    %c0_70 = arith.constant 0 : index
    %c1792 = arith.constant 1792 : index
    %59 = vector.load %arg15[%c0_70, %c1792] : memref<256x2176xbf16, #tpu.memory_space<vmem>>, vector<256x128xbf16>
    tpu.vector_store %arg15[%c0_70, %c1792], %58 {strides = array<i32>} : memref<256x2176xbf16, #tpu.memory_space<vmem>>, vector<256x128xbf16>,
    %c0_71 = arith.constant 0 : index
    %c24_72 = arith.constant 24 : index
    %c12_73 = arith.constant 12 : index
    %c0_74 = arith.constant 0 : index
    %60 = vector.load %arg1[%c0_71, %c24_72, %c12_73, %c0_74] : memref<1x40x40x128xbf16, #tpu.memory_space<vmem>>, vector<1x16x16x128xbf16>
    %61 = vector.shape_cast %60 : vector<1x16x16x128xbf16> to vector<16x16x128xbf16>
    %62 = vector.shape_cast %61 : vector<16x16x128xbf16> to vector<256x128xbf16>
    %c0_75 = arith.constant 0 : index
    %c1920 = arith.constant 1920 : index
    %63 = vector.load %arg15[%c0_75, %c1920] : memref<256x2176xbf16, #tpu.memory_space<vmem>>, vector<256x128xbf16>
    tpu.vector_store %arg15[%c0_75, %c1920], %62 {strides = array<i32>} : memref<256x2176xbf16, #tpu.memory_space<vmem>>, vector<256x128xbf16>,
    %c0_76 = arith.constant 0 : index
    %c24_77 = arith.constant 24 : index
    %c24_78 = arith.constant 24 : index
    %c0_79 = arith.constant 0 : index
    %64 = vector.load %arg1[%c0_76, %c24_77, %c24_78, %c0_79] : memref<1x40x40x128xbf16, #tpu.memory_space<vmem>>, vector<1x16x16x128xbf16>
    %65 = vector.shape_cast %64 : vector<1x16x16x128xbf16> to vector<16x16x128xbf16>
    %66 = vector.shape_cast %65 : vector<16x16x128xbf16> to vector<256x128xbf16>
    %c0_80 = arith.constant 0 : index
    %c2048 = arith.constant 2048 : index
    %67 = vector.load %arg15[%c0_80, %c2048] : memref<256x2176xbf16, #tpu.memory_space<vmem>>, vector<256x128xbf16>
    tpu.vector_store %arg15[%c0_80, %c2048], %66 {strides = array<i32>} : memref<256x2176xbf16, #tpu.memory_space<vmem>>, vector<256x128xbf16>,
    %c0_81 = arith.constant 0 : index
    %c0_82 = arith.constant 0 : index
    %68 = vector.load %arg15[%c0_81, %c0_82] : memref<256x2176xbf16, #tpu.memory_space<vmem>>, vector<256x2176xbf16>
    %c0_83 = arith.constant 0 : index
    %c0_84 = arith.constant 0 : index
    %69 = vector.load %arg3[%c0_83, %c0_84] : memref<2176x128xbf16, #tpu.memory_space<vmem>>, vector<2176x128xbf16>
    %cst = arith.constant dense<0.000000e+00> : vector<256x128xf32>
    %70 = tpu.matmul %68, %69, %cst {dimension_numbers = #tpu.dot_dimension_numbers<[1], [0], [0], [1], [0, 0, 1, 1], [], []>} : vector<256x2176xbf16>, vector<2176x128xbf16>, vector<256x128xf32> -> vector<256x128xf32>
    %c0_85 = arith.constant 0 : index
    %c0_86 = arith.constant 0 : index
    %71 = vector.load %arg4[%c0_85, %c0_86] : memref<1x128xf32, #tpu.memory_space<vmem>>, vector<1x128xf32>
    %72 = vector.broadcast %71 : vector<1x128xf32> to vector<256x128xf32>
    %73 = arith.addf %70, %72 : vector<256x128xf32>
    %cst_87 = arith.constant 0.000000e+00 : f32
    %74 = vector.broadcast %cst_87 : f32 to vector<256x128xf32>
    %75 = arith.maximumf %73, %74 : vector<256x128xf32>
    %76 = arith.truncf %75 : vector<256x128xf32> to vector<256x128xbf16>
    %c0_88 = arith.constant 0 : index
    %c0_89 = arith.constant 0 : index
    %77 = vector.load %arg5[%c0_88, %c0_89] : memref<128x128xbf16, #tpu.memory_space<vmem>>, vector<128x128xbf16>
    %cst_90 = arith.constant dense<0.000000e+00> : vector<256x128xf32>
    %78 = tpu.matmul %76, %77, %cst_90 {dimension_numbers = #tpu.dot_dimension_numbers<[1], [0], [0], [1], [0, 0, 1, 1], [], []>} : vector<256x128xbf16>, vector<128x128xbf16>, vector<256x128xf32> -> vector<256x128xf32>
    %c0_91 = arith.constant 0 : index
    %c0_92 = arith.constant 0 : index
    %c0_93 = arith.constant 0 : index
    %79 = vector.load %arg6[%c0_91, %c0_92, %c0_93] : memref<1x1x128xf32, #tpu.memory_space<vmem>>, vector<1x1x128xf32>
    %80 = vector.shape_cast %79 : vector<1x1x128xf32> to vector<1x128xf32>
    %81 = vector.broadcast %80 : vector<1x128xf32> to vector<256x128xf32>
    %82 = arith.addf %78, %81 : vector<256x128xf32>
    %c0_94 = arith.constant 0 : index
    %c0_95 = arith.constant 0 : index
    %83 = vector.load %arg7[%c0_94, %c0_95] : memref<1x128xf32, #tpu.memory_space<vmem>>, vector<1x128xf32>
    %84 = vector.broadcast %83 : vector<1x128xf32> to vector<256x128xf32>
    %85 = arith.addf %82, %84 : vector<256x128xf32>
    %cst_96 = arith.constant 0.000000e+00 : f32
    %86 = vector.broadcast %cst_96 : f32 to vector<256x128xf32>
    %87 = arith.maximumf %85, %86 : vector<256x128xf32>
    %88 = arith.truncf %87 : vector<256x128xf32> to vector<256x128xbf16>
    %89 = vector.shape_cast %88 : vector<256x128xbf16> to vector<16x16x128xbf16>
    %cst_97 = arith.constant 0.000000e+00 : bf16
    %90 = vector.broadcast %cst_97 : bf16 to vector<18x18x128xbf16>
    %c0_98 = arith.constant 0 : index
    %c0_99 = arith.constant 0 : index
    %c0_100 = arith.constant 0 : index
    %91 = vector.load %arg16[%c0_98, %c0_99, %c0_100] : memref<18x18x128xbf16, #tpu.memory_space<vmem>>, vector<18x18x128xbf16>
    tpu.vector_store %arg16[%c0_98, %c0_99, %c0_100], %90 {strides = array<i32>} : memref<18x18x128xbf16, #tpu.memory_space<vmem>>, vector<18x18x128xbf16>,
    %c1 = arith.constant 1 : index
    %c1_101 = arith.constant 1 : index
    %c0_102 = arith.constant 0 : index
    %92 = vector.load %arg16[%c1, %c1_101, %c0_102] : memref<18x18x128xbf16, #tpu.memory_space<vmem>>, vector<16x16x128xbf16>
    tpu.vector_store %arg16[%c1, %c1_101, %c0_102], %89 {strides = array<i32>} : memref<18x18x128xbf16, #tpu.memory_space<vmem>>, vector<16x16x128xbf16>,
    %93 = vector.extract_strided_slice %89 {offsets = [14, 0, 0], sizes = [1, 16, 128], strides = [1, 1, 1]} : vector<16x16x128xbf16> to vector<1x16x128xbf16>
    %c17 = arith.constant 17 : index
    %c1_103 = arith.constant 1 : index
    %c0_104 = arith.constant 0 : index
    %94 = vector.load %arg16[%c17, %c1_103, %c0_104] : memref<18x18x128xbf16, #tpu.memory_space<vmem>>, vector<1x16x128xbf16>
    tpu.vector_store %arg16[%c17, %c1_103, %c0_104], %93 {strides = array<i32>} : memref<18x18x128xbf16, #tpu.memory_space<vmem>>, vector<1x16x128xbf16>,
    %95 = vector.extract_strided_slice %89 {offsets = [0, 14, 0], sizes = [16, 1, 128], strides = [1, 1, 1]} : vector<16x16x128xbf16> to vector<16x1x128xbf16>
    %c1_105 = arith.constant 1 : index
    %c17_106 = arith.constant 17 : index
    %c0_107 = arith.constant 0 : index
    %96 = vector.load %arg16[%c1_105, %c17_106, %c0_107] : memref<18x18x128xbf16, #tpu.memory_space<vmem>>, vector<16x1x128xbf16>
    tpu.vector_store %arg16[%c1_105, %c17_106, %c0_107], %95 {strides = array<i32>} : memref<18x18x128xbf16, #tpu.memory_space<vmem>>, vector<16x1x128xbf16>,
    %97 = vector.extract_strided_slice %89 {offsets = [14, 14, 0], sizes = [1, 1, 128], strides = [1, 1, 1]} : vector<16x16x128xbf16> to vector<1x1x128xbf16>
    %c17_108 = arith.constant 17 : index
    %c17_109 = arith.constant 17 : index
    %c0_110 = arith.constant 0 : index
    %98 = vector.load %arg16[%c17_108, %c17_109, %c0_110] : memref<18x18x128xbf16, #tpu.memory_space<vmem>>, vector<1x1x128xbf16>
    tpu.vector_store %arg16[%c17_108, %c17_109, %c0_110], %97 {strides = array<i32>} : memref<18x18x128xbf16, #tpu.memory_space<vmem>>, vector<1x1x128xbf16>,
    %c0_111 = arith.constant 0 : index
    %c0_112 = arith.constant 0 : index
    %c0_113 = arith.constant 0 : index
    %99 = vector.load %arg16[%c0_111, %c0_112, %c0_113] : memref<18x18x128xbf16, #tpu.memory_space<vmem>>, vector<16x16x128xbf16>
    %100 = vector.shape_cast %99 : vector<16x16x128xbf16> to vector<256x128xbf16>
    %c0_114 = arith.constant 0 : index
    %c0_115 = arith.constant 0 : index
    %101 = vector.load %arg17[%c0_114, %c0_115] : memref<256x1152xbf16, #tpu.memory_space<vmem>>, vector<256x128xbf16>
    tpu.vector_store %arg17[%c0_114, %c0_115], %100 {strides = array<i32>} : memref<256x1152xbf16, #tpu.memory_space<vmem>>, vector<256x128xbf16>,
    %c0_116 = arith.constant 0 : index
    %c1_117 = arith.constant 1 : index
    %c0_118 = arith.constant 0 : index
    %102 = vector.load %arg16[%c0_116, %c1_117, %c0_118] : memref<18x18x128xbf16, #tpu.memory_space<vmem>>, vector<16x16x128xbf16>
    %103 = vector.shape_cast %102 : vector<16x16x128xbf16> to vector<256x128xbf16>
    %c0_119 = arith.constant 0 : index
    %c128_120 = arith.constant 128 : index
    %104 = vector.load %arg17[%c0_119, %c128_120] : memref<256x1152xbf16, #tpu.memory_space<vmem>>, vector<256x128xbf16>
    tpu.vector_store %arg17[%c0_119, %c128_120], %103 {strides = array<i32>} : memref<256x1152xbf16, #tpu.memory_space<vmem>>, vector<256x128xbf16>,
    %c0_121 = arith.constant 0 : index
    %c2 = arith.constant 2 : index
    %c0_122 = arith.constant 0 : index
    %105 = vector.load %arg16[%c0_121, %c2, %c0_122] : memref<18x18x128xbf16, #tpu.memory_space<vmem>>, vector<16x16x128xbf16>
    %106 = vector.shape_cast %105 : vector<16x16x128xbf16> to vector<256x128xbf16>
    %c0_123 = arith.constant 0 : index
    %c256_124 = arith.constant 256 : index
    %107 = vector.load %arg17[%c0_123, %c256_124] : memref<256x1152xbf16, #tpu.memory_space<vmem>>, vector<256x128xbf16>
    tpu.vector_store %arg17[%c0_123, %c256_124], %106 {strides = array<i32>} : memref<256x1152xbf16, #tpu.memory_space<vmem>>, vector<256x128xbf16>,
    %c1_125 = arith.constant 1 : index
    %c0_126 = arith.constant 0 : index
    %c0_127 = arith.constant 0 : index
    %108 = vector.load %arg16[%c1_125, %c0_126, %c0_127] : memref<18x18x128xbf16, #tpu.memory_space<vmem>>, vector<16x16x128xbf16>
    %109 = vector.shape_cast %108 : vector<16x16x128xbf16> to vector<256x128xbf16>
    %c0_128 = arith.constant 0 : index
    %c384_129 = arith.constant 384 : index
    %110 = vector.load %arg17[%c0_128, %c384_129] : memref<256x1152xbf16, #tpu.memory_space<vmem>>, vector<256x128xbf16>
    tpu.vector_store %arg17[%c0_128, %c384_129], %109 {strides = array<i32>} : memref<256x1152xbf16, #tpu.memory_space<vmem>>, vector<256x128xbf16>,
    %c1_130 = arith.constant 1 : index
    %c1_131 = arith.constant 1 : index
    %c0_132 = arith.constant 0 : index
    %111 = vector.load %arg16[%c1_130, %c1_131, %c0_132] : memref<18x18x128xbf16, #tpu.memory_space<vmem>>, vector<16x16x128xbf16>
    %112 = vector.shape_cast %111 : vector<16x16x128xbf16> to vector<256x128xbf16>
    %c0_133 = arith.constant 0 : index
    %c512_134 = arith.constant 512 : index
    %113 = vector.load %arg17[%c0_133, %c512_134] : memref<256x1152xbf16, #tpu.memory_space<vmem>>, vector<256x128xbf16>
    tpu.vector_store %arg17[%c0_133, %c512_134], %112 {strides = array<i32>} : memref<256x1152xbf16, #tpu.memory_space<vmem>>, vector<256x128xbf16>,
    %c1_135 = arith.constant 1 : index
    %c2_136 = arith.constant 2 : index
    %c0_137 = arith.constant 0 : index
    %114 = vector.load %arg16[%c1_135, %c2_136, %c0_137] : memref<18x18x128xbf16, #tpu.memory_space<vmem>>, vector<16x16x128xbf16>
    %115 = vector.shape_cast %114 : vector<16x16x128xbf16> to vector<256x128xbf16>
    %c0_138 = arith.constant 0 : index
    %c640_139 = arith.constant 640 : index
    %116 = vector.load %arg17[%c0_138, %c640_139] : memref<256x1152xbf16, #tpu.memory_space<vmem>>, vector<256x128xbf16>
    tpu.vector_store %arg17[%c0_138, %c640_139], %115 {strides = array<i32>} : memref<256x1152xbf16, #tpu.memory_space<vmem>>, vector<256x128xbf16>,
    %c2_140 = arith.constant 2 : index
    %c0_141 = arith.constant 0 : index
    %c0_142 = arith.constant 0 : index
    %117 = vector.load %arg16[%c2_140, %c0_141, %c0_142] : memref<18x18x128xbf16, #tpu.memory_space<vmem>>, vector<16x16x128xbf16>
    %118 = vector.shape_cast %117 : vector<16x16x128xbf16> to vector<256x128xbf16>
    %c0_143 = arith.constant 0 : index
    %c768_144 = arith.constant 768 : index
    %119 = vector.load %arg17[%c0_143, %c768_144] : memref<256x1152xbf16, #tpu.memory_space<vmem>>, vector<256x128xbf16>
    tpu.vector_store %arg17[%c0_143, %c768_144], %118 {strides = array<i32>} : memref<256x1152xbf16, #tpu.memory_space<vmem>>, vector<256x128xbf16>,
    %c2_145 = arith.constant 2 : index
    %c1_146 = arith.constant 1 : index
    %c0_147 = arith.constant 0 : index
    %120 = vector.load %arg16[%c2_145, %c1_146, %c0_147] : memref<18x18x128xbf16, #tpu.memory_space<vmem>>, vector<16x16x128xbf16>
    %121 = vector.shape_cast %120 : vector<16x16x128xbf16> to vector<256x128xbf16>
    %c0_148 = arith.constant 0 : index
    %c896_149 = arith.constant 896 : index
    %122 = vector.load %arg17[%c0_148, %c896_149] : memref<256x1152xbf16, #tpu.memory_space<vmem>>, vector<256x128xbf16>
    tpu.vector_store %arg17[%c0_148, %c896_149], %121 {strides = array<i32>} : memref<256x1152xbf16, #tpu.memory_space<vmem>>, vector<256x128xbf16>,
    %c2_150 = arith.constant 2 : index
    %c2_151 = arith.constant 2 : index
    %c0_152 = arith.constant 0 : index
    %123 = vector.load %arg16[%c2_150, %c2_151, %c0_152] : memref<18x18x128xbf16, #tpu.memory_space<vmem>>, vector<16x16x128xbf16>
    %124 = vector.shape_cast %123 : vector<16x16x128xbf16> to vector<256x128xbf16>
    %c0_153 = arith.constant 0 : index
    %c1024_154 = arith.constant 1024 : index
    %125 = vector.load %arg17[%c0_153, %c1024_154] : memref<256x1152xbf16, #tpu.memory_space<vmem>>, vector<256x128xbf16>
    tpu.vector_store %arg17[%c0_153, %c1024_154], %124 {strides = array<i32>} : memref<256x1152xbf16, #tpu.memory_space<vmem>>, vector<256x128xbf16>,
    %c0_155 = arith.constant 0 : index
    %c0_156 = arith.constant 0 : index
    %c0_157 = arith.constant 0 : index
    %c0_158 = arith.constant 0 : index
    %126 = vector.load %arg2[%c0_155, %c0_156, %c0_157, %c0_158] : memref<1x16x16x128xf32, #tpu.memory_space<vmem>>, vector<1x16x16x128xf32>
    %127 = vector.shape_cast %126 : vector<1x16x16x128xf32> to vector<256x128xf32>
    %c0_159 = arith.constant 0 : index
    %c0_160 = arith.constant 0 : index
    %128 = vector.load %arg17[%c0_159, %c0_160] : memref<256x1152xbf16, #tpu.memory_space<vmem>>, vector<256x1152xbf16>
    %c0_161 = arith.constant 0 : index
    %c0_162 = arith.constant 0 : index
    %129 = vector.load %arg8[%c0_161, %c0_162] : memref<1152x128xbf16, #tpu.memory_space<vmem>>, vector<1152x128xbf16>
    %cst_163 = arith.constant dense<0.000000e+00> : vector<256x128xf32>
    %130 = tpu.matmul %128, %129, %cst_163 {dimension_numbers = #tpu.dot_dimension_numbers<[1], [0], [0], [1], [0, 0, 1, 1], [], []>} : vector<256x1152xbf16>, vector<1152x128xbf16>, vector<256x128xf32> -> vector<256x128xf32>
    %c0_164 = arith.constant 0 : index
    %c0_165 = arith.constant 0 : index
    %131 = vector.load %arg9[%c0_164, %c0_165] : memref<1x128xf32, #tpu.memory_space<vmem>>, vector<1x128xf32>
    %132 = vector.broadcast %131 : vector<1x128xf32> to vector<256x128xf32>
    %133 = arith.addf %130, %132 : vector<256x128xf32>
    %134 = arith.addf %133, %127 : vector<256x128xf32>
    %135 = arith.truncf %134 : vector<256x128xf32> to vector<256x128xbf16>
    %c0_166 = arith.constant 0 : index
    %c0_167 = arith.constant 0 : index
    %136 = vector.load %arg10[%c0_166, %c0_167] : memref<128x128xbf16, #tpu.memory_space<vmem>>, vector<128x128xbf16>
    %cst_168 = arith.constant dense<0.000000e+00> : vector<256x128xf32>
    %137 = tpu.matmul %135, %136, %cst_168 {dimension_numbers = #tpu.dot_dimension_numbers<[1], [0], [0], [1], [0, 0, 1, 1], [], []>} : vector<256x128xbf16>, vector<128x128xbf16>, vector<256x128xf32> -> vector<256x128xf32>
    %c0_169 = arith.constant 0 : index
    %c0_170 = arith.constant 0 : index
    %138 = vector.load %arg11[%c0_169, %c0_170] : memref<1x128xf32, #tpu.memory_space<vmem>>, vector<1x128xf32>
    %139 = vector.broadcast %138 : vector<1x128xf32> to vector<256x128xf32>
    %140 = arith.addf %137, %139 : vector<256x128xf32>
    %cst_171 = arith.constant 0.000000e+00 : f32
    %cst_172 = arith.constant 6.000000e+00 : f32
    %141 = vector.broadcast %cst_171 : f32 to vector<256x128xf32>
    %142 = arith.maximumf %141, %140 : vector<256x128xf32>
    %143 = vector.broadcast %cst_172 : f32 to vector<256x128xf32>
    %144 = arith.minimumf %143, %142 : vector<256x128xf32>
    %145 = arith.truncf %144 : vector<256x128xf32> to vector<256x128xbf16>
    %c0_173 = arith.constant 0 : index
    %c0_174 = arith.constant 0 : index
    %146 = vector.load %arg12[%c0_173, %c0_174] : memref<128x128xbf16, #tpu.memory_space<vmem>>, vector<128x128xbf16>
    %cst_175 = arith.constant dense<0.000000e+00> : vector<256x128xf32>
    %147 = tpu.matmul %145, %146, %cst_175 {dimension_numbers = #tpu.dot_dimension_numbers<[1], [0], [0], [1], [0, 0, 1, 1], [], []>} : vector<256x128xbf16>, vector<128x128xbf16>, vector<256x128xf32> -> vector<256x128xf32>
    %c0_176 = arith.constant 0 : index
    %c0_177 = arith.constant 0 : index
    %148 = vector.load %arg13[%c0_176, %c0_177] : memref<1x128xf32, #tpu.memory_space<vmem>>, vector<1x128xf32>
    %149 = vector.broadcast %148 : vector<1x128xf32> to vector<256x128xf32>
    %150 = arith.addf %147, %149 : vector<256x128xf32>
    %151 = arith.addf %150, %134 : vector<256x128xf32>
    %152 = vector.shape_cast %151 : vector<256x128xf32> to vector<1x16x16x128xf32>
    %c0_178 = arith.constant 0 : index
    %c0_179 = arith.constant 0 : index
    %c0_180 = arith.constant 0 : index
    %c0_181 = arith.constant 0 : index
    %153 = vector.load %arg14[%c0_178, %c0_179, %c0_180, %c0_181] : memref<1x16x16x128xf32, #tpu.memory_space<vmem>>, vector<1x16x16x128xf32>
    tpu.vector_store %arg14[%c0_178, %c0_179, %c0_180, %c0_181], %152 {strides = array<i32>} : memref<1x16x16x128xf32, #tpu.memory_space<vmem>>, vector<1x16x16x128xf32>,
    return
  }
  func.func @transform_0(%arg0: i32) -> (i32, i32, i32, i32) {
    %c0_i32 = arith.constant 0 : i32
    %c0_i32_0 = arith.constant 0 : i32
    %c0_i32_1 = arith.constant 0 : i32
    %c0_i32_2 = arith.constant 0 : i32
    return %arg0, %c0_i32, %c0_i32_0, %c0_i32_1 : i32, i32, i32, i32
  }
  func.func @transform_1(%arg0: i32) -> (i32, i32, i32, i32) {
    %c0_i32 = arith.constant 0 : i32
    %c0_i32_0 = arith.constant 0 : i32
    %c0_i32_1 = arith.constant 0 : i32
    %c0_i32_2 = arith.constant 0 : i32
    return %arg0, %c0_i32, %c0_i32_0, %c0_i32_1 : i32, i32, i32, i32
  }
  func.func @transform_2(%arg0: i32) -> (i32, i32) {
    %c0_i32 = arith.constant 0 : i32
    %c0_i32_0 = arith.constant 0 : i32
    %c0_i32_1 = arith.constant 0 : i32
    return %c0_i32, %c0_i32_0 : i32, i32
  }
  func.func @transform_3(%arg0: i32) -> (i32, i32) {
    %c0_i32 = arith.constant 0 : i32
    %c0_i32_0 = arith.constant 0 : i32
    %c0_i32_1 = arith.constant 0 : i32
    return %c0_i32, %c0_i32_0 : i32, i32
  }
  func.func @transform_4(%arg0: i32) -> (i32, i32) {
    %c0_i32 = arith.constant 0 : i32
    %c0_i32_0 = arith.constant 0 : i32
    %c0_i32_1 = arith.constant 0 : i32
    return %c0_i32, %c0_i32_0 : i32, i32
  }
  func.func @transform_5(%arg0: i32) -> (i32, i32, i32) {
    %c0_i32 = arith.constant 0 : i32
    %c0_i32_0 = arith.constant 0 : i32
    %c0_i32_1 = arith.constant 0 : i32
    return %arg0, %c0_i32, %c0_i32_0 : i32, i32, i32
  }
  func.func @transform_6(%arg0: i32) -> (i32, i32) {
    %c0_i32 = arith.constant 0 : i32
    %c0_i32_0 = arith.constant 0 : i32
    %c0_i32_1 = arith.constant 0 : i32
    return %c0_i32, %c0_i32_0 : i32, i32
  }
  func.func @transform_7(%arg0: i32) -> (i32, i32) {
    %c0_i32 = arith.constant 0 : i32
    %c0_i32_0 = arith.constant 0 : i32
    %c0_i32_1 = arith.constant 0 : i32
    return %c0_i32, %c0_i32_0 : i32, i32
  }
  func.func @transform_8(%arg0: i32) -> (i32, i32) {
    %c0_i32 = arith.constant 0 : i32
    %c0_i32_0 = arith.constant 0 : i32
    %c0_i32_1 = arith.constant 0 : i32
    return %c0_i32, %c0_i32_0 : i32, i32
  }
  func.func @transform_9(%arg0: i32) -> (i32, i32) {
    %c0_i32 = arith.constant 0 : i32
    %c0_i32_0 = arith.constant 0 : i32
    %c0_i32_1 = arith.constant 0 : i32
    return %c0_i32, %c0_i32_0 : i32, i32
  }
  func.func @transform_10(%arg0: i32) -> (i32, i32) {
    %c0_i32 = arith.constant 0 : i32
    %c0_i32_0 = arith.constant 0 : i32
    %c0_i32_1 = arith.constant 0 : i32
    return %c0_i32, %c0_i32_0 : i32, i32
  }
  func.func @transform_11(%arg0: i32) -> (i32, i32) {
    %c0_i32 = arith.constant 0 : i32
    %c0_i32_0 = arith.constant 0 : i32
    %c0_i32_1 = arith.constant 0 : i32
    return %c0_i32, %c0_i32_0 : i32, i32
  }
  func.func @transform_12(%arg0: i32) -> (i32, i32) {
    %c0_i32 = arith.constant 0 : i32
    %c0_i32_0 = arith.constant 0 : i32
    %c0_i32_1 = arith.constant 0 : i32
    return %c0_i32, %c0_i32_0 : i32, i32
  }
  func.func @transform_13(%arg0: i32) -> (i32, i32, i32, i32) {
    %c0_i32 = arith.constant 0 : i32
    %c0_i32_0 = arith.constant 0 : i32
    %c0_i32_1 = arith.constant 0 : i32
    %c0_i32_2 = arith.constant 0 : i32
    return %arg0, %c0_i32, %c0_i32_0, %c0_i32_1 : i32, i32, i32, i32
  }
}

</mosaic_0001>

<bundles_post_ra>
// kernel: multilocal_block_forward.1
= control target key start
LH: loop header
LB: loop body
LE: loop exit
PB: predicated region body
PF: predicated region fallthrough
CT: control target
= control target key end

     0   :  { %s17288_s25 = smov 0   ;;  %s22109_s0 = inlined_call_operand.vmem [shape: bf16[2,40,40,128], index: 0, kind: input, shape index: {}]   ;;  %s22110_s1 = inlined_call_operand.vmem [shape: f32[2,16,16,128], index: 1, kind: input, shape index: {}, may-alias: {1,13}]   ;;  %s22111_s2 = inlined_call_operand.vmem [shape: bf16[2176,128], index: 2, kind: input, shape index: {}]   ;;  %s22112_s3 = inlined_call_operand.vmem [shape: f32[1,128], index: 3, kind: input, shape index: {}]   ;;  %s22113_s4 = inlined_call_operand.vmem [shape: bf16[128,128], index: 4, kind: input, shape index: {}]   ;;  %s22114_s5 = inlined_call_operand.vmem [shape: f32[2,1,128], index: 5, kind: input, shape index: {}]   ;;  %s22115_s6 = inlined_call_operand.vmem [shape: f32[1,128], index: 6, kind: input, shape index: {}]   ;;  %s22116_s7 = inlined_call_operand.vmem [shape: bf16[1152,128], index: 7, kind: input, shape index: {}]   ;;  %s22117_s8 = inlined_call_operand.vmem [shape: f32[1,128], index: 8, kind: input, shape index: {}]   ;;  %s22118_s9 = inlined_call_operand.vmem [shape: bf16[128,128], index: 9, kind: input, shape index: {}]   ;;  %s22119_s10 = inlined_call_operand.vmem [shape: f32[1,128], index: 10, kind: input, shape index: {}]   ;;  %s22120_s11 = inlined_call_operand.vmem [shape: bf16[128,128], index: 11, kind: input, shape index: {}]   ;;  %s22121_s12 = inlined_call_operand.vmem [shape: f32[1,128], index: 12, kind: input, shape index: {}]   ;;  %s22122_s13 = inlined_call_operand.vmem [shape: f32[2,16,16,128], index: 13, kind: output, shape index: {}, may-alias: {1,13}]  }
   0x1 LB: > { %s13518_s26 = sadd.s32 4294967295, %s17215_s25   ;;  %p13522_p0 = scmp.ge.s32.totalorder %s17215_s25, 1  ;;  %s17215_s25 = sphi %s17288_s25, %s23_s25  }
   0x2   : > { %p405_p1 = scmp.lt.s32.totalorder %s17215_s25, 3 }
   0x4   : > { %p406_p2 = pnand %p13522_p0, %p405_p1 }
   0x6   : > { %409 = sbr.rel (%p406_p2) target bundleno = 2066 (0x812), region = 72 }
   0xd   : > { %v16827_v0 = vld [vmem:[%s22111_s2 + $0x40] sm:$0xff]   ;;  %p457_p3 = scmp.lt.s32.totalorder %s13518_s26, 1  ;;  %v16829_v2 = vld [vmem:[%s22111_s2 + $0x48] sm:$0xff]   ;;  %v16831_v4 = vld [vmem:[%s22111_s2 + $0x50] sm:$0xff]   ;;  %vm865_vm0 = vcmask 1040384   ;;  %vm866_vm1 = vcmask 1044484  }
   0xe   : > { %v16828_v1 = vld [vmem:[%s22111_s2] sm:$0xff]   ;;  %15097 = vmatprep.subr.bf16.mxu0 %v16827_v0  ;;  %16801 = vmatprep.subr.bf16.mxu1 %v16827_v0  ;;  %v16830_v3 = vld [vmem:[%s22111_s2 + $0x8] sm:$0xff]   ;;  %v16832_v5 = vld [vmem:[%s22111_s2 + $0x10] sm:$0xff]   ;;  %vm573_vm3 = vcmask 1041408   ;;  %vm574_vm4 = vcmask 1045508   ;;  %vm1444_vm6 = vcmask 1042432  }
   0xf   : > { %15098 = vmatpush3.bf16.msra.mxu0 %v16828_v1  ;;  %16809 = vmatpush3.bf16.msra.mxu1 %v16828_v1  ;;  %s22193_s26 = smov (!%p457_p3, %s13518_s26), 1  ;;  %v16833_v6 = vld [vmem:[%s22111_s2 + $0x58] sm:$0xff]   ;;  %v16835_v8 = vld [vmem:[%s22111_s2 + $0x60] sm:$0xff]   ;;  %v16837_v10 = vld [vmem:[%s22111_s2 + $0x68] sm:$0xff]   ;;  %vm1445_vm7 = vcmask 1046532   ;;  %vm8162_vm12 = vcmask 1043456  }
  0x10   : > { %15099 = vmatprep.subr.bf16.mxu0 %v16829_v2  ;;  %16802 = vmatprep.subr.bf16.mxu1 %v16829_v2  ;;  %s16817_s24 = smul.u32 800, %s22193_s26  ;;  %v16834_v7 = vld [vmem:[%s22111_s2 + $0x18] sm:$0xff]   ;;  %v16836_v9 = vld [vmem:[%s22111_s2 + $0x20] sm:$0xff]   ;;  %vm17341_vm2 = vmor %vm865_vm0, %vm866_vm1  ;;  %vm8578_vm9 = vsmask.f32 3328  ;;  %s20143_s23 = scalar_lea.vmem %s22114_s5, %s22193_s26 }
  0x11   : > { %v16838_v22 = vld [vmem:[%s22111_s2 + $0x28] sm:$0xff]   ;;  %v16839_v28 = vld [vmem:[%s22111_s2 + $0x70] sm:$0xff]   ;;  %vm17373_vm5 = vmor %vm573_vm3, %vm574_vm4  ;;  %vm8579_vm10 = vsmask.f32 7440  ;;  %vm8163_vm13 = vsmask.f32 7938 }
  0x12   : > { %s17329_s16 = scalar_lea.vmem %s22109_s0, %s16817_s24  ;;  %v16840_v38 = vld [vmem:[%s22111_s2 + $0x30] sm:$0xff]   ;;  %v16841_v48 = vld [vmem:[%s22111_s2 + $0x78] sm:$0xff]   ;;  %v16843_v53 = vld [vmem:[%s22111_s2 + $0xc0] sm:$0xff]   ;;  %vm7838_vm14 = vsmask.f32 256  ;;  %s15063_s18 = sshll.u32 %s22193_s26, 8 }
  0x13   : > { %15100 = vmatpush3.bf16.msra.mxu0 %v16830_v3  ;;  %16810 = vmatpush3.bf16.msra.mxu1 %v16830_v3  ;;  %v13608_v11 = vld [vmem:[%s17329_s16 + $0x78] sm:$0x8]  ;;  %v13609_v12 = vld [vmem:[%s17329_s16 + $0x7c] sm:$0xf]  ;;  %v13610_v13 = vld [vmem:[%s17329_s16 + $0x80] sm:$0x7]  ;;  %s22009_s14 = scalar_lea.vmem %s22122_s13, %s15063_s18 }
  0x14   : > { %15101 = vmatprep.subr.bf16.mxu0 %v16831_v4  ;;  %16803 = vmatprep.subr.bf16.mxu1 %v16831_v4  ;;  %v13656_v15 = vrot.slane %v13608_v11, 11  ;;  %v870_v16 = vrot.slane %v13609_v12, 7  ;;  %v873_v17 = vrot.slane %v13610_v13, 7  ;;  %v13644_v18 = vld [vmem:[%s17329_s16 + $0x168] sm:$0x8]  ;;  %v16842_v51 = vld [vmem:[%s22111_s2 + $0x38] sm:$0xff]   ;;  %vm17551_vm8 = vmor %vm1444_vm6, %vm1445_vm7 }
  0x15   : > { %v13645_v19 = vld [vmem:[%s17329_s16 + $0x16c] sm:$0xf]  ;;  %v13646_v20 = vld [vmem:[%s17329_s16 + $0x170] sm:$0x7]  ;;  %v13668_v21 = vrot.slane %v13644_v18, 11  ;;  %v16844_v57 = vld [vmem:[%s22111_s2 + $0x140] sm:$0xff]  }
  0x16   : > { %v871_v23 = vsel %vm17341_vm2, %v13656_v15, %v870_v16  ;;  %v872_v24 = vrot.slane %v870_v16, 4  ;;  %v954_v25 = vrot.slane %v13645_v19, 7  ;;  %v957_v26 = vrot.slane %v13646_v20, 7  ;;  %v13528_v27 = vld [vmem:[%s17329_s16 + $0xf4] sm:$0xc]  ;;  %v16845_v61 = vld [vmem:[%s22111_s2 + $0x80] sm:$0xff]   ;;  %vm20119_vm11 = vmor %vm8578_vm9, %vm8579_vm10 }
  0x17   : > { %15102 = vmatpush3.bf16.msra.mxu0 %v16832_v5  ;;  %16811 = vmatpush3.bf16.msra.mxu1 %v16832_v5  ;;  %v13529_v29 = vld [vmem:[%s17329_s16 + $0xf8] sm:$0xf]  ;;  %v13530_v30 = vld [vmem:[%s17329_s16 + $0xfc] sm:$0x3]  ;;  %v13576_v31 = vrot.slane %v13528_v27, 10  ;;  %v16846_v4 = vld [vmem:[%s22111_s2 + $0x100] sm:$0xff]  }
  0x18   : > { %15103 = vmatprep.subr.bf16.mxu0 %v16833_v6  ;;  %16804 = vmatprep.subr.bf16.mxu1 %v16833_v6  ;;  %v874_v32 = vsel %vm17341_vm2, %v872_v24, %v873_v17  ;;  %v955_v33 = vsel %vm17341_vm2, %v13668_v21, %v954_v25  ;;  %v956_v34 = vrot.slane %v954_v25, 4  ;;  %v578_v35 = vrot.slane %v13529_v29, 6  ;;  %v13564_v36 = vld [vmem:[%s17329_s16 + $0x1e4] sm:$0xc]  ;;  %v13565_v37 = vld [vmem:[%s17329_s16 + $0x1e8] sm:$0xf]  ;;  %vm20182_vm1 = vmand %vm8162_vm12, %vm8163_vm13 }
  0x19   : > { %v13672_v39 = vcombine.low %v871_v23, %v874_v32  ;;  %v581_v40 = vrot.slane %v13530_v30, 6  ;;  %v13566_v41 = vld [vmem:[%s17329_s16 + $0x1ec] sm:$0x3]  ;;  %v13588_v42 = vrot.slane %v13564_v36, 10  ;;  %v662_v43 = vrot.slane %v13565_v37, 6  ;;  %vm20197_vm3 = vmand %vm865_vm0, %vm7838_vm14 }
  0x1a   : > { %v958_v44 = vsel %vm17341_vm2, %v956_v34, %v957_v26  ;;  %v580_v46 = vrot.slane %v578_v35, 4  ;;  %v665_v47 = vrot.slane %v13566_v41, 6  ;;  %v579_v52 = vsel %vm17373_vm5, %v13576_v31, %v578_v35  ;;  %v13611_v58 = vld [vmem:[%s17329_s16 + $0x8c] sm:$0x8]  ;;  %v13612_v59 = vld [vmem:[%s17329_s16 + $0x90] sm:$0xf]  ;;  %vm20239_vm4 = vmand %vm865_vm0, %vm8163_vm13 }
  0x1b   : > { %15104 = vmatpush3.bf16.msra.mxu0 %v16834_v7  ;;  %16812 = vmatpush3.bf16.msra.mxu1 %v16834_v7  ;;  %v13684_v49 = vcombine.low %v955_v33, %v958_v44  ;;  %v664_v50 = vrot.slane %v662_v43, 4  ;;  %v663_v55 = vsel %vm17373_vm5, %v13588_v42, %v662_v43  ;;  %v13613_v60 = vld [vmem:[%s17329_s16 + $0x94] sm:$0x7]  ;;  %v13657_v62 = vrot.slane %v13611_v58, 11  ;;  %v13647_v1 = vld [vmem:[%s17329_s16 + $0x17c] sm:$0x8] }
  0x1c   : > { %15105 = vmatprep.subr.bf16.mxu0 %v16835_v8  ;;  %16805 = vmatprep.subr.bf16.mxu1 %v16835_v8  ;;  %v582_v54 = vsel %vm17373_vm5, %v580_v46, %v581_v40  ;;  %v877_v63 = vrot.slane %v13612_v59, 7  ;;  %v880_v0 = vrot.slane %v13613_v60, 7  ;;  %v13648_v5 = vld [vmem:[%s17329_s16 + $0x180] sm:$0xf]  ;;  %v13649_v6 = vld [vmem:[%s17329_s16 + $0x184] sm:$0x7] }
  0x1d   : > { %5920 = vmatprep.mubr.bf16.mxu0 %v13672_v39  ;;  %6016 = vmatprep.mubr.bf16.mxu1 %v13684_v49  ;;  %v666_v56 = vsel %vm17373_vm5, %v664_v50, %v665_v47  ;;  %v13592_v2 = vcombine.low %v579_v52, %v582_v54  ;;  %v13669_v7 = vrot.slane %v13647_v1, 11  ;;  %v16847_v8 = vld [vmem:[%s22111_s2 + $0xc8] sm:$0xff]   ;;  %v961_v11 = vrot.slane %v13648_v5, 7  ;;  %v13533_v16 = vld [vmem:[%s17329_s16 + $0x110] sm:$0x3]  ;;  %v16851_v47 = vld [vmem:[%s22111_s2 + $0xd8] sm:$0xff]  }
  0x1e   : > { %v13604_v3 = vcombine.low %v663_v55, %v666_v56  ;;  %v964_v12 = vrot.slane %v13649_v6, 7  ;;  %v13531_v13 = vld [vmem:[%s17329_s16 + $0x108] sm:$0xc]  ;;  %v13532_v15 = vld [vmem:[%s17329_s16 + $0x10c] sm:$0xf]  ;;  %v588_v27 = vrot.slane %v13533_v16, 6 }
  0x1f   : > { %15106 = vmatpush3.bf16.msra.mxu0 %v16836_v9  ;;  %16813 = vmatpush3.bf16.msra.mxu1 %v16836_v9  ;;  %v878_v9 = vsel %vm17341_vm2, %v13657_v62, %v877_v63  ;;  %v13577_v17 = vrot.slane %v13531_v13, 10  ;;  %v16852_v18 = vld [vmem:[%s22111_s2 + $0x148] sm:$0xff]   ;;  %v962_v21 = vsel %vm17341_vm2, %v13669_v7, %v961_v11  ;;  %v585_v23 = vrot.slane %v13532_v15, 6  ;;  %v13567_v24 = vld [vmem:[%s17329_s16 + $0x1f8] sm:$0xc]  ;;  %v16849_v31 = vld [vmem:[%s22111_s2 + $0xd0] sm:$0xff]  }
  0x20   : > { %15107 = vmatprep.subr.bf16.mxu0 %v16837_v10  ;;  %16806 = vmatprep.subr.bf16.mxu1 %v16837_v10  ;;  %v879_v10 = vrot.slane %v877_v63, 4  ;;  %v16848_v19 = vld [vmem:[%s22111_s2 + $0x88] sm:$0xff]   ;;  %v13568_v25 = vld [vmem:[%s17329_s16 + $0x1fc] sm:$0xf]  ;;  %v13589_v29 = vrot.slane %v13567_v24, 10  ;;  %v16850_v41 = vld [vmem:[%s22111_s2 + $0x90] sm:$0xff]  }
  0x21   : > { %v669_v30 = vrot.slane %v13568_v25, 6  ;;  %v586_v33 = vsel %vm17373_vm5, %v13577_v17, %v585_v23  ;;  %v587_v34 = vrot.slane %v585_v23, 4  ;;  %v16854_v39 = vld [vmem:[%s22111_s2 + $0x108] sm:$0xff]   ;;  %v13614_v46 = vld [vmem:[%s17329_s16 + $0xa0] sm:$0x8] }
  0x22   : > { %v881_v20 = vsel %vm17341_vm2, %v879_v10, %v880_v0  ;;  %v13616_v49 = vld [vmem:[%s17329_s16 + $0xa8] sm:$0x7]  ;;  %v13658_v50 = vrot.slane %v13614_v46, 11  ;;  %v13650_v54 = vld [vmem:[%s17329_s16 + $0x190] sm:$0x8]  ;;  %v16855_v6 = vld [vmem:[%s22111_s2 + $0xe0] sm:$0xff]  }
  0x23   : > { %15108 = vmatpush3.bf16.msra.mxu0 %v16838_v22  ;;  %16814 = vmatpush3.bf16.msra.mxu1 %v16838_v22  ;;  %v963_v22 = vrot.slane %v961_v11, 4  ;;  %v13673_v26 = vcombine.low %v878_v9, %v881_v20  ;;  %v670_v37 = vsel %vm17373_vm5, %v13589_v29, %v669_v30  ;;  %v589_v40 = vsel %vm17373_vm5, %v587_v34, %v588_v27  ;;  %v13651_v55 = vld [vmem:[%s17329_s16 + $0x194] sm:$0xf]  ;;  %v13652_v56 = vld [vmem:[%s17329_s16 + $0x198] sm:$0x7] }
  0x24   : > { %15109 = vmatprep.subr.bf16.mxu0 %v16839_v28  ;;  %16807 = vmatprep.subr.bf16.mxu1 %v16839_v28  ;;  %v13569_v28 = vld [vmem:[%s17329_s16 + $0x200] sm:$0x3]  ;;  %v13593_v42 = vcombine.low %v586_v33, %v589_v40  ;;  %v968_v58 = vrot.slane %v13651_v55, 7  ;;  %v13534_v59 = vld [vmem:[%s17329_s16 + $0x11c] sm:$0xc]  ;;  %v971_v62 = vrot.slane %v13652_v56, 7 }
  0x25   : > { %v965_v32 = vsel %vm17341_vm2, %v963_v22, %v964_v12  ;;  %v672_v35 = vrot.slane %v13569_v28, 6  ;;  %v13535_v63 = vld [vmem:[%s17329_s16 + $0x120] sm:$0xf]  ;;  %v13536_v0 = vld [vmem:[%s17329_s16 + $0x124] sm:$0x3] }
  0x26   : > { %v13685_v36 = vcombine.low %v962_v21, %v965_v32  ;;  %v13570_v5 = vld [vmem:[%s17329_s16 + $0x20c] sm:$0xc]  ;;  %v13571_v9 = vld [vmem:[%s17329_s16 + $0x210] sm:$0xf]  ;;  %v13572_v10 = vld [vmem:[%s17329_s16 + $0x214] sm:$0x3] }
  0x27   : > { %15110 = vmatpush3.bf16.msra.mxu0 %v16840_v38  ;;  %16815 = vmatpush3.bf16.msra.mxu1 %v16840_v38  ;;  %v671_v38 = vrot.slane %v669_v30, 4  ;;  %v13590_v11 = vrot.slane %v13570_v5, 10  ;;  %v16856_v12 = vld [vmem:[%s22111_s2 + $0xa0] sm:$0xff]   ;;  %v676_v20 = vrot.slane %v13571_v9, 6  ;;  %v679_v21 = vrot.slane %v13572_v10, 6  ;;  %v16864_v10 = vld [vmem:[%s22111_s2 + $0xb8] sm:$0xff]  }
  0x28   : > { %15111 = vmatprep.subr.bf16.mxu0 %v16841_v48  ;;  %16808 = vmatprep.subr.bf16.mxu1 %v16841_v48  ;;  %v13615_v48 = vld [vmem:[%s17329_s16 + $0xa4] sm:$0xf]  ;;  %v13617_v27 = vld [vmem:[%s17329_s16 + $0xb4] sm:$0x8]  ;;  %v13618_v28 = vld [vmem:[%s17329_s16 + $0xb8] sm:$0xf] }
  0x29   : > { %v673_v43 = vsel %vm17373_vm5, %v671_v38, %v672_v35  ;;  %v884_v52 = vrot.slane %v13615_v48, 7  ;;  %v677_v24 = vsel %vm17373_vm5, %v13590_v11, %v676_v20  ;;  %v678_v25 = vrot.slane %v676_v20, 4  ;;  %v13619_v29 = vld [vmem:[%s17329_s16 + $0xbc] sm:$0x7]  ;;  %v13653_v35 = vld [vmem:[%s17329_s16 + $0x1a4] sm:$0x8] }
  0x2a   : > { %v13605_v44 = vcombine.low %v670_v37, %v673_v43  ;;  %v13659_v30 = vrot.slane %v13617_v27, 11  ;;  %v891_v33 = vrot.slane %v13618_v28, 7  ;;  %v894_v34 = vrot.slane %v13619_v29, 7  ;;  %v13655_v38 = vld [vmem:[%s17329_s16 + $0x1ac] sm:$0x7] }
  0x2b   : > { %15112 = vmatpush3.bf16.msra.mxu0 %v16842_v51  ;;  %16816 = vmatpush3.bf16.msra.mxu1 %v16842_v51  ;;  %v16853_v51 = vld [vmem:[%s22111_s2 + $0x98] sm:$0xff]   ;;  %v885_v60 = vsel %vm17341_vm2, %v13658_v50, %v884_v52  ;;  %v680_v32 = vsel %vm17373_vm5, %v678_v25, %v679_v21  ;;  %v13538_v46 = vld [vmem:[%s17329_s16 + $0x134] sm:$0xf]  ;;  %v13574_v56 = vld [vmem:[%s17329_s16 + $0x224] sm:$0xf] }
  0x2c   : > { %15209 = vmatprep.subr.bf16.mxu1 %v16843_v53  ;;  %15321 = vmatprep.subr.bf16.mxu0 %v16844_v57  ;;  %v887_v53 = vrot.slane %v13616_v49, 7  ;;  %v13670_v57 = vrot.slane %v13650_v54, 11  ;;  %v13606_v37 = vcombine.low %v677_v24, %v680_v32  ;;  %v893_v43 = vrot.slane %v891_v33, 4  ;;  %v13620_v11 = vld [vmem:[%s17329_s16 + $0xc8] sm:$0x8] }
  0x2d   : > { %v13768_v20 = vld [vmem:[%s17329_s16 + $0x80] sm:$0xe]  ;;  %v13769_v21 = vld [vmem:[%s17329_s16 + $0x84] sm:$0xf]  ;;  %vm7839_vm15 = vsmask.f32 4368 }
  0x2e   : > { %5921 = vmatmul.mubr.bf16.vlgmr.msra.gmra.mrb[0].mxu0 %v13592_v2  ;;  %6017 = vmatmul.mubr.bf16.vlgmr.msra.gmra.mrb[0].mxu1 %v13604_v3  ;;  %v969_v1 = vsel %vm17341_vm2, %v13670_v57, %v968_v58  ;;  %v970_v2 = vrot.slane %v968_v58, 4  ;;  %v13578_v3 = vrot.slane %v13534_v59, 10  ;;  %v895_v54 = vsel %vm17341_vm2, %v893_v43, %v894_v34  ;;  %v13575_v57 = vld [vmem:[%s17329_s16 + $0x228] sm:$0x3] }
  0x2f   : > { %15210 = vmatpush3.bf16.msra.mxu1 %v16845_v61  ;;  %15322 = vmatpush3.bf16.msra.mxu0 %v16846_v4  ;;  %v886_v61 = vrot.slane %v884_v52, 4  ;;  %v592_v4 = vrot.slane %v13535_v63, 6  ;;  %v13573_v52 = vld [vmem:[%s17329_s16 + $0x220] sm:$0xc]  ;;  %v16861_v63 = vld [vmem:[%s22111_s2 + $0xb0] sm:$0xff]   ;;  %v13816_v24 = vrot.slane %v13768_v20, 9 }
  0x30   : > { %15211 = vmatprep.subr.bf16.mxu1 %v16847_v8  ;;  %5928 = vmatprep.mubr.bf16.mxu0 %v13673_v26  ;;  %v595_v8 = vrot.slane %v13536_v0, 6  ;;  %v972_v15 = vsel %vm17341_vm2, %v970_v2, %v971_v62  ;;  %v16858_v26 = vld [vmem:[%s22111_s2 + $0xa8] sm:$0xff]   ;;  %v13591_v58 = vrot.slane %v13573_v52, 10  ;;  %v686_v2 = vrot.slane %v13575_v57, 6  ;;  %v13692_v20 = vld [vmem:[%s17329_s16 + $0x94] sm:$0xf] }
  0x31   : > { %15323 = vmatprep.subr.bf16.mxu0 %v16852_v18  ;;  %6024 = vmatprep.mubr.bf16.mxu1 %v13685_v36  ;;  %v888_v7 = vsel %vm17341_vm2, %v886_v61, %v887_v53  ;;  %v593_v16 = vsel %vm17373_vm5, %v13578_v3, %v592_v4  ;;  %v594_v17 = vrot.slane %v592_v4, 4  ;;  %v16857_v18 = vld [vmem:[%s22111_s2 + $0xe8] sm:$0xff]   ;;  %v16860_v53 = vld [vmem:[%s22111_s2 + $0x150] sm:$0xff]   ;;  %v1449_v25 = vrot.slane %v13769_v21, 5 }
  0x32   : > { %v13674_v13 = vcombine.low %v885_v60, %v888_v7  ;;  %v13654_v36 = vld [vmem:[%s17329_s16 + $0x1a8] sm:$0xf]  ;;  %v16862_v7 = vld [vmem:[%s22111_s2 + $0x110] sm:$0xff]  }
  0x33   : > { %15212 = vmatpush3.bf16.msra.mxu1 %v16848_v19  ;;  %15324 = vmatpush3.bf16.msra.mxu0 %v16854_v39  ;;  %v13686_v19 = vcombine.low %v969_v1, %v972_v15  ;;  %v596_v22 = vsel %vm17373_vm5, %v594_v17, %v595_v8  ;;  %v13671_v39 = vrot.slane %v13653_v35, 11  ;;  %v975_v40 = vrot.slane %v13654_v36, 7  ;;  %v16863_v8 = vld [vmem:[%s22111_s2 + $0xf8] sm:$0xff]   ;;  %v13622_v15 = vld [vmem:[%s17329_s16 + $0xd0] sm:$0x7] }
  0x34   : > { %15213 = vmatprep.subr.bf16.mxu1 %v16849_v31  ;;  %v13594_v23 = vcombine.low %v593_v16, %v596_v22  ;;  %v16859_v31 = vld [vmem:[%s22111_s2 + $0xf0] sm:$0xff]   ;;  %15325 = vmatprep.subr.bf16.mxu0 %v16860_v53  ;;  %v683_v1 = vrot.slane %v13574_v56, 6  ;;  %v13660_v16 = vrot.slane %v13620_v11, 11  ;;  %v16865_v17 = vld [vmem:[%s22111_s2 + $0x158] sm:$0xff]   ;;  %v22132_v22 = vmov 0 }
  0x35   : > { %v976_v48 = vsel %vm17341_vm2, %v13671_v39, %v975_v40  ;;  %v977_v49 = vrot.slane %v975_v40, 4  ;;  %v22133_v22 = vsel %vm17551_vm8, 4294967295, %v22132_v22  ;;  %v1450_v32 = vsel %vm17551_vm8, %v13816_v24, %v1449_v25  ;;  %v13688_v36 = vld [vmem:[%s17329_s16 + $0x7c] sm:$0xc]  ;;  %v13689_v40 = vld [vmem:[%s17329_s16 + $0x80] sm:$0xf] }
  0x36   : > { %5929 = vmatmul.mubr.bf16.gmra.mrb[4].mxu0 %v13593_v42  ;;  %6025 = vmatmul.mubr.bf16.gmra.mrb[4].mxu1 %v13605_v44  ;;  %v892_v42 = vsel %vm17341_vm2, %v13659_v30, %v891_v33  ;;  %v978_v44 = vrot.slane %v13655_v38, 7  ;;  %v684_v5 = vsel %vm17373_vm5, %v13591_v58, %v683_v1  ;;  %22134 = vst [vmem:[#allocation5_spill] sm:$0xff] %v22133_v22  ;;  %v13541_v30 = vld [vmem:[%s17329_s16 + $0x148] sm:$0xf]  ;;  %v1451_v33 = vrot.slane %v1449_v25, 4  ;;  %v17034_v22 = vld [vmem:[%s17329_s16 + $0x26c] sm:$0xff]  }
  0x37   : > { %15214 = vmatpush3.bf16.msra.mxu1 %v16850_v41  ;;  %5936 = vmatprep.mubr.bf16.mxu0 %v13674_v13  ;;  %v13537_v41 = vld [vmem:[%s17329_s16 + $0x130] sm:$0xc]  ;;  %v13675_v59 = vcombine.low %v892_v42, %v895_v54  ;;  %v13621_v13 = vld [vmem:[%s17329_s16 + $0xcc] sm:$0xf]  ;;  %v606_v35 = vrot.slane %v13541_v30, 6  ;;  %v13736_v42 = vrot.slane %v13688_v36, 10 }
  0x38   : > { %15215 = vmatprep.subr.bf16.mxu1 %v16851_v47  ;;  %6032 = vmatprep.mubr.bf16.mxu1 %v13686_v19  ;;  %v13539_v47 = vld [vmem:[%s17329_s16 + $0x138] sm:$0x3]  ;;  %v13579_v50 = vrot.slane %v13537_v41, 10  ;;  %v979_v60 = vsel %vm17341_vm2, %v977_v49, %v978_v44  ;;  %v901_v19 = vrot.slane %v13622_v15, 7  ;;  %v13690_v41 = vld [vmem:[%s17329_s16 + $0x84] sm:$0x3] }
  0x39   : > { %v602_v55 = vrot.slane %v13539_v47, 6  ;;  %v13687_v0 = vcombine.low %v976_v48, %v979_v60  ;;  %15326 = vmatpush3.bf16.msra.mxu0 %v16862_v7  ;;  %v608_v47 = vrot.slane %v606_v35, 4  ;;  %v16867_v48 = vld [vmem:[%s22111_s2 + $0x160] sm:$0xff]   ;;  %v13623_v53 = vld [vmem:[%s17329_s16 + $0xdc] sm:$0x8]  ;;  %v16869_v15 = vld [vmem:[%s22111_s2 + $0x168] sm:$0xff]  }
  0x3a   : > { %15327 = vmatprep.subr.bf16.mxu0 %v16865_v17  ;;  %v13624_v54 = vld [vmem:[%s17329_s16 + $0xe0] sm:$0xf]  ;;  %v13771_v60 = vld [vmem:[%s17329_s16 + $0x94] sm:$0xe]  ;;  %v1165_v25 = vrot.slane %v13692_v20, 6 }
  0x3b   : > { %15216 = vmatpush3.bf16.msra.mxu1 %v16853_v51  ;;  %v599_v51 = vrot.slane %v13538_v46, 6  ;;  %v16868_v7 = vld [vmem:[%s22111_s2 + $0x120] sm:$0xff]   ;;  %v13631_v20 = vld [vmem:[%s17329_s16 + $0x10c] sm:$0x7] }
  0x3c   : > { %15217 = vmatprep.subr.bf16.mxu1 %v16855_v6  ;;  %v685_v6 = vrot.slane %v683_v1, 4  ;;  %v13817_v1 = vrot.slane %v13771_v60, 9  ;;  %v1167_v36 = vrot.slane %v1165_v25, 4 }
  0x3d   : > { %v600_v61 = vsel %vm17373_vm5, %v13579_v50, %v599_v51  ;;  %v601_v62 = vrot.slane %v599_v51, 4  ;;  %v1158_v50 = vrot.slane %v13689_v40, 6  ;;  %v1161_v51 = vrot.slane %v13690_v41, 6 }
  0x3e   : > { %5937 = vmatmul.mubr.bf16.gmra.mrb[8].mxu0 %v13594_v23  ;;  %6033 = vmatmul.mubr.bf16.gmra.mrb[8].mxu1 %v13606_v37  ;;  %v687_v9 = vsel %vm17373_vm5, %v685_v6, %v686_v2  ;;  %v13770_v23 = vld [vmem:[%s17329_s16 + $0x88] sm:$0x1]  ;;  %v16866_v37 = vld [vmem:[%s22111_s2 + $0x118] sm:$0xff]  }
  0x3f   : > { %15218 = vmatpush3.bf16.msra.mxu1 %v16856_v12  ;;  %5944 = vmatprep.mubr.bf16.mxu0 %v13675_v59  ;;  %v603_v3 = vsel %vm17373_vm5, %v601_v62, %v602_v55  ;;  %v13607_v12 = vcombine.low %v684_v5, %v687_v9  ;;  %v1452_v29 = vrot.slane %v13770_v23, 5  ;;  %v13625_v55 = vld [vmem:[%s17329_s16 + $0xe4] sm:$0x7]  ;;  %v1159_v57 = vsel %vm17373_vm5, %v13736_v42, %v1158_v50  ;;  %v13543_v5 = vld [vmem:[%s17329_s16 + $0x158] sm:$0xc] }
  0x40   : > { %15219 = vmatprep.subr.bf16.mxu1 %v16857_v18  ;;  %6040 = vmatprep.mubr.bf16.mxu1 %v13687_v0  ;;  %v13595_v4 = vcombine.low %v600_v61, %v603_v3  ;;  %v898_v18 = vrot.slane %v13621_v13, 7  ;;  %v1160_v58 = vrot.slane %v1158_v50, 4  ;;  %v13661_v59 = vrot.slane %v13623_v53, 11  ;;  %v13772_v61 = vld [vmem:[%s17329_s16 + $0x98] sm:$0xf] }
  0x41   : > { %v1453_v44 = vsel %vm17551_vm8, %v1451_v33, %v1452_v29  ;;  %15328 = vmatpush3.bf16.msra.mxu0 %v16866_v37  ;;  %v905_v62 = vrot.slane %v13624_v54, 7  ;;  %v13773_v0 = vld [vmem:[%s17329_s16 + $0x9c] sm:$0x1]  ;;  %v1456_v2 = vrot.slane %v13772_v61, 5  ;;  %v13691_v13 = vld [vmem:[%s17329_s16 + $0x90] sm:$0xc] }
  0x42   : > { %v899_v27 = vsel %vm17341_vm2, %v13660_v16, %v898_v18  ;;  %v900_v28 = vrot.slane %v898_v18, 4  ;;  %v13832_v49 = vcombine.low %v1450_v32, %v1453_v44  ;;  %15329 = vmatprep.subr.bf16.mxu0 %v16867_v48  ;;  %v1162_v3 = vsel %vm17373_vm5, %v1160_v58, %v1161_v51  ;;  %v13544_v6 = vld [vmem:[%s17329_s16 + $0x15c] sm:$0xf]  ;;  %v13693_v23 = vld [vmem:[%s17329_s16 + $0x98] sm:$0x3]  ;;  %v16870_v33 = vld [vmem:[%s22111_s2 + $0x128] sm:$0xff]  }
  0x43   : > { %15220 = vmatpush3.bf16.msra.mxu1 %v16858_v26  ;;  %v13540_v26 = vld [vmem:[%s17329_s16 + $0x144] sm:$0xc]  ;;  %v906_v9 = vsel %vm17341_vm2, %v13661_v59, %v905_v62  ;;  %v1457_v11 = vsel %vm17551_vm8, %v13817_v1, %v1456_v2  ;;  %v1458_v16 = vrot.slane %v1456_v2, 4  ;;  %v13581_v17 = vrot.slane %v13543_v5, 10  ;;  %v13628_v32 = vld [vmem:[%s17329_s16 + $0xf8] sm:$0x7] }
  0x44   : > { %15221 = vmatprep.subr.bf16.mxu1 %v16859_v31  ;;  %v13542_v31 = vld [vmem:[%s17329_s16 + $0x14c] sm:$0x3]  ;;  %v13580_v34 = vrot.slane %v13540_v26, 10  ;;  %v902_v38 = vsel %vm17341_vm2, %v900_v28, %v901_v19  ;;  %v613_v18 = vrot.slane %v13544_v6, 6  ;;  %v13737_v24 = vrot.slane %v13691_v13, 10  ;;  %v16873_v6 = vld [vmem:[%s22111_s2 + $0x178] sm:$0xff]  }
  0x45   : > { %v609_v39 = vrot.slane %v13542_v31, 6  ;;  %v13676_v43 = vcombine.low %v899_v27, %v902_v38  ;;  %15330 = vmatpush3.bf16.msra.mxu0 %v16868_v7  ;;  %v13626_v26 = vld [vmem:[%s17329_s16 + $0xf0] sm:$0x8]  ;;  %v13627_v31 = vld [vmem:[%s17329_s16 + $0xf4] sm:$0xf]  ;;  %v1168_v37 = vrot.slane %v13693_v23, 6 }
  0x46   : > { %5945 = vmatmul.mubr.bf16.gmra.mrb[12].mxu0 %v13595_v4  ;;  %6041 = vmatmul.mubr.bf16.gmra.mrb[12].mxu1 %v13607_v12  ;;  %v607_v46 = vsel %vm17373_vm5, %v13580_v34, %v606_v35  ;;  %v1459_v4 = vrot.slane %v13773_v0, 5  ;;  %v13545_v12 = vld [vmem:[%s17329_s16 + $0x160] sm:$0x3]  ;;  %v614_v29 = vsel %vm17373_vm5, %v13581_v17, %v613_v18  ;;  %v615_v30 = vrot.slane %v613_v18, 4  ;;  %v13774_v38 = vld [vmem:[%s17329_s16 + $0xa8] sm:$0xe] }
  0x47   : > { %15222 = vmatpush3.bf16.msra.mxu1 %v16861_v63  ;;  %5952 = vmatprep.mubr.bf16.mxu0 %v13676_v43  ;;  %v610_v52 = vsel %vm17373_vm5, %v608_v47, %v609_v39  ;;  %v908_v63 = vrot.slane %v13625_v55, 7  ;;  %v616_v19 = vrot.slane %v13545_v12, 6  ;;  %v1166_v35 = vsel %vm17373_vm5, %v13737_v24, %v1165_v25  ;;  %v13775_v39 = vld [vmem:[%s17329_s16 + $0xac] sm:$0xf]  ;;  %v13776_v44 = vld [vmem:[%s17329_s16 + $0xb0] sm:$0x1] }
  0x48   : > { %15223 = vmatprep.subr.bf16.mxu1 %v16863_v8  ;;  %6081 = vmatprep.mubr.bf16.mxu1 %v13832_v49  ;;  %v13596_v56 = vcombine.low %v607_v46, %v610_v52  ;;  %v13752_v8 = vcombine.low %v1159_v57, %v1162_v3  ;;  %v1460_v28 = vsel %vm17551_vm8, %v1458_v16, %v1459_v4  ;;  %v13662_v41 = vrot.slane %v13626_v26, 11  ;;  %v16871_v46 = vld [vmem:[%s22111_s2 + $0x170] sm:$0xff]   ;;  %v13546_v51 = vld [vmem:[%s17329_s16 + $0x16c] sm:$0xc]  ;;  %v13694_v58 = vld [vmem:[%s17329_s16 + $0xa4] sm:$0xc] }
  0x49   : > { %15331 = vmatprep.subr.bf16.mxu0 %v16869_v15  ;;  %v13833_v34 = vcombine.low %v1457_v11, %v1460_v28  ;;  %v617_v40 = vsel %vm17373_vm5, %v615_v30, %v616_v19  ;;  %v912_v42 = vrot.slane %v13627_v31, 7  ;;  %v915_v43 = vrot.slane %v13628_v32, 7  ;;  %v13547_v52 = vld [vmem:[%s17329_s16 + $0x170] sm:$0xf]  ;;  %v13548_v57 = vld [vmem:[%s17329_s16 + $0x174] sm:$0x3] }
  0x4a   : > { %15332 = vmatpush3.bf16.msra.mxu0 %v16870_v33  ;;  %v13597_v47 = vcombine.low %v614_v29, %v617_v40  ;;  %v1169_v48 = vsel %vm17373_vm5, %v1167_v36, %v1168_v37  ;;  %v13818_v49 = vrot.slane %v13774_v38, 9  ;;  %v1463_v50 = vrot.slane %v13775_v39, 5  ;;  %v16872_v0 = vld [vmem:[%s22111_s2 + $0x130] sm:$0xff]   ;;  %v13696_v3 = vld [vmem:[%s17329_s16 + $0xac] sm:$0x3]  ;;  %v16874_v11 = vld [vmem:[%s22111_s2 + $0x138] sm:$0xff]  }
  0x4b   : > { %15224 = vmatpush3.bf16.msra.mxu1 %v16864_v10  ;;  %v907_v10 = vrot.slane %v905_v62, 4  ;;  %v13753_v53 = vcombine.low %v1166_v35, %v1169_v48  ;;  %v913_v54 = vsel %vm17341_vm2, %v13662_v41, %v912_v42  ;;  %v914_v55 = vrot.slane %v912_v42, 4  ;;  %15333 = vmatprep.subr.bf16.mxu0 %v16871_v46  ;;  %v13629_v18 = vld [vmem:[%s17329_s16 + $0x104] sm:$0x8]  ;;  %v13630_v19 = vld [vmem:[%s17329_s16 + $0x108] sm:$0xf] }
  0x4c   : > { %v1464_v59 = vsel %vm17551_vm8, %v13818_v49, %v1463_v50  ;;  %v1465_v60 = vrot.slane %v1463_v50, 4  ;;  %v13582_v61 = vrot.slane %v13546_v51, 10  ;;  %v620_v62 = vrot.slane %v13547_v52, 6  ;;  %v13777_v26 = vld [vmem:[%s17329_s16 + $0xbc] sm:$0xe]  ;;  %v16875_v33 = vld [vmem:[%s22111_s2 + $0x1c0] sm:$0xff]  }
  0x4d   : > { %v909_v21 = vsel %vm17341_vm2, %v907_v10, %v908_v63  ;;  %v13695_v63 = vld [vmem:[%s17329_s16 + $0xa8] sm:$0xf]  ;;  %v916_v1 = vsel %vm17341_vm2, %v914_v55, %v915_v43  ;;  %v623_v2 = vrot.slane %v13548_v57, 6  ;;  %v13738_v4 = vrot.slane %v13694_v58, 10  ;;  %v13779_v30 = vld [vmem:[%s17329_s16 + $0xc4] sm:$0x1]  ;;  %15433 = vmatprep.subr.bf16.mxu1 %v16875_v33 }
  0x4e   : > { %5953 = vmatmul.mubr.bf16.gmra.mrb[16].mxu0 %v13596_v56  ;;  %6082 = vmatmul.mubr.bf16.vlgmr.msra.gmra.mrb[16].mxu1 %v13752_v8  ;;  %v13677_v27 = vcombine.low %v906_v9, %v909_v21  ;;  %v1466_v56 = vrot.slane %v13776_v44, 5  ;;  %v1172_v5 = vrot.slane %v13695_v63, 6  ;;  %v13678_v7 = vcombine.low %v913_v54, %v916_v1  ;;  %v13549_v37 = vld [vmem:[%s17329_s16 + $0x180] sm:$0xc]  ;;  %v13550_v38 = vld [vmem:[%s17329_s16 + $0x184] sm:$0xf] }
  0x4f   : > { %6089 = vmatprep.mubr.bf16.mxu1 %v13833_v34  ;;  %v621_v9 = vsel %vm17373_vm5, %v13582_v61, %v620_v62  ;;  %v622_v10 = vrot.slane %v620_v62, 4  ;;  %15334 = vmatpush3.bf16.msra.mxu0 %v16872_v0  ;;  %v1175_v16 = vrot.slane %v13696_v3, 6  ;;  %v13663_v24 = vrot.slane %v13629_v18, 11  ;;  %v13551_v41 = vld [vmem:[%s17329_s16 + $0x188] sm:$0x3]  ;;  %v16876_v44 = vld [vmem:[%s22111_s2 + $0x180] sm:$0xff]  }
  0x50   : > { %5960 = vmatprep.mubr.bf16.mxu0 %v13677_v27  ;;  %v1467_v8 = vsel %vm17551_vm8, %v1465_v60, %v1466_v56  ;;  %v1173_v13 = vsel %vm17373_vm5, %v13738_v4, %v1172_v5  ;;  %v1174_v15 = vrot.slane %v1172_v5, 4  ;;  %15335 = vmatprep.subr.bf16.mxu0 %v16873_v6  ;;  %v919_v25 = vrot.slane %v13630_v19, 7  ;;  %v13778_v27 = vld [vmem:[%s17329_s16 + $0xc0] sm:$0xf]  ;;  %v13697_v48 = vld [vmem:[%s17329_s16 + $0xb8] sm:$0xc] }
  0x51   : > { %v13834_v12 = vcombine.low %v1464_v59, %v1467_v8  ;;  %v624_v17 = vsel %vm17373_vm5, %v622_v10, %v623_v2  ;;  %v922_v29 = vrot.slane %v13631_v20, 7  ;;  %v13819_v31 = vrot.slane %v13777_v26, 9  ;;  %v13698_v49 = vld [vmem:[%s17329_s16 + $0xbc] sm:$0xf]  ;;  %v16877_v50 = vld [vmem:[%s22111_s2 + $0x240] sm:$0xff]   ;;  %15434 = vmatpush3.bf16.msra.mxu1 %v16876_v44  ;;  %v16879_v60 = vld [vmem:[%s22111_s2 + $0x1c8] sm:$0xff]  }
  0x52   : > { %v13598_v21 = vcombine.low %v621_v9, %v624_v17  ;;  %v1176_v23 = vsel %vm17373_vm5, %v1174_v15, %v1175_v16  ;;  %v1470_v32 = vrot.slane %v13778_v27, 5  ;;  %v920_v34 = vsel %vm17341_vm2, %v13663_v24, %v919_v25  ;;  %v13699_v55 = vld [vmem:[%s17329_s16 + $0xc0] sm:$0x3]  ;;  %v13632_v62 = vld [vmem:[%s17329_s16 + $0x118] sm:$0x8]  ;;  %15435 = vmatprep.subr.bf16.mxu1 %v16879_v60  ;;  %v16880_v27 = vld [vmem:[%s22111_s2 + $0x188] sm:$0xff]  }
  0x53   : > { %v13754_v28 = vcombine.low %v1173_v13, %v1176_v23  ;;  %15336 = vmatpush3.bf16.msra.mxu0 %v16874_v11  ;;  %v921_v35 = vrot.slane %v919_v25, 4  ;;  %v1473_v36 = vrot.slane %v13779_v30, 5  ;;  %v13583_v42 = vrot.slane %v13549_v37, 10  ;;  %v13633_v2 = vld [vmem:[%s17329_s16 + $0x11c] sm:$0xf] }
  0x54   : > { %v1471_v39 = vsel %vm17551_vm8, %v13819_v31, %v1470_v32  ;;  %v1472_v40 = vrot.slane %v1470_v32, 4  ;;  %v627_v43 = vrot.slane %v13550_v38, 6  ;;  %v13739_v57 = vrot.slane %v13697_v48, 10  ;;  %15545 = vmatprep.subr.bf16.mxu0 %v16877_v50  ;;  %v13634_v3 = vld [vmem:[%s17329_s16 + $0x120] sm:$0x7] }
  0x55   : > { %v923_v46 = vsel %vm17341_vm2, %v921_v35, %v922_v29  ;;  %v1179_v58 = vrot.slane %v13698_v49, 6  ;;  %v1182_v59 = vrot.slane %v13699_v55, 6  ;;  %v13664_v4 = vrot.slane %v13632_v62, 11  ;;  %v13781_v8 = vld [vmem:[%s17329_s16 + $0xd4] sm:$0xf]  ;;  %15436 = vmatpush3.bf16.msra.mxu1 %v16880_v27 }
  0x56   : > { %5961 = vmatmul.mubr.bf16.gmra.mrb[20].mxu0 %v13597_v47  ;;  %6090 = vmatmul.mubr.bf16.gmra.mrb[20].mxu1 %v13753_v53  ;;  %v630_v47 = vrot.slane %v13551_v41, 6  ;;  %v13679_v51 = vcombine.low %v920_v34, %v923_v46  ;;  %v1474_v52 = vsel %vm17551_vm8, %v1472_v40, %v1473_v36  ;;  %v628_v53 = vsel %vm17373_vm5, %v13583_v42, %v627_v43  ;;  %v13782_v10 = vld [vmem:[%s17329_s16 + $0xd8] sm:$0x1]  ;;  %v13552_v13 = vld [vmem:[%s17329_s16 + $0x194] sm:$0xc] }
  0x57   : > { %5968 = vmatprep.mubr.bf16.mxu0 %v13678_v7  ;;  %6097 = vmatprep.mubr.bf16.mxu1 %v13834_v12  ;;  %v629_v54 = vrot.slane %v627_v43, 4  ;;  %v13835_v56 = vcombine.low %v1471_v39, %v1474_v52  ;;  %v1180_v0 = vsel %vm17373_vm5, %v13739_v57, %v1179_v58  ;;  %v1181_v1 = vrot.slane %v1179_v58, 4  ;;  %v13780_v7 = vld [vmem:[%s17329_s16 + $0xd0] sm:$0xe]  ;;  %v13553_v19 = vld [vmem:[%s17329_s16 + $0x198] sm:$0xf] }
  0x58   : > { %v926_v5 = vrot.slane %v13633_v2, 7  ;;  %v929_v6 = vrot.slane %v13634_v3, 7  ;;  %v13820_v11 = vrot.slane %v13780_v7, 9  ;;  %v1477_v12 = vrot.slane %v13781_v8, 5  ;;  %v13554_v20 = vld [vmem:[%s17329_s16 + $0x19c] sm:$0x3] }
  0x59   : > { %v631_v61 = vsel %vm17373_vm5, %v629_v54, %v630_v47  ;;  %v1183_v9 = vsel %vm17373_vm5, %v1181_v1, %v1182_v59  ;;  %v1480_v18 = vrot.slane %v13782_v10, 5  ;;  %v13584_v24 = vrot.slane %v13552_v13, 10  ;;  %v13700_v26 = vld [vmem:[%s17329_s16 + $0xcc] sm:$0xc]  ;;  %v13701_v30 = vld [vmem:[%s17329_s16 + $0xd0] sm:$0xf] }
  0x5a   : > { %v13599_v63 = vcombine.low %v628_v53, %v631_v61  ;;  %v13755_v15 = vcombine.low %v1180_v0, %v1183_v9  ;;  %v927_v16 = vsel %vm17341_vm2, %v13664_v4, %v926_v5  ;;  %v928_v17 = vrot.slane %v926_v5, 4  ;;  %v13702_v31 = vld [vmem:[%s17329_s16 + $0xd4] sm:$0x3]  ;;  %v13635_v37 = vld [vmem:[%s17329_s16 + $0x12c] sm:$0x8] }
  0x5b   : > { %v1479_v23 = vrot.slane %v1477_v12, 4  ;;  %v634_v25 = vrot.slane %v13553_v19, 6  ;;  %v637_v29 = vrot.slane %v13554_v20, 6  ;;  %v13740_v32 = vrot.slane %v13700_v26, 10  ;;  %v13636_v38 = vld [vmem:[%s17329_s16 + $0x130] sm:$0xf] }
  0x5c   : > { %v1186_v40 = vrot.slane %v13701_v30, 6  ;;  %v1189_v41 = vrot.slane %v13702_v31, 6  ;;  %v13637_v42 = vld [vmem:[%s17329_s16 + $0x134] sm:$0x7]  ;;  %v13665_v43 = vrot.slane %v13635_v37, 11  ;;  %v933_v46 = vrot.slane %v13636_v38, 7 }
  0x5d   : > { %v1481_v34 = vsel %vm17551_vm8, %v1479_v23, %v1480_v18  ;;  %v635_v35 = vsel %vm17373_vm5, %v13584_v24, %v634_v25  ;;  %v636_v36 = vrot.slane %v634_v25, 4  ;;  %v936_v47 = vrot.slane %v13637_v42, 7  ;;  %v13783_v48 = vld [vmem:[%s17329_s16 + $0xe4] sm:$0xe]  ;;  %v13784_v49 = vld [vmem:[%s17329_s16 + $0xe8] sm:$0xf] }
  0x5e   : > { %5969 = vmatmul.mubr.bf16.gmra.mrb[24].mxu0 %v13598_v21  ;;  %6098 = vmatmul.mubr.bf16.gmra.mrb[24].mxu1 %v13754_v28  ;;  %v1478_v21 = vsel %vm17551_vm8, %v13820_v11, %v1477_v12  ;;  %v930_v28 = vsel %vm17341_vm2, %v928_v17, %v929_v6  ;;  %v1188_v52 = vrot.slane %v1186_v40, 4  ;;  %v13785_v53 = vld [vmem:[%s17329_s16 + $0xec] sm:$0x1]  ;;  %v13821_v54 = vrot.slane %v13783_v48, 9  ;;  %v13555_v55 = vld [vmem:[%s17329_s16 + $0x1a8] sm:$0xc] }
  0x5f   : > { %5976 = vmatprep.mubr.bf16.mxu0 %v13679_v51  ;;  %6105 = vmatprep.mubr.bf16.mxu1 %v13835_v56  ;;  %v13680_v33 = vcombine.low %v927_v16, %v930_v28  ;;  %v13836_v39 = vcombine.low %v1478_v21, %v1481_v34  ;;  %v638_v44 = vsel %vm17373_vm5, %v636_v36, %v637_v29  ;;  %v935_v57 = vrot.slane %v933_v46, 4  ;;  %v13556_v60 = vld [vmem:[%s17329_s16 + $0x1ac] sm:$0xf]  ;;  %v16883_v61 = vld [vmem:[%s22111_s2 + $0x1d0] sm:$0xff]   ;;  %v13703_v2 = vld [vmem:[%s17329_s16 + $0xe0] sm:$0xc] }
  0x60   : > { %v13600_v50 = vcombine.low %v635_v35, %v638_v44  ;;  %v1187_v51 = vsel %vm17373_vm5, %v13740_v32, %v1186_v40  ;;  %v934_v56 = vsel %vm17341_vm2, %v13665_v43, %v933_v46  ;;  %v1484_v58 = vrot.slane %v13784_v49, 5  ;;  %v13704_v7 = vld [vmem:[%s17329_s16 + $0xe4] sm:$0xf]  ;;  %v13705_v8 = vld [vmem:[%s17329_s16 + $0xe8] sm:$0x3]  ;;  %15437 = vmatprep.subr.bf16.mxu1 %v16883_v61  ;;  %v16884_v9 = vld [vmem:[%s22111_s2 + $0x190] sm:$0xff]  }
  0x61   : > { %v1487_v59 = vrot.slane %v13785_v53, 5  ;;  %v1190_v62 = vsel %vm17373_vm5, %v1188_v52, %v1189_v41  ;;  %v13585_v0 = vrot.slane %v13555_v55, 10  ;;  %v641_v1 = vrot.slane %v13556_v60, 6  ;;  %v13638_v21 = vld [vmem:[%s17329_s16 + $0x140] sm:$0x8]  ;;  %15438 = vmatpush3.bf16.msra.mxu1 %v16884_v9 }
  0x62   : > { %v13756_v3 = vcombine.low %v1187_v51, %v1190_v62  ;;  %v937_v4 = vsel %vm17341_vm2, %v935_v57, %v936_v47  ;;  %v1485_v5 = vsel %vm17551_vm8, %v13821_v54, %v1484_v58  ;;  %v1486_v6 = vrot.slane %v1484_v58, 4  ;;  %v13639_v23 = vld [vmem:[%s17329_s16 + $0x144] sm:$0xf]  ;;  %v13640_v27 = vld [vmem:[%s17329_s16 + $0x148] sm:$0x7]  ;;  %v16887_v51 = vld [vmem:[%s22111_s2 + $0x1d8] sm:$0xff]  }
  0x63   : > { %v13681_v10 = vcombine.low %v934_v56, %v937_v4  ;;  %v642_v11 = vsel %vm17373_vm5, %v13585_v0, %v641_v1  ;;  %v643_v12 = vrot.slane %v641_v1, 4  ;;  %v13741_v16 = vrot.slane %v13703_v2, 10  ;;  %v13786_v29 = vld [vmem:[%s17329_s16 + $0xf8] sm:$0xe]  ;;  %v13787_v32 = vld [vmem:[%s17329_s16 + $0xfc] sm:$0xf]  ;;  %15439 = vmatprep.subr.bf16.mxu1 %v16887_v51 }
  0x64   : > { %v1193_v17 = vrot.slane %v13704_v7, 6  ;;  %v1196_v18 = vrot.slane %v13705_v8, 6  ;;  %v13666_v28 = vrot.slane %v13638_v21, 11  ;;  %v940_v30 = vrot.slane %v13639_v23, 7  ;;  %v13558_v38 = vld [vmem:[%s17329_s16 + $0x1bc] sm:$0xc] }
  0x65   : > { %v943_v31 = vrot.slane %v13640_v27, 7  ;;  %v13822_v35 = vrot.slane %v13786_v29, 9  ;;  %v1491_v36 = vrot.slane %v13787_v32, 5  ;;  %v13559_v42 = vld [vmem:[%s17329_s16 + $0x1c0] sm:$0xf]  ;;  %v13586_v44 = vrot.slane %v13558_v38, 10 }
  0x66   : > { %5977 = vmatmul.mubr.bf16.gmra.mrb[28].mxu0 %v13599_v63  ;;  %6106 = vmatmul.mubr.bf16.gmra.mrb[28].mxu1 %v13755_v15  ;;  %v13557_v63 = vld [vmem:[%s17329_s16 + $0x1b0] sm:$0x3]  ;;  %v1488_v15 = vsel %vm17551_vm8, %v1486_v6, %v1487_v59  ;;  %v1194_v25 = vsel %vm17373_vm5, %v13741_v16, %v1193_v17  ;;  %v1195_v26 = vrot.slane %v1193_v17, 4  ;;  %v941_v40 = vsel %vm17341_vm2, %v13666_v28, %v940_v30  ;;  %v13560_v43 = vld [vmem:[%s17329_s16 + $0x1c4] sm:$0x3]  ;;  %v16888_v56 = vld [vmem:[%s22111_s2 + $0x198] sm:$0xff]  }
  0x67   : > { %5984 = vmatprep.mubr.bf16.mxu0 %v13680_v33  ;;  %6113 = vmatprep.mubr.bf16.mxu1 %v13836_v39  ;;  %v644_v13 = vrot.slane %v13557_v63, 6  ;;  %v13837_v19 = vcombine.low %v1485_v5, %v1488_v15  ;;  %v13788_v33 = vld [vmem:[%s17329_s16 + $0x100] sm:$0x1]  ;;  %v942_v41 = vrot.slane %v940_v30, 4  ;;  %v1492_v46 = vsel %vm17551_vm8, %v13822_v35, %v1491_v36  ;;  %v13707_v53 = vld [vmem:[%s17329_s16 + $0xf8] sm:$0xf] }
  0x68   : > { %v1197_v34 = vsel %vm17373_vm5, %v1195_v26, %v1196_v18  ;;  %v1494_v37 = vrot.slane %v13788_v33, 5  ;;  %v1493_v47 = vrot.slane %v1491_v36, 4  ;;  %v648_v48 = vrot.slane %v13559_v42, 6  ;;  %v13708_v54 = vld [vmem:[%s17329_s16 + $0xfc] sm:$0x3]  ;;  %v16889_v61 = vld [vmem:[%s22111_s2 + $0x1e0] sm:$0xff]   ;;  %15440 = vmatpush3.bf16.msra.mxu1 %v16888_v56 }
  0x69   : > { %v645_v20 = vsel %vm17373_vm5, %v643_v12, %v644_v13  ;;  %v13757_v39 = vcombine.low %v1194_v25, %v1197_v34  ;;  %v651_v49 = vrot.slane %v13560_v43, 6  ;;  %v944_v52 = vsel %vm17341_vm2, %v942_v41, %v943_v31  ;;  %15441 = vmatprep.subr.bf16.mxu1 %v16889_v61  ;;  %v13641_v5 = vld [vmem:[%s17329_s16 + $0x154] sm:$0x8]  ;;  %v13642_v6 = vld [vmem:[%s17329_s16 + $0x158] sm:$0xf]  ;;  %v16891_v9 = vld [vmem:[%s22111_s2 + $0x1a0] sm:$0xff]  }
  0x6a   : > { %v13601_v24 = vcombine.low %v642_v11, %v645_v20  ;;  %v13682_v57 = vcombine.low %v941_v40, %v944_v52  ;;  %v1495_v58 = vsel %vm17551_vm8, %v1493_v47, %v1494_v37  ;;  %v649_v59 = vsel %vm17373_vm5, %v13586_v44, %v648_v48  ;;  %v13643_v7 = vld [vmem:[%s17329_s16 + $0x15c] sm:$0x7]  ;;  %v13789_v13 = vld [vmem:[%s17329_s16 + $0x10c] sm:$0xe]  ;;  %v13790_v15 = vld [vmem:[%s17329_s16 + $0x110] sm:$0xf] }
  0x6b   : > { %v650_v60 = vrot.slane %v648_v48, 4  ;;  %v13838_v62 = vcombine.low %v1492_v46, %v1495_v58  ;;  %v1200_v63 = vrot.slane %v13707_v53, 6  ;;  %v1203_v0 = vrot.slane %v13708_v54, 6  ;;  %v13791_v17 = vld [vmem:[%s17329_s16 + $0x114] sm:$0x1]  ;;  %v16893_v43 = vld [vmem:[%s22111_s2 + $0x1e8] sm:$0xff]  }
  0x6c   : > { %v13667_v8 = vrot.slane %v13641_v5, 11  ;;  %v947_v11 = vrot.slane %v13642_v6, 7  ;;  %v950_v12 = vrot.slane %v13643_v7, 7  ;;  %v13823_v18 = vrot.slane %v13789_v13, 9  ;;  %v13561_v20 = vld [vmem:[%s17329_s16 + $0x1d0] sm:$0xc]  ;;  %15442 = vmatpush3.bf16.msra.mxu1 %v16891_v9 }
  0x6d   : > { %v652_v1 = vsel %vm17373_vm5, %v650_v60, %v651_v49  ;;  %v1202_v4 = vrot.slane %v1200_v63, 4  ;;  %v13562_v25 = vld [vmem:[%s17329_s16 + $0x1d4] sm:$0xf]  ;;  %v13563_v26 = vld [vmem:[%s17329_s16 + $0x1d8] sm:$0x3]  ;;  %v13587_v29 = vrot.slane %v13561_v20, 10  ;;  %15443 = vmatprep.subr.bf16.mxu1 %v16893_v43 }
  0x6e   : > { %5985 = vmatmul.mubr.bf16.gmra.mrb[32].mxu0 %v13600_v50  ;;  %6114 = vmatmul.mubr.bf16.gmra.mrb[32].mxu1 %v13756_v3  ;;  %v13706_v50 = vld [vmem:[%s17329_s16 + $0xf4] sm:$0xc]  ;;  %v13602_v2 = vcombine.low %v649_v59, %v652_v1  ;;  %v948_v21 = vsel %vm17341_vm2, %v13667_v8, %v947_v11  ;;  %v949_v23 = vrot.slane %v947_v11, 4  ;;  %v655_v30 = vrot.slane %v13562_v25, 6  ;;  %v13709_v31 = vld [vmem:[%s17329_s16 + $0x108] sm:$0xc] }
  0x6f   : > { %5992 = vmatprep.mubr.bf16.mxu0 %v13681_v10  ;;  %6121 = vmatprep.mubr.bf16.mxu1 %v13837_v19  ;;  %v13742_v55 = vrot.slane %v13706_v50, 10  ;;  %v1204_v10 = vsel %vm17373_vm5, %v1202_v4, %v1203_v0  ;;  %v1498_v19 = vrot.slane %v13790_v15, 5  ;;  %v658_v33 = vrot.slane %v13563_v26, 6  ;;  %v13710_v34 = vld [vmem:[%s17329_s16 + $0x10c] sm:$0xf]  ;;  %v16897_v26 = vld [vmem:[%s22111_s2 + $0x1f8] sm:$0xff]  }
  0x70   : > { %v951_v32 = vsel %vm17341_vm2, %v949_v23, %v950_v12  ;;  %v13711_v35 = vld [vmem:[%s17329_s16 + $0x110] sm:$0x3]  ;;  %v13743_v36 = vrot.slane %v13709_v31, 10  ;;  %v657_v40 = vrot.slane %v655_v30, 4  ;;  %v13792_v41 = vld [vmem:[%s17329_s16 + $0x120] sm:$0xe] }
  0x71   : > { %v1201_v3 = vsel %vm17373_vm5, %v13742_v55, %v1200_v63  ;;  %v1499_v27 = vsel %vm17551_vm8, %v13823_v18, %v1498_v19  ;;  %v1500_v28 = vrot.slane %v1498_v19, 4  ;;  %v13683_v37 = vcombine.low %v948_v21, %v951_v32  ;;  %v13793_v42 = vld [vmem:[%s17329_s16 + $0x124] sm:$0xf]  ;;  %v13794_v48 = vld [vmem:[%s17329_s16 + $0x128] sm:$0x1]  ;;  %v16898_v31 = vld [vmem:[%s22111_s2 + $0x1b8] sm:$0xff]  }
  0x72   : > { %v13758_v16 = vcombine.low %v1201_v3, %v1204_v10  ;;  %v1207_v46 = vrot.slane %v13710_v34, 6  ;;  %v1210_v47 = vrot.slane %v13711_v35, 6  ;;  %v13824_v49 = vrot.slane %v13792_v41, 9  ;;  %v16894_v50 = vld [vmem:[%s22111_s2 + $0x1a8] sm:$0xff]   ;;  %v13928_v54 = vld [vmem:[%s17329_s16 + $0xf8] sm:$0xe] }
  0x73   : > { %v659_v51 = vsel %vm17373_vm5, %v657_v40, %v658_v33  ;;  %v1505_v52 = vrot.slane %v13793_v42, 5  ;;  %v1508_v53 = vrot.slane %v13794_v48, 5  ;;  %v13929_v55 = vld [vmem:[%s17329_s16 + $0xfc] sm:$0xf]  ;;  %v13930_v59 = vld [vmem:[%s17329_s16 + $0x100] sm:$0x1]  ;;  %15444 = vmatpush3.bf16.msra.mxu1 %v16894_v50 }
  0x74   : > { %v1209_v58 = vrot.slane %v1207_v46, 4  ;;  %v13976_v60 = vrot.slane %v13928_v54, 9  ;;  %v13712_v61 = vld [vmem:[%s17329_s16 + $0x11c] sm:$0xc]  ;;  %v2025_v0 = vrot.slane %v13929_v55, 5  ;;  %v2028_v1 = vrot.slane %v13930_v59, 5 }
  0x75   : > { %v1507_v63 = vrot.slane %v1505_v52, 4  ;;  %v16895_v3 = vld [vmem:[%s22111_s2 + $0x1f0] sm:$0xff]   ;;  %v13714_v5 = vld [vmem:[%s17329_s16 + $0x124] sm:$0x3]  ;;  %v13744_v6 = vrot.slane %v13712_v61, 10 }
  0x76   : > { %5993 = vmatmul.mubr.bf16.gmra.mrb[36].mxu0 %v13601_v24  ;;  %6122 = vmatmul.mubr.bf16.gmra.mrb[36].mxu1 %v13757_v39  ;;  %v1501_v24 = vrot.slane %v13791_v17, 5  ;;  %v656_v39 = vsel %vm17373_vm5, %v13587_v29, %v655_v30  ;;  %v1211_v4 = vsel %vm17373_vm5, %v1209_v58, %v1210_v47  ;;  %v13848_v8 = vld [vmem:[%s17329_s16 + $0xf0] sm:$0x8]  ;;  %v2026_v11 = vsel %vm17551_vm8, %v13976_v60, %v2025_v0  ;;  %v13849_v13 = vld [vmem:[%s17329_s16 + $0xf4] sm:$0xf]  ;;  %v16881_v47 = vld [vmem:[%s22111_s2 + $0x248] sm:$0xff]  }
  0x77   : > { %6000 = vmatprep.mubr.bf16.mxu0 %v13682_v57  ;;  %6129 = vmatprep.mubr.bf16.mxu1 %v13838_v62  ;;  %v13603_v56 = vcombine.low %v656_v39, %v659_v51  ;;  %v1208_v57 = vsel %vm17373_vm5, %v13743_v36, %v1207_v46  ;;  %v1506_v62 = vsel %vm17551_vm8, %v13824_v49, %v1505_v52  ;;  %v2027_v12 = vrot.slane %v2025_v0, 4  ;;  %v13850_v15 = vld [vmem:[%s17329_s16 + $0xf8] sm:$0x7]  ;;  %v13795_v33 = vld [vmem:[%s17329_s16 + $0x134] sm:$0xe] }
  0x78   : > { %v1502_v38 = vsel %vm17551_vm8, %v1500_v28, %v1501_v24  ;;  %v13759_v9 = vcombine.low %v1208_v57, %v1211_v4  ;;  %v1509_v10 = vsel %vm17551_vm8, %v1507_v63, %v1508_v53  ;;  %15445 = vmatprep.subr.bf16.mxu1 %v16895_v3  ;;  %v1217_v20 = vrot.slane %v13714_v5, 6  ;;  %v13796_v34 = vld [vmem:[%s17329_s16 + $0x138] sm:$0xf]  ;;  %v13797_v35 = vld [vmem:[%s17329_s16 + $0x13c] sm:$0x1]  ;;  %v16885_v4 = vld [vmem:[%s22111_s2 + $0x250] sm:$0xff]  }
  0x79   : > { %v13839_v44 = vcombine.low %v1499_v27, %v1502_v38  ;;  %v13840_v17 = vcombine.low %v1506_v62, %v1509_v10  ;;  %v2029_v21 = vsel %vm17551_vm8, %v2027_v12, %v2028_v1  ;;  %v13896_v23 = vrot.slane %v13848_v8, 11  ;;  %v13931_v41 = vld [vmem:[%s17329_s16 + $0x10c] sm:$0xe]  ;;  %v13932_v43 = vld [vmem:[%s17329_s16 + $0x110] sm:$0xf] }
  0x7a   : > { %v1737_v24 = vrot.slane %v13849_v13, 7  ;;  %v1740_v25 = vrot.slane %v13850_v15, 7  ;;  %v13992_v27 = vcombine.low %v2026_v11, %v2029_v21  ;;  %v13825_v38 = vrot.slane %v13795_v33, 9  ;;  %v13715_v52 = vld [vmem:[%s17329_s16 + $0x130] sm:$0xc] }
  0x7b   : > { %v1512_v39 = vrot.slane %v13796_v34, 5  ;;  %v1515_v40 = vrot.slane %v13797_v35, 5  ;;  %v13977_v46 = vrot.slane %v13931_v41, 9  ;;  %v2032_v50 = vrot.slane %v13932_v43, 5  ;;  %v13716_v53 = vld [vmem:[%s17329_s16 + $0x134] sm:$0xf] }
  0x7c   : > { %v1738_v29 = vsel %vm17341_vm2, %v13896_v23, %v1737_v24  ;;  %v1739_v30 = vrot.slane %v1737_v24, 4  ;;  %v13717_v54 = vld [vmem:[%s17329_s16 + $0x138] sm:$0x3]  ;;  %v13745_v55 = vrot.slane %v13715_v52, 10  ;;  %v1221_v60 = vrot.slane %v13716_v53, 6 }
  0x7d   : > { %v1513_v48 = vsel %vm17551_vm8, %v13825_v38, %v1512_v39  ;;  %v1514_v49 = vrot.slane %v1512_v39, 4  ;;  %v2033_v58 = vsel %vm17551_vm8, %v13977_v46, %v2032_v50  ;;  %v2034_v59 = vrot.slane %v2032_v50, 4  ;;  %v13851_v61 = vld [vmem:[%s17329_s16 + $0x104] sm:$0x8]  ;;  %v13852_v62 = vld [vmem:[%s17329_s16 + $0x108] sm:$0xf] }
  0x7e   : > { %6001 = vmatmul.mubr.bf16.gmra.mrb[40].mxu0 %v13602_v2  ;;  %6130 = vmatmul.mubr.bf16.gmra.mrb[40].mxu1 %v13758_v16  ;;  %v13713_v2 = vld [vmem:[%s17329_s16 + $0x120] sm:$0xf]  ;;  %v16896_v16 = vld [vmem:[%s22111_s2 + $0x1b0] sm:$0xff]   ;;  %v1741_v36 = vsel %vm17341_vm2, %v1739_v30, %v1740_v25  ;;  %v1224_v0 = vrot.slane %v13717_v54, 6  ;;  %v13853_v1 = vld [vmem:[%s17329_s16 + $0x10c] sm:$0x7] }
  0x7f   : > { %6008 = vmatprep.mubr.bf16.mxu0 %v13683_v37  ;;  %6137 = vmatprep.mubr.bf16.mxu1 %v13839_v44  ;;  %v1214_v7 = vrot.slane %v13713_v2, 6  ;;  %v16878_v37 = vld [vmem:[%s22111_s2 + $0x200] sm:$0xff]   ;;  %v13912_v42 = vcombine.low %v1738_v29, %v1741_v36  ;;  %v13933_v44 = vld [vmem:[%s17329_s16 + $0x114] sm:$0x1]  ;;  %v1516_v57 = vsel %vm17551_vm8, %v1514_v49, %v1515_v40  ;;  %v13897_v2 = vrot.slane %v13851_v61, 11  ;;  %v16890_v25 = vld [vmem:[%s22111_s2 + $0x258] sm:$0xff]  }
  0x80   : > { %15446 = vmatpush3.bf16.msra.mxu1 %v16896_v16  ;;  %v2035_v51 = vrot.slane %v13933_v44, 5  ;;  %v13841_v63 = vcombine.low %v1513_v48, %v1516_v57  ;;  %v1744_v3 = vrot.slane %v13852_v62, 7  ;;  %v1747_v8 = vrot.slane %v13853_v1, 7  ;;  %v13799_v10 = vld [vmem:[%s17329_s16 + $0x14c] sm:$0xf]  ;;  %v16892_v49 = vld [vmem:[%s22111_s2 + $0x218] sm:$0xff]  }
  0x81   : > { %v1215_v18 = vsel %vm17373_vm5, %v13744_v6, %v1214_v7  ;;  %v1216_v19 = vrot.slane %v1214_v7, 4  ;;  %15447 = vmatprep.subr.bf16.mxu1 %v16897_v26  ;;  %v1222_v6 = vsel %vm17373_vm5, %v13745_v55, %v1221_v60  ;;  %v1223_v7 = vrot.slane %v1221_v60, 4  ;;  %v13800_v15 = vld [vmem:[%s17329_s16 + $0x150] sm:$0x1]  ;;  %v13935_v23 = vld [vmem:[%s17329_s16 + $0x124] sm:$0xf] }
  0x82   : > { %v2036_v5 = vsel %vm17551_vm8, %v2034_v59, %v2035_v51  ;;  %v1745_v12 = vsel %vm17341_vm2, %v13897_v2, %v1744_v3  ;;  %v1746_v13 = vrot.slane %v1744_v3, 4  ;;  %v1522_v21 = vrot.slane %v13800_v15, 5  ;;  %v13936_v24 = vld [vmem:[%s17329_s16 + $0x128] sm:$0x1]  ;;  %v13718_v30 = vld [vmem:[%s17329_s16 + $0x144] sm:$0xc] }
  0x83   : > { %v1218_v28 = vsel %vm17373_vm5, %v1216_v19, %v1217_v20  ;;  %v13993_v11 = vcombine.low %v2033_v58, %v2036_v5  ;;  %v1225_v19 = vsel %vm17373_vm5, %v1223_v7, %v1224_v0  ;;  %v1519_v20 = vrot.slane %v13799_v10, 5  ;;  %v13720_v36 = vld [vmem:[%s17329_s16 + $0x14c] sm:$0x3]  ;;  %v13856_v46 = vld [vmem:[%s17329_s16 + $0x120] sm:$0x7] }
  0x84   : > { %v13760_v32 = vcombine.low %v1215_v18, %v1218_v28  ;;  %15448 = vmatpush3.bf16.msra.mxu1 %v16898_v31  ;;  %v16886_v18 = vld [vmem:[%s22111_s2 + $0x210] sm:$0xff]   ;;  %v13761_v26 = vcombine.low %v1222_v6, %v1225_v19  ;;  %v2039_v29 = vrot.slane %v13935_v23, 5  ;;  %v13719_v31 = vld [vmem:[%s17329_s16 + $0x148] sm:$0xf]  ;;  %v2042_v35 = vrot.slane %v13936_v24, 5  ;;  %v16899_v54 = vld [vmem:[%s22111_s2 + $0x260] sm:$0xff]  }
  0x85   : > { %v1521_v34 = vrot.slane %v1519_v20, 4  ;;  %v13746_v40 = vrot.slane %v13718_v30, 10  ;;  %v1228_v41 = vrot.slane %v13719_v31, 6  ;;  %v1231_v44 = vrot.slane %v13720_v36, 6  ;;  %v16900_v60 = vld [vmem:[%s22111_s2 + $0x220] sm:$0xff]   ;;  %v16901_v1 = vld [vmem:[%s22111_s2 + $0x268] sm:$0xff]  }
  0x86   : > { %6009 = vmatmul.mubr.bf16.gmra.mrb[44].mxu0 %v13603_v56  ;;  %6138 = vmatmul.mubr.bf16.gmra.mrb[44].mxu1 %v13759_v9  ;;  %v16882_v56 = vld [vmem:[%s22111_s2 + $0x208] sm:$0xff]   ;;  %v2041_v39 = vrot.slane %v2039_v29, 4  ;;  %v1754_v58 = vrot.slane %v13856_v46, 7  ;;  %v13802_v0 = vld [vmem:[%s17329_s16 + $0x160] sm:$0xf] }
  0x87   : > { %6145 = vmatprep.mubr.bf16.mxu1 %v13840_v17  ;;  %6242 = vmatprep.mubr.bf16.mxu0 %v13992_v27  ;;  %v13798_v9 = vld [vmem:[%s17329_s16 + $0x148] sm:$0xe]  ;;  %v13934_v17 = vld [vmem:[%s17329_s16 + $0x120] sm:$0xe]  ;;  %v1748_v27 = vsel %vm17341_vm2, %v1746_v13, %v1747_v8  ;;  %v1523_v43 = vsel %vm17551_vm8, %v1521_v34, %v1522_v21  ;;  %v1229_v52 = vsel %vm17373_vm5, %v13746_v40, %v1228_v41  ;;  %v1230_v53 = vrot.slane %v1228_v41, 4  ;;  %v16903_v34 = vld [vmem:[%s22111_s2 + $0x270] sm:$0xff]  }
  0x88   : > { %v13826_v16 = vrot.slane %v13798_v9, 9  ;;  %v13978_v28 = vrot.slane %v13934_v17, 9  ;;  %v2043_v51 = vsel %vm17551_vm8, %v2041_v39, %v2042_v35  ;;  %v13803_v3 = vld [vmem:[%s17329_s16 + $0x164] sm:$0x1]  ;;  %v1526_v5 = vrot.slane %v13802_v0, 5  ;;  %v16902_v21 = vld [vmem:[%s22111_s2 + $0x228] sm:$0xff]  }
  0x89   : > { %v1232_v59 = vsel %vm17373_vm5, %v1230_v53, %v1231_v44  ;;  %v13937_v6 = vld [vmem:[%s17329_s16 + $0x134] sm:$0xe]  ;;  %v1529_v7 = vrot.slane %v13803_v3, 5  ;;  %v13938_v8 = vld [vmem:[%s17329_s16 + $0x138] sm:$0xf]  ;;  %v16907_v17 = vld [vmem:[%s22111_s2 + $0x2c0] sm:$0xff]  }
  0x8a   : > { %v1520_v33 = vsel %vm17551_vm8, %v13826_v16, %v1519_v20  ;;  %v2040_v38 = vsel %vm17551_vm8, %v13978_v28, %v2039_v29  ;;  %v13762_v61 = vcombine.low %v1229_v52, %v1232_v59  ;;  %v13939_v9 = vld [vmem:[%s17329_s16 + $0x13c] sm:$0x1]  ;;  %v13979_v10 = vrot.slane %v13937_v6, 9  ;;  %v13721_v16 = vld [vmem:[%s17329_s16 + $0x158] sm:$0xc]  ;;  %15657 = vmatprep.subr.bf16.mxu1 %v16907_v17 }
  0x8b   : > { %v13842_v50 = vcombine.low %v1520_v33, %v1523_v43  ;;  %v13994_v55 = vcombine.low %v2040_v38, %v2043_v51  ;;  %v2046_v13 = vrot.slane %v13938_v8, 5  ;;  %v2049_v15 = vrot.slane %v13939_v9, 5  ;;  %v13723_v19 = vld [vmem:[%s17329_s16 + $0x160] sm:$0x3]  ;;  %v13858_v28 = vld [vmem:[%s17329_s16 + $0x130] sm:$0xf] }
  0x8c   : > { %v13747_v20 = vrot.slane %v13721_v16, 10  ;;  %v1238_v30 = vrot.slane %v13723_v19, 6  ;;  %v13859_v31 = vld [vmem:[%s17329_s16 + $0x134] sm:$0x7]  ;;  %v1758_v33 = vrot.slane %v13858_v28, 7  ;;  %v16910_v19 = vld [vmem:[%s22111_s2 + $0x340] sm:$0xff]  }
  0x8d   : > { %v2047_v24 = vsel %vm17551_vm8, %v13979_v10, %v2046_v13  ;;  %v1761_v38 = vrot.slane %v13859_v31, 7  ;;  %v13804_v39 = vld [vmem:[%s17329_s16 + $0x170] sm:$0xe]  ;;  %v13805_v40 = vld [vmem:[%s17329_s16 + $0x174] sm:$0xf] }
  0x8e   : > { %6243 = vmatmul.mubr.bf16.vlgmr.msra.gmra.mrb[48].mxu0 %v13912_v42  ;;  %6146 = vmatmul.mubr.bf16.gmra.mrb[48].mxu1 %v13760_v32  ;;  %v13913_v32 = vcombine.low %v1745_v12, %v1748_v27  ;;  %v13855_v42 = vld [vmem:[%s17329_s16 + $0x11c] sm:$0xf]  ;;  %v1528_v12 = vrot.slane %v1526_v5, 4  ;;  %v13857_v27 = vld [vmem:[%s17329_s16 + $0x12c] sm:$0x8]  ;;  %v1760_v43 = vrot.slane %v1758_v33, 4 }
  0x8f   : > { %15546 = vmatpush3.bf16.msra.mxu0 %v16878_v37  ;;  %6153 = vmatprep.mubr.bf16.mxu1 %v13841_v63  ;;  %v13854_v37 = vld [vmem:[%s17329_s16 + $0x118] sm:$0x8]  ;;  %v1751_v48 = vrot.slane %v13855_v42, 7  ;;  %v13801_v63 = vld [vmem:[%s17329_s16 + $0x15c] sm:$0xe]  ;;  %v13828_v46 = vrot.slane %v13804_v39, 9 }
  0x90   : > { %15547 = vmatprep.subr.bf16.mxu0 %v16881_v47  ;;  %6250 = vmatprep.mubr.bf16.mxu0 %v13993_v11  ;;  %v13898_v47 = vrot.slane %v13854_v37, 11  ;;  %v1530_v23 = vsel %vm17551_vm8, %v1528_v12, %v1529_v7  ;;  %v13806_v44 = vld [vmem:[%s17329_s16 + $0x178] sm:$0x1]  ;;  %v13941_v52 = vld [vmem:[%s17329_s16 + $0x14c] sm:$0xf] }
  0x91   : > { %v1753_v57 = vrot.slane %v1751_v48, 4  ;;  %v1536_v51 = vrot.slane %v13806_v44, 5  ;;  %v13942_v53 = vld [vmem:[%s17329_s16 + $0x150] sm:$0x1]  ;;  %v13724_v59 = vld [vmem:[%s17329_s16 + $0x16c] sm:$0xc] }
  0x92   : > { %v2056_v0 = vrot.slane %v13942_v53, 5  ;;  %v13861_v7 = vld [vmem:[%s17329_s16 + $0x144] sm:$0xf]  ;;  %v13862_v10 = vld [vmem:[%s17329_s16 + $0x148] sm:$0x7] }
  0x93   : > { %15548 = vmatpush3.bf16.msra.mxu0 %v16882_v56  ;;  %v1752_v56 = vsel %vm17341_vm2, %v13898_v47, %v1751_v48  ;;  %v1755_v62 = vsel %vm17341_vm2, %v1753_v57, %v1754_v58  ;;  %v13940_v47 = vld [vmem:[%s17329_s16 + $0x148] sm:$0xe]  ;;  %v16904_v48 = vld [vmem:[%s22111_s2 + $0x230] sm:$0xff]   ;;  %v2053_v58 = vrot.slane %v13941_v52, 5  ;;  %v1765_v12 = vrot.slane %v13861_v7, 7 }
  0x94   : > { %15549 = vmatprep.subr.bf16.mxu0 %v16885_v4  ;;  %v13914_v2 = vcombine.low %v1752_v56, %v1755_v62  ;;  %v13827_v4 = vrot.slane %v13801_v63, 9  ;;  %v1762_v56 = vsel %vm17341_vm2, %v1760_v43, %v1761_v38  ;;  %v13980_v57 = vrot.slane %v13940_v47, 9  ;;  %v13807_v28 = vld [vmem:[%s17329_s16 + $0x184] sm:$0xe]  ;;  %v13809_v31 = vld [vmem:[%s17329_s16 + $0x18c] sm:$0x1] }
  0x95   : > { %v13727_v43 = vld [vmem:[%s17329_s16 + $0x180] sm:$0xc]  ;;  %v13728_v44 = vld [vmem:[%s17329_s16 + $0x184] sm:$0xf]  ;;  %v13863_v52 = vld [vmem:[%s17329_s16 + $0x154] sm:$0x8] }
  0x96   : > { %6154 = vmatmul.mubr.bf16.gmra.mrb[52].mxu1 %v13761_v26  ;;  %6251 = vmatmul.mubr.bf16.gmra.mrb[52].mxu0 %v13913_v32  ;;  %v1527_v11 = vsel %vm17551_vm8, %v13827_v4, %v1526_v5  ;;  %v13899_v32 = vrot.slane %v13857_v27, 11  ;;  %v2054_v3 = vsel %vm17551_vm8, %v13980_v57, %v2053_v58  ;;  %v2055_v4 = vrot.slane %v2053_v58, 4  ;;  %v13864_v53 = vld [vmem:[%s17329_s16 + $0x158] sm:$0xf] }
  0x97   : > { %15550 = vmatpush3.bf16.msra.mxu0 %v16886_v18  ;;  %6161 = vmatprep.mubr.bf16.mxu1 %v13842_v50  ;;  %v13722_v18 = vld [vmem:[%s17329_s16 + $0x15c] sm:$0xf]  ;;  %v13843_v29 = vcombine.low %v1527_v11, %v1530_v23  ;;  %v1533_v50 = vrot.slane %v13805_v40, 5  ;;  %v13748_v5 = vrot.slane %v13724_v59, 10  ;;  %v1767_v23 = vrot.slane %v1765_v12, 4 }
  0x98   : > { %15551 = vmatprep.subr.bf16.mxu0 %v16890_v25  ;;  %6258 = vmatprep.mubr.bf16.mxu0 %v13994_v55  ;;  %v2048_v25 = vrot.slane %v2046_v13, 4  ;;  %v1235_v26 = vrot.slane %v13722_v18, 6  ;;  %v1759_v42 = vsel %vm17341_vm2, %v13899_v32, %v1758_v33  ;;  %v16906_v13 = vld [vmem:[%s22111_s2 + $0x238] sm:$0xff]   ;;  %v2057_v16 = vsel %vm17551_vm8, %v2055_v4, %v2056_v0  ;;  %v13812_v4 = vld [vmem:[%s17329_s16 + $0x1a0] sm:$0x1] }
  0x99   : > { %v1534_v62 = vsel %vm17551_vm8, %v13828_v46, %v1533_v50  ;;  %v1535_v63 = vrot.slane %v1533_v50, 4  ;;  %v13829_v32 = vrot.slane %v13807_v28, 9  ;;  %v13729_v46 = vld [vmem:[%s17329_s16 + $0x188] sm:$0x3]  ;;  %v13749_v47 = vrot.slane %v13727_v43, 10 }
  0x9a   : > { %v2050_v35 = vsel %vm17551_vm8, %v2048_v25, %v2049_v15  ;;  %v1236_v36 = vsel %vm17373_vm5, %v13747_v20, %v1235_v26  ;;  %v1237_v37 = vrot.slane %v1235_v26, 4  ;;  %v13996_v20 = vcombine.low %v2054_v3, %v2057_v16  ;;  %v13811_v0 = vld [vmem:[%s17329_s16 + $0x19c] sm:$0xf] }
  0x9b   : > { %15552 = vmatpush3.bf16.msra.mxu0 %v16892_v49  ;;  %v13995_v41 = vcombine.low %v2047_v24, %v2050_v35  ;;  %v1537_v8 = vsel %vm17551_vm8, %v1535_v63, %v1536_v51  ;;  %v1768_v24 = vrot.slane %v13862_v10, 7  ;;  %v1543_v35 = vrot.slane %v13809_v31, 5  ;;  %v13810_v63 = vld [vmem:[%s17329_s16 + $0x198] sm:$0xe]  ;;  %v13947_v10 = vld [vmem:[%s17329_s16 + $0x174] sm:$0xf] }
  0x9c   : > { %15553 = vmatprep.subr.bf16.mxu0 %v16899_v54  ;;  %v1239_v49 = vsel %vm17373_vm5, %v1237_v37, %v1238_v30  ;;  %v16905_v54 = vld [vmem:[%s22111_s2 + $0x278] sm:$0xff]   ;;  %v13844_v15 = vcombine.low %v1534_v62, %v1537_v8  ;;  %v13945_v37 = vld [vmem:[%s17329_s16 + $0x164] sm:$0x1]  ;;  %v1249_v51 = vrot.slane %v13728_v44, 6  ;;  %v13901_v57 = vrot.slane %v13863_v52, 11 }
  0x9d   : > { %v13763_v55 = vcombine.low %v1236_v36, %v1239_v49  ;;  %v1769_v27 = vsel %vm17341_vm2, %v1767_v23, %v1768_v24  ;;  %v13944_v36 = vld [vmem:[%s17329_s16 + $0x160] sm:$0xf]  ;;  %v1772_v58 = vrot.slane %v13864_v53, 7  ;;  %v1547_v8 = vrot.slane %v13811_v0, 5  ;;  %v13732_v24 = vld [vmem:[%s17329_s16 + $0x19c] sm:$0x3] }
  0x9e   : > { %6162 = vmatmul.mubr.bf16.gmra.mrb[56].mxu1 %v13762_v61  ;;  %6259 = vmatmul.mubr.bf16.gmra.mrb[56].mxu0 %v13914_v2  ;;  %v13915_v61 = vcombine.low %v1759_v42, %v1762_v56  ;;  %v13860_v2 = vld [vmem:[%s17329_s16 + $0x140] sm:$0x8]  ;;  %v2063_v42 = vrot.slane %v13945_v37, 5  ;;  %v13865_v56 = vld [vmem:[%s17329_s16 + $0x15c] sm:$0x7]  ;;  %v2067_v16 = vrot.slane %v13947_v10, 5 }
  0x9f   : > { %15554 = vmatpush3.bf16.msra.mxu0 %v16900_v60  ;;  %6169 = vmatprep.mubr.bf16.mxu1 %v13843_v29  ;;  %v13725_v60 = vld [vmem:[%s17329_s16 + $0x170] sm:$0xf]  ;;  %v13900_v11 = vrot.slane %v13860_v2, 11  ;;  %v13808_v29 = vld [vmem:[%s17329_s16 + $0x188] sm:$0xf]  ;;  %v1775_v62 = vrot.slane %v13865_v56, 7  ;;  %v1773_v2 = vsel %vm17341_vm2, %v13901_v57, %v1772_v58 }
  0xa0   : > { %15555 = vmatprep.subr.bf16.mxu0 %v16901_v1  ;;  %6266 = vmatprep.mubr.bf16.mxu0 %v13995_v41  ;;  %v13726_v1 = vld [vmem:[%s17329_s16 + $0x174] sm:$0x3]  ;;  %v1242_v6 = vrot.slane %v13725_v60, 6  ;;  %v1540_v33 = vrot.slane %v13808_v29, 5  ;;  %v2060_v41 = vrot.slane %v13944_v36, 5  ;;  %v1250_v60 = vsel %vm17373_vm5, %v13749_v47, %v1249_v51 }
  0xa1   : > { %v1245_v9 = vrot.slane %v13726_v1, 6  ;;  %v1774_v3 = vrot.slane %v1772_v58, 4  ;;  %v13950_v56 = vld [vmem:[%s17329_s16 + $0x188] sm:$0xf]  ;;  %v13951_v57 = vld [vmem:[%s17329_s16 + $0x18c] sm:$0x1] }
  0xa2   : > { %v1243_v17 = vsel %vm17373_vm5, %v13748_v5, %v1242_v6  ;;  %v1244_v18 = vrot.slane %v1242_v6, 4  ;;  %v1541_v39 = vsel %vm17551_vm8, %v13829_v32, %v1540_v33  ;;  %v1542_v40 = vrot.slane %v1540_v33, 4  ;;  %v13946_v6 = vld [vmem:[%s17329_s16 + $0x170] sm:$0xe]  ;;  %v13734_v0 = vld [vmem:[%s17329_s16 + $0x1ac] sm:$0xf] }
  0xa3   : > { %15556 = vmatpush3.bf16.msra.mxu0 %v16902_v21  ;;  %v1766_v21 = vsel %vm17341_vm2, %v13900_v11, %v1765_v12  ;;  %v2062_v50 = vrot.slane %v2060_v41, 4  ;;  %v13830_v5 = vrot.slane %v13810_v63, 9  ;;  %v13948_v11 = vld [vmem:[%s17329_s16 + $0x178] sm:$0x1]  ;;  %v1259_v32 = vrot.slane %v13732_v24, 6 }
  0xa4   : > { %15557 = vmatprep.subr.bf16.mxu0 %v16903_v34  ;;  %v1246_v25 = vsel %vm17373_vm5, %v1244_v18, %v1245_v9  ;;  %v13916_v30 = vcombine.low %v1766_v21, %v1769_v27  ;;  %v13943_v34 = vld [vmem:[%s17329_s16 + $0x15c] sm:$0xe]  ;;  %v1550_v9 = vrot.slane %v13812_v4, 5  ;;  %v13731_v18 = vld [vmem:[%s17329_s16 + $0x198] sm:$0xf]  ;;  %v1549_v21 = vrot.slane %v1547_v8, 4 }
  0xa5   : > { %v13764_v26 = vcombine.low %v1243_v17, %v1246_v25  ;;  %v13981_v38 = vrot.slane %v13943_v34, 9  ;;  %v2064_v59 = vsel %vm17551_vm8, %v2062_v50, %v2063_v42  ;;  %v13730_v17 = vld [vmem:[%s17329_s16 + $0x194] sm:$0xc]  ;;  %v2070_v23 = vrot.slane %v13948_v11, 5  ;;  %v13866_v25 = vld [vmem:[%s17329_s16 + $0x168] sm:$0x8] }
  0xa6   : > { %6170 = vmatmul.mubr.bf16.gmra.mrb[60].mxu1 %v13763_v55  ;;  %6267 = vmatmul.mubr.bf16.gmra.mrb[60].mxu0 %v13915_v61  ;;  %v1252_v55 = vrot.slane %v13729_v46, 6  ;;  %v1251_v61 = vrot.slane %v1249_v51, 4  ;;  %v2069_v27 = vrot.slane %v2067_v16, 4  ;;  %v13750_v28 = vrot.slane %v13730_v17, 10  ;;  %v13868_v33 = vld [vmem:[%s17329_s16 + $0x170] sm:$0x7] }
  0xa7   : > { %15558 = vmatpush3.bf16.msra.mxu0 %v16904_v48  ;;  %6177 = vmatprep.mubr.bf16.mxu1 %v13844_v15  ;;  %v1544_v48 = vsel %vm17551_vm8, %v1542_v40, %v1543_v35  ;;  %v2061_v49 = vsel %vm17551_vm8, %v13981_v38, %v2060_v41  ;;  %v13982_v15 = vrot.slane %v13946_v6, 9  ;;  %v1256_v29 = vrot.slane %v13731_v18, 6  ;;  %v13814_v50 = vld [vmem:[%s17329_s16 + $0x1b0] sm:$0xf]  ;;  %v13815_v51 = vld [vmem:[%s17329_s16 + $0x1b4] sm:$0x1] }
  0xa8   : > { %15559 = vmatprep.subr.bf16.mxu0 %v16905_v54  ;;  %6274 = vmatprep.mubr.bf16.mxu0 %v13996_v20  ;;  %v13845_v54 = vcombine.low %v1541_v39, %v1544_v48  ;;  %v13997_v1 = vcombine.low %v2061_v49, %v2064_v59  ;;  %v1253_v7 = vsel %vm17373_vm5, %v1251_v61, %v1252_v55  ;;  %v13902_v34 = vrot.slane %v13866_v25, 11  ;;  %v13813_v49 = vld [vmem:[%s17329_s16 + $0x1ac] sm:$0xe]  ;;  %v13949_v55 = vld [vmem:[%s17329_s16 + $0x184] sm:$0xe] }
  0xa9   : > { %v13765_v12 = vcombine.low %v1250_v60, %v1253_v7  ;;  %v1548_v20 = vsel %vm17551_vm8, %v13830_v5, %v1547_v8  ;;  %v1551_v31 = vsel %vm17551_vm8, %v1549_v21, %v1550_v9  ;;  %v2071_v37 = vsel %vm17551_vm8, %v2069_v27, %v2070_v23  ;;  %v13733_v60 = vld [vmem:[%s17329_s16 + $0x1a8] sm:$0xc]  ;;  %v13869_v6 = vld [vmem:[%s17329_s16 + $0x17c] sm:$0x8]  ;;  %v13870_v9 = vld [vmem:[%s17329_s16 + $0x180] sm:$0xf] }
  0xaa   : > { %v13846_v36 = vcombine.low %v1548_v20, %v1551_v31  ;;  %v1257_v38 = vsel %vm17373_vm5, %v13750_v28, %v1256_v29  ;;  %v1258_v39 = vrot.slane %v1256_v29, 4  ;;  %v1782_v43 = vrot.slane %v13868_v33, 7  ;;  %v13871_v10 = vld [vmem:[%s17329_s16 + $0x184] sm:$0x7]  ;;  %v13952_v25 = vld [vmem:[%s17329_s16 + $0x198] sm:$0xe] }
  0xab   : > { %15560 = vmatpush3.bf16.msra.mxu0 %v16906_v13  ;;  %v1776_v13 = vsel %vm17341_vm2, %v1774_v3, %v1775_v62  ;;  %v13831_v52 = vrot.slane %v13813_v49, 9  ;;  %v1554_v53 = vrot.slane %v13814_v50, 5  ;;  %v13983_v58 = vrot.slane %v13949_v55, 9  ;;  %v13954_v27 = vld [vmem:[%s17329_s16 + $0x1a0] sm:$0x1] }
  0xac   : > { %15769 = vmatprep.subr.bf16.mxu0 %v16910_v19  ;;  %v13917_v19 = vcombine.low %v1773_v2, %v1776_v13  ;;  %v1260_v44 = vsel %vm17373_vm5, %v1258_v39, %v1259_v32  ;;  %v2074_v59 = vrot.slane %v13950_v56, 5  ;;  %v2077_v63 = vrot.slane %v13951_v57, 5  ;;  %v14088_v32 = vld [vmem:[%s17329_s16 + $0x16c] sm:$0xc]  ;;  %v14089_v33 = vld [vmem:[%s17329_s16 + $0x170] sm:$0xf] }
  0xad   : > { %v13766_v46 = vcombine.low %v1257_v38, %v1260_v44  ;;  %v1555_v61 = vsel %vm17551_vm8, %v13831_v52, %v1554_v53  ;;  %v1556_v62 = vrot.slane %v1554_v53, 4  ;;  %v13751_v4 = vrot.slane %v13733_v60, 10  ;;  %v13872_v38 = vld [vmem:[%s17329_s16 + $0x190] sm:$0x8]  ;;  %v14008_v49 = vld [vmem:[%s17329_s16 + $0x168] sm:$0x8] }
  0xae   : > { %6178 = vmatmul.mubr.bf16.gmra.mrb[64].mxu1 %v13764_v26  ;;  %6275 = vmatmul.mubr.bf16.gmra.mrb[64].mxu0 %v13916_v30  ;;  %v2068_v26 = vsel %vm17551_vm8, %v13982_v15, %v2067_v16  ;;  %v13867_v30 = vld [vmem:[%s17329_s16 + $0x16c] sm:$0xf]  ;;  %v2075_v2 = vsel %vm17551_vm8, %v13983_v58, %v2074_v59  ;;  %v2076_v3 = vrot.slane %v2074_v59, 4  ;;  %v1263_v5 = vrot.slane %v13734_v0, 6  ;;  %v14010_v53 = vld [vmem:[%s17329_s16 + $0x170] sm:$0x7] }
  0xaf   : > { %6185 = vmatprep.mubr.bf16.mxu1 %v13845_v54  ;;  %6282 = vmatprep.mubr.bf16.mxu0 %v13997_v1  ;;  %v1779_v35 = vrot.slane %v13867_v30, 7  ;;  %v13998_v40 = vcombine.low %v2068_v26, %v2071_v37  ;;  %v1557_v54 = vrot.slane %v13815_v51, 5  ;;  %v13735_v1 = vld [vmem:[%s17329_s16 + $0x1b0] sm:$0x3]  ;;  %v13903_v11 = vrot.slane %v13869_v6, 11 }
  0xb0   : > { %v1266_v8 = vrot.slane %v13735_v1, 6  ;;  %v2078_v13 = vsel %vm17551_vm8, %v2076_v3, %v2077_v63  ;;  %v1264_v15 = vsel %vm17373_vm5, %v13751_v4, %v1263_v5  ;;  %v1265_v16 = vrot.slane %v1263_v5, 4  ;;  %v13953_v26 = vld [vmem:[%s17329_s16 + $0x19c] sm:$0xf]  ;;  %v14009_v52 = vld [vmem:[%s17329_s16 + $0x16c] sm:$0xf] }
  0xb1   : > { %v1780_v41 = vsel %vm17341_vm2, %v13902_v34, %v1779_v35  ;;  %v1781_v42 = vrot.slane %v1779_v35, 4  ;;  %v1558_v7 = vsel %vm17551_vm8, %v1556_v62, %v1557_v54  ;;  %v13999_v17 = vcombine.low %v2075_v2, %v2078_v13  ;;  %v14090_v35 = vld [vmem:[%s17329_s16 + $0x174] sm:$0x3]  ;;  %v13955_v63 = vld [vmem:[%s17329_s16 + $0x1ac] sm:$0xe] }
  0xb2   : > { %v1786_v18 = vrot.slane %v13870_v9, 7  ;;  %v1267_v20 = vsel %vm17373_vm5, %v1265_v16, %v1266_v8  ;;  %v13984_v28 = vrot.slane %v13952_v25, 9  ;;  %v2081_v30 = vrot.slane %v13953_v26, 5  ;;  %v13956_v0 = vld [vmem:[%s17329_s16 + $0x1b0] sm:$0xf]  ;;  %v16912_v26 = vld [vmem:[%s22111_s2 + $0x2c8] sm:$0xff]  }
  0xb3   : > { %v1783_v47 = vsel %vm17341_vm2, %v1781_v42, %v1782_v43  ;;  %v13767_v21 = vcombine.low %v1264_v15, %v1267_v20  ;;  %v2084_v31 = vrot.slane %v13954_v27, 5  ;;  %v2602_v37 = vrot.slane %v14089_v33, 6  ;;  %v13873_v42 = vld [vmem:[%s17329_s16 + $0x194] sm:$0xf]  ;;  %v13874_v43 = vld [vmem:[%s17329_s16 + $0x198] sm:$0x7] }
  0xb4   : > { %v13918_v48 = vcombine.low %v1780_v41, %v1783_v47  ;;  %v1787_v23 = vsel %vm17341_vm2, %v13903_v11, %v1786_v18  ;;  %v1788_v24 = vrot.slane %v1786_v18, 4  ;;  %v2082_v39 = vsel %vm17551_vm8, %v13984_v28, %v2081_v30  ;;  %v13957_v1 = vld [vmem:[%s17329_s16 + $0x1b4] sm:$0x1]  ;;  %v14091_v6 = vld [vmem:[%s17329_s16 + $0x180] sm:$0xc] }
  0xb5   : > { %v2605_v41 = vrot.slane %v14090_v35, 6  ;;  %v13904_v47 = vrot.slane %v13872_v38, 11  ;;  %v1796_v51 = vrot.slane %v13874_v43, 7  ;;  %v14056_v54 = vrot.slane %v14008_v49, 11  ;;  %v13875_v16 = vld [vmem:[%s17329_s16 + $0x1a4] sm:$0x8] }
  0xb6   : > { %6186 = vmatmul.mubr.bf16.gmra.mrb[68].mxu1 %v13765_v12  ;;  %6283 = vmatmul.mubr.bf16.gmra.mrb[68].mxu0 %v13917_v19  ;;  %v13847_v12 = vcombine.low %v1555_v61, %v1558_v7  ;;  %v1789_v19 = vrot.slane %v13871_v10, 7  ;;  %v2314_v60 = vrot.slane %v14009_v52, 7  ;;  %v2317_v61 = vrot.slane %v14010_v53, 7  ;;  %v14092_v7 = vld [vmem:[%s17329_s16 + $0x184] sm:$0xf] }
  0xb7   : > { %6193 = vmatprep.mubr.bf16.mxu1 %v13846_v36  ;;  %6290 = vmatprep.mubr.bf16.mxu0 %v13998_v40  ;;  %v14136_v36 = vrot.slane %v14088_v32, 10  ;;  %v2083_v40 = vrot.slane %v2081_v30, 4  ;;  %v13985_v5 = vrot.slane %v13955_v63, 9  ;;  %v2088_v8 = vrot.slane %v13956_v0, 5  ;;  %v14093_v10 = vld [vmem:[%s17329_s16 + $0x188] sm:$0x3] }
  0xb8   : > { %v1790_v29 = vsel %vm17341_vm2, %v1788_v24, %v1789_v19  ;;  %v2315_v3 = vsel %vm17341_vm2, %v14056_v54, %v2314_v60  ;;  %v2316_v4 = vrot.slane %v2314_v60, 4  ;;  %v2091_v9 = vrot.slane %v13957_v1, 5  ;;  %v16908_v18 = vld [vmem:[%s22111_s2 + $0x280] sm:$0xff]   ;;  %v13877_v24 = vld [vmem:[%s17329_s16 + $0x1ac] sm:$0x7] }
  0xb9   : > { %v13919_v34 = vcombine.low %v1787_v23, %v1790_v29  ;;  %v2603_v44 = vsel %vm17373_vm5, %v14136_v36, %v2602_v37  ;;  %v2085_v50 = vsel %vm17551_vm8, %v2083_v40, %v2084_v31  ;;  %v14137_v11 = vrot.slane %v14091_v6, 10  ;;  %v14011_v25 = vld [vmem:[%s17329_s16 + $0x17c] sm:$0x8]  ;;  %v14012_v31 = vld [vmem:[%s17329_s16 + $0x180] sm:$0xf]  ;;  %v16913_v32 = vld [vmem:[%s22111_s2 + $0x288] sm:$0xff]  }
  0xba   : > { %v14000_v55 = vcombine.low %v2082_v39, %v2085_v50  ;;  %v2318_v13 = vsel %vm17341_vm2, %v2316_v4, %v2317_v61  ;;  %v2612_v15 = vrot.slane %v14093_v10, 6  ;;  %v2089_v20 = vsel %vm17551_vm8, %v13985_v5, %v2088_v8  ;;  %v13960_v43 = vld [vmem:[%s17329_s16 + $0x1c8] sm:$0x1]  ;;  %v14094_v50 = vld [vmem:[%s17329_s16 + $0x194] sm:$0xc] }
  0xbb   : > { %v14072_v19 = vcombine.low %v2315_v3, %v2318_v13  ;;  %v13905_v28 = vrot.slane %v13875_v16, 11  ;;  %v1803_v30 = vrot.slane %v13877_v24, 7  ;;  %v14057_v35 = vrot.slane %v14011_v25, 11  ;;  %v13879_v63 = vld [vmem:[%s17329_s16 + $0x1bc] sm:$0xf]  ;;  %v16928_v24 = vld [vmem:[%s22111_s2 + $0x2e0] sm:$0xff]  }
  0xbc   : > { %v2321_v36 = vrot.slane %v14012_v31, 7  ;;  %v14138_v60 = vrot.slane %v14094_v50, 10  ;;  %v13880_v4 = vld [vmem:[%s17329_s16 + $0x1c0] sm:$0x7]  ;;  %v14014_v5 = vld [vmem:[%s17329_s16 + $0x190] sm:$0x8] }
  0xbd   : > { %v14015_v10 = vld [vmem:[%s17329_s16 + $0x194] sm:$0xf]  ;;  %v1810_v13 = vrot.slane %v13880_v4, 7  ;;  %v14058_v16 = vrot.slane %v14014_v5, 11  ;;  %v13962_v31 = vld [vmem:[%s17329_s16 + $0x1d8] sm:$0xf] }
  0xbe   : > { %6194 = vmatmul.mubr.bf16.gmra.mrb[72].mxu1 %v13766_v46  ;;  %6291 = vmatmul.mubr.bf16.gmra.mrb[72].mxu0 %v13918_v48  ;;  %v2604_v46 = vrot.slane %v2602_v37, 4  ;;  %v1793_v48 = vrot.slane %v13873_v42, 7  ;;  %v13958_v37 = vld [vmem:[%s17329_s16 + $0x1c0] sm:$0xe]  ;;  %v13959_v42 = vld [vmem:[%s17329_s16 + $0x1c4] sm:$0xf] }
  0xbf   : > { %6201 = vmatprep.mubr.bf16.mxu1 %v13847_v12  ;;  %6298 = vmatprep.mubr.bf16.mxu0 %v13999_v17  ;;  %v2609_v12 = vrot.slane %v14092_v7, 6  ;;  %v13876_v17 = vld [vmem:[%s17329_s16 + $0x1a8] sm:$0xf]  ;;  %v13986_v53 = vrot.slane %v13958_v37, 9  ;;  %v2095_v54 = vrot.slane %v13959_v42, 5 }
  0xc0   : > { %v2606_v56 = vsel %vm17373_vm5, %v2604_v46, %v2605_v41  ;;  %v1794_v57 = vsel %vm17341_vm2, %v13904_v47, %v1793_v48  ;;  %v1795_v58 = vrot.slane %v1793_v48, 4  ;;  %v1800_v29 = vrot.slane %v13876_v17, 7  ;;  %v14097_v37 = vld [vmem:[%s17329_s16 + $0x1a8] sm:$0xc]  ;;  %v13882_v50 = vld [vmem:[%s17329_s16 + $0x1d0] sm:$0xf] }
  0xc1   : > { %v14152_v59 = vcombine.low %v2603_v44, %v2606_v56  ;;  %v2610_v23 = vsel %vm17373_vm5, %v14137_v11, %v2609_v12  ;;  %v2611_v27 = vrot.slane %v2609_v12, 4  ;;  %v16918_v44 = vld [vmem:[%s22111_s2 + $0x2d0] sm:$0xff]   ;;  %v2322_v47 = vsel %vm17341_vm2, %v14057_v35, %v2321_v36  ;;  %v14096_v56 = vld [vmem:[%s17329_s16 + $0x19c] sm:$0x3] }
  0xc2   : > { %v1797_v62 = vsel %vm17341_vm2, %v1795_v58, %v1796_v51  ;;  %v1801_v40 = vsel %vm17341_vm2, %v13905_v28, %v1800_v29  ;;  %v1802_v41 = vrot.slane %v1800_v29, 4  ;;  %v2323_v48 = vrot.slane %v2321_v36, 4  ;;  %v14095_v51 = vld [vmem:[%s17329_s16 + $0x198] sm:$0xf] }
  0xc3   : > { %v13920_v2 = vcombine.low %v1794_v57, %v1797_v62  ;;  %v2613_v39 = vsel %vm17373_vm5, %v2611_v27, %v2612_v15  ;;  %v16919_v57 = vld [vmem:[%s22111_s2 + $0x290] sm:$0xff]   ;;  %v2616_v61 = vrot.slane %v14095_v51, 6  ;;  %v13878_v62 = vld [vmem:[%s17329_s16 + $0x1b8] sm:$0x8]  ;;  %v2096_v1 = vsel %vm17551_vm8, %v13986_v53, %v2095_v54  ;;  %v14016_v15 = vld [vmem:[%s17329_s16 + $0x198] sm:$0x7] }
  0xc4   : > { %v14153_v46 = vcombine.low %v2610_v23, %v2613_v39  ;;  %v1804_v52 = vsel %vm17341_vm2, %v1802_v41, %v1803_v30  ;;  %v2619_v3 = vrot.slane %v14096_v56, 6  ;;  %v16924_v11 = vld [vmem:[%s22111_s2 + $0x2d8] sm:$0xff]   ;;  %v2328_v17 = vrot.slane %v14015_v10, 7  ;;  %v13961_v30 = vld [vmem:[%s17329_s16 + $0x1d4] sm:$0xe]  ;;  %v16932_v56 = vld [vmem:[%s22111_s2 + $0x2e8] sm:$0xff]  }
  0xc5   : > { %v13921_v58 = vcombine.low %v1801_v40, %v1804_v52  ;;  %v2617_v6 = vsel %vm17373_vm5, %v14138_v60, %v2616_v61  ;;  %v2618_v7 = vrot.slane %v2616_v61, 4  ;;  %v2331_v28 = vrot.slane %v14016_v15, 7  ;;  %v14099_v41 = vld [vmem:[%s17329_s16 + $0x1b0] sm:$0x3]  ;;  %v13883_v53 = vld [vmem:[%s17329_s16 + $0x1d4] sm:$0x7] }
  0xc6   : > { %6202 = vmatmul.mubr.bf16.gmra.mrb[76].mxu1 %v13767_v21  ;;  %6299 = vmatmul.mubr.bf16.gmra.mrb[76].mxu0 %v13919_v34  ;;  %v2090_v21 = vrot.slane %v2088_v8, 4  ;;  %v14013_v34 = vld [vmem:[%s17329_s16 + $0x184] sm:$0x7]  ;;  %v13906_v8 = vrot.slane %v13878_v62, 11  ;;  %v2330_v27 = vrot.slane %v2328_v17, 4  ;;  %v13987_v35 = vrot.slane %v13961_v30, 9 }
  0xc7   : > { %6306 = vmatprep.mubr.bf16.mxu0 %v14000_v55  ;;  %6403 = vmatprep.mubr.bf16.mxu1 %v14152_v59  ;;  %v2324_v49 = vrot.slane %v14013_v34, 7  ;;  %v2098_v55 = vrot.slane %v13960_v43, 5  ;;  %v2102_v36 = vrot.slane %v13962_v31, 5  ;;  %v14139_v42 = vrot.slane %v14097_v37, 10  ;;  %v14018_v60 = vld [vmem:[%s17329_s16 + $0x1a8] sm:$0xf] }
  0xc8   : > { %v2092_v33 = vsel %vm17551_vm8, %v2090_v21, %v2091_v9  ;;  %v1807_v9 = vrot.slane %v13879_v63, 7  ;;  %v2332_v34 = vsel %vm17341_vm2, %v2330_v27, %v2331_v28  ;;  %v14100_v15 = vld [vmem:[%s17329_s16 + $0x1bc] sm:$0xc]  ;;  %v13884_v27 = vld [vmem:[%s17329_s16 + $0x1e0] sm:$0x8]  ;;  %v16936_v28 = vld [vmem:[%s22111_s2 + $0x2b0] sm:$0xff]  }
  0xc9   : > { %v14001_v38 = vcombine.low %v2089_v20, %v2092_v33  ;;  %v2325_v59 = vsel %vm17341_vm2, %v2323_v48, %v2324_v49  ;;  %v2620_v20 = vsel %vm17373_vm5, %v2618_v7, %v2619_v3  ;;  %v2626_v48 = vrot.slane %v14099_v41, 6  ;;  %v13881_v49 = vld [vmem:[%s17329_s16 + $0x1cc] sm:$0x8]  ;;  %v13885_v31 = vld [vmem:[%s17329_s16 + $0x1e4] sm:$0xf] }
  0xca   : > { %v14073_v0 = vcombine.low %v2322_v47, %v2325_v59  ;;  %v1808_v21 = vsel %vm17341_vm2, %v13906_v8, %v1807_v9  ;;  %v1809_v23 = vrot.slane %v1807_v9, 4  ;;  %v14154_v25 = vcombine.low %v2617_v6, %v2620_v20  ;;  %v14017_v59 = vld [vmem:[%s17329_s16 + $0x1a4] sm:$0x8]  ;;  %v16933_v3 = vld [vmem:[%s22111_s2 + $0x2a8] sm:$0xff]   ;;  %v16935_v9 = vld [vmem:[%s22111_s2 + $0x2f0] sm:$0xff]  }
  0xcb   : > { %v2104_v47 = vrot.slane %v2102_v36, 4  ;;  %v14059_v5 = vrot.slane %v14017_v59, 11  ;;  %v2335_v6 = vrot.slane %v14018_v60, 7  ;;  %v13965_v8 = vld [vmem:[%s17329_s16 + $0x1ec] sm:$0xf] }
  0xcc   : > { %v1811_v29 = vsel %vm17341_vm2, %v1809_v23, %v1810_v13  ;;  %v2109_v13 = vrot.slane %v13965_v8, 5  ;;  %v14101_v20 = vld [vmem:[%s17329_s16 + $0x1c0] sm:$0xf]  ;;  %v13969_v59 = vld [vmem:[%s17329_s16 + $0x204] sm:$0x1] }
  0xcd   : > { %v13922_v33 = vcombine.low %v1808_v21, %v1811_v29  ;;  %v14102_v21 = vld [vmem:[%s17329_s16 + $0x1c4] sm:$0x3] }
  0xce   : > { %6307 = vmatmul.mubr.bf16.gmra.mrb[80].mxu0 %v13920_v2  ;;  %6404 = vmatmul.mubr.bf16.vlgmr.msra.gmra.mrb[80].mxu1 %v14072_v19  ;;  %v2097_v2 = vrot.slane %v2095_v54, 4  ;;  %v13907_v54 = vrot.slane %v13881_v49, 11  ;;  %v2633_v30 = vrot.slane %v14102_v21, 6  ;;  %v14023_v21 = vld [vmem:[%s17329_s16 + $0x1cc] sm:$0x8] }
  0xcf   : > { %15658 = vmatpush3.bf16.msra.mxu1 %v16908_v18  ;;  %6314 = vmatprep.mubr.bf16.mxu0 %v14001_v38  ;;  %v16925_v18 = vld [vmem:[%s22111_s2 + $0x298] sm:$0xff]   ;;  %v14098_v38 = vld [vmem:[%s17329_s16 + $0x1ac] sm:$0xf] }
  0xd0   : > { %15659 = vmatprep.subr.bf16.mxu1 %v16912_v26  ;;  %6411 = vmatprep.mubr.bf16.mxu1 %v14153_v46  ;;  %v2099_v12 = vsel %vm17551_vm8, %v2097_v2, %v2098_v55  ;;  %v2329_v26 = vsel %vm17341_vm2, %v14058_v16, %v2328_v17  ;;  %v2623_v43 = vrot.slane %v14098_v38, 6  ;;  %v2103_v46 = vsel %vm17551_vm8, %v13987_v35, %v2102_v36  ;;  %v13964_v2 = vld [vmem:[%s17329_s16 + $0x1e8] sm:$0xe]  ;;  %v14020_v38 = vld [vmem:[%s17329_s16 + $0x1b8] sm:$0x8] }
  0xd1   : > { %v14002_v19 = vcombine.low %v2096_v1, %v2099_v12  ;;  %v14074_v39 = vcombine.low %v2329_v26, %v2332_v34  ;;  %v1814_v55 = vrot.slane %v13882_v50, 7  ;;  %v14019_v1 = vld [vmem:[%s17329_s16 + $0x1ac] sm:$0x7]  ;;  %v13988_v12 = vrot.slane %v13964_v2, 9  ;;  %v14104_v2 = vld [vmem:[%s17329_s16 + $0x1d4] sm:$0xf] }
  0xd2   : > { %v2624_v51 = vsel %vm17373_vm5, %v14139_v42, %v2623_v43  ;;  %v2625_v52 = vrot.slane %v2623_v43, 4  ;;  %v2338_v7 = vrot.slane %v14019_v1, 7  ;;  %v2336_v17 = vsel %vm17341_vm2, %v14059_v5, %v2335_v6 }
  0xd3   : > { %15660 = vmatpush3.bf16.msra.mxu1 %v16913_v32  ;;  %v13963_v32 = vld [vmem:[%s17329_s16 + $0x1dc] sm:$0x1]  ;;  %v1815_v63 = vsel %vm17341_vm2, %v13907_v54, %v1814_v55  ;;  %v2110_v23 = vsel %vm17551_vm8, %v13988_v12, %v2109_v13  ;;  %v2630_v26 = vrot.slane %v14101_v20, 6  ;;  %v1821_v42 = vrot.slane %v13885_v31, 7 }
  0xd4   : > { %15661 = vmatprep.subr.bf16.mxu1 %v16918_v44  ;;  %v2105_v40 = vrot.slane %v13963_v32, 5  ;;  %v16930_v44 = vld [vmem:[%s22111_s2 + $0x2a0] sm:$0xff]   ;;  %v2627_v62 = vsel %vm17373_vm5, %v2625_v52, %v2626_v48  ;;  %v13886_v32 = vld [vmem:[%s17329_s16 + $0x1e8] sm:$0x7]  ;;  %v2119_v1 = vrot.slane %v13969_v59, 5  ;;  %v2637_v8 = vrot.slane %v14104_v2, 6 }
  0xd5   : > { %v14155_v4 = vcombine.low %v2624_v51, %v2627_v62  ;;  %v2632_v37 = vrot.slane %v2630_v26, 4  ;;  %v1824_v43 = vrot.slane %v13886_v32, 7  ;;  %v1823_v52 = vrot.slane %v1821_v42, 4  ;;  %v14103_v62 = vld [vmem:[%s17329_s16 + $0x1d0] sm:$0xc] }
  0xd6   : > { %6315 = vmatmul.mubr.bf16.gmra.mrb[84].mxu0 %v13921_v58  ;;  %6412 = vmatmul.mubr.bf16.gmra.mrb[84].mxu1 %v14073_v0  ;;  %v1817_v58 = vrot.slane %v13883_v53, 7  ;;  %v1816_v0 = vrot.slane %v1814_v55, 4  ;;  %v16938_v53 = vld [vmem:[%s22111_s2 + $0x2b8] sm:$0xff]  }
  0xd7   : > { %15662 = vmatpush3.bf16.msra.mxu1 %v16919_v57  ;;  %6322 = vmatprep.mubr.bf16.mxu0 %v14002_v19  ;;  %v2106_v57 = vsel %vm17551_vm8, %v2104_v47, %v2105_v40  ;;  %v16937_v40 = vld [vmem:[%s22111_s2 + $0x2f8] sm:$0xff]   ;;  %v2634_v47 = vsel %vm17373_vm5, %v2632_v37, %v2633_v30 }
  0xd8   : > { %15663 = vmatprep.subr.bf16.mxu1 %v16924_v11  ;;  %6419 = vmatprep.mubr.bf16.mxu1 %v14154_v25  ;;  %v14003_v61 = vcombine.low %v2103_v46, %v2106_v57  ;;  %v1818_v10 = vsel %vm17341_vm2, %v1816_v0, %v1817_v58  ;;  %v13966_v11 = vld [vmem:[%s17329_s16 + $0x1f0] sm:$0x1]  ;;  %v14140_v25 = vrot.slane %v14100_v15, 10  ;;  %v14060_v46 = vrot.slane %v14020_v38, 11  ;;  %v13968_v57 = vld [vmem:[%s17329_s16 + $0x200] sm:$0xf] }
  0xd9   : > { %v13923_v16 = vcombine.low %v1815_v63, %v1818_v10  ;;  %v2112_v19 = vrot.slane %v13966_v11, 5  ;;  %v1825_v58 = vsel %vm17341_vm2, %v1823_v52, %v1824_v43  ;;  %v13888_v10 = vld [vmem:[%s17329_s16 + $0x1f8] sm:$0xf]  ;;  %v13889_v12 = vld [vmem:[%s17329_s16 + $0x1fc] sm:$0x7] }
  0xda   : > { %v2631_v36 = vsel %vm17373_vm5, %v14140_v25, %v2630_v26  ;;  %v1828_v15 = vrot.slane %v13888_v10, 7  ;;  %v1831_v20 = vrot.slane %v13889_v12, 7  ;;  %v13891_v52 = vld [vmem:[%s17329_s16 + $0x20c] sm:$0xf] }
  0xdb   : > { %15664 = vmatpush3.bf16.msra.mxu1 %v16925_v18  ;;  %v2337_v18 = vrot.slane %v2335_v6, 4  ;;  %v14156_v50 = vcombine.low %v2631_v36, %v2634_v47  ;;  %v13890_v47 = vld [vmem:[%s17329_s16 + $0x208] sm:$0x8] }
  0xdc   : > { %15665 = vmatprep.subr.bf16.mxu1 %v16928_v24  ;;  %v2111_v24 = vrot.slane %v2109_v13, 4  ;;  %v1830_v26 = vrot.slane %v1828_v15, 4 }
  0xdd   : > { %v2339_v29 = vsel %vm17341_vm2, %v2337_v18, %v2338_v7 }
  0xde   : > { %6323 = vmatmul.mubr.bf16.gmra.mrb[88].mxu0 %v13922_v33  ;;  %6420 = vmatmul.mubr.bf16.gmra.mrb[88].mxu1 %v14074_v39  ;;  %v13908_v33 = vrot.slane %v13884_v27, 11  ;;  %v14075_v34 = vcombine.low %v2336_v17, %v2339_v29  ;;  %v2113_v35 = vsel %vm17551_vm8, %v2111_v24, %v2112_v19  ;;  %v14021_v39 = vld [vmem:[%s17329_s16 + $0x1bc] sm:$0xf]  ;;  %v2639_v19 = vrot.slane %v2637_v8, 4  ;;  %v14025_v27 = vld [vmem:[%s17329_s16 + $0x1d4] sm:$0x7] }
  0xdf   : > { %15666 = vmatpush3.bf16.msra.mxu1 %v16930_v44  ;;  %6330 = vmatprep.mubr.bf16.mxu0 %v14003_v61  ;;  %v14004_v41 = vcombine.low %v2110_v23, %v2113_v35  ;;  %v14022_v44 = vld [vmem:[%s17329_s16 + $0x1c0] sm:$0x7]  ;;  %v2342_v48 = vrot.slane %v14021_v39, 7  ;;  %v2116_v61 = vrot.slane %v13968_v57, 5  ;;  %v14024_v23 = vld [vmem:[%s17329_s16 + $0x1d0] sm:$0xf]  ;;  %v1832_v36 = vsel %vm17341_vm2, %v1830_v26, %v1831_v20 }
  0xe0   : > { %15667 = vmatprep.subr.bf16.mxu1 %v16932_v56  ;;  %6427 = vmatprep.mubr.bf16.mxu1 %v14155_v4  ;;  %v2345_v49 = vrot.slane %v14022_v44, 7  ;;  %v1822_v51 = vsel %vm17341_vm2, %v13908_v33, %v1821_v42  ;;  %v13967_v56 = vld [vmem:[%s17329_s16 + $0x1fc] sm:$0xe]  ;;  %v14141_v4 = vrot.slane %v14103_v62, 10  ;;  %v13970_v29 = vld [vmem:[%s17329_s16 + $0x210] sm:$0xe] }
  0xe1   : > { %v2343_v54 = vsel %vm17341_vm2, %v14060_v46, %v2342_v48  ;;  %v2344_v55 = vrot.slane %v2342_v48, 4  ;;  %v13989_v60 = vrot.slane %v13967_v56, 9  ;;  %v13924_v63 = vcombine.low %v1822_v51, %v1825_v58  ;;  %v13971_v33 = vld [vmem:[%s17329_s16 + $0x214] sm:$0xf]  ;;  %v14106_v39 = vld [vmem:[%s17329_s16 + $0x1e4] sm:$0xc] }
  0xe2   : > { %v2118_v7 = vrot.slane %v2116_v61, 4  ;;  %v2638_v18 = vsel %vm17373_vm5, %v14141_v4, %v2637_v8  ;;  %v2349_v31 = vrot.slane %v14024_v23, 7  ;;  %v2352_v32 = vrot.slane %v14025_v27, 7  ;;  %v14108_v46 = vld [vmem:[%s17329_s16 + $0x1ec] sm:$0x3] }
  0xe3   : > { %15668 = vmatpush3.bf16.msra.mxu1 %v16933_v3  ;;  %v2346_v0 = vsel %vm17341_vm2, %v2344_v55, %v2345_v49  ;;  %v14105_v3 = vld [vmem:[%s17329_s16 + $0x1d8] sm:$0x3]  ;;  %v2117_v6 = vsel %vm17551_vm8, %v13989_v60, %v2116_v61  ;;  %v13990_v37 = vrot.slane %v13970_v29, 9  ;;  %v2123_v38 = vrot.slane %v13971_v33, 5  ;;  %v13892_v56 = vld [vmem:[%s17329_s16 + $0x210] sm:$0x7] }
  0xe4   : > { %15669 = vmatprep.subr.bf16.mxu1 %v16935_v9  ;;  %v14076_v5 = vcombine.low %v2343_v54, %v2346_v0  ;;  %v13887_v9 = vld [vmem:[%s17329_s16 + $0x1f4] sm:$0x8]  ;;  %v2640_v11 = vrot.slane %v14105_v3, 6  ;;  %v2120_v17 = vsel %vm17551_vm8, %v2118_v7, %v2119_v1  ;;  %v2351_v43 = vrot.slane %v2349_v31, 4  ;;  %v14026_v0 = vld [vmem:[%s17329_s16 + $0x1e0] sm:$0x8] }
  0xe5   : > { %v13909_v13 = vrot.slane %v13887_v9, 11  ;;  %v14005_v24 = vcombine.low %v2117_v6, %v2120_v17  ;;  %v2124_v48 = vsel %vm17551_vm8, %v13990_v37, %v2123_v38  ;;  %v2125_v49 = vrot.slane %v2123_v38, 4  ;;  %v14027_v1 = vld [vmem:[%s17329_s16 + $0x1e4] sm:$0xf]  ;;  %v14028_v7 = vld [vmem:[%s17329_s16 + $0x1e8] sm:$0x7] }
  0xe6   : > { %6331 = vmatmul.mubr.bf16.gmra.mrb[92].mxu0 %v13923_v16  ;;  %6428 = vmatmul.mubr.bf16.gmra.mrb[92].mxu1 %v14075_v34  ;;  %v2641_v30 = vsel %vm17373_vm5, %v2639_v19, %v2640_v11  ;;  %v13972_v34 = vld [vmem:[%s17329_s16 + $0x218] sm:$0x1]  ;;  %v2353_v54 = vsel %vm17341_vm2, %v2351_v43, %v2352_v32  ;;  %v2647_v55 = vrot.slane %v14108_v46, 6  ;;  %v13910_v57 = vrot.slane %v13890_v47, 11  ;;  %v13974_v26 = vld [vmem:[%s17329_s16 + $0x228] sm:$0xf] }
  0xe7   : > { %6338 = vmatprep.mubr.bf16.mxu0 %v14004_v41  ;;  %15670 = vmatpush3.bf16.msra.mxu1 %v16936_v28  ;;  %v1829_v25 = vsel %vm17341_vm2, %v13909_v13, %v1828_v15  ;;  %v14061_v28 = vrot.slane %v14023_v21, 11  ;;  %v14157_v35 = vcombine.low %v2638_v18, %v2641_v30  ;;  %v2126_v44 = vrot.slane %v13972_v34, 5  ;;  %v13975_v27 = vld [vmem:[%s17329_s16 + $0x22c] sm:$0x1]  ;;  %v14109_v33 = vld [vmem:[%s17329_s16 + $0x1f8] sm:$0xc] }
  0xe8   : > { %15671 = vmatprep.subr.bf16.mxu1 %v16937_v40  ;;  %6435 = vmatprep.mubr.bf16.mxu1 %v14156_v50  ;;  %v14107_v40 = vld [vmem:[%s17329_s16 + $0x1e8] sm:$0xf]  ;;  %v13925_v41 = vcombine.low %v1829_v25, %v1832_v36  ;;  %v14142_v50 = vrot.slane %v14106_v39, 10  ;;  %v1835_v58 = vrot.slane %v13891_v52, 7  ;;  %v1838_v6 = vrot.slane %v13892_v56, 7 }
  0xe9   : > { %v2350_v42 = vsel %vm17341_vm2, %v14061_v28, %v2349_v31  ;;  %v2644_v51 = vrot.slane %v14107_v40, 6  ;;  %v2127_v61 = vsel %vm17551_vm8, %v2125_v49, %v2126_v44  ;;  %v14062_v9 = vrot.slane %v14026_v0, 11  ;;  %v14110_v34 = vld [vmem:[%s17329_s16 + $0x1fc] sm:$0xf]  ;;  %v13895_v43 = vld [vmem:[%s17329_s16 + $0x224] sm:$0x7] }
  0xea   : > { %v14077_v60 = vcombine.low %v2350_v42, %v2353_v54  ;;  %v14006_v3 = vcombine.low %v2124_v48, %v2127_v61  ;;  %v1836_v4 = vsel %vm17341_vm2, %v13910_v57, %v1835_v58  ;;  %v2356_v10 = vrot.slane %v14027_v1, 7  ;;  %v13893_v38 = vld [vmem:[%s17329_s16 + $0x21c] sm:$0x8]  ;;  %v13894_v42 = vld [vmem:[%s17329_s16 + $0x220] sm:$0xf] }
  0xeb   : > { %15672 = vmatpush3.bf16.msra.mxu1 %v16938_v53  ;;  %v2645_v62 = vsel %vm17373_vm5, %v14142_v50, %v2644_v51  ;;  %v2359_v11 = vrot.slane %v14028_v7, 7  ;;  %v2130_v31 = vrot.slane %v13974_v26, 5  ;;  %v2133_v32 = vrot.slane %v13975_v27, 5  ;;  %v14029_v49 = vld [vmem:[%s17329_s16 + $0x1f4] sm:$0x8] }
  0xec   : > { %v2357_v20 = vsel %vm17341_vm2, %v14062_v9, %v2356_v10  ;;  %v2358_v21 = vrot.slane %v2356_v10, 4  ;;  %v14143_v36 = vrot.slane %v14109_v33, 10  ;;  %v2651_v37 = vrot.slane %v14110_v34, 6  ;;  %v14031_v54 = vld [vmem:[%s17329_s16 + $0x1fc] sm:$0x7] }
  0xed   : > { %v2132_v40 = vrot.slane %v2130_v31, 4  ;;  %v13911_v47 = vrot.slane %v13893_v38, 11  ;;  %v1842_v48 = vrot.slane %v13894_v42, 7  ;;  %v1845_v52 = vrot.slane %v13895_v43, 7  ;;  %v14112_v61 = vld [vmem:[%s17329_s16 + $0x20c] sm:$0xc] }
  0xee   : > { %6339 = vmatmul.mubr.bf16.gmra.mrb[96].mxu0 %v13924_v63  ;;  %6436 = vmatmul.mubr.bf16.gmra.mrb[96].mxu1 %v14076_v5  ;;  %v2646_v63 = vrot.slane %v2644_v51, 4  ;;  %v1837_v5 = vrot.slane %v1835_v58, 4  ;;  %v2652_v44 = vsel %vm17373_vm5, %v14143_v36, %v2651_v37  ;;  %v2653_v46 = vrot.slane %v2651_v37, 4  ;;  %v14170_v37 = vld [vmem:[%s17329_s16 + $0x178] sm:$0x1] }
  0xef   : > { %6346 = vmatprep.mubr.bf16.mxu0 %v14005_v24  ;;  %6443 = vmatprep.mubr.bf16.mxu1 %v14157_v35  ;;  %v13973_v24 = vld [vmem:[%s17329_s16 + $0x224] sm:$0xe]  ;;  %v14111_v35 = vld [vmem:[%s17329_s16 + $0x200] sm:$0x3]  ;;  %v2134_v51 = vsel %vm17551_vm8, %v2132_v40, %v2133_v32  ;;  %v2893_v42 = vrot.slane %v14170_v37, 5 }
  0xf0   : > { %v2648_v8 = vsel %vm17373_vm5, %v2646_v63, %v2647_v55  ;;  %v1839_v15 = vsel %vm17341_vm2, %v1837_v5, %v1838_v6  ;;  %v13991_v28 = vrot.slane %v13973_v24, 9  ;;  %v14063_v55 = vrot.slane %v14029_v49, 11  ;;  %v16909_v63 = vld [vmem:[%s17329_s16] sm:$0xff]  }
  0xf1   : > { %v14158_v13 = vcombine.low %v2645_v62, %v2648_v8  ;;  %v13926_v19 = vcombine.low %v1836_v4, %v1839_v15  ;;  %v14113_v62 = vld [vmem:[%s17329_s16 + $0x210] sm:$0xf]  ;;  %v14114_v4 = vld [vmem:[%s17329_s16 + $0x214] sm:$0x3]  ;;  %v14144_v6 = vrot.slane %v14112_v61, 10 }
  0xf2   : > { %v2131_v39 = vsel %vm17551_vm8, %v13991_v28, %v2130_v31  ;;  %v2658_v7 = vrot.slane %v14113_v62, 6  ;;  %v2661_v8 = vrot.slane %v14114_v4, 6  ;;  %v14033_v15 = vld [vmem:[%s17329_s16 + $0x20c] sm:$0xf]  ;;  %v14117_v61 = vld [vmem:[%s17329_s16 + $0x228] sm:$0x3] }
  0xf3   : > { %v14007_v57 = vcombine.low %v2131_v39, %v2134_v51 }
  0xf6   : > { %6347 = vmatmul.mubr.bf16.gmra.mrb[100].mxu0 %v13925_v41  ;;  %6444 = vmatmul.mubr.bf16.gmra.mrb[100].mxu1 %v14077_v60  ;;  %v2654_v41 = vrot.slane %v14111_v35, 6  ;;  %v1844_v60 = vrot.slane %v1842_v48, 4 }
  0xf7   : > { %6354 = vmatprep.mubr.bf16.mxu0 %v14006_v3  ;;  %6451 = vmatprep.mubr.bf16.mxu1 %v14158_v13  ;;  %v2366_v3 = vrot.slane %v14031_v54, 7  ;;  %v14032_v13 = vld [vmem:[%s17329_s16 + $0x208] sm:$0x8] }
  0xf8   : > { %v2655_v58 = vsel %vm17373_vm5, %v2653_v46, %v2654_v41  ;;  %v1846_v5 = vsel %vm17341_vm2, %v1844_v60, %v1845_v52  ;;  %v14064_v24 = vrot.slane %v14032_v13, 11  ;;  %v16914_v52 = vld [vmem:[%s17329_s16 + $0x14] sm:$0xff]   ;;  %v14116_v60 = vld [vmem:[%s17329_s16 + $0x224] sm:$0xf] }
  0xf9   : > { %v14159_v1 = vcombine.low %v2652_v44, %v2655_v58  ;;  %v16916_v58 = vld [vmem:[%s22111_s2 + $0x348] sm:$0xff]  }
  0xfe   : > { %6355 = vmatmul.mubr.bf16.gmra.mrb[104].mxu0 %v13926_v19 }
  0xff   : > { %6362 = vmatprep.mubr.bf16.mxu0 %v14007_v57 }
 0x101   : > { %v18323_v16 = vpop.f32.mrb[0].mxu0  ;;  %v15185_v9 = vpop.f32.mrb[0].mxu1 }
 0x102   : > { %v15114_v53 = vpop.f32.mrb[1].mxu0  ;;  %v15186_v26 = vpop.f32.mrb[1].mxu1 }
 0x103   : > { %v15116_v59 = vpop.f32.mrb[2].mxu0  ;;  %v18367_v17 = vadd.f32 %v15114_v53, %v18323_v16  ;;  %v2360_v16 = vsel %vm17341_vm2, %v2358_v21, %v2359_v11  ;;  %v14030_v53 = vld [vmem:[%s17329_s16 + $0x1f8] sm:$0xf]  ;;  %v2660_v21 = vrot.slane %v2658_v7, 4  ;;  %v18420_v32 = vadd.f32 %v15186_v26, %v15185_v9  ;;  %v15188_v38 = vpop.f32.mrb[2].mxu1 }
 0x104   : > { %v15117_v2 = vpop.f32.mrb[3].mxu0  ;;  %v14078_v30 = vcombine.low %v2357_v20, %v2360_v16  ;;  %v2659_v20 = vsel %vm17373_vm5, %v14144_v6, %v2658_v7  ;;  %v2370_v16 = vrot.slane %v14033_v15, 7  ;;  %v15189_v51 = vpop.f32.mrb[3].mxu1  ;;  %v14036_v6 = vld [vmem:[%s17329_s16 + $0x220] sm:$0xf]  ;;  %v16917_v15 = vld [vmem:[%s22111_s2 + $0x308] sm:$0xff]  }
 0x105   : > { %v18369_v18 = vadd.f32 %v15117_v2, %v15116_v59  ;;  %v1843_v59 = vsel %vm17341_vm2, %v13911_v47, %v1842_v48  ;;  %v2363_v2 = vrot.slane %v14030_v53, 7  ;;  %v2662_v35 = vsel %vm17373_vm5, %v2660_v21, %v2661_v8  ;;  %v14037_v7 = vld [vmem:[%s17329_s16 + $0x224] sm:$0x7]  ;;  %v14173_v21 = vld [vmem:[%s17329_s16 + $0x18c] sm:$0x1] }
 0x106   : > { %6452 = vmatmul.mubr.bf16.gmra.mrb[104].mxu1 %v14078_v30  ;;  %v13927_v10 = vcombine.low %v1843_v59, %v1846_v5  ;;  %v14169_v30 = vld [vmem:[%s17329_s16 + $0x174] sm:$0xf]  ;;  %v2372_v36 = vrot.slane %v2370_v16, 4  ;;  %v14160_v39 = vcombine.low %v2659_v20, %v2662_v35  ;;  %v2371_v46 = vsel %vm17341_vm2, %v14064_v24, %v2370_v16  ;;  %v14035_v5 = vld [vmem:[%s17329_s16 + $0x21c] sm:$0x8] }
 0x107   : > { %6459 = vmatprep.mubr.bf16.mxu1 %v14159_v1  ;;  %v2364_v11 = vsel %vm17341_vm2, %v14063_v55, %v2363_v2  ;;  %v2890_v41 = vrot.slane %v14169_v30, 5  ;;  %v18437_v53 = vadd.f32 %v15189_v51, %v15188_v38  ;;  %v14115_v55 = vld [vmem:[%s17329_s16 + $0x220] sm:$0xc]  ;;  %v14172_v20 = vld [vmem:[%s17329_s16 + $0x188] sm:$0xf] }
 0x108   : > { %6363 = vmatmul.mubr.bf16.gmra.mrb[108].mxu0 %v13927_v10  ;;  %v14145_v62 = vrot.slane %v14115_v55, 10  ;;  %v14065_v10 = vrot.slane %v14035_v5, 11  ;;  %v14118_v30 = vld [vmem:[%s17329_s16 + $0x234] sm:$0xc] }
 0x109   : > { %v15119_v12 = vpop.f32.mrb[4].mxu0  ;;  %6564 = vmatprep.mubr.bf16.mxu0 %v16909_v63  ;;  %v2892_v49 = vrot.slane %v2890_v41, 4  ;;  %v15191_v54 = vpop.f32.mrb[4].mxu1 }
 0x10a   : > { %v15120_v23 = vpop.f32.mrb[5].mxu0  ;;  %v15192_v63 = vpop.f32.mrb[5].mxu1 }
 0x10b   : > { %v18374_v25 = vadd.f32 %v15120_v23, %v15119_v12  ;;  %v15122_v29 = vpop.f32.mrb[6].mxu0  ;;  %v2365_v12 = vrot.slane %v2363_v2, 4  ;;  %v14034_v23 = vld [vmem:[%s17329_s16 + $0x210] sm:$0x7]  ;;  %v2894_v59 = vsel %vm17551_vm8, %v2892_v49, %v2893_v42  ;;  %v2665_v2 = vrot.slane %v14116_v60, 6  ;;  %v15194_v13 = vpop.f32.mrb[6].mxu1 }
 0x10c   : > { %v15123_v50 = vpop.f32.mrb[7].mxu0  ;;  %v2373_v28 = vrot.slane %v14034_v23, 7  ;;  %v18447_v4 = vadd.f32 %v15192_v63, %v15191_v54  ;;  %v14146_v49 = vrot.slane %v14118_v30, 10  ;;  %v14038_v63 = vld [vmem:[%s17329_s16 + $0x230] sm:$0x8]  ;;  %v16941_v30 = vld [vmem:[%s22111_s2 + $0x360] sm:$0xff]  }
 0x10d   : > { %v18395_v56 = vadd.f32 %v15123_v50, %v15122_v29  ;;  %v2367_v27 = vsel %vm17341_vm2, %v2365_v12, %v2366_v3  ;;  %v14168_v29 = vld [vmem:[%s17329_s16 + $0x170] sm:$0xe]  ;;  %v16911_v50 = vld [vmem:[%s22111_s2 + $0x300] sm:$0xff]   ;;  %v2668_v3 = vrot.slane %v14117_v61, 6  ;;  %v2666_v8 = vsel %vm17373_vm5, %v14145_v62, %v2665_v2 }
 0x10e   : > { %v14079_v34 = vcombine.low %v2364_v11, %v2367_v27  ;;  %v14216_v40 = vrot.slane %v14168_v29, 9  ;;  %v2374_v47 = vsel %vm17341_vm2, %v2372_v36, %v2373_v28  ;;  %v2667_v9 = vrot.slane %v2665_v2, 4  ;;  %v14171_v12 = vld [vmem:[%s17329_s16 + $0x184] sm:$0xe]  ;;  %v15195_v28 = vpop.f32.mrb[7].mxu1 }
 0x10f   : > { %v2377_v11 = vrot.slane %v14036_v6, 7  ;;  %v14217_v23 = vrot.slane %v14171_v12, 9  ;;  %v2897_v27 = vrot.slane %v14172_v20, 5  ;;  %v18465_v35 = vadd.f32 %v15195_v28, %v15194_v13  ;;  %v14039_v6 = vld [vmem:[%s17329_s16 + $0x234] sm:$0xf] }
 0x110   : > { %6460 = vmatmul.mubr.bf16.gmra.mrb[108].mxu1 %v14079_v34  ;;  %v2891_v48 = vsel %vm17551_vm8, %v14216_v40, %v2890_v41  ;;  %v2669_v24 = vsel %vm17373_vm5, %v2667_v9, %v2668_v3  ;;  %v2900_v34 = vrot.slane %v14173_v21, 5  ;;  %v16922_v40 = vld [vmem:[%s22111_s2 + $0x350] sm:$0xff]   ;;  %v2384_v12 = vrot.slane %v14039_v6, 7  ;;  %v14174_v13 = vld [vmem:[%s17329_s16 + $0x198] sm:$0xe] }
 0x111   : > { %v15125_v0 = vpop.f32.mrb[8].mxu0  ;;  %6467 = vmatprep.mubr.bf16.mxu1 %v14160_v39  ;;  %v14232_v1 = vcombine.low %v2891_v48, %v2894_v59  ;;  %v2378_v16 = vsel %vm17341_vm2, %v14065_v10, %v2377_v11  ;;  %v2379_v26 = vrot.slane %v2377_v11, 4  ;;  %v15197_v36 = vpop.f32.mrb[8].mxu1  ;;  %v14119_v39 = vld [vmem:[%s17329_s16 + $0x238] sm:$0xf]  ;;  %v2898_v42 = vsel %vm17551_vm8, %v14217_v23, %v2897_v27 }
 0x112   : > { %v15126_v19 = vpop.f32.mrb[9].mxu0  ;;  %v14120_v48 = vld [vmem:[%s17329_s16 + $0x23c] sm:$0x3]  ;;  %v2672_v61 = vrot.slane %v14119_v39, 6  ;;  %v14176_v23 = vld [vmem:[%s17329_s16 + $0x1a0] sm:$0x1] }
 0x113   : > { %v18418_v31 = vadd.f32 %v15126_v19, %v15125_v0  ;;  %v15128_v33 = vpop.f32.mrb[10].mxu0  ;;  %v14080_v0 = vcombine.low %v2371_v46, %v2374_v47  ;;  %6565 = vmatmul.mubr.bf16.vlgmr.msra.gmra.mrb[112].mxu0 %v14232_v1  ;;  %v2380_v19 = vrot.slane %v14037_v7, 7  ;;  %v15198_v46 = vpop.f32.mrb[9].mxu1  ;;  %v2675_v62 = vrot.slane %v14120_v48, 6  ;;  %v16929_v1 = vld [vmem:[%s22111_s2 + $0x358] sm:$0xff]  }
 0x114   : > { %v15129_v43 = vpop.f32.mrb[11].mxu0  ;;  %15770 = vmatpush3.bf16.msra.mxu0 %v16911_v50  ;;  %6572 = vmatprep.mubr.bf16.mxu0 %v16914_v52  ;;  %v16915_v50 = vld [vmem:[%s17329_s16 + $0x28] sm:$0xff]   ;;  %v18479_v52 = vadd.f32 %v15198_v46, %v15197_v36  ;;  %v15200_v54 = vpop.f32.mrb[10].mxu1  ;;  %v14040_v7 = vld [vmem:[%s17329_s16 + $0x238] sm:$0x7]  ;;  %v2673_v9 = vsel %vm17373_vm5, %v14146_v49, %v2672_v61  ;;  %v2674_v10 = vrot.slane %v2672_v61, 4 }
 0x115   : > { %v18425_v44 = vadd.f32 %v15129_v43, %v15128_v33  ;;  %15771 = vmatprep.subr.bf16.mxu0 %v16916_v58  ;;  %v14161_v33 = vcombine.low %v2666_v8, %v2669_v24  ;;  %v2381_v41 = vsel %vm17341_vm2, %v2379_v26, %v2380_v19  ;;  %v2899_v43 = vrot.slane %v2897_v27, 4  ;;  %v15201_v60 = vpop.f32.mrb[11].mxu1  ;;  %v14175_v21 = vld [vmem:[%s17329_s16 + $0x19c] sm:$0xf]  ;;  %v18509_v26 = vld [vmem:[%s22112_s3] ss:$0 sm:$0xff] }
 0x116   : > { %v14081_v51 = vcombine.low %v2378_v16, %v2381_v41  ;;  %v18492_v3 = vadd.f32 %v15201_v60, %v15200_v54  ;;  %v14066_v8 = vrot.slane %v14038_v63, 11  ;;  %v2387_v20 = vrot.slane %v14040_v7, 7  ;;  %v16931_v16 = vld [vmem:[%s22111_s2 + $0x318] sm:$0xff]   ;;  %v14122_v60 = vld [vmem:[%s17329_s16 + $0x24c] sm:$0xf] }
 0x117   : > { %v2901_v58 = vsel %vm17551_vm8, %v2899_v43, %v2900_v34  ;;  %v14218_v24 = vrot.slane %v14174_v13, 9  ;;  %v2676_v27 = vsel %vm17373_vm5, %v2674_v10, %v2675_v62  ;;  %v2386_v28 = vrot.slane %v2384_v12, 4  ;;  %v16920_v46 = vld [vmem:[%s17329_s16 + $0x3c] sm:$0xff]   ;;  %v14041_v13 = vld [vmem:[%s17329_s16 + $0x244] sm:$0x8] }
 0x118   : > { %6468 = vmatmul.mubr.bf16.gmra.mrb[112].mxu1 %v14080_v0  ;;  %15772 = vmatpush3.bf16.msra.mxu0 %v16917_v15  ;;  %v14233_v2 = vcombine.low %v2898_v42, %v2901_v58  ;;  %v2385_v34 = vsel %vm17341_vm2, %v14066_v8, %v2384_v12  ;;  %v2907_v36 = vrot.slane %v14176_v23, 5  ;;  %v14121_v58 = vld [vmem:[%s17329_s16 + $0x248] sm:$0xc]  ;;  %v5923_v62 = vadd.f32 %v18367_v17, %v18509_v26 }
 0x119   : > { %v15131_v57 = vpop.f32.mrb[12].mxu0  ;;  %6475 = vmatprep.mubr.bf16.mxu1 %v14161_v33  ;;  %v15203_v5 = vpop.f32.mrb[12].mxu1  ;;  %15773 = vmatprep.subr.bf16.mxu0 %v16922_v40  ;;  %v14162_v33 = vcombine.low %v2673_v9, %v2676_v27  ;;  %v2388_v40 = vsel %vm17341_vm2, %v2386_v28, %v2387_v20  ;;  %v5926_v6 = vadd.f32 %v18369_v18, %v18509_v26  ;;  %v2679_v8 = vrot.slane %v14122_v60, 6  ;;  %v14043_v20 = vld [vmem:[%s17329_s16 + $0x24c] sm:$0x7] }
 0x11a   : > { %v15132_v29 = vpop.f32.mrb[13].mxu0  ;;  %v15204_v11 = vpop.f32.mrb[13].mxu1  ;;  %v5931_v17 = vadd.f32 %v18374_v25, %v18509_v26  ;;  %v14177_v25 = vld [vmem:[%s17329_s16 + $0x1ac] sm:$0xe]  ;;  %v5934_v28 = vadd.f32 %v18395_v56, %v18509_v26 }
 0x11b   : > { %v18467_v37 = vadd.f32 %v15132_v29, %v15131_v57  ;;  %v15134_v38 = vpop.f32.mrb[14].mxu0  ;;  %v16923_v57 = vld [vmem:[%s22111_s2 + $0x310] sm:$0xff]   ;;  %6573 = vmatmul.mubr.bf16.gmra.mrb[116].mxu0 %v14233_v2  ;;  %v18499_v19 = vadd.f32 %v15204_v11, %v15203_v5  ;;  %v2904_v29 = vrot.slane %v14175_v21, 5  ;;  %v14147_v5 = vrot.slane %v14121_v58, 10 }
 0x11c   : > { %v15135_v47 = vpop.f32.mrb[15].mxu0  ;;  %6580 = vmatprep.mubr.bf16.mxu0 %v16915_v50  ;;  %15774 = vmatpush3.bf16.msra.mxu0 %v16923_v57  ;;  %v16942_v50 = vld [vmem:[%s22111_s2 + $0x320] sm:$0xff]   ;;  %v14123_v2 = vld [vmem:[%s17329_s16 + $0x250] sm:$0x3]  ;;  %v2681_v23 = vrot.slane %v2679_v8, 4 }
 0x11d   : > { %v18486_v59 = vadd.f32 %v15135_v47, %v15134_v38  ;;  %v15206_v38 = vpop.f32.mrb[14].mxu1  ;;  %v2905_v41 = vsel %vm17551_vm8, %v14218_v24, %v2904_v29  ;;  %v2906_v42 = vrot.slane %v2904_v29, 4  ;;  %15775 = vmatprep.subr.bf16.mxu0 %v16929_v1  ;;  %v2682_v9 = vrot.slane %v14123_v2, 6  ;;  %v16921_v2 = vld [vmem:[%s17329_s16 + $0x50] sm:$0xff]  }
 0x11e   : > { %v15207_v43 = vpop.f32.mrb[15].mxu1  ;;  %v2680_v18 = vsel %vm17373_vm5, %v14147_v5, %v2679_v8  ;;  %v14067_v24 = vrot.slane %v14041_v13, 11 }
 0x11f   : > { %v18525_v47 = vadd.f32 %v15207_v43, %v15206_v38  ;;  %v2908_v54 = vsel %vm17551_vm8, %v2906_v42, %v2907_v36  ;;  %v14219_v36 = vrot.slane %v14177_v25, 9  ;;  %v2683_v38 = vsel %vm17373_vm5, %v2681_v23, %v2682_v9  ;;  %v14044_v9 = vld [vmem:[%s17329_s16 + $0x258] sm:$0x8]  ;;  %v14180_v25 = vld [vmem:[%s17329_s16 + $0x1c0] sm:$0xe] }
 0x120   : > { %6476 = vmatmul.mubr.bf16.gmra.mrb[116].mxu1 %v14081_v51  ;;  %v14082_v51 = vcombine.low %v2385_v34, %v2388_v40  ;;  %v14234_v63 = vcombine.low %v2905_v41, %v2908_v54  ;;  %15776 = vmatpush3.bf16.msra.mxu0 %v16931_v16  ;;  %v14179_v34 = vld [vmem:[%s17329_s16 + $0x1b4] sm:$0x1] }
 0x121   : > { %v15137_v55 = vpop.f32.mrb[16].mxu0  ;;  %6483 = vmatprep.mubr.bf16.mxu1 %v14162_v33  ;;  %v15225_v48 = vpop.f32.mrb[16].mxu1  ;;  %15777 = vmatprep.subr.bf16.mxu0 %v16941_v30  ;;  %v2394_v30 = vrot.slane %v14043_v20, 7  ;;  %v14178_v33 = vld [vmem:[%s17329_s16 + $0x1b0] sm:$0xf] }
 0x122   : > { %v15138_v0 = vpop.f32.mrb[17].mxu0  ;;  %v2911_v42 = vrot.slane %v14178_v33, 5  ;;  %v14046_v20 = vld [vmem:[%s17329_s16 + $0x260] sm:$0x7] }
 0x123   : > { %v15140_v15 = vpop.f32.mrb[18].mxu0  ;;  %v18518_v39 = vadd.f32 %v15138_v0, %v15137_v55  ;;  %v15226_v55 = vpop.f32.mrb[17].mxu1  ;;  %6581 = vmatmul.mubr.bf16.gmra.mrb[120].mxu0 %v14234_v63 }
 0x124   : > { %v15141_v49 = vpop.f32.mrb[19].mxu0  ;;  %v15227_v0 = vadd.f32 %v15226_v55, %v15225_v48  ;;  %v15228_v1 = vpop.f32.mrb[18].mxu1  ;;  %6588 = vmatprep.mubr.bf16.mxu0 %v16920_v46  ;;  %15778 = vmatpush3.bf16.msra.mxu0 %v16942_v50  ;;  %v14124_v46 = vld [vmem:[%s17329_s16 + $0x25c] sm:$0xc]  ;;  %v14163_v48 = vcombine.low %v2680_v18, %v2683_v38  ;;  %v14125_v50 = vld [vmem:[%s17329_s16 + $0x260] sm:$0xf] }
 0x125   : > { %v18532_v57 = vadd.f32 %v15141_v49, %v15140_v15  ;;  %v15229_v7 = vpop.f32.mrb[19].mxu1  ;;  %v14042_v15 = vld [vmem:[%s17329_s16 + $0x248] sm:$0xf]  ;;  %v2914_v49 = vrot.slane %v14179_v34, 5  ;;  %v14148_v58 = vrot.slane %v14124_v46, 10  ;;  %v2686_v8 = vrot.slane %v14125_v50, 6 }
 0x126   : > { %v18543_v11 = vadd.f32 %v15227_v0, %v5923_v62  ;;  %v15230_v12 = vadd.f32 %v15229_v7, %v15228_v1  ;;  %v2391_v16 = vrot.slane %v14042_v15, 7  ;;  %v2913_v62 = vrot.slane %v2911_v42, 4  ;;  %v14126_v1 = vld [vmem:[%s17329_s16 + $0x264] sm:$0x3]  ;;  %v14045_v15 = vld [vmem:[%s17329_s16 + $0x25c] sm:$0xf] }
 0x127   : > { %v2689_v13 = vrot.slane %v14126_v1, 6  ;;  %v14068_v18 = vrot.slane %v14044_v9, 11  ;;  %v2398_v33 = vrot.slane %v14045_v15, 7  ;;  %v2401_v34 = vrot.slane %v14046_v20, 7  ;;  %v14128_v9 = vld [vmem:[%s17329_s16 + $0x274] sm:$0xf] }
 0x128   : > { %6484 = vmatmul.mubr.bf16.gmra.mrb[120].mxu1 %v14082_v51  ;;  %v18555_v29 = vadd.f32 %v15230_v12, %v5926_v6  ;;  %v2392_v40 = vsel %vm17341_vm2, %v14067_v24, %v2391_v16  ;;  %v2393_v41 = vrot.slane %v2391_v16, 4  ;;  %v2915_v12 = vsel %vm17551_vm8, %v2913_v62, %v2914_v49  ;;  %v14129_v15 = vld [vmem:[%s17329_s16 + $0x278] sm:$0x3] }
 0x129   : > { %v15143_v61 = vpop.f32.mrb[20].mxu0  ;;  %v15231_v27 = vpop.f32.mrb[20].mxu1  ;;  %6491 = vmatprep.mubr.bf16.mxu1 %v14163_v48  ;;  %v2687_v16 = vsel %vm17373_vm5, %v14148_v58, %v2686_v8  ;;  %v14220_v38 = vrot.slane %v14180_v25, 9  ;;  %v2399_v46 = vsel %vm17341_vm2, %v14068_v18, %v2398_v33  ;;  %v2400_v48 = vrot.slane %v2398_v33, 4  ;;  %v14048_v25 = vld [vmem:[%s17329_s16 + $0x270] sm:$0xf] }
 0x12a   : > { %v15144_v10 = vpop.f32.mrb[21].mxu0  ;;  %v15232_v43 = vpop.f32.mrb[21].mxu1  ;;  %v2395_v60 = vsel %vm17341_vm2, %v2393_v41, %v2394_v30  ;;  %v5942_v1 = vadd.f32 %v18425_v44, %v18509_v26  ;;  %v2696_v44 = vrot.slane %v14129_v15, 6 }
 0x12b   : > { %v18548_v21 = vadd.f32 %v15144_v10, %v15143_v61  ;;  %v15146_v56 = vpop.f32.mrb[22].mxu0  ;;  %v15233_v51 = vadd.f32 %v15232_v43, %v15231_v27  ;;  %v15234_v54 = vpop.f32.mrb[22].mxu1  ;;  %v2912_v61 = vsel %vm17551_vm8, %v14219_v36, %v2911_v42  ;;  %v14083_v5 = vcombine.low %v2392_v40, %v2395_v60  ;;  %v14181_v27 = vld [vmem:[%s17329_s16 + $0x1c4] sm:$0xf]  ;;  %v14182_v36 = vld [vmem:[%s17329_s16 + $0x1c8] sm:$0x1] }
 0x12c   : > { %v15147_v55 = vpop.f32.mrb[23].mxu0  ;;  %v15235_v0 = vpop.f32.mrb[23].mxu1  ;;  %v14235_v23 = vcombine.low %v2912_v61, %v2915_v12  ;;  %v2918_v40 = vrot.slane %v14181_v27, 5  ;;  %v2921_v42 = vrot.slane %v14182_v36, 5  ;;  %v5939_v43 = vadd.f32 %v18418_v31, %v18509_v26  ;;  %v14049_v27 = vld [vmem:[%s17329_s16 + $0x274] sm:$0x7] }
 0x12d   : > { %v18569_v63 = vadd.f32 %v15147_v55, %v15146_v56  ;;  %v18573_v6 = vadd.f32 %v15233_v51, %v5931_v17  ;;  %v15236_v7 = vadd.f32 %v15235_v0, %v15234_v54  ;;  %v2688_v17 = vrot.slane %v2686_v8, 4  ;;  %v16926_v0 = vld [vmem:[%s17329_s16 + $0x64] sm:$0xff]   ;;  %v14127_v8 = vld [vmem:[%s17329_s16 + $0x270] sm:$0xc] }
 0x12e   : > { %6589 = vmatmul.mubr.bf16.gmra.mrb[124].mxu0 %v14235_v23  ;;  %v2919_v51 = vsel %vm17551_vm8, %v14220_v38, %v2918_v40  ;;  %v2920_v54 = vrot.slane %v2918_v40, 4  ;;  %v2402_v60 = vsel %vm17341_vm2, %v2400_v48, %v2401_v34  ;;  %v14149_v20 = vrot.slane %v14127_v8, 10  ;;  %v14131_v8 = vld [vmem:[%s17329_s16 + $0x288] sm:$0xf] }
 0x12f   : > { %v18580_v24 = vadd.f32 %v15236_v7, %v5934_v28  ;;  %v2690_v41 = vsel %vm17373_vm5, %v2688_v17, %v2689_v13  ;;  %6596 = vmatprep.mubr.bf16.mxu0 %v16921_v2  ;;  %v14084_v2 = vcombine.low %v2399_v46, %v2402_v60  ;;  %v2693_v23 = vrot.slane %v14128_v9, 6  ;;  %v14130_v60 = vld [vmem:[%s17329_s16 + $0x284] sm:$0xc] }
 0x130   : > { %6492 = vmatmul.mubr.bf16.gmra.mrb[124].mxu1 %v14083_v5  ;;  %v14164_v56 = vcombine.low %v2687_v16, %v2690_v41  ;;  %v2922_v5 = vsel %vm17551_vm8, %v2920_v54, %v2921_v42  ;;  %v14047_v16 = vld [vmem:[%s17329_s16 + $0x26c] sm:$0x8]  ;;  %v2405_v38 = vrot.slane %v14048_v25, 7  ;;  %v2408_v40 = vrot.slane %v14049_v27, 7  ;;  %v14183_v41 = vld [vmem:[%s17329_s16 + $0x1d4] sm:$0xe] }
 0x131   : > { %v15149_v10 = vpop.f32.mrb[24].mxu0  ;;  %v15237_v30 = vpop.f32.mrb[24].mxu1  ;;  %v2694_v34 = vsel %vm17373_vm5, %v14149_v20, %v2693_v23  ;;  %v2695_v36 = vrot.slane %v2693_v23, 4  ;;  %v14221_v46 = vrot.slane %v14183_v41, 9  ;;  %v14132_v20 = vld [vmem:[%s17329_s16 + $0x28c] sm:$0x3] }
 0x132   : > { %v15150_v28 = vpop.f32.mrb[25].mxu0  ;;  %v15238_v49 = vpop.f32.mrb[25].mxu1  ;;  %6499 = vmatprep.mubr.bf16.mxu1 %v14164_v56  ;;  %v14185_v56 = vld [vmem:[%s17329_s16 + $0x1dc] sm:$0x1]  ;;  %v14150_v25 = vrot.slane %v14130_v60, 10 }
 0x133   : > { %v18595_v55 = vadd.f32 %v15150_v28, %v15149_v10  ;;  %v15239_v50 = vadd.f32 %v15238_v49, %v15237_v30  ;;  %v15152_v58 = vpop.f32.mrb[26].mxu0  ;;  %v15240_v31 = vpop.f32.mrb[26].mxu1  ;;  %v14236_v10 = vcombine.low %v2919_v51, %v2922_v5  ;;  %v14069_v30 = vrot.slane %v14047_v16, 11  ;;  %v14050_v27 = vld [vmem:[%s17329_s16 + $0x280] sm:$0x8] }
 0x134   : > { %v15153_v61 = vpop.f32.mrb[27].mxu0  ;;  %v15241_v62 = vpop.f32.mrb[27].mxu1  ;;  %v5947_v28 = vadd.f32 %v18467_v37, %v18509_v26  ;;  %v2697_v51 = vsel %vm17373_vm5, %v2695_v36, %v2696_v44  ;;  %v2703_v36 = vrot.slane %v14132_v20, 6 }
 0x135   : > { %v18604_v7 = vadd.f32 %v15239_v50, %v5939_v43  ;;  %v18608_v12 = vadd.f32 %v15153_v61, %v15152_v58  ;;  %v15242_v13 = vadd.f32 %v15241_v62, %v15240_v31  ;;  %v14184_v43 = vld [vmem:[%s17329_s16 + $0x1d8] sm:$0xf]  ;;  %v2406_v54 = vsel %vm17341_vm2, %v14069_v30, %v2405_v38 }
 0x136   : > { %6597 = vmatmul.mubr.bf16.gmra.mrb[128].mxu0 %v14236_v10  ;;  %v2407_v50 = vrot.slane %v2405_v38, 4  ;;  %v2925_v58 = vrot.slane %v14184_v43, 5  ;;  %v5950_v61 = vadd.f32 %v18486_v59, %v18509_v26  ;;  %v14165_v62 = vcombine.low %v2694_v34, %v2697_v51  ;;  %v16927_v59 = vld [vmem:[%s17329_s16 + $0x78] sm:$0xff]   ;;  %v14051_v38 = vld [vmem:[%s17329_s16 + $0x284] sm:$0xf] }
 0x137   : > { %v18612_v17 = vadd.f32 %v15242_v13, %v5942_v1  ;;  %6604 = vmatprep.mubr.bf16.mxu0 %v16926_v0  ;;  %v2928_v0 = vrot.slane %v14185_v56, 5  ;;  %v2700_v34 = vrot.slane %v14131_v8, 6  ;;  %v14070_v43 = vrot.slane %v14050_v27, 11  ;;  %v14186_v56 = vld [vmem:[%s17329_s16 + $0x1e8] sm:$0xe] }
 0x138   : > { %6500 = vmatmul.mubr.bf16.gmra.mrb[128].mxu1 %v14084_v2  ;;  %v2409_v9 = vsel %vm17341_vm2, %v2407_v50, %v2408_v40  ;;  %v2926_v10 = vsel %vm17551_vm8, %v14221_v46, %v2925_v58  ;;  %v2927_v13 = vrot.slane %v2925_v58, 4  ;;  %v14052_v40 = vld [vmem:[%s17329_s16 + $0x288] sm:$0x7]  ;;  %v14187_v46 = vld [vmem:[%s17329_s16 + $0x1ec] sm:$0xf]  ;;  %v14222_v58 = vrot.slane %v14186_v56, 9 }
 0x139   : > { %v15155_v18 = vpop.f32.mrb[28].mxu0  ;;  %v15243_v33 = vpop.f32.mrb[28].mxu1  ;;  %6507 = vmatprep.mubr.bf16.mxu1 %v14165_v62  ;;  %v14085_v23 = vcombine.low %v2406_v54, %v2409_v9  ;;  %v2702_v51 = vrot.slane %v2700_v34, 4  ;;  %v2415_v54 = vrot.slane %v14052_v40, 7  ;;  %v14188_v50 = vld [vmem:[%s17329_s16 + $0x1f0] sm:$0x1]  ;;  %v5958_v40 = vadd.f32 %v18532_v57, %v18509_v26 }
 0x13a   : > { %v15156_v42 = vpop.f32.mrb[29].mxu0  ;;  %v15244_v49 = vpop.f32.mrb[29].mxu1  ;;  %v2935_v62 = vrot.slane %v14188_v50, 5  ;;  %v14053_v50 = vld [vmem:[%s17329_s16 + $0x294] sm:$0x8] }
 0x13b   : > { %v18623_v48 = vadd.f32 %v15156_v42, %v15155_v18  ;;  %v15158_v31 = vpop.f32.mrb[30].mxu0  ;;  %v15246_v37 = vpop.f32.mrb[30].mxu1  ;;  %v15245_v1 = vadd.f32 %v15244_v49, %v15243_v33  ;;  %v2929_v33 = vsel %vm17551_vm8, %v2927_v13, %v2928_v0  ;;  %v2701_v49 = vsel %vm17373_vm5, %v14150_v25, %v2700_v34  ;;  %v16934_v25 = vld [vmem:[%s17329_s16 + $0x8c] sm:$0xff]  }
 0x13c   : > { %v15159_v2 = vpop.f32.mrb[31].mxu0  ;;  %v15247_v5 = vpop.f32.mrb[31].mxu1  ;;  %v14237_v41 = vcombine.low %v2926_v10, %v2929_v33 }
 0x13d   : > { %v18637_v15 = vadd.f32 %v15159_v2, %v15158_v31  ;;  %v18641_v44 = vadd.f32 %v15245_v1, %v5947_v28  ;;  %v15248_v16 = vadd.f32 %v15247_v5, %v15246_v37  ;;  %v2412_v28 = vrot.slane %v14051_v38, 7 }
 0x13e   : > { %6605 = vmatmul.mubr.bf16.gmra.mrb[132].mxu0 %v14237_v41  ;;  %v5955_v1 = vadd.f32 %v18518_v39, %v18509_v26  ;;  %v2704_v2 = vsel %vm17373_vm5, %v2702_v51, %v2703_v36  ;;  %v14133_v36 = vld [vmem:[%s17329_s16 + $0x298] sm:$0xc] }
 0x13f   : > { %v18648_v42 = vadd.f32 %v15248_v16, %v5950_v61  ;;  %v2413_v37 = vsel %vm17341_vm2, %v14070_v43, %v2412_v28  ;;  %v2414_v60 = vrot.slane %v2412_v28, 4  ;;  %v2932_v61 = vrot.slane %v14187_v46, 5  ;;  %6612 = vmatprep.mubr.bf16.mxu0 %v16927_v59  ;;  %v14134_v43 = vld [vmem:[%s17329_s16 + $0x29c] sm:$0xf]  ;;  %v14135_v28 = vld [vmem:[%s17329_s16 + $0x2a0] sm:$0x3] }
 0x140   : > { %6508 = vmatmul.mubr.bf16.gmra.mrb[132].mxu1 %v14085_v23  ;;  %v14166_v9 = vcombine.low %v2701_v49, %v2704_v2  ;;  %v14151_v56 = vrot.slane %v14133_v36, 10  ;;  %v2707_v49 = vrot.slane %v14134_v43, 6  ;;  %v2710_v51 = vrot.slane %v14135_v28, 6  ;;  %v14190_v2 = vld [vmem:[%s17329_s16 + $0x200] sm:$0xf] }
 0x141   : > { %v15161_v18 = vpop.f32.mrb[32].mxu0  ;;  %v15249_v31 = vpop.f32.mrb[32].mxu1  ;;  %v2416_v10 = vsel %vm17341_vm2, %v2414_v60, %v2415_v54  ;;  %v2933_v13 = vsel %vm17551_vm8, %v14222_v58, %v2932_v61  ;;  %v2934_v20 = vrot.slane %v2932_v61, 4  ;;  %v14054_v58 = vld [vmem:[%s17329_s16 + $0x298] sm:$0xf]  ;;  %v14071_v60 = vrot.slane %v14053_v50, 11 }
 0x142   : > { %v15162_v30 = vpop.f32.mrb[33].mxu0  ;;  %v15250_v0 = vpop.f32.mrb[33].mxu1  ;;  %v14086_v16 = vcombine.low %v2413_v37, %v2416_v10  ;;  %6515 = vmatprep.mubr.bf16.mxu1 %v14166_v9  ;;  %v2708_v57 = vsel %vm17373_vm5, %v14151_v56, %v2707_v49  ;;  %v2709_v37 = vrot.slane %v2707_v49, 4  ;;  %v2419_v61 = vrot.slane %v14054_v58, 7  ;;  %v16939_v43 = vld [vmem:[%s17329_s16 + $0xa0] sm:$0xff]  }
 0x143   : > { %v18661_v5 = vadd.f32 %v15162_v30, %v15161_v18  ;;  %v15251_v8 = vadd.f32 %v15250_v0, %v15249_v31  ;;  %v15164_v23 = vpop.f32.mrb[34].mxu0  ;;  %v2936_v59 = vsel %vm17551_vm8, %v2934_v20, %v2935_v62  ;;  %v15252_v18 = vpop.f32.mrb[34].mxu1  ;;  %v14055_v31 = vld [vmem:[%s17329_s16 + $0x29c] sm:$0x7] }
 0x144   : > { %v15165_v27 = vpop.f32.mrb[35].mxu0  ;;  %v14238_v30 = vcombine.low %v2933_v13, %v2936_v59  ;;  %v15253_v34 = vpop.f32.mrb[35].mxu1  ;;  %v14189_v62 = vld [vmem:[%s17329_s16 + $0x1fc] sm:$0xe]  ;;  %v2711_v13 = vsel %vm17373_vm5, %v2709_v37, %v2710_v51  ;;  %v2420_v20 = vsel %vm17341_vm2, %v14071_v60, %v2419_v61  ;;  %v5963_v59 = vadd.f32 %v18548_v21, %v18509_v26  ;;  %v14192_v37 = vld [vmem:[%s17329_s16 + $0x210] sm:$0xe] }
 0x145   : > { %v18667_v39 = vadd.f32 %v15251_v8, %v5955_v1  ;;  %v18672_v33 = vadd.f32 %v15165_v27, %v15164_v23  ;;  %v15254_v41 = vadd.f32 %v15253_v34, %v15252_v18  ;;  %v2422_v1 = vrot.slane %v14055_v31, 7  ;;  %v14191_v8 = vld [vmem:[%s17329_s16 + $0x204] sm:$0x1]  ;;  %v14193_v60 = vld [vmem:[%s17329_s16 + $0x214] sm:$0xf] }
 0x146   : > { %6613 = vmatmul.mubr.bf16.gmra.mrb[136].mxu0 %v14238_v30  ;;  %v14223_v9 = vrot.slane %v14189_v62, 9  ;;  %v2421_v23 = vrot.slane %v2419_v61, 4  ;;  %v14167_v18 = vcombine.low %v2708_v57, %v2711_v13  ;;  %v2942_v27 = vrot.slane %v14191_v8, 5  ;;  %v14194_v61 = vld [vmem:[%s17329_s16 + $0x218] sm:$0x1] }
 0x147   : > { %v18679_v54 = vadd.f32 %v15254_v41, %v5958_v40  ;;  %6620 = vmatprep.mubr.bf16.mxu0 %v16934_v25  ;;  %v16940_v25 = vld [vmem:[%s17329_s16 + $0xc] sm:$0xff]   ;;  %v14224_v62 = vrot.slane %v14192_v37, 9  ;;  %v2949_v8 = vrot.slane %v14194_v61, 5  ;;  %v3225_v13 = vld [vmem:[%s17329_s16 + $0x8] sm:$0xf] }
 0x148   : > { %6516 = vmatmul.mubr.bf16.gmra.mrb[136].mxu1 %v14086_v16  ;;  %v2939_v16 = vrot.slane %v14190_v2, 5  ;;  %v2423_v34 = vsel %vm17341_vm2, %v2421_v23, %v2422_v1  ;;  %v2946_v2 = vrot.slane %v14193_v60, 5  ;;  %v3322_v23 = vrot.slane %v3225_v13, 6  ;;  %v14195_v60 = vld [vmem:[%s17329_s16 + $0x224] sm:$0xe]  ;;  %vm20189_vm2 = vmor %vm7838_vm14, %vm7839_vm15 }
 0x149   : > { %v15167_v38 = vpop.f32.mrb[36].mxu0  ;;  %v15255_v46 = vpop.f32.mrb[36].mxu1  ;;  %6523 = vmatprep.mubr.bf16.mxu1 %v14167_v18  ;;  %v14087_v28 = vcombine.low %v2420_v20, %v2423_v34  ;;  %v14196_v61 = vld [vmem:[%s17329_s16 + $0x228] sm:$0xf]  ;;  %v3227_v13 = vld [vmem:[%s17329_s16 + $0x18] sm:$0xc] }
 0x14a   : > { %v15168_v0 = vpop.f32.mrb[37].mxu0  ;;  %v15256_v30 = vpop.f32.mrb[37].mxu1  ;;  %v2940_v36 = vsel %vm17551_vm8, %v14223_v9, %v2939_v16  ;;  %v3224_v9 = vld [vmem:[%s17329_s16 + $0x4] sm:$0xc] }
 0x14b   : > { %v18689_v10 = vadd.f32 %v15168_v0, %v15167_v38  ;;  %v2941_v38 = vrot.slane %v2939_v16, 4  ;;  %v15257_v40 = vadd.f32 %v15256_v30, %v15255_v46  ;;  %v15170_v41 = vpop.f32.mrb[38].mxu0  ;;  %v15258_v56 = vpop.f32.mrb[38].mxu1  ;;  %v5966_v46 = vadd.f32 %v18569_v63, %v18509_v26  ;;  %v3226_v63 = vld [vmem:[%s17329_s16 + $0xc] sm:$0x3] }
 0x14c   : > { %v15171_v21 = vpop.f32.mrb[39].mxu0  ;;  %v15259_v50 = vpop.f32.mrb[39].mxu1  ;;  %v14264_v20 = vrot.slane %v3224_v9, 10  ;;  %v2947_v16 = vsel %vm17551_vm8, %v14224_v62, %v2946_v2  ;;  %v14197_v62 = vld [vmem:[%s17329_s16 + $0x22c] sm:$0x1] }
 0x14d   : > { %v2943_v49 = vsel %vm17551_vm8, %v2941_v38, %v2942_v27  ;;  %v18705_v51 = vadd.f32 %v15257_v40, %v5963_v59  ;;  %v18707_v14 = vadd.f32 %v15171_v21, %v15170_v41  ;;  %v15260_v57 = vadd.f32 %v15259_v50, %v15258_v56  ;;  %v16944_v38 = vld [vmem:[%s17329_s16 + $0x20] sm:$0xff]  }
 0x14e   : > { %v14239_v31 = vcombine.low %v2940_v36, %v2943_v49  ;;  %v3325_v59 = vrot.slane %v3226_v63, 6  ;;  %v3323_v18 = vsel %vm17373_vm5, %v14264_v20, %v3322_v23  ;;  %v3324_v27 = vrot.slane %v3322_v23, 4  ;;  %v16943_v36 = vld [vmem:[%s17329_s16 + $0xb4] sm:$0xff]   ;;  %v3228_v20 = vld [vmem:[%s17329_s16 + $0x1c] sm:$0xf] }
 0x14f   : > { %v18714_v1 = vadd.f32 %v15260_v57, %v5966_v46  ;;  %v5971_v40 = vadd.f32 %v18595_v55, %v18509_v26  ;;  %v5974_v55 = vadd.f32 %v18608_v12, %v18509_v26  ;;  %v2956_v9 = vrot.slane %v14197_v62, 5  ;;  %v3229_v23 = vld [vmem:[%s17329_s16 + $0x20] sm:$0x3] }
 0x150   : > { %6524 = vmatmul.mubr.bf16.gmra.mrb[140].mxu1 %v14087_v28  ;;  %6621 = vmatmul.mubr.bf16.gmra.mrb[140].mxu0 %v14239_v31  ;;  %v3326_v50 = vsel %vm17373_vm5, %v3324_v27, %v3325_v59  ;;  %v14265_v12 = vrot.slane %v3227_v13, 10  ;;  %v3329_v27 = vrot.slane %v3228_v20, 6  ;;  %v14200_v20 = vld [vmem:[%s17329_s16 + $0x240] sm:$0x1] }
 0x151   : > { %v15173_v58 = vpop.f32.mrb[40].mxu0  ;;  %6725 = vmatprep.mubr.bf16.mxu1 %v16940_v25  ;;  %v15261_v0 = vpop.f32.mrb[40].mxu1  ;;  %6628 = vmatprep.mubr.bf16.mxu0 %v16939_v43  ;;  %v2948_v25 = vrot.slane %v2946_v2, 4  ;;  %v14280_v57 = vcombine.low %v3323_v18, %v3326_v50  ;;  %v14225_v2 = vrot.slane %v14195_v60, 9  ;;  %v16948_v60 = vld [vmem:[%s22111_s2 + $0x328] sm:$0xff]  }
 0x152   : > { %v15174_v30 = vpop.f32.mrb[41].mxu0  ;;  %v15262_v34 = vpop.f32.mrb[41].mxu1  ;;  %v3330_v50 = vsel %vm17373_vm5, %v14265_v12, %v3329_v27 }
 0x153   : > { %v2950_v41 = vsel %vm17551_vm8, %v2948_v25, %v2949_v8  ;;  %v18729_v43 = vadd.f32 %v15174_v30, %v15173_v58  ;;  %v15263_v28 = vadd.f32 %v15262_v34, %v15261_v0  ;;  %v15176_v56 = vpop.f32.mrb[42].mxu0  ;;  %v15264_v21 = vpop.f32.mrb[42].mxu1  ;;  %v2953_v8 = vrot.slane %v14196_v61, 5 }
 0x154   : > { %v14240_v49 = vcombine.low %v2947_v16, %v2950_v41  ;;  %v15177_v46 = vpop.f32.mrb[43].mxu0  ;;  %v15265_v31 = vpop.f32.mrb[43].mxu1  ;;  %v3332_v41 = vrot.slane %v3229_v23, 6  ;;  %v5982_v61 = vadd.f32 %v18637_v15, %v18509_v26 }
 0x155   : > { %v18735_v37 = vadd.f32 %v15263_v28, %v5971_v40  ;;  %v18737_v58 = vadd.f32 %v15177_v46, %v15176_v56  ;;  %v15266_v0 = vadd.f32 %v15265_v31, %v15264_v21  ;;  %v2954_v59 = vsel %vm17551_vm8, %v14225_v2, %v2953_v8 }
 0x156   : > { %v2955_v18 = vrot.slane %v2953_v8, 4  ;;  %v5979_v40 = vadd.f32 %v18623_v48, %v18509_v26  ;;  %v3331_v48 = vrot.slane %v3329_v27, 4  ;;  %v14198_v8 = vld [vmem:[%s17329_s16 + $0x238] sm:$0xe]  ;;  %v3232_v27 = vld [vmem:[%s17329_s16 + $0x34] sm:$0x3] }
 0x157   : > { %v18745_v25 = vadd.f32 %v15266_v0, %v5974_v55  ;;  %v16945_v55 = vld [vmem:[%s17329_s16 + $0xc8] sm:$0xff]   ;;  %v14226_v23 = vrot.slane %v14198_v8, 9 }
 0x158   : > { %6629 = vmatmul.mubr.bf16.gmra.mrb[144].mxu0 %v14240_v49  ;;  %6726 = vmatmul.mubr.bf16.vlgmr.msra.gmra.mrb[144].mxu1 %v14280_v57  ;;  %v2957_v49 = vsel %vm17551_vm8, %v2955_v18, %v2956_v9  ;;  %v16946_v57 = vld [vmem:[%s17329_s16 + $0x34] sm:$0xff]   ;;  %v14199_v9 = vld [vmem:[%s17329_s16 + $0x23c] sm:$0xf]  ;;  %v3333_v13 = vsel %vm17373_vm5, %v3331_v48, %v3332_v41  ;;  %v2963_v18 = vrot.slane %v14200_v20, 5 }
 0x159   : > { %v15179_v63 = vpop.f32.mrb[44].mxu0  ;;  %v15267_v16 = vpop.f32.mrb[44].mxu1  ;;  %6636 = vmatprep.mubr.bf16.mxu0 %v16943_v36  ;;  %6733 = vmatprep.mubr.bf16.mxu1 %v16944_v38  ;;  %v16947_v38 = vld [vmem:[%s22111_s2 + $0x368] sm:$0xff]   ;;  %v14241_v62 = vcombine.low %v2954_v59, %v2957_v49  ;;  %v2960_v12 = vrot.slane %v14199_v9, 5  ;;  %v14281_v15 = vcombine.low %v3330_v50, %v3333_v13  ;;  %v3231_v59 = vld [vmem:[%s17329_s16 + $0x30] sm:$0xf] }
 0x15a   : > { %v15180_v30 = vpop.f32.mrb[45].mxu0  ;;  %v15268_v34 = vpop.f32.mrb[45].mxu1  ;;  %15779 = vmatprep.subr.bf16.mxu0 %v16947_v38 }
 0x15b   : > { %v18751_v28 = vadd.f32 %v15180_v30, %v15179_v63  ;;  %v15269_v56 = vadd.f32 %v15268_v34, %v15267_v16  ;;  %v15182_v21 = vpop.f32.mrb[46].mxu0  ;;  %v15270_v36 = vpop.f32.mrb[46].mxu1  ;;  %v3230_v16 = vld [vmem:[%s17329_s16 + $0x2c] sm:$0xc]  ;;  %15780 = vmatpush3.bf16.msra.mxu0 %v16948_v60  ;;  %v2961_v41 = vsel %vm17551_vm8, %v14226_v23, %v2960_v12 }
 0x15c   : > { %v15183_v46 = vpop.f32.mrb[47].mxu0  ;;  %v15271_v31 = vpop.f32.mrb[47].mxu1  ;;  %v14266_v30 = vrot.slane %v3230_v16, 10 }
 0x15d   : > { %v18767_v0 = vadd.f32 %v15269_v56, %v5979_v40  ;;  %v18769_v2 = vadd.f32 %v15183_v46, %v15182_v21  ;;  %v15272_v63 = vadd.f32 %v15271_v31, %v15270_v36  ;;  %v2962_v40 = vrot.slane %v2960_v12, 4 }
 0x15e   : > { %v3336_v56 = vrot.slane %v3231_v59, 6  ;;  %v3339_v21 = vrot.slane %v3232_v27, 6  ;;  %v5987_v31 = vadd.f32 %v18661_v5, %v18509_v26  ;;  %v14203_v27 = vld [vmem:[%s17329_s16 + $0x254] sm:$0x1] }
 0x15f   : > { %v18779_v34 = vadd.f32 %v15272_v63, %v5982_v61  ;;  %v2964_v36 = vsel %vm17551_vm8, %v2962_v40, %v2963_v18  ;;  %v5990_v61 = vadd.f32 %v18672_v33, %v18509_v26  ;;  %v16949_v63 = vld [vmem:[%s17329_s16 + $0xdc] sm:$0xff]   ;;  %v14201_v18 = vld [vmem:[%s17329_s16 + $0x24c] sm:$0xe]  ;;  %v14202_v26 = vld [vmem:[%s17329_s16 + $0x250] sm:$0xf] }
 0x160   : > { %6637 = vmatmul.mubr.bf16.gmra.mrb[148].mxu0 %v14241_v62  ;;  %6734 = vmatmul.mubr.bf16.gmra.mrb[148].mxu1 %v14281_v15  ;;  %v3337_v49 = vsel %vm17373_vm5, %v14266_v30, %v3336_v56  ;;  %v3338_v50 = vrot.slane %v3336_v56, 4  ;;  %v14242_v20 = vcombine.low %v2961_v41, %v2964_v36  ;;  %v16950_v15 = vld [vmem:[%s17329_s16 + $0x48] sm:$0xff]   ;;  %v14227_v30 = vrot.slane %v14201_v18, 9  ;;  %v3233_v56 = vld [vmem:[%s17329_s16 + $0x40] sm:$0xc] }
 0x161   : > { %v15273_v38 = vpop.f32.mrb[48].mxu1  ;;  %6644 = vmatprep.mubr.bf16.mxu0 %v16945_v55  ;;  %6741 = vmatprep.mubr.bf16.mxu1 %v16946_v57  ;;  %v15337_v48 = vpop.f32.mrb[48].mxu0  ;;  %v2967_v40 = vrot.slane %v14202_v26, 5  ;;  %v3234_v41 = vld [vmem:[%s17329_s16 + $0x44] sm:$0xf] }
 0x162   : > { %v15274_v46 = vpop.f32.mrb[49].mxu1  ;;  %v15338_v57 = vpop.f32.mrb[49].mxu0  ;;  %v3340_v62 = vsel %vm17373_vm5, %v3338_v50, %v3339_v21  ;;  %v3235_v36 = vld [vmem:[%s17329_s16 + $0x48] sm:$0x3] }
 0x163   : > { %v15275_v55 = vadd.f32 %v15274_v46, %v15273_v38  ;;  %v15276_v60 = vpop.f32.mrb[50].mxu1  ;;  %v15339_v8 = vadd.f32 %v15338_v57, %v15337_v48  ;;  %v15340_v9 = vpop.f32.mrb[50].mxu0  ;;  %v14282_v5 = vcombine.low %v3337_v49, %v3340_v62  ;;  %v2970_v38 = vrot.slane %v14203_v27, 5  ;;  %v18816_v57 = vld [vmem:[%s22112_s3] ss:$0 sm:$0xff] }
 0x164   : > { %v15277_v13 = vpop.f32.mrb[51].mxu1  ;;  %v15341_v16 = vpop.f32.mrb[51].mxu0  ;;  %v14267_v49 = vrot.slane %v3233_v56, 10  ;;  %v2968_v48 = vsel %vm17551_vm8, %v14227_v30, %v2967_v40  ;;  %v2969_v46 = vrot.slane %v2967_v40, 4  ;;  %v14204_v27 = vld [vmem:[%s17329_s16 + $0x260] sm:$0xe] }
 0x165   : > { %v18794_v23 = vadd.f32 %v15275_v55, %v5987_v31  ;;  %v15278_v12 = vadd.f32 %v15277_v13, %v15276_v60  ;;  %v18800_v33 = vadd.f32 %v15339_v8, %v18543_v11  ;;  %v15342_v59 = vadd.f32 %v15341_v16, %v15340_v9  ;;  %v16953_v8 = vld [vmem:[%s22111_s2 + $0x370] sm:$0xff]  }
 0x166   : > { %v3343_v11 = vrot.slane %v3234_v41, 6  ;;  %v5995_v60 = vadd.f32 %v18816_v57, %v18689_v10  ;;  %v2971_v9 = vsel %vm17551_vm8, %v2969_v46, %v2970_v38  ;;  %v16954_v16 = vld [vmem:[%s22111_s2 + $0x330] sm:$0xff]   ;;  %15781 = vmatprep.subr.bf16.mxu0 %v16953_v8  ;;  %v14206_v46 = vld [vmem:[%s17329_s16 + $0x268] sm:$0x1] }
 0x167   : > { %v18804_v21 = vadd.f32 %v15278_v12, %v5990_v61  ;;  %v18809_v50 = vadd.f32 %v15342_v59, %v18555_v29  ;;  %v3346_v61 = vrot.slane %v3235_v36, 6  ;;  %v16951_v41 = vld [vmem:[%s17329_s16 + $0xf0] sm:$0xff]   ;;  %v16952_v36 = vld [vmem:[%s17329_s16 + $0x5c] sm:$0xff]   ;;  %15782 = vmatpush3.bf16.msra.mxu0 %v16954_v16 }
 0x168   : > { %6645 = vmatmul.mubr.bf16.gmra.mrb[152].mxu0 %v14242_v20  ;;  %6742 = vmatmul.mubr.bf16.gmra.mrb[152].mxu1 %v14282_v5  ;;  %v3344_v13 = vsel %vm17373_vm5, %v14267_v49, %v3343_v11  ;;  %v3345_v12 = vrot.slane %v3343_v11, 4  ;;  %v14205_v49 = vld [vmem:[%s17329_s16 + $0x264] sm:$0xf] }
 0x169   : > { %v15279_v31 = vpop.f32.mrb[52].mxu1  ;;  %v15343_v55 = vpop.f32.mrb[52].mxu0  ;;  %6652 = vmatprep.mubr.bf16.mxu0 %v16949_v63  ;;  %6749 = vmatprep.mubr.bf16.mxu1 %v16950_v15  ;;  %v5998_v63 = vadd.f32 %v18816_v57, %v18707_v14  ;;  %v14243_v15 = vcombine.low %v2968_v48, %v2971_v9  ;;  %v3236_v14 = vld [vmem:[%s17329_s16 + $0x54] sm:$0xc] }
 0x16a   : > { %v15280_v29 = vpop.f32.mrb[53].mxu1  ;;  %v15344_v62 = vpop.f32.mrb[53].mxu0  ;;  %v3347_v30 = vsel %vm17373_vm5, %v3345_v12, %v3346_v61  ;;  %v2977_v61 = vrot.slane %v14206_v46, 5  ;;  %v14268_v9 = vrot.slane %v3236_v14, 10  ;;  %v14207_v14 = vld [vmem:[%s17329_s16 + $0x274] sm:$0xe] }
 0x16b   : > { %v15281_v10 = vadd.f32 %v15280_v29, %v15279_v31  ;;  %v15282_v20 = vpop.f32.mrb[54].mxu1  ;;  %v15346_v5 = vpop.f32.mrb[54].mxu0  ;;  %v15345_v18 = vadd.f32 %v15344_v62, %v15343_v55  ;;  %v14283_v48 = vcombine.low %v3344_v13, %v3347_v30  ;;  %v14228_v31 = vrot.slane %v14204_v27, 9  ;;  %v3237_v29 = vld [vmem:[%s17329_s16 + $0x58] sm:$0xf] }
 0x16c   : > { %v15283_v26 = vpop.f32.mrb[55].mxu1  ;;  %v15347_v59 = vpop.f32.mrb[55].mxu0  ;;  %v2974_v55 = vrot.slane %v14205_v49, 5  ;;  %v3238_v62 = vld [vmem:[%s17329_s16 + $0x5c] sm:$0x3]  ;;  %v6003_v13 = vadd.f32 %v18816_v57, %v18729_v43 }
 0x16d   : > { %v18835_v40 = vadd.f32 %v15281_v10, %v5995_v60  ;;  %v15284_v56 = vadd.f32 %v15283_v26, %v15282_v20  ;;  %v15348_v38 = vadd.f32 %v15347_v59, %v15346_v5  ;;  %v18843_v11 = vadd.f32 %v15345_v18, %v18573_v6 }
 0x16e   : > { %v2976_v12 = vrot.slane %v2974_v55, 4  ;;  %v3350_v10 = vrot.slane %v3237_v29, 6  ;;  %v3353_v20 = vrot.slane %v3238_v62, 6  ;;  %v16955_v62 = vld [vmem:[%s17329_s16 + $0x104] sm:$0xff]  }
 0x16f   : > { %v18847_v8 = vadd.f32 %v15284_v56, %v5998_v63  ;;  %v18850_v60 = vadd.f32 %v15348_v38, %v18580_v24  ;;  %v2975_v63 = vsel %vm17551_vm8, %v14228_v31, %v2974_v55  ;;  %v6006_v38 = vadd.f32 %v18816_v57, %v18737_v58 }
 0x170   : > { %6653 = vmatmul.mubr.bf16.gmra.mrb[156].mxu0 %v14243_v15  ;;  %6750 = vmatmul.mubr.bf16.gmra.mrb[156].mxu1 %v14283_v48  ;;  %v2978_v24 = vsel %vm17551_vm8, %v2976_v12, %v2977_v61  ;;  %v3352_v18 = vrot.slane %v3350_v10, 4  ;;  %v3351_v43 = vsel %vm17373_vm5, %v14268_v9, %v3350_v10  ;;  %v14208_v48 = vld [vmem:[%s17329_s16 + $0x278] sm:$0xf]  ;;  %v16956_v61 = vld [vmem:[%s17329_s16 + $0x70] sm:$0xff]   ;;  %v14209_v9 = vld [vmem:[%s17329_s16 + $0x27c] sm:$0x1] }
 0x171   : > { %v15285_v5 = vpop.f32.mrb[56].mxu1  ;;  %v15349_v6 = vpop.f32.mrb[56].mxu0  ;;  %6660 = vmatprep.mubr.bf16.mxu0 %v16951_v41  ;;  %6757 = vmatprep.mubr.bf16.mxu1 %v16952_v36  ;;  %v14244_v31 = vcombine.low %v2975_v63, %v2978_v24  ;;  %v14229_v58 = vrot.slane %v14207_v14, 9  ;;  %v3239_v12 = vld [vmem:[%s17329_s16 + $0x68] sm:$0xc] }
 0x172   : > { %v15286_v16 = vpop.f32.mrb[57].mxu1  ;;  %v15350_v59 = vpop.f32.mrb[57].mxu0  ;;  %v3354_v49 = vsel %vm17373_vm5, %v3352_v18, %v3353_v20  ;;  %v14269_v63 = vrot.slane %v3239_v12, 10 }
 0x173   : > { %v15287_v26 = vadd.f32 %v15286_v16, %v15285_v5  ;;  %v15288_v27 = vpop.f32.mrb[58].mxu1  ;;  %v15351_v15 = vadd.f32 %v15350_v59, %v15349_v6  ;;  %v15352_v30 = vpop.f32.mrb[58].mxu0  ;;  %v14284_v10 = vcombine.low %v3351_v43, %v3354_v49  ;;  %v2981_v5 = vrot.slane %v14208_v48, 5  ;;  %v3240_v6 = vld [vmem:[%s17329_s16 + $0x6c] sm:$0xf] }
 0x174   : > { %v15289_v56 = vpop.f32.mrb[59].mxu1  ;;  %v15353_v36 = vpop.f32.mrb[59].mxu0  ;;  %v3241_v16 = vld [vmem:[%s17329_s16 + $0x70] sm:$0x3]  ;;  %v3357_v24 = vrot.slane %v3240_v6, 6  ;;  %v6011_v43 = vadd.f32 %v18816_v57, %v18751_v28 }
 0x175   : > { %v18864_v46 = vadd.f32 %v15287_v26, %v6003_v13  ;;  %v15290_v41 = vadd.f32 %v15289_v56, %v15288_v27  ;;  %v18869_v55 = vadd.f32 %v15351_v15, %v18604_v7  ;;  %v15354_v29 = vadd.f32 %v15353_v36, %v15352_v30 }
 0x176   : > { %v2984_v13 = vrot.slane %v14209_v9, 5  ;;  %v3360_v7 = vrot.slane %v3241_v16, 6  ;;  %v2983_v59 = vrot.slane %v2981_v5, 4  ;;  %v2982_v30 = vsel %vm17551_vm8, %v14229_v58, %v2981_v5  ;;  %v14210_v9 = vld [vmem:[%s17329_s16 + $0x288] sm:$0xe] }
 0x177   : > { %v18875_v20 = vadd.f32 %v15290_v41, %v6006_v38  ;;  %v18880_v18 = vadd.f32 %v15354_v29, %v18612_v17  ;;  %v3359_v56 = vrot.slane %v3357_v24, 4  ;;  %v16959_v17 = vld [vmem:[%s22111_s2 + $0x378] sm:$0xff]   ;;  %v6014_v36 = vadd.f32 %v18816_v57, %v18769_v2  ;;  %v14212_v5 = vld [vmem:[%s17329_s16 + $0x290] sm:$0x1] }
 0x178   : > { %6661 = vmatmul.mubr.bf16.gmra.mrb[160].mxu0 %v14244_v31  ;;  %6758 = vmatmul.mubr.bf16.gmra.mrb[160].mxu1 %v14284_v10  ;;  %v2985_v28 = vsel %vm17551_vm8, %v2983_v59, %v2984_v13  ;;  %v3358_v58 = vsel %vm17373_vm5, %v14269_v63, %v3357_v24  ;;  %v14211_v10 = vld [vmem:[%s17329_s16 + $0x28c] sm:$0xf]  ;;  %v14230_v13 = vrot.slane %v14210_v9, 9  ;;  %v3243_v59 = vld [vmem:[%s17329_s16 + $0x80] sm:$0xf]  ;;  %v16957_v63 = vld [vmem:[%s17329_s16 + $0x118] sm:$0xff]  }
 0x179   : > { %v15291_v26 = vpop.f32.mrb[60].mxu1  ;;  %v15355_v27 = vpop.f32.mrb[60].mxu0  ;;  %6668 = vmatprep.mubr.bf16.mxu0 %v16955_v62  ;;  %6765 = vmatprep.mubr.bf16.mxu1 %v16956_v61  ;;  %v3361_v2 = vsel %vm17373_vm5, %v3359_v56, %v3360_v7  ;;  %v14245_v6 = vcombine.low %v2982_v30, %v2985_v28  ;;  %v16958_v24 = vld [vmem:[%s17329_s16 + $0x84] sm:$0xff]   ;;  %v2991_v7 = vrot.slane %v14212_v5, 5  ;;  %v3364_v56 = vrot.slane %v3243_v59, 6 }
 0x17a   : > { %v15292_v15 = vpop.f32.mrb[61].mxu1  ;;  %v15356_v49 = vpop.f32.mrb[61].mxu0  ;;  %15783 = vmatprep.subr.bf16.mxu0 %v16959_v17 }
 0x17b   : > { %v15293_v38 = vadd.f32 %v15292_v15, %v15291_v26  ;;  %v15294_v41 = vpop.f32.mrb[62].mxu1  ;;  %v15357_v14 = vadd.f32 %v15356_v49, %v15355_v27  ;;  %v15358_v48 = vpop.f32.mrb[62].mxu0  ;;  %v3242_v26 = vld [vmem:[%s17329_s16 + $0x7c] sm:$0xc]  ;;  %v3244_v27 = vld [vmem:[%s17329_s16 + $0x84] sm:$0x3] }
 0x17c   : > { %v15295_v29 = vpop.f32.mrb[63].mxu1  ;;  %v15359_v12 = vpop.f32.mrb[63].mxu0  ;;  %v2988_v15 = vrot.slane %v14211_v10, 5 }
 0x17d   : > { %v18898_v31 = vadd.f32 %v15293_v38, %v6011_v43  ;;  %v18903_v16 = vadd.f32 %v15357_v14, %v18641_v44  ;;  %v15296_v62 = vadd.f32 %v15295_v29, %v15294_v41  ;;  %v15360_v61 = vadd.f32 %v15359_v12, %v15358_v48  ;;  %v16960_v41 = vld [vmem:[%s22111_s2 + $0x338] sm:$0xff]   ;;  %v16961_v48 = vld [vmem:[%s22111_s2 + $0x3c0] sm:$0xff]  }
 0x17e   : > { %v14270_v43 = vrot.slane %v3242_v26, 10  ;;  %v14285_v38 = vcombine.low %v3358_v58, %v3361_v2  ;;  %v3367_v44 = vrot.slane %v3244_v27, 6  ;;  %v2990_v28 = vrot.slane %v2988_v15, 4  ;;  %15784 = vmatpush3.bf16.msra.mxu0 %v16960_v41  ;;  %15881 = vmatprep.subr.bf16.mxu1 %v16961_v48  ;;  %v16964_v41 = vld [vmem:[%s17329_s16 + $0x98] sm:$0xff]  }
 0x17f   : > { %v18910_v49 = vadd.f32 %v15296_v62, %v6014_v36  ;;  %v18913_v30 = vadd.f32 %v15360_v61, %v18648_v42  ;;  %v3366_v14 = vrot.slane %v3364_v56, 4  ;;  %v6019_v36 = vadd.f32 %v18816_v57, %v18420_v32 }
 0x180   : > { %v6022_v42 = vadd.f32 %v18816_v57, %v18437_v53  ;;  %v2989_v58 = vsel %vm17551_vm8, %v14230_v13, %v2988_v15  ;;  %6669 = vmatmul.mubr.bf16.gmra.mrb[164].mxu0 %v14245_v6  ;;  %6766 = vmatmul.mubr.bf16.gmra.mrb[164].mxu1 %v14285_v38  ;;  %v2992_v5 = vsel %vm17551_vm8, %v2990_v28, %v2991_v7  ;;  %v16962_v13 = vld [vmem:[%s22111_s2 + $0x380] sm:$0xff]  }
 0x181   : > { %v15297_v17 = vpop.f32.mrb[64].mxu1  ;;  %v15361_v29 = vpop.f32.mrb[64].mxu0  ;;  %v3365_v32 = vsel %vm17373_vm5, %v14270_v43, %v3364_v56  ;;  %6676 = vmatprep.mubr.bf16.mxu0 %v16957_v63  ;;  %6773 = vmatprep.mubr.bf16.mxu1 %v16958_v24  ;;  %v3368_v6 = vsel %vm17373_vm5, %v3366_v14, %v3367_v44  ;;  %v14213_v43 = vld [vmem:[%s17329_s16 + $0x29c] sm:$0xe]  ;;  %v14214_v56 = vld [vmem:[%s17329_s16 + $0x2a0] sm:$0xf]  ;;  %v14246_v38 = vcombine.low %v2989_v58, %v2992_v5 }
 0x182   : > { %v15298_v9 = vpop.f32.mrb[65].mxu1  ;;  %v15362_v12 = vpop.f32.mrb[65].mxu0  ;;  %15882 = vmatpush3.bf16.msra.mxu1 %v16962_v13  ;;  %v16963_v24 = vld [vmem:[%s17329_s16 + $0x12c] sm:$0xff]   ;;  %v14215_v28 = vld [vmem:[%s17329_s16 + $0x2a4] sm:$0x1]  ;;  %v2995_v44 = vrot.slane %v14214_v56, 5  ;;  %v6027_v5 = vadd.f32 %v18816_v57, %v18447_v4 }
 0x183   : > { %v15299_v2 = vadd.f32 %v15298_v9, %v15297_v17  ;;  %v15300_v10 = vpop.f32.mrb[66].mxu1  ;;  %v15363_v62 = vadd.f32 %v15362_v12, %v15361_v29  ;;  %v15364_v61 = vpop.f32.mrb[66].mxu0  ;;  %v3245_v14 = vld [vmem:[%s17329_s16 + $0x90] sm:$0xc]  ;;  %v14286_v17 = vcombine.low %v3365_v32, %v3368_v6  ;;  %v2998_v29 = vrot.slane %v14215_v28, 5 }
 0x184   : > { %v15301_v53 = vpop.f32.mrb[67].mxu1  ;;  %v15365_v27 = vpop.f32.mrb[67].mxu0  ;;  %v3246_v9 = vld [vmem:[%s17329_s16 + $0x94] sm:$0xf]  ;;  %v14271_v12 = vrot.slane %v3245_v14, 10 }
 0x185   : > { %v18936_v26 = vadd.f32 %v15299_v2, %v6019_v36  ;;  %v15302_v59 = vadd.f32 %v15301_v53, %v15300_v10  ;;  %v18939_v15 = vadd.f32 %v15363_v62, %v18667_v39  ;;  %v15366_v7 = vadd.f32 %v15365_v27, %v15364_v61  ;;  %v3247_v36 = vld [vmem:[%s17329_s16 + $0x98] sm:$0x3]  ;;  %v3248_v27 = vld [vmem:[%s17329_s16 + $0xa4] sm:$0xc] }
 0x186   : > { %v14231_v39 = vrot.slane %v14213_v43, 9  ;;  %v2997_v2 = vrot.slane %v2995_v44, 4  ;;  %v3371_v58 = vrot.slane %v3246_v9, 6 }
 0x187   : > { %v18943_v63 = vadd.f32 %v15302_v59, %v6022_v42  ;;  %v18950_v48 = vadd.f32 %v15366_v7, %v18679_v54  ;;  %v3374_v42 = vrot.slane %v3247_v36, 6  ;;  %v3249_v7 = vld [vmem:[%s17329_s16 + $0xa8] sm:$0xf]  ;;  %v16965_v36 = vld [vmem:[%s17329_s16 + $0xac] sm:$0xff]  }
 0x188   : > { %v3373_v62 = vrot.slane %v3371_v58, 4  ;;  %6677 = vmatmul.mubr.bf16.gmra.mrb[168].mxu0 %v14246_v38  ;;  %6774 = vmatmul.mubr.bf16.gmra.mrb[168].mxu1 %v14286_v17  ;;  %v2996_v54 = vsel %vm17551_vm8, %v14231_v39, %v2995_v44  ;;  %v2999_v53 = vsel %vm17551_vm8, %v2997_v2, %v2998_v29  ;;  %v3372_v4 = vsel %vm17373_vm5, %v14271_v12, %v3371_v58  ;;  %v3250_v44 = vld [vmem:[%s17329_s16 + $0xac] sm:$0x3]  ;;  %v16966_v2 = vld [vmem:[%s17329_s16 + $0xfc] sm:$0xff]  }
 0x189   : > { %v15303_v10 = vpop.f32.mrb[68].mxu1  ;;  %v15367_v61 = vpop.f32.mrb[68].mxu0  ;;  %6684 = vmatprep.mubr.bf16.mxu0 %v16963_v24  ;;  %6781 = vmatprep.mubr.bf16.mxu1 %v16964_v41  ;;  %v3378_v14 = vrot.slane %v3249_v7, 6  ;;  %v6030_v17 = vadd.f32 %v18816_v57, %v18465_v35  ;;  %v14272_v12 = vrot.slane %v3248_v27, 10  ;;  %v16968_v58 = vld [vmem:[%s22111_s2 + $0x400] sm:$0xff]   ;;  %v3381_v35 = vrot.slane %v3250_v44, 6 }
 0x18a   : > { %v15304_v32 = vpop.f32.mrb[69].mxu1  ;;  %v15368_v6 = vpop.f32.mrb[69].mxu0  ;;  %v3375_v43 = vsel %vm17373_vm5, %v3373_v62, %v3374_v42  ;;  %v14247_v42 = vcombine.low %v2996_v54, %v2999_v53  ;;  %16561 = vmatprep.subr.bf16.mxu0 %v16968_v58  ;;  %v6038_v44 = vadd.f32 %v18816_v57, %v18492_v3 }
 0x18b   : > { %v15305_v13 = vadd.f32 %v15304_v32, %v15303_v10  ;;  %v15306_v59 = vpop.f32.mrb[70].mxu1  ;;  %v15369_v56 = vadd.f32 %v15368_v6, %v15367_v61  ;;  %v15370_v38 = vpop.f32.mrb[70].mxu0  ;;  %v14287_v10 = vcombine.low %v3372_v4, %v3375_v43  ;;  %v3380_v61 = vrot.slane %v3378_v14, 4  ;;  %v16970_v32 = vld [vmem:[%s22111_s2 + $0x388] sm:$0xff]  }
 0x18c   : > { %v15307_v28 = vpop.f32.mrb[71].mxu1  ;;  %v15371_v24 = vpop.f32.mrb[71].mxu0  ;;  %v6035_v6 = vadd.f32 %v18816_v57, %v18479_v52  ;;  %v3379_v7 = vsel %vm17373_vm5, %v14272_v12, %v3378_v14  ;;  %v3251_v52 = vld [vmem:[%s17329_s16 + $0xb8] sm:$0xc] }
 0x18d   : > { %v18969_v39 = vadd.f32 %v15305_v13, %v6027_v5  ;;  %v15308_v29 = vadd.f32 %v15307_v28, %v15306_v59  ;;  %v18972_v41 = vadd.f32 %v15369_v56, %v18705_v51  ;;  %v15372_v9 = vadd.f32 %v15371_v24, %v15370_v38  ;;  %v16969_v5 = vld [vmem:[%s22111_s2 + $0x3c8] sm:$0xff]   ;;  %v3252_v28 = vld [vmem:[%s17329_s16 + $0xbc] sm:$0xf] }
 0x18e   : > { %15883 = vmatprep.subr.bf16.mxu1 %v16969_v5  ;;  %v3382_v4 = vsel %vm17373_vm5, %v3380_v61, %v3381_v35  ;;  %v3385_v14 = vrot.slane %v3252_v28, 6  ;;  %v16971_v35 = vld [vmem:[%s17329_s16 + $0xc0] sm:$0xff]   ;;  %v14273_v3 = vrot.slane %v3251_v52, 10 }
 0x18f   : > { %v18979_v62 = vadd.f32 %v15308_v29, %v6030_v17  ;;  %v18985_v51 = vadd.f32 %v15372_v9, %v18714_v1  ;;  %15884 = vmatpush3.bf16.msra.mxu1 %v16970_v32  ;;  %v3253_v9 = vld [vmem:[%s17329_s16 + $0xc0] sm:$0x3]  ;;  %v16973_v52 = vld [vmem:[%s17329_s16 + $0x104] sm:$0xff]  }
 0x190   : > { %6685 = vmatmul.mubr.bf16.gmra.mrb[172].mxu0 %v14247_v42  ;;  %6782 = vmatmul.mubr.bf16.gmra.mrb[172].mxu1 %v14287_v10  ;;  %v14288_v42 = vcombine.low %v3379_v7, %v3382_v4  ;;  %v3387_v61 = vrot.slane %v3385_v14, 4  ;;  %v3388_v32 = vrot.slane %v3253_v9, 6  ;;  %v16978_v4 = vld [vmem:[%s22111_s2 + $0x3d0] sm:$0xff]  }
 0x191   : > { %v15309_v13 = vpop.f32.mrb[72].mxu1  ;;  %v15373_v54 = vpop.f32.mrb[72].mxu0  ;;  %6789 = vmatprep.mubr.bf16.mxu1 %v16965_v36  ;;  %6886 = vmatprep.mubr.bf16.mxu0 %v16966_v2  ;;  %v16967_v36 = vld [vmem:[%s17329_s16 + $0xf0] sm:$0xff]  }
 0x192   : > { %v15310_v53 = vpop.f32.mrb[73].mxu1  ;;  %v15374_v59 = vpop.f32.mrb[73].mxu0  ;;  %15885 = vmatprep.subr.bf16.mxu1 %v16978_v4  ;;  %v16976_v4 = vld [vmem:[%s17329_s16 + $0x118] sm:$0xff]  }
 0x193   : > { %v15311_v1 = vadd.f32 %v15310_v53, %v15309_v13  ;;  %v15312_v27 = vpop.f32.mrb[74].mxu1  ;;  %v15375_v43 = vadd.f32 %v15374_v59, %v15373_v54  ;;  %v15376_v56 = vpop.f32.mrb[74].mxu0  ;;  %v3255_v13 = vld [vmem:[%s17329_s16 + $0xd0] sm:$0xf]  ;;  %v16977_v53 = vld [vmem:[%s22111_s2 + $0x408] sm:$0xff]  }
 0x194   : > { %v15313_v38 = vpop.f32.mrb[75].mxu1  ;;  %v15377_v24 = vpop.f32.mrb[75].mxu0  ;;  %v16972_v54 = vld [vmem:[%s17329_s16 + $0x110] sm:$0xff]   ;;  %v3392_v59 = vrot.slane %v3255_v13, 6  ;;  %v3258_v13 = vld [vmem:[%s17329_s16 + $0xe4] sm:$0xf] }
 0x195   : > { %v19000_v17 = vadd.f32 %v15311_v1, %v6035_v6  ;;  %v15314_v29 = vadd.f32 %v15313_v38, %v15312_v27  ;;  %v19005_v2 = vadd.f32 %v15375_v43, %v18735_v37  ;;  %v15378_v12 = vadd.f32 %v15377_v24, %v15376_v56  ;;  %v3254_v6 = vld [vmem:[%s17329_s16 + $0xcc] sm:$0xc]  ;;  %v3256_v1 = vld [vmem:[%s17329_s16 + $0xd4] sm:$0x3] }
 0x196   : > { %v3389_v27 = vsel %vm17373_vm5, %v3387_v61, %v3388_v32  ;;  %v6043_v43 = vadd.f32 %v18816_v57, %v18499_v19  ;;  %v6046_v24 = vadd.f32 %v18816_v57, %v18525_v47  ;;  %v3394_v61 = vrot.slane %v3392_v59, 4  ;;  %v3257_v57 = vld [vmem:[%s17329_s16 + $0xe0] sm:$0xc] }
 0x197   : > { %v19007_v10 = vadd.f32 %v15314_v29, %v6038_v44  ;;  %v19011_v5 = vadd.f32 %v15378_v12, %v18745_v25  ;;  %v3386_v25 = vsel %vm17373_vm5, %v14273_v3, %v3385_v14  ;;  %v16974_v29 = vld [vmem:[%s17329_s16 + $0xd4] sm:$0xff]   ;;  %v16975_v12 = vld [vmem:[%s17329_s16 + $0x124] sm:$0xff]   ;;  %v14274_v3 = vrot.slane %v3254_v6, 10 }
 0x198   : > { %6790 = vmatmul.mubr.bf16.gmra.mrb[176].mxu1 %v14288_v42  ;;  %6887 = vmatmul.mubr.bf16.vlgmr.msra.gmra.mrb[176].mxu0 %v16967_v36  ;;  %v14289_v19 = vcombine.low %v3386_v25, %v3389_v27  ;;  %v3395_v32 = vrot.slane %v3256_v1, 6  ;;  %v3259_v27 = vld [vmem:[%s17329_s16 + $0xe8] sm:$0x3]  ;;  %v3399_v6 = vrot.slane %v3258_v13, 6 }
 0x199   : > { %v15315_v37 = vpop.f32.mrb[76].mxu1  ;;  %16562 = vmatpush3.bf16.msra.mxu0 %v16968_v58  ;;  %6797 = vmatprep.mubr.bf16.mxu1 %v16971_v35  ;;  %v16979_v58 = vld [vmem:[%s22111_s2 + $0x390] sm:$0xff]   ;;  %v15379_v28 = vpop.f32.mrb[76].mxu0 }
 0x19a   : > { %v15316_v7 = vpop.f32.mrb[77].mxu1  ;;  %6894 = vmatprep.mubr.bf16.mxu0 %v16972_v54  ;;  %16563 = vmatprep.subr.bf16.mxu0 %v16977_v53  ;;  %v15380_v14 = vpop.f32.mrb[77].mxu0 }
 0x19b   : > { %v15317_v56 = vadd.f32 %v15316_v7, %v15315_v37  ;;  %v15318_v38 = vpop.f32.mrb[78].mxu1  ;;  %15886 = vmatpush3.bf16.msra.mxu1 %v16979_v58  ;;  %v15381_v42 = vadd.f32 %v15380_v14, %v15379_v28  ;;  %v15382_v35 = vpop.f32.mrb[78].mxu0  ;;  %v3396_v7 = vsel %vm17373_vm5, %v3394_v61, %v3395_v32  ;;  %v16980_v58 = vld [vmem:[%s17329_s16 + $0xe8] sm:$0xff]   ;;  %v19064_v28 = vld [vmem:[%s17329_s16 + $0xf8] sm:$0xf] }
 0x19c   : > { %v15319_v44 = vpop.f32.mrb[79].mxu1  ;;  %v15383_v47 = vpop.f32.mrb[79].mxu0 }
 0x19d   : > { %v19036_v9 = vadd.f32 %v15317_v56, %v6043_v43  ;;  %v15320_v36 = vadd.f32 %v15319_v44, %v15318_v38  ;;  %16564 = vmatpush3.bf16.msra.mxu0 %v16977_v53  ;;  %v19044_v37 = vadd.f32 %v15381_v42, %v18767_v0  ;;  %v15384_v25 = vadd.f32 %v15383_v47, %v15382_v35  ;;  %v16986_v53 = vld [vmem:[%s22111_s2 + $0x410] sm:$0xff]   ;;  %v16987_v38 = vld [vmem:[%s22111_s2 + $0x3d8] sm:$0xff]  }
 0x19e   : > { %v3393_v0 = vsel %vm17373_vm5, %v14274_v3, %v3392_v59  ;;  %v14275_v43 = vrot.slane %v3257_v57, 10  ;;  %v3402_v56 = vrot.slane %v3259_v27, 6  ;;  %16565 = vmatprep.subr.bf16.mxu0 %v16986_v53  ;;  %v16988_v59 = vld [vmem:[%s22111_s2 + $0x398] sm:$0xff]   ;;  %15887 = vmatprep.subr.bf16.mxu1 %v16987_v38  ;;  %v3406_v57 = vrot.slane %v19064_v28, 6 }
 0x19f   : > { %v19040_v54 = vadd.f32 %v15320_v36, %v6046_v24  ;;  %v19051_v1 = vadd.f32 %v15384_v25, %v18779_v34  ;;  %v14290_v44 = vcombine.low %v3393_v0, %v3396_v7  ;;  %v3401_v24 = vrot.slane %v3399_v6, 4  ;;  %v3262_v42 = vld [vmem:[%s17329_s16 + $0xfc] sm:$0x3]  ;;  %15888 = vmatpush3.bf16.msra.mxu1 %v16988_v59 }
 0x1a0   : > { %6798 = vmatmul.mubr.bf16.gmra.mrb[180].mxu1 %v14289_v19  ;;  %6895 = vmatmul.mubr.bf16.gmra.mrb[180].mxu0 %v16973_v52  ;;  %v16981_v52 = vld [vmem:[%s17329_s16 + $0x138] sm:$0xff]   ;;  %v3400_v27 = vsel %vm17373_vm5, %v14275_v43, %v3399_v6  ;;  %v3408_v59 = vrot.slane %v3406_v57, 4 }
 0x1a1   : > { %6805 = vmatprep.mubr.bf16.mxu1 %v16974_v29  ;;  %6902 = vmatprep.mubr.bf16.mxu0 %v16975_v12  ;;  %v15385_v34 = vpop.f32.mrb[80].mxu0  ;;  %v15449_v19 = vpop.f32.mrb[80].mxu1  ;;  %v3260_v12 = vld [vmem:[%s17329_s16 + $0xf4] sm:$0xc]  ;;  %v16983_v43 = vld [vmem:[%s17329_s16 + $0xfc] sm:$0xff]  }
 0x1a2   : > { %16566 = vmatpush3.bf16.msra.mxu0 %v16986_v53  ;;  %v15386_v29 = vpop.f32.mrb[81].mxu0  ;;  %v15450_v35 = vpop.f32.mrb[81].mxu1  ;;  %v3403_v53 = vsel %vm17373_vm5, %v3401_v24, %v3402_v56  ;;  %v14276_v38 = vrot.slane %v3260_v12, 10  ;;  %v19091_v56 = vld [vmem:[%s17329_s16 + $0x108] sm:$0xc] }
 0x1a3   : > { %v15387_v14 = vadd.f32 %v15386_v29, %v15385_v34  ;;  %v15388_v36 = vpop.f32.mrb[82].mxu0  ;;  %v15451_v32 = vadd.f32 %v15450_v35, %v15449_v19  ;;  %v15452_v13 = vpop.f32.mrb[82].mxu1  ;;  %v3409_v34 = vrot.slane %v3262_v42, 6  ;;  %v16984_v19 = vld [vmem:[%s17329_s16 + $0x14c] sm:$0xff]  }
 0x1a4   : > { %v15389_v3 = vpop.f32.mrb[83].mxu0  ;;  %v15453_v25 = vpop.f32.mrb[83].mxu1 }
 0x1a5   : > { %v19072_v61 = vadd.f32 %v15387_v14, %v18794_v23  ;;  %v15390_v47 = vadd.f32 %v15389_v3, %v15388_v36  ;;  %v19080_v23 = vadd.f32 %v15451_v32, %v18800_v33  ;;  %v15454_v7 = vadd.f32 %v15453_v25, %v15452_v13  ;;  %v19094_v33 = vld [vmem:[%s17329_s16 + $0x10c] sm:$0xf]  ;;  %v3265_v32 = vld [vmem:[%s17329_s16 + $0x110] sm:$0x3] }
 0x1a6   : > { %v3413_v13 = vrot.slane %v19094_v33, 6 }
 0x1a7   : > { %v19083_v0 = vadd.f32 %v15390_v47, %v18804_v21  ;;  %v19087_v28 = vadd.f32 %v15454_v7, %v18809_v50  ;;  %v14291_v21 = vcombine.low %v3400_v27, %v3403_v53  ;;  %v16996_v50 = vld [vmem:[%s22111_s2 + $0x418] sm:$0xff]   ;;  %v16997_v47 = vld [vmem:[%s22111_s2 + $0x3a0] sm:$0xff]   ;;  %v3410_v27 = vsel %vm17373_vm5, %v3408_v59, %v3409_v34  ;;  %v16998_v7 = vld [vmem:[%s22111_s2 + $0x3e8] sm:$0xff]  }
 0x1a8   : > { %6806 = vmatmul.mubr.bf16.gmra.mrb[184].mxu1 %v14290_v44  ;;  %6903 = vmatmul.mubr.bf16.gmra.mrb[184].mxu0 %v16976_v4  ;;  %v16982_v4 = vld [vmem:[%s17329_s16 + $0x12c] sm:$0xff]   ;;  %v14277_v53 = vrot.slane %v19091_v56, 10  ;;  %v3416_v34 = vrot.slane %v3265_v32, 6 }
 0x1a9   : > { %6813 = vmatprep.mubr.bf16.mxu1 %v16980_v58  ;;  %6910 = vmatprep.mubr.bf16.mxu0 %v16981_v52  ;;  %v15391_v6 = vpop.f32.mrb[84].mxu0  ;;  %v16995_v58 = vld [vmem:[%s22111_s2 + $0x3e0] sm:$0xff]   ;;  %v15455_v52 = vpop.f32.mrb[84].mxu1  ;;  %v16999_v59 = vld [vmem:[%s22111_s2 + $0x3a8] sm:$0xff]   ;;  %v16989_v56 = vld [vmem:[%s17329_s16 + $0x110] sm:$0xff]  }
 0x1aa   : > { %v15392_v44 = vpop.f32.mrb[85].mxu0  ;;  %v15456_v14 = vpop.f32.mrb[85].mxu1  ;;  %15889 = vmatprep.subr.bf16.mxu1 %v16995_v58  ;;  %16567 = vmatprep.subr.bf16.mxu0 %v16996_v50 }
 0x1ab   : > { %v15393_v29 = vadd.f32 %v15392_v44, %v15391_v6  ;;  %v15394_v24 = vpop.f32.mrb[86].mxu0  ;;  %v15457_v42 = vadd.f32 %v15456_v14, %v15455_v52  ;;  %v15458_v35 = vpop.f32.mrb[86].mxu1  ;;  %15890 = vmatpush3.bf16.msra.mxu1 %v16997_v47  ;;  %16568 = vmatpush3.bf16.msra.mxu0 %v16996_v50  ;;  %v3266_v50 = vld [vmem:[%s17329_s16 + $0x11c] sm:$0xc]  ;;  %v3268_v14 = vld [vmem:[%s17329_s16 + $0x124] sm:$0x3] }
 0x1ac   : > { %v15395_v36 = vpop.f32.mrb[87].mxu0  ;;  %v15459_v25 = vpop.f32.mrb[87].mxu1  ;;  %15891 = vmatprep.subr.bf16.mxu1 %v16998_v7  ;;  %v17003_v47 = vld [vmem:[%s22111_s2 + $0x3f0] sm:$0xff]  }
 0x1ad   : > { %v19104_v12 = vadd.f32 %v15393_v29, %v18835_v40  ;;  %v15396_v3 = vadd.f32 %v15395_v36, %v15394_v24  ;;  %v3407_v40 = vsel %vm17373_vm5, %v14276_v38, %v3406_v57  ;;  %v19120_v6 = vadd.f32 %v15457_v42, %v18843_v11  ;;  %v19126_v57 = vld [vmem:[%s17329_s16 + $0x120] sm:$0xf] }
 0x1ae   : > { %v15460_v33 = vadd.f32 %v15459_v25, %v15458_v35  ;;  %v16985_v38 = vld [vmem:[%s17329_s16 + $0x140] sm:$0xff]   ;;  %v14292_v44 = vcombine.low %v3407_v40, %v3410_v27  ;;  %v3420_v52 = vrot.slane %v19126_v57, 6  ;;  %v3414_v40 = vsel %vm17373_vm5, %v14277_v53, %v3413_v13  ;;  %v17004_v27 = vld [vmem:[%s22111_s2 + $0x3b0] sm:$0xff]  }
 0x1af   : > { %15892 = vmatpush3.bf16.msra.mxu1 %v16999_v59  ;;  %v14278_v53 = vrot.slane %v3266_v50, 10  ;;  %v3271_v50 = vld [vmem:[%s17329_s16 + $0x138] sm:$0x3] }
 0x1b0   : > { %6814 = vmatmul.mubr.bf16.gmra.mrb[188].mxu1 %v14291_v21  ;;  %6911 = vmatmul.mubr.bf16.gmra.mrb[188].mxu0 %v16982_v4  ;;  %v19123_v4 = vadd.f32 %v15396_v3, %v18847_v8  ;;  %v19133_v11 = vadd.f32 %v15460_v33, %v18850_v60  ;;  %v16990_v21 = vld [vmem:[%s17329_s16 + $0x160] sm:$0xff]  }
 0x1b1   : > { %6821 = vmatprep.mubr.bf16.mxu1 %v16983_v43  ;;  %6918 = vmatprep.mubr.bf16.mxu0 %v16984_v19  ;;  %v15397_v8 = vpop.f32.mrb[88].mxu0  ;;  %v3415_v43 = vrot.slane %v3413_v13, 4  ;;  %v15461_v29 = vpop.f32.mrb[88].mxu1  ;;  %v16991_v13 = vld [vmem:[%s17329_s16 + $0x154] sm:$0xff]  }
 0x1b2   : > { %v15398_v58 = vpop.f32.mrb[89].mxu0  ;;  %v15462_v36 = vpop.f32.mrb[89].mxu1  ;;  %15893 = vmatprep.subr.bf16.mxu1 %v17003_v47 }
 0x1b3   : > { %v15399_v24 = vadd.f32 %v15398_v58, %v15397_v8  ;;  %v15400_v19 = vpop.f32.mrb[90].mxu0  ;;  %v15463_v35 = vadd.f32 %v15462_v36, %v15461_v29  ;;  %v15464_v3 = vpop.f32.mrb[90].mxu1  ;;  %v16992_v8 = vld [vmem:[%s17329_s16 + $0x124] sm:$0xff]   ;;  %15894 = vmatpush3.bf16.msra.mxu1 %v17004_v27  ;;  %v3422_v29 = vrot.slane %v3420_v52, 4 }
 0x1b4   : > { %v15401_v42 = vpop.f32.mrb[91].mxu0  ;;  %v15465_v25 = vpop.f32.mrb[91].mxu1 }
 0x1b5   : > { %v19141_v60 = vadd.f32 %v15399_v24, %v18864_v46  ;;  %v15402_v32 = vadd.f32 %v15401_v42, %v15400_v19  ;;  %v3417_v46 = vsel %vm17373_vm5, %v3415_v43, %v3416_v34  ;;  %v19154_v7 = vadd.f32 %v15463_v35, %v18869_v55  ;;  %v17005_v34 = vld [vmem:[%s22111_s2 + $0x3f8] sm:$0xff]  }
 0x1b6   : > { %v15466_v57 = vadd.f32 %v15465_v25, %v15464_v3  ;;  %v16993_v43 = vld [vmem:[%s17329_s16 + $0x174] sm:$0xff]   ;;  %15895 = vmatprep.subr.bf16.mxu1 %v17005_v34  ;;  %v3421_v25 = vsel %vm17373_vm5, %v14278_v53, %v3420_v52  ;;  %v14456_v34 = vld [vmem:[%s17329_s16 + $0x1e4] sm:$0xc]  ;;  %v14457_v52 = vld [vmem:[%s17329_s16 + $0x1e8] sm:$0xf] }
 0x1b7   : > { %v19157_v33 = vadd.f32 %v15402_v32, %v18875_v20  ;;  %v19169_v20 = vld [vmem:[%s17329_s16 + $0x130] sm:$0xc]  ;;  %v14458_v53 = vld [vmem:[%s17329_s16 + $0x1ec] sm:$0x3] }
 0x1b8   : > { %6822 = vmatmul.mubr.bf16.gmra.mrb[192].mxu1 %v14292_v44  ;;  %6919 = vmatmul.mubr.bf16.gmra.mrb[192].mxu0 %v16985_v38  ;;  %v3423_v38 = vrot.slane %v3268_v14, 6  ;;  %v19164_v59 = vadd.f32 %v15466_v57, %v18880_v18  ;;  %v19172_v44 = vld [vmem:[%s17329_s16 + $0x134] sm:$0xf] }
 0x1b9   : > { %6829 = vmatprep.mubr.bf16.mxu1 %v16989_v56  ;;  %6926 = vmatprep.mubr.bf16.mxu0 %v16990_v21  ;;  %v15403_v55 = vpop.f32.mrb[92].mxu0  ;;  %v17006_v56 = vld [vmem:[%s22111_s2 + $0x3b8] sm:$0xff]   ;;  %v14293_v21 = vcombine.low %v3414_v40, %v3417_v46  ;;  %v15467_v24 = vpop.f32.mrb[92].mxu1  ;;  %v3427_v46 = vrot.slane %v19172_v44, 6 }
 0x1ba   : > { %v15404_v58 = vpop.f32.mrb[93].mxu0  ;;  %v15468_v14 = vpop.f32.mrb[93].mxu1  ;;  %15896 = vmatpush3.bf16.msra.mxu1 %v17006_v56  ;;  %v3424_v40 = vsel %vm17373_vm5, %v3422_v29, %v3423_v38  ;;  %v3430_v38 = vrot.slane %v3271_v50, 6  ;;  %v4187_v56 = vrot.slane %v14457_v52, 6  ;;  %v17000_v44 = vld [vmem:[%s17329_s16 + $0x138] sm:$0xff]  }
 0x1bb   : > { %v15405_v19 = vadd.f32 %v15404_v58, %v15403_v55  ;;  %v15406_v18 = vpop.f32.mrb[94].mxu0  ;;  %v15469_v35 = vadd.f32 %v15468_v14, %v15467_v24  ;;  %v15470_v3 = vpop.f32.mrb[94].mxu1  ;;  %v16994_v55 = vld [vmem:[%s17329_s16 + $0x168] sm:$0xff]  }
 0x1bc   : > { %v15407_v36 = vpop.f32.mrb[95].mxu0  ;;  %v15471_v47 = vpop.f32.mrb[95].mxu1  ;;  %v17001_v58 = vld [vmem:[%s17329_s16 + $0x188] sm:$0xff]   ;;  %v4189_v14 = vrot.slane %v4187_v56, 4 }
 0x1bd   : > { %v19179_v42 = vadd.f32 %v15405_v19, %v18898_v31  ;;  %v15408_v32 = vadd.f32 %v15407_v36, %v15406_v18  ;;  %v14279_v31 = vrot.slane %v19169_v20, 10  ;;  %v19188_v27 = vadd.f32 %v15469_v35, %v18903_v16  ;;  %v17010_v16 = vld [vmem:[%s22111_s2 + $0x420] sm:$0xff]  }
 0x1be   : > { %16569 = vmatprep.subr.bf16.mxu0 %v17010_v16  ;;  %v4190_v36 = vrot.slane %v14458_v53, 6  ;;  %v14461_v53 = vld [vmem:[%s17329_s16 + $0x200] sm:$0x3] }
 0x1bf   : > { %v19191_v57 = vadd.f32 %v15408_v32, %v18910_v49  ;;  %v14294_v49 = vcombine.low %v3421_v25, %v3424_v40  ;;  %16570 = vmatpush3.bf16.msra.mxu0 %v17010_v16  ;;  %v14459_v25 = vld [vmem:[%s17329_s16 + $0x1f8] sm:$0xc]  ;;  %v14460_v40 = vld [vmem:[%s17329_s16 + $0x1fc] sm:$0xf]  ;;  %v3428_v52 = vsel %vm17373_vm5, %v14279_v31, %v3427_v46 }
 0x1c0   : > { %6830 = vmatmul.mubr.bf16.gmra.mrb[196].mxu1 %v14293_v21  ;;  %6927 = vmatmul.mubr.bf16.gmra.mrb[196].mxu0 %v16991_v13  ;;  %v15472_v13 = vadd.f32 %v15471_v47, %v15470_v3  ;;  %v4191_v31 = vsel %vm17373_vm5, %v4189_v14, %v4190_v36  ;;  %v14462_v14 = vld [vmem:[%s17329_s16 + $0x20c] sm:$0xc]  ;;  %v14463_v36 = vld [vmem:[%s17329_s16 + $0x210] sm:$0xf] }
 0x1c1   : > { %6837 = vmatprep.mubr.bf16.mxu1 %v16992_v8  ;;  %6934 = vmatprep.mubr.bf16.mxu0 %v16993_v43  ;;  %v15409_v21 = vpop.f32.mrb[96].mxu0  ;;  %v3429_v8 = vrot.slane %v3427_v46, 4  ;;  %v15473_v43 = vpop.f32.mrb[96].mxu1 }
 0x1c2   : > { %v19198_v20 = vadd.f32 %v15472_v13, %v18913_v30  ;;  %v15410_v29 = vpop.f32.mrb[97].mxu0  ;;  %v15474_v18 = vpop.f32.mrb[97].mxu1  ;;  %v14504_v30 = vrot.slane %v14456_v34, 10 }
 0x1c3   : > { %v15411_v24 = vadd.f32 %v15410_v29, %v15409_v21  ;;  %v15412_v19 = vpop.f32.mrb[98].mxu0  ;;  %v15475_v3 = vadd.f32 %v15474_v18, %v15473_v43  ;;  %v15476_v32 = vpop.f32.mrb[98].mxu1  ;;  %v3431_v34 = vsel %vm17373_vm5, %v3429_v8, %v3430_v38  ;;  %v4194_v21 = vrot.slane %v14460_v40, 6  ;;  %v14464_v40 = vld [vmem:[%s17329_s16 + $0x214] sm:$0x3] }
 0x1c4   : > { %v15413_v50 = vpop.f32.mrb[99].mxu0  ;;  %v15477_v13 = vpop.f32.mrb[99].mxu1  ;;  %v14505_v43 = vrot.slane %v14459_v25, 10 }
 0x1c5   : > { %v19206_v35 = vadd.f32 %v15411_v24, %v18936_v26  ;;  %v15414_v47 = vadd.f32 %v15413_v50, %v15412_v19  ;;  %v19216_v26 = vadd.f32 %v15475_v3, %v18939_v15  ;;  %v15478_v29 = vadd.f32 %v15477_v13, %v15476_v32 }
 0x1c6   : > { %v14295_v15 = vcombine.low %v3428_v52, %v3431_v34  ;;  %v4196_v18 = vrot.slane %v4194_v21, 4 }
 0x1c7   : > { %v19219_v16 = vadd.f32 %v15414_v47, %v18943_v63  ;;  %v19226_v46 = vadd.f32 %v15478_v29, %v18950_v48  ;;  %v17007_v63 = vld [vmem:[%s17329_s16 + $0x19c] sm:$0xff]   ;;  %v17017_v48 = vld [vmem:[%s22111_s2 + $0x428] sm:$0xff]   ;;  %v17008_v29 = vld [vmem:[%s17329_s16 + $0x190] sm:$0xff]  }
 0x1c8   : > { %6838 = vmatmul.mubr.bf16.gmra.mrb[200].mxu1 %v14294_v49  ;;  %6935 = vmatmul.mubr.bf16.gmra.mrb[200].mxu0 %v16994_v55  ;;  %v4188_v55 = vsel %vm17373_vm5, %v14504_v30, %v4187_v56  ;;  %v17002_v49 = vld [vmem:[%s17329_s16 + $0x17c] sm:$0xff]  }
 0x1c9   : > { %6845 = vmatprep.mubr.bf16.mxu1 %v17000_v44  ;;  %6942 = vmatprep.mubr.bf16.mxu0 %v17001_v58  ;;  %v15415_v38 = vpop.f32.mrb[100].mxu0  ;;  %v4197_v44 = vrot.slane %v14461_v53, 6  ;;  %v15479_v58 = vpop.f32.mrb[100].mxu1  ;;  %v14520_v56 = vcombine.low %v4188_v55, %v4191_v31  ;;  %v4195_v55 = vsel %vm17373_vm5, %v14505_v43, %v4194_v21  ;;  %v17024_v43 = vld [vmem:[%s22111_s2 + $0x430] sm:$0xff]  }
 0x1ca   : > { %v15416_v8 = vpop.f32.mrb[101].mxu0  ;;  %v15480_v50 = vpop.f32.mrb[101].mxu1  ;;  %16571 = vmatprep.subr.bf16.mxu0 %v17017_v48 }
 0x1cb   : > { %v15417_v24 = vadd.f32 %v15416_v8, %v15415_v38  ;;  %v15418_v19 = vpop.f32.mrb[102].mxu0  ;;  %v15481_v32 = vadd.f32 %v15480_v50, %v15479_v58  ;;  %v15482_v47 = vpop.f32.mrb[102].mxu1  ;;  %v4198_v31 = vsel %vm17373_vm5, %v4196_v18, %v4197_v44  ;;  %16572 = vmatpush3.bf16.msra.mxu0 %v17017_v48 }
 0x1cc   : > { %v15419_v30 = vpop.f32.mrb[103].mxu0  ;;  %v15483_v13 = vpop.f32.mrb[103].mxu1  ;;  %16573 = vmatprep.subr.bf16.mxu0 %v17024_v43 }
 0x1cd   : > { %v19236_v3 = vadd.f32 %v15417_v24, %v18969_v39  ;;  %v15420_v25 = vadd.f32 %v15419_v30, %v15418_v19  ;;  %v19240_v52 = vadd.f32 %v15481_v32, %v18972_v41  ;;  %v15484_v53 = vadd.f32 %v15483_v13, %v15482_v47  ;;  %v17009_v41 = vld [vmem:[%s17329_s16 + $0x1e0] sm:$0xff]  }
 0x1ce   : > { %v4201_v39 = vrot.slane %v14463_v36, 6  ;;  %v14465_v32 = vld [vmem:[%s17329_s16 + $0x220] sm:$0xc] }
 0x1cf   : > { %v19243_v34 = vadd.f32 %v15420_v25, %v18979_v62  ;;  %v19251_v38 = vadd.f32 %v15484_v53, %v18985_v51  ;;  %v14506_v62 = vrot.slane %v14462_v14, 10  ;;  %v14466_v14 = vld [vmem:[%s17329_s16 + $0x224] sm:$0xf]  ;;  %16574 = vmatpush3.bf16.msra.mxu0 %v17024_v43 }
 0x1d0   : > { %6846 = vmatmul.mubr.bf16.gmra.mrb[204].mxu1 %v14295_v15  ;;  %6943 = vmatmul.mubr.bf16.gmra.mrb[204].mxu0 %v17002_v49  ;;  %v17011_v49 = vld [vmem:[%s17329_s16 + $0x1b0] sm:$0xff]   ;;  %v4203_v21 = vrot.slane %v4201_v39, 4 }
 0x1d1   : > { %6950 = vmatprep.mubr.bf16.mxu0 %v17007_v63  ;;  %7047 = vmatprep.mubr.bf16.mxu1 %v14520_v56  ;;  %v15421_v15 = vpop.f32.mrb[104].mxu0  ;;  %v4204_v63 = vrot.slane %v14464_v40, 6  ;;  %v14521_v56 = vcombine.low %v4195_v55, %v4198_v31  ;;  %v14467_v40 = vld [vmem:[%s17329_s16 + $0x228] sm:$0x3]  ;;  %v4202_v13 = vsel %vm17373_vm5, %v14506_v62, %v4201_v39  ;;  %v17013_v31 = vld [vmem:[%s17329_s16 + $0x1f4] sm:$0xff]  }
 0x1d2   : > { %v15422_v8 = vpop.f32.mrb[105].mxu0 }
 0x1d3   : > { %v15423_v24 = vadd.f32 %v15422_v8, %v15421_v15  ;;  %v15424_v19 = vpop.f32.mrb[106].mxu0  ;;  %v4205_v53 = vsel %vm17373_vm5, %v4203_v21, %v4204_v63  ;;  %v17014_v15 = vld [vmem:[%s17329_s16 + $0x1c4] sm:$0xff]   ;;  %v14507_v8 = vrot.slane %v14465_v32, 10 }
 0x1d4   : > { %v15425_v51 = vpop.f32.mrb[107].mxu0 }
 0x1d5   : > { %v19259_v18 = vadd.f32 %v15423_v24, %v19000_v17  ;;  %v15426_v30 = vadd.f32 %v15425_v51, %v15424_v19  ;;  %v14469_v19 = vld [vmem:[%s17329_s16 + $0x238] sm:$0xf] }
 0x1d7   : > { %v19267_v25 = vadd.f32 %v15426_v30, %v19007_v10 }
 0x1d8   : > { %6951 = vmatmul.mubr.bf16.gmra.mrb[208].mxu0 %v17008_v29  ;;  %7048 = vmatmul.mubr.bf16.vlgmr.msra.gmra.mrb[208].mxu1 %v17009_v41  ;;  %v4208_v29 = vrot.slane %v14466_v14, 6 }
 0x1d9   : > { %v15485_v58 = vpop.f32.mrb[104].mxu1  ;;  %6958 = vmatprep.mubr.bf16.mxu0 %v17011_v49  ;;  %7055 = vmatprep.mubr.bf16.mxu1 %v14521_v56  ;;  %v14522_v49 = vcombine.low %v4202_v13, %v4205_v53 }
 0x1da   : > { %v15486_v44 = vpop.f32.mrb[105].mxu1  ;;  %v4210_v62 = vrot.slane %v4208_v29, 4 }
 0x1db   : > { %v15487_v48 = vadd.f32 %v15486_v44, %v15485_v58  ;;  %v15488_v50 = vpop.f32.mrb[106].mxu1  ;;  %v15427_v10 = vpop.f32.mrb[108].mxu0  ;;  %v4211_v58 = vrot.slane %v14467_v40, 6  ;;  %v4215_v40 = vrot.slane %v14469_v19, 6 }
 0x1dc   : > { %v15489_v36 = vpop.f32.mrb[107].mxu1  ;;  %v15428_v41 = vpop.f32.mrb[109].mxu0 }
 0x1dd   : > { %v19264_v47 = vadd.f32 %v15487_v48, %v19005_v2  ;;  %v15490_v17 = vadd.f32 %v15489_v36, %v15488_v50  ;;  %v17012_v2 = vld [vmem:[%s17329_s16 + $0x1a4] sm:$0xff]   ;;  %v15429_v24 = vadd.f32 %v15428_v41, %v15427_v10  ;;  %v15430_v39 = vpop.f32.mrb[110].mxu0  ;;  %v14468_v48 = vld [vmem:[%s17329_s16 + $0x234] sm:$0xc]  ;;  %v17031_v50 = vld [vmem:[%s22111_s2 + $0x438] sm:$0xff]   ;;  %v4212_v32 = vsel %vm17373_vm5, %v4210_v62, %v4211_v58 }
 0x1de   : > { %v15431_v56 = vpop.f32.mrb[111].mxu0  ;;  %v17015_v36 = vld [vmem:[%s17329_s16 + $0x1b8] sm:$0xff]   ;;  %16575 = vmatprep.subr.bf16.mxu0 %v17031_v50 }
 0x1df   : > { %v19275_v55 = vadd.f32 %v15490_v17, %v19011_v5  ;;  %v19282_v5 = vadd.f32 %v15429_v24, %v19036_v9  ;;  %v15432_v43 = vadd.f32 %v15431_v56, %v15430_v39  ;;  %v4209_v9 = vsel %vm17373_vm5, %v14507_v8, %v4208_v29  ;;  %v14470_v17 = vld [vmem:[%s17329_s16 + $0x23c] sm:$0x3]  ;;  %16576 = vmatpush3.bf16.msra.mxu0 %v17031_v50  ;;  %v14472_v39 = vld [vmem:[%s17329_s16 + $0x24c] sm:$0xf] }
 0x1e0   : > { %6959 = vmatmul.mubr.bf16.gmra.mrb[212].mxu0 %v17012_v2  ;;  %7056 = vmatmul.mubr.bf16.gmra.mrb[212].mxu1 %v17013_v31  ;;  %v17016_v2 = vld [vmem:[%s17329_s16 + $0x208] sm:$0xff]   ;;  %v17018_v31 = vld [vmem:[%s17329_s16 + $0x1d8] sm:$0xff]   ;;  %v14523_v41 = vcombine.low %v4209_v9, %v4212_v32  ;;  %v4217_v8 = vrot.slane %v4215_v40, 4  ;;  %v4222_v50 = vrot.slane %v14472_v39, 6  ;;  %v14473_v32 = vld [vmem:[%s17329_s16 + $0x250] sm:$0x3] }
 0x1e1   : > { %6966 = vmatprep.mubr.bf16.mxu0 %v17014_v15  ;;  %7063 = vmatprep.mubr.bf16.mxu1 %v14522_v49  ;;  %v19289_v30 = vadd.f32 %v15432_v43, %v19040_v54  ;;  %v14508_v54 = vrot.slane %v14468_v48, 10  ;;  %v4218_v15 = vrot.slane %v14470_v17, 6  ;;  %v17019_v9 = vld [vmem:[%s17329_s16 + $0x1cc] sm:$0xff]   ;;  %v17020_v17 = vld [vmem:[%s17329_s16 + $0x21c] sm:$0xff]  }
 0x1e3   : > { %v15491_v63 = vpop.f32.mrb[108].mxu1  ;;  %v4219_v48 = vsel %vm17373_vm5, %v4217_v8, %v4218_v15 }
 0x1e4   : > { %v15492_v21 = vpop.f32.mrb[109].mxu1 }
 0x1e5   : > { %v15493_v44 = vadd.f32 %v15492_v21, %v15491_v63  ;;  %v15494_v51 = vpop.f32.mrb[110].mxu1  ;;  %v14471_v63 = vld [vmem:[%s17329_s16 + $0x248] sm:$0xc] }
 0x1e6   : > { %v15495_v14 = vpop.f32.mrb[111].mxu1  ;;  %v15561_v29 = vpop.f32.mrb[112].mxu0 }
 0x1e7   : > { %v19298_v13 = vadd.f32 %v15493_v44, %v19044_v37  ;;  %v15496_v53 = vadd.f32 %v15495_v14, %v15494_v51  ;;  %v15562_v49 = vpop.f32.mrb[113].mxu0  ;;  %v4216_v51 = vsel %vm17373_vm5, %v14508_v54, %v4215_v40 }
 0x1e8   : > { %v15563_v24 = vadd.f32 %v15562_v49, %v15561_v29  ;;  %v15564_v37 = vpop.f32.mrb[114].mxu0  ;;  %6967 = vmatmul.mubr.bf16.gmra.mrb[216].mxu0 %v17015_v36  ;;  %7064 = vmatmul.mubr.bf16.gmra.mrb[216].mxu1 %v17016_v2  ;;  %v14509_v2 = vrot.slane %v14471_v63, 10  ;;  %v14524_v40 = vcombine.low %v4216_v51, %v4219_v48  ;;  %v4224_v29 = vrot.slane %v4222_v50, 4  ;;  %v14475_v49 = vld [vmem:[%s17329_s16 + $0x260] sm:$0xf] }
 0x1e9   : > { %v19303_v10 = vadd.f32 %v15496_v53, %v19051_v1  ;;  %v15565_v19 = vpop.f32.mrb[115].mxu0  ;;  %6974 = vmatprep.mubr.bf16.mxu0 %v17018_v31  ;;  %7071 = vmatprep.mubr.bf16.mxu1 %v14523_v41  ;;  %v17021_v53 = vld [vmem:[%s17329_s16 + $0x1ec] sm:$0xff]   ;;  %v4225_v41 = vrot.slane %v14473_v32, 6  ;;  %v17025_v32 = vld [vmem:[%s17329_s16 + $0x200] sm:$0xff]  }
 0x1ea   : > { %v19308_v1 = vadd.f32 %v15563_v24, %v19080_v23  ;;  %v15566_v43 = vadd.f32 %v15565_v19, %v15564_v37  ;;  %v4223_v39 = vsel %vm17373_vm5, %v14509_v2, %v4222_v50  ;;  %v17023_v50 = vld [vmem:[%s17329_s16 + $0x230] sm:$0xff]  }
 0x1eb   : > { %v15497_v58 = vpop.f32.mrb[112].mxu1 }
 0x1ec   : > { %v15498_v62 = vpop.f32.mrb[113].mxu1  ;;  %v19318_v23 = vadd.f32 %v15566_v43, %v19087_v28  ;;  %v14476_v43 = vld [vmem:[%s17329_s16 + $0x264] sm:$0x3] }
 0x1ed   : > { %v15499_v56 = vadd.f32 %v15498_v62, %v15497_v58  ;;  %v15500_v21 = vpop.f32.mrb[114].mxu1  ;;  %v14474_v62 = vld [vmem:[%s17329_s16 + $0x25c] sm:$0xc]  ;;  %v4232_v2 = vrot.slane %v14476_v43, 6 }
 0x1ee   : > { %v15501_v44 = vpop.f32.mrb[115].mxu1  ;;  %v15567_v54 = vpop.f32.mrb[116].mxu0 }
 0x1ef   : > { %v19315_v14 = vadd.f32 %v15499_v56, %v19072_v61  ;;  %v15502_v36 = vadd.f32 %v15501_v44, %v15500_v21  ;;  %v15568_v61 = vpop.f32.mrb[117].mxu0  ;;  %v4226_v21 = vsel %vm17373_vm5, %v4224_v29, %v4225_v41  ;;  %v4229_v44 = vrot.slane %v14475_v49, 6  ;;  %v14478_v29 = vld [vmem:[%s17329_s16 + $0x274] sm:$0xf] }
 0x1f0   : > { %6975 = vmatmul.mubr.bf16.gmra.mrb[220].mxu0 %v17019_v9  ;;  %7072 = vmatmul.mubr.bf16.gmra.mrb[220].mxu1 %v17020_v17  ;;  %v15569_v8 = vadd.f32 %v15568_v61, %v15567_v54  ;;  %v15570_v58 = vpop.f32.mrb[118].mxu0  ;;  %v14525_v17 = vcombine.low %v4223_v39, %v4226_v21  ;;  %v14479_v21 = vld [vmem:[%s17329_s16 + $0x278] sm:$0x3]  ;;  %v4236_v43 = vrot.slane %v14478_v29, 6 }
 0x1f1   : > { %v19325_v31 = vadd.f32 %v15502_v36, %v19083_v0  ;;  %v15571_v0 = vpop.f32.mrb[119].mxu0  ;;  %6982 = vmatprep.mubr.bf16.mxu0 %v17021_v53  ;;  %7079 = vmatprep.mubr.bf16.mxu1 %v14524_v40  ;;  %v17022_v36 = vld [vmem:[%s17329_s16 + $0x1e0] sm:$0xff]   ;;  %v14510_v53 = vrot.slane %v14474_v62, 10  ;;  %v4231_v54 = vrot.slane %v4229_v44, 4  ;;  %v17026_v62 = vld [vmem:[%s17329_s16 + $0x1f4] sm:$0xff]  }
 0x1f2   : > { %v19332_v19 = vadd.f32 %v15569_v8, %v19120_v6  ;;  %v15572_v56 = vadd.f32 %v15571_v0, %v15570_v58  ;;  %v4238_v29 = vrot.slane %v4236_v43, 4 }
 0x1f3   : > { %v15503_v15 = vpop.f32.mrb[116].mxu1  ;;  %v4230_v58 = vsel %vm17373_vm5, %v14510_v53, %v4229_v44  ;;  %v19379_v53 = vld [vmem:[%s17329_s16 + $0x29c] sm:$0xf] }
 0x1f4   : > { %v15504_v28 = vpop.f32.mrb[117].mxu1  ;;  %v19342_v9 = vadd.f32 %v15572_v56, %v19133_v11  ;;  %v4233_v56 = vsel %vm17373_vm5, %v4231_v54, %v4232_v2 }
 0x1f5   : > { %v15505_v24 = vadd.f32 %v15504_v28, %v15503_v15  ;;  %v15506_v37 = vpop.f32.mrb[118].mxu1 }
 0x1f6   : > { %v15507_v63 = vpop.f32.mrb[119].mxu1  ;;  %v15573_v40 = vpop.f32.mrb[120].mxu0 }
 0x1f7   : > { %v19338_v51 = vadd.f32 %v15505_v24, %v19104_v12  ;;  %v15508_v48 = vadd.f32 %v15507_v63, %v15506_v37  ;;  %v15574_v41 = vpop.f32.mrb[121].mxu0  ;;  %v14477_v24 = vld [vmem:[%s17329_s16 + $0x270] sm:$0xc]  ;;  %v17027_v63 = vld [vmem:[%s17329_s16 + $0x244] sm:$0xff]  }
 0x1f8   : > { %6983 = vmatmul.mubr.bf16.gmra.mrb[224].mxu0 %v17022_v36  ;;  %7080 = vmatmul.mubr.bf16.gmra.mrb[224].mxu1 %v17023_v50  ;;  %v15575_v15 = vadd.f32 %v15574_v41, %v15573_v40  ;;  %v15576_v61 = vpop.f32.mrb[122].mxu0  ;;  %v17028_v50 = vld [vmem:[%s17329_s16 + $0x214] sm:$0xff]   ;;  %v14526_v40 = vcombine.low %v4230_v58, %v4233_v56  ;;  %v14511_v54 = vrot.slane %v14477_v24, 10  ;;  %v19393_v24 = vld [vmem:[%s17329_s16 + $0x2a0] sm:$0x3] }
 0x1f9   : > { %v19346_v6 = vadd.f32 %v15508_v48, %v19123_v4  ;;  %v19351_v4 = vld [vmem:[%s17329_s16 + $0x288] sm:$0xf]  ;;  %v15577_v8 = vpop.f32.mrb[123].mxu0  ;;  %6990 = vmatprep.mubr.bf16.mxu0 %v17025_v32  ;;  %7087 = vmatprep.mubr.bf16.mxu1 %v14525_v17  ;;  %v19365_v48 = vld [vmem:[%s17329_s16 + $0x284] sm:$0xc] }
 0x1fa   : > { %v19357_v37 = vadd.f32 %v15575_v15, %v19154_v7  ;;  %v15578_v39 = vadd.f32 %v15577_v8, %v15576_v61  ;;  %v19372_v32 = vld [vmem:[%s17329_s16 + $0x28c] sm:$0x3]  ;;  %v22124_v7 = vrot.slane %v19351_v4, 6  ;;  %v14512_v41 = vrot.slane %v19365_v48, 10  ;;  %v19387_v15 = vld [vmem:[%s17329_s16 + $0x298] sm:$0xc] }
 0x1fb   : > { %v15509_v12 = vpop.f32.mrb[120].mxu1  ;;  %v4237_v56 = vsel %vm17373_vm5, %v14511_v54, %v4236_v43  ;;  %v19415_v54 = vld [vmem:[%s17329_s16 + $0x2b0] sm:$0xf] }
 0x1fc   : > { %v15510_v11 = vpop.f32.mrb[121].mxu1  ;;  %v19376_v17 = vadd.f32 %v15578_v39, %v19164_v59 }
 0x1fd   : > { %v15511_v49 = vadd.f32 %v15510_v11, %v15509_v12  ;;  %v15512_v28 = vpop.f32.mrb[122].mxu1  ;;  %v4239_v12 = vrot.slane %v14479_v21, 6  ;;  %v4246_v11 = vrot.slane %v19372_v32, 6 }
 0x1fe   : > { %v15513_v0 = vpop.f32.mrb[123].mxu1 }
 0x1ff   : > { %v19368_v36 = vadd.f32 %v15511_v49, %v19141_v60  ;;  %v15514_v44 = vadd.f32 %v15513_v0, %v15512_v28  ;;  %v22123_v49 = vrot.slane %v19379_v53, 6  ;;  %v4240_v21 = vsel %vm17373_vm5, %v4238_v29, %v4239_v12 }
 0x200   : > { %6991 = vmatmul.mubr.bf16.gmra.mrb[228].mxu0 %v17026_v62  ;;  %7088 = vmatmul.mubr.bf16.gmra.mrb[228].mxu1 %v17027_v63  ;;  %v17029_v63 = vld [vmem:[%s17329_s16 + $0x208] sm:$0xff]   ;;  %v14527_v12 = vcombine.low %v4237_v56, %v4240_v21  ;;  %v19434_v56 = vld [vmem:[%s17329_s16 + $0x2c0] sm:$0xc] }
 0x201   : > { %v19382_v2 = vadd.f32 %v15514_v44, %v19157_v33  ;;  %v15579_v59 = vpop.f32.mrb[124].mxu0  ;;  %v4245_v33 = vrot.slane %v22124_v7, 4  ;;  %6998 = vmatprep.mubr.bf16.mxu0 %v17028_v50  ;;  %7095 = vmatprep.mubr.bf16.mxu1 %v14526_v40  ;;  %v19411_v43 = vrot.slane %v22123_v49, 4  ;;  %v19437_v21 = vld [vmem:[%s17329_s16 + $0x2c8] sm:$0x3]  ;;  %v17033_v7 = vld [vmem:[%s17329_s16 + $0x21c] sm:$0xff]  }
 0x202   : > { %v15580_v8 = vpop.f32.mrb[125].mxu0 }
 0x203   : > { %v15515_v60 = vpop.f32.mrb[124].mxu1  ;;  %v15581_v0 = vadd.f32 %v15580_v8, %v15579_v59  ;;  %v15582_v39 = vpop.f32.mrb[126].mxu0  ;;  %v17030_v59 = vld [vmem:[%s17329_s16 + $0x258] sm:$0xff]  }
 0x204   : > { %v15516_v61 = vpop.f32.mrb[125].mxu1  ;;  %v15583_v50 = vpop.f32.mrb[127].mxu0 }
 0x205   : > { %v15517_v28 = vadd.f32 %v15516_v61, %v15515_v60  ;;  %v15518_v58 = vpop.f32.mrb[126].mxu1  ;;  %v19405_v40 = vadd.f32 %v15581_v0, %v19188_v27  ;;  %v15584_v60 = vadd.f32 %v15583_v50, %v15582_v39  ;;  %v17032_v61 = vld [vmem:[%s17329_s16 + $0x228] sm:$0xff]   ;;  %v19430_v0 = vld [vmem:[%s17329_s16 + $0x2b4] sm:$0x3] }
 0x206   : > { %v15519_v62 = vpop.f32.mrb[127].mxu1  ;;  %v19421_v27 = vld [vmem:[%s17329_s16 + $0x2ac] sm:$0xc] }
 0x207   : > { %v19401_v48 = vadd.f32 %v15517_v28, %v19179_v42  ;;  %v15520_v44 = vadd.f32 %v15519_v62, %v15518_v58  ;;  %v19424_v28 = vld [vmem:[%s17329_s16 + $0x2c4] sm:$0xf]  ;;  %v19427_v8 = vadd.f32 %v15584_v60, %v19198_v20  ;;  %v19445_v42 = vld [vmem:[%s17329_s16 + $0x2d4] sm:$0xc] }
 0x208   : > { %6999 = vmatmul.mubr.bf16.gmra.mrb[232].mxu0 %v17029_v63  ;;  %7096 = vmatmul.mubr.bf16.gmra.mrb[232].mxu1 %v17030_v59 }
 0x209   : > { %v19418_v29 = vadd.f32 %v15520_v44, %v19191_v57  ;;  %22136 = vst [vmem:[#allocation7_spill] sm:$0xff] %v19427_v8  ;;  %v15585_v62 = vpop.f32.mrb[128].mxu0  ;;  %v19440_v44 = vld [vmem:[%s17329_s16 + $0x2d8] sm:$0xf]  ;;  %7006 = vmatprep.mubr.bf16.mxu0 %v17032_v61  ;;  %7103 = vmatprep.mubr.bf16.mxu1 %v14527_v12  ;;  %v22137_v8 = vrot.slane %v19351_v4, 6  ;;  %v4247_v61 = vsel %vm17373_vm5, %v4245_v33, %v4246_v11 }
 0x20a   : > { %v15586_v50 = vpop.f32.mrb[129].mxu0  ;;  %v19456_v12 = vld [vmem:[%s17329_s16 + $0x2dc] sm:$0x3]  ;;  %v22127_v59 = vrot.slane %v19440_v44, 6 }
 0x20b   : > { %22135 = vst [vmem:[#allocation6_spill] sm:$0xff] %v19418_v29  ;;  %v15521_v58 = vpop.f32.mrb[128].mxu1  ;;  %v15587_v32 = vadd.f32 %v15586_v50, %v15585_v62  ;;  %v15588_v49 = vpop.f32.mrb[130].mxu0  ;;  %v17035_v50 = vld [vmem:[%s17329_s16 + $0x1ec] sm:$0xff]  }
 0x20c   : > { %v15522_v57 = vpop.f32.mrb[129].mxu1  ;;  %v15589_v62 = vpop.f32.mrb[131].mxu0 }
 0x20d   : > { %v15523_v20 = vadd.f32 %v15522_v57, %v15521_v58  ;;  %v15524_v60 = vpop.f32.mrb[130].mxu1  ;;  %v4244_v58 = vsel %vm17373_vm5, %v14512_v41, %v22137_v8  ;;  %v19464_v4 = vadd.f32 %v15587_v32, %v19216_v26  ;;  %v15590_v41 = vadd.f32 %v15589_v62, %v15588_v49 }
 0x20e   : > { %v15525_v39 = vpop.f32.mrb[131].mxu1  ;;  %v22139_v8 = vrot.slane %v19415_v54, 6  ;;  %v14528_v33 = vcombine.low %v4244_v58, %v4247_v61  ;;  %v22142_v49 = vrot.slane %v19424_v28, 6  ;;  %v19493_v58 = vrot.slane %v22127_v59, 4  ;;  %v19496_v61 = vld [vmem:[%s17329_s16 + $0x2f0] sm:$0x3] }
 0x20f   : > { %v19459_v57 = vadd.f32 %v15523_v20, %v19206_v35  ;;  %v15526_v63 = vadd.f32 %v15525_v39, %v15524_v60  ;;  %22138 = vst [vmem:[#allocation8_spill] sm:$0xff] %v19464_v4  ;;  %v19477_v60 = vld [vmem:[%s17329_s16 + $0x2e8] sm:$0xc]  ;;  %v19480_v26 = vadd.f32 %v15590_v41, %v19226_v46  ;;  %v17059_v59 = vld [vmem:[%s22113_s4] sm:$0xff]   ;;  %v22144_v41 = vrot.slane %v19387_v15, 10 }
 0x210   : > { %v19468_v29 = vrot.slane %v22139_v8, 4  ;;  %v19484_v32 = vrot.slane %v22142_v49, 4  ;;  %7007 = vmatmul.mubr.bf16.gmra.mrb[236].mxu0 %v17033_v7  ;;  %7104 = vmatmul.mubr.bf16.gmra.mrb[236].mxu1 %v17034_v22  ;;  %v17037_v7 = vld [vmem:[%s17329_s16 + $0x200] sm:$0xff]   ;;  %v22143_v22 = vrot.slane %v19379_v53, 6  ;;  %v17038_v53 = vld [vmem:[%s17329_s16 + $0x214] sm:$0xff]   ;;  %v17060_v15 = vld [vmem:[%s22113_s4 + $0x8] sm:$0xff]  }
 0x211   : > { %v19472_v35 = vadd.f32 %v15526_v63, %v19219_v16  ;;  %22141 = vst [vmem:[#allocation10_spill] sm:$0xff] %v19480_v26  ;;  %v19489_v16 = vld [vmem:[%s17329_s16 + $0x2ec] sm:$0xf]  ;;  %v15591_v49 = vpop.f32.mrb[132].mxu0  ;;  %7111 = vmatprep.mubr.bf16.mxu1 %v14528_v33  ;;  %16577 = vmatprep.mubr.bf16.mxu0 %v17035_v50  ;;  %v17036_v26 = vld [vmem:[%s17329_s16 + $0x280] sm:$0xff]   ;;  %v22145_v33 = vrot.slane %v19393_v24, 6 }
 0x212   : > { %v15592_v39 = vpop.f32.mrb[133].mxu0  ;;  %16609 = vmatprep.subr.bf16.mxu1 %v17059_v59 }
 0x213   : > { %22140 = vst [vmem:[#allocation9_spill] sm:$0xff] %v19472_v35  ;;  %v15527_v63 = vpop.f32.mrb[132].mxu1  ;;  %v4254_v50 = vsel %vm17373_vm5, %v19411_v43, %v22145_v33  ;;  %v15593_v20 = vadd.f32 %v15592_v39, %v15591_v49  ;;  %v15594_v35 = vpop.f32.mrb[134].mxu0  ;;  %16610 = vmatpush3.bf16.msra.mxu1 %v17059_v59  ;;  %v22147_v59 = vrot.slane %v19489_v16, 6 }
 0x214   : > { %v15528_v46 = vpop.f32.mrb[133].mxu1  ;;  %16611 = vmatprep.subr.bf16.mxu1 %v17060_v15 }
 0x215   : > { %v15529_v62 = vadd.f32 %v15528_v46, %v15527_v63  ;;  %v15530_v8 = vpop.f32.mrb[134].mxu1  ;;  %v4251_v63 = vsel %vm17373_vm5, %v22144_v41, %v22143_v22  ;;  %v15595_v41 = vpop.f32.mrb[135].mxu0  ;;  %v19525_v43 = vadd.f32 %v15593_v20, %v19240_v52  ;;  %v19537_v22 = vld [vmem:[%s17329_s16 + $0x300] sm:$0xf]  ;;  %v17061_v52 = vld [vmem:[%s22113_s4 + $0x10] sm:$0xff]  }
 0x216   : > { %v15531_v11 = vpop.f32.mrb[135].mxu1  ;;  %v15596_v39 = vadd.f32 %v15595_v41, %v15594_v35  ;;  %v17040_v41 = vld [vmem:[%s17329_s16 + $0x228] sm:$0xff]  }
 0x217   : > { %v19517_v46 = vadd.f32 %v15529_v62, %v19236_v3  ;;  %v15532_v4 = vadd.f32 %v15531_v11, %v15530_v8  ;;  %v14529_v62 = vcombine.low %v4251_v63, %v4254_v50  ;;  %v19531_v11 = vld [vmem:[%s17329_s16 + $0x2fc] sm:$0xc]  ;;  %v17039_v50 = vld [vmem:[%s17329_s16 + $0x294] sm:$0xff]   ;;  %16612 = vmatpush3.bf16.msra.mxu1 %v17060_v15 }
 0x218   : > { %v19534_v8 = vadd.f32 %v15596_v39, %v19251_v38  ;;  %7112 = vmatmul.mubr.bf16.gmra.mrb[240].mxu1 %v17036_v26  ;;  %16578 = vmatmul.mubr.bf16.vlgmr.msra.gmra.mrb[240].mxu0 %v17037_v7  ;;  %v22148_v39 = vrot.slane %v19415_v54, 6  ;;  %v22149_v26 = vrot.slane %v19421_v27, 10  ;;  %v17041_v54 = vld [vmem:[%s17329_s16 + $0x23c] sm:$0xff]   ;;  %v14518_v27 = vrot.slane %v19531_v11, 10 }
 0x219   : > { %v19528_v3 = vadd.f32 %v15532_v4, %v19243_v34  ;;  %v19544_v4 = vrot.slane %v22147_v59, 4  ;;  %v15597_v35 = vpop.f32.mrb[136].mxu0  ;;  %7119 = vmatprep.mubr.bf16.mxu1 %v14529_v62  ;;  %16581 = vmatprep.mubr.bf16.mxu0 %v17038_v53  ;;  %v22150_v59 = vrot.slane %v19430_v0, 6  ;;  %v4285_v0 = vrot.slane %v19537_v22, 6 }
 0x21a   : > { %22146 = vst [vmem:[#allocation11_spill] sm:$0xff] %v19534_v8  ;;  %v15598_v63 = vpop.f32.mrb[137].mxu0  ;;  %v4258_v7 = vsel %vm17373_vm5, %v22149_v26, %v22148_v39  ;;  %16613 = vmatprep.subr.bf16.mxu1 %v17061_v52  ;;  %v19565_v39 = vld [vmem:[%s17329_s16 + $0x304] sm:$0x3]  ;;  %v17043_v26 = vld [vmem:[%s17329_s16 + $0x250] sm:$0xff]  }
 0x21b   : > { %v15533_v49 = vpop.f32.mrb[136].mxu1  ;;  %v15599_v62 = vadd.f32 %v15598_v63, %v15597_v35  ;;  %16614 = vmatpush3.bf16.msra.mxu1 %v17061_v52 }
 0x21c   : > { %v15534_v34 = vpop.f32.mrb[137].mxu1 }
 0x21d   : > { %v15535_v20 = vadd.f32 %v15534_v34, %v15533_v49  ;;  %v15536_v38 = vpop.f32.mrb[138].mxu1  ;;  %v4261_v49 = vsel %vm17373_vm5, %v19468_v29, %v22150_v59  ;;  %v15600_v34 = vpop.f32.mrb[138].mxu0  ;;  %v19569_v29 = vadd.f32 %v15599_v62, %v19264_v47  ;;  %v22151_v47 = vrot.slane %v19424_v28, 6 }
 0x21e   : > { %v15537_v33 = vpop.f32.mrb[139].mxu1  ;;  %v15601_v8 = vpop.f32.mrb[139].mxu0  ;;  %v14530_v35 = vcombine.low %v4258_v7, %v4261_v49  ;;  %v19599_v28 = vrot.slane %v4285_v0, 4  ;;  %v17044_v49 = vld [vmem:[%s17329_s16 + $0x264] sm:$0xff]  }
 0x21f   : > { %v19560_v53 = vadd.f32 %v15535_v20, %v19259_v18  ;;  %v15538_v24 = vadd.f32 %v15537_v33, %v15536_v38  ;;  %v15602_v15 = vadd.f32 %v15601_v8, %v15600_v34  ;;  %v19578_v38 = vld [vmem:[%s17329_s16 + $0x310] sm:$0xc]  ;;  %v22153_v8 = vrot.slane %v19437_v21, 6  ;;  %v19593_v33 = vld [vmem:[%s17329_s16 + $0x314] sm:$0xf] }
 0x220   : > { %7120 = vmatmul.mubr.bf16.gmra.mrb[244].mxu1 %v17039_v50  ;;  %16582 = vmatmul.mubr.bf16.gmra.mrb[244].mxu0 %v17040_v41  ;;  %v17042_v41 = vld [vmem:[%s17329_s16 + $0x2a8] sm:$0xff]   ;;  %v4292_v52 = vrot.slane %v19593_v33, 6 }
 0x221   : > { %v19572_v18 = vadd.f32 %v15538_v24, %v19267_v25  ;;  %v19575_v20 = vadd.f32 %v15602_v15, %v19275_v55  ;;  %7127 = vmatprep.mubr.bf16.mxu1 %v14530_v35  ;;  %16585 = vmatprep.mubr.bf16.mxu0 %v17041_v54  ;;  %v22152_v25 = vrot.slane %v19434_v56, 10  ;;  %v4268_v55 = vsel %vm17373_vm5, %v19484_v32, %v22153_v8  ;;  %v19602_v56 = vld [vmem:[%s17329_s16 + $0x318] sm:$0x3] }
 0x223   : > { %v15539_v63 = vpop.f32.mrb[140].mxu1  ;;  %v4265_v24 = vsel %vm17373_vm5, %v22152_v25, %v22151_v47  ;;  %v15603_v7 = vpop.f32.mrb[140].mxu0  ;;  %v14519_v25 = vrot.slane %v19578_v38, 10 }
 0x224   : > { %v15540_v50 = vpop.f32.mrb[141].mxu1  ;;  %v15604_v62 = vpop.f32.mrb[141].mxu0  ;;  %v14531_v32 = vcombine.low %v4265_v24, %v4268_v55  ;;  %v17062_v55 = vld [vmem:[%s22113_s4 + $0x18] sm:$0xff]  }
 0x225   : > { %v15541_v59 = vadd.f32 %v15540_v50, %v15539_v63  ;;  %v15542_v21 = vpop.f32.mrb[142].mxu1  ;;  %v15605_v15 = vadd.f32 %v15604_v62, %v15603_v7  ;;  %v15606_v35 = vpop.f32.mrb[142].mxu0  ;;  %16615 = vmatprep.subr.bf16.mxu1 %v17062_v55 }
 0x226   : > { %v15543_v34 = vpop.f32.mrb[143].mxu1  ;;  %v15607_v8 = vpop.f32.mrb[143].mxu0  ;;  %16616 = vmatpush3.bf16.msra.mxu1 %v17062_v55 }
 0x227   : > { %v19606_v54 = vadd.f32 %v15541_v59, %v19282_v5  ;;  %v15544_v47 = vadd.f32 %v15543_v34, %v15542_v21  ;;  %v19611_v63 = vadd.f32 %v15605_v15, %v19298_v13  ;;  %v15608_v24 = vadd.f32 %v15607_v8, %v15606_v35  ;;  %v17045_v13 = vld [vmem:[%s17329_s16 + $0x2bc] sm:$0xff]  }
 0x228   : > { %v4295_v5 = vrot.slane %v19602_v56, 6  ;;  %7128 = vmatmul.mubr.bf16.gmra.mrb[248].mxu1 %v17042_v41  ;;  %16586 = vmatmul.mubr.bf16.gmra.mrb[248].mxu0 %v17043_v26  ;;  %v17046_v59 = vld [vmem:[%s17329_s16 + $0x278] sm:$0xff]   ;;  %v22155_v21 = vrot.slane %v19445_v42, 10  ;;  %v22156_v34 = vrot.slane %v19456_v12, 6 }
 0x229   : > { %v19614_v50 = vadd.f32 %v15544_v47, %v19289_v30  ;;  %v19621_v7 = vadd.f32 %v15608_v24, %v19303_v10  ;;  %7135 = vmatprep.mubr.bf16.mxu1 %v14531_v32  ;;  %16589 = vmatprep.mubr.bf16.mxu0 %v17044_v49  ;;  %v22154_v30 = vrot.slane %v19440_v44, 6  ;;  %v17047_v32 = vld [vmem:[%s17329_s16 + $0x28c] sm:$0xff]  }
 0x22a   : > { %v4275_v41 = vsel %vm17373_vm5, %v19493_v58, %v22156_v34 }
 0x22b   : > { %v4272_v62 = vsel %vm17373_vm5, %v22155_v21, %v22154_v30  ;;  %v15609_v10 = vpop.f32.mrb[144].mxu0  ;;  %v15673_v26 = vpop.f32.mrb[144].mxu1 }
 0x22c   : > { %v15610_v49 = vpop.f32.mrb[145].mxu0  ;;  %v15674_v15 = vpop.f32.mrb[145].mxu1  ;;  %v14532_v8 = vcombine.low %v4272_v62, %v4275_v41  ;;  %v17048_v62 = vld [vmem:[%s17329_s16 + $0x2d0] sm:$0xff]   ;;  %v17049_v41 = vld [vmem:[%s17329_s16 + $0x2a0] sm:$0xff]  }
 0x22d   : > { %v15611_v35 = vadd.f32 %v15610_v49, %v15609_v10  ;;  %v15675_v44 = vadd.f32 %v15674_v15, %v15673_v26  ;;  %v15612_v42 = vpop.f32.mrb[146].mxu0  ;;  %v15676_v47 = vpop.f32.mrb[146].mxu1  ;;  %v22158_v26 = vrot.slane %v19477_v60, 10  ;;  %v17050_v49 = vld [vmem:[%s17329_s16 + $0x2b4] sm:$0xff]  }
 0x22e   : > { %v15613_v24 = vpop.f32.mrb[147].mxu0  ;;  %v15677_v12 = vpop.f32.mrb[147].mxu1 }
 0x22f   : > { %v19638_v30 = vadd.f32 %v15611_v35, %v19315_v14  ;;  %v19641_v58 = vadd.f32 %v15675_v44, %v19308_v1  ;;  %v15614_v21 = vadd.f32 %v15613_v24, %v15612_v42  ;;  %v15678_v55 = vadd.f32 %v15677_v12, %v15676_v47 }
 0x230   : > { %7136 = vmatmul.mubr.bf16.gmra.mrb[252].mxu1 %v17045_v13  ;;  %16590 = vmatmul.mubr.bf16.gmra.mrb[252].mxu0 %v17046_v59  ;;  %v22157_v14 = vrot.slane %v19489_v16, 6  ;;  %v22159_v13 = vrot.slane %v19496_v61, 6 }
 0x231   : > { %v19644_v34 = vadd.f32 %v15614_v21, %v19325_v31  ;;  %v19647_v10 = vadd.f32 %v15678_v55, %v19318_v23  ;;  %7143 = vmatprep.mubr.bf16.mxu1 %v14532_v8  ;;  %16593 = vmatprep.mubr.bf16.mxu0 %v17047_v32 }
 0x232   : > { %v4279_v1 = vsel %vm17373_vm5, %v22158_v26, %v22157_v14  ;;  %v4282_v31 = vsel %vm17373_vm5, %v19544_v4, %v22159_v13  ;;  %v17051_v14 = vld [vmem:[%s17329_s16 + $0x2e4] sm:$0xff]   ;;  %v17053_v13 = vld [vmem:[%s17329_s16 + $0x2dc] sm:$0xff]  }
 0x233   : > { %v15615_v59 = vpop.f32.mrb[148].mxu0  ;;  %v15679_v23 = vpop.f32.mrb[148].mxu1  ;;  %v14533_v60 = vcombine.low %v4279_v1, %v4282_v31  ;;  %v17052_v26 = vld [vmem:[%s17329_s16 + $0x2c8] sm:$0xff]  }
 0x234   : > { %v15616_v15 = vpop.f32.mrb[149].mxu0  ;;  %v15680_v32 = vpop.f32.mrb[149].mxu1 }
 0x235   : > { %v15617_v35 = vadd.f32 %v15616_v15, %v15615_v59  ;;  %v15681_v44 = vadd.f32 %v15680_v32, %v15679_v23  ;;  %v15618_v42 = vpop.f32.mrb[150].mxu0  ;;  %v15682_v16 = vpop.f32.mrb[150].mxu1 }
 0x236   : > { %v15619_v47 = vpop.f32.mrb[151].mxu0  ;;  %v15683_v8 = vpop.f32.mrb[151].mxu1 }
 0x237   : > { %v19664_v61 = vadd.f32 %v15617_v35, %v19338_v51  ;;  %v19667_v24 = vadd.f32 %v15681_v44, %v19332_v19  ;;  %v15620_v4 = vadd.f32 %v15619_v47, %v15618_v42  ;;  %v15684_v12 = vadd.f32 %v15683_v8, %v15682_v16  ;;  %v17063_v19 = vld [vmem:[%s22113_s4 + $0x20] sm:$0xff]   ;;  %v17054_v16 = vld [vmem:[%s17329_s16 + $0x2f8] sm:$0xff]  }
 0x238   : > { %7144 = vmatmul.mubr.bf16.gmra.mrb[0].mxu1 %v17048_v62  ;;  %16594 = vmatmul.mubr.bf16.gmra.mrb[0].mxu0 %v17049_v41  ;;  %v4294_v51 = vrot.slane %v4292_v52, 4 }
 0x239   : > { %v19670_v21 = vadd.f32 %v15620_v4, %v19346_v6  ;;  %v19673_v55 = vadd.f32 %v15684_v12, %v19342_v9  ;;  %7151 = vmatprep.mubr.bf16.mxu1 %v14533_v60  ;;  %16597 = vmatprep.mubr.bf16.mxu0 %v17050_v49  ;;  %v4286_v6 = vsel %vm17373_vm5, %v14518_v27, %v4285_v0  ;;  %v22160_v9 = vrot.slane %v19565_v39, 6  ;;  %v17055_v60 = vld [vmem:[%s17329_s16 + $0x2f0] sm:$0xff]  }
 0x23a   : > { %16617 = vmatprep.subr.bf16.mxu1 %v17063_v19 }
 0x23b   : > { %v4289_v62 = vsel %vm17373_vm5, %v19599_v28, %v22160_v9  ;;  %v15621_v41 = vpop.f32.mrb[152].mxu0  ;;  %v15685_v1 = vpop.f32.mrb[152].mxu1  ;;  %16618 = vmatpush3.bf16.msra.mxu1 %v17063_v19  ;;  %v22162_v9 = vld [vmem:[#allocation7_spill] sm:$0xff] }
 0x23c   : > { %v15622_v31 = vpop.f32.mrb[153].mxu0  ;;  %v15686_v59 = vpop.f32.mrb[153].mxu1  ;;  %v14534_v27 = vcombine.low %v4286_v6, %v4289_v62 }
 0x23d   : > { %v15623_v23 = vadd.f32 %v15622_v31, %v15621_v41  ;;  %v15687_v22 = vadd.f32 %v15686_v59, %v15685_v1  ;;  %v15624_v11 = vpop.f32.mrb[154].mxu0  ;;  %v15688_v49 = vpop.f32.mrb[154].mxu1  ;;  %v17057_v41 = vld [vmem:[%s17329_s16 + $0x30c] sm:$0xff]   ;;  %v17058_v1 = vld [vmem:[%s17329_s16 + $0x318] sm:$0xff]  }
 0x23e   : > { %v15625_v0 = vpop.f32.mrb[155].mxu0  ;;  %v15689_v39 = vpop.f32.mrb[155].mxu1 }
 0x23f   : > { %v19695_v15 = vadd.f32 %v15623_v23, %v19368_v36  ;;  %v19698_v28 = vadd.f32 %v15687_v22, %v19357_v37  ;;  %v15626_v32 = vadd.f32 %v15625_v0, %v15624_v11  ;;  %v15690_v35 = vadd.f32 %v15689_v39, %v15688_v49 }
 0x240   : > { %7152 = vmatmul.mubr.bf16.gmra.mrb[4].mxu1 %v17051_v14  ;;  %16598 = vmatmul.mubr.bf16.gmra.mrb[4].mxu0 %v17052_v26  ;;  %v4293_v37 = vsel %vm17373_vm5, %v14519_v25, %v4292_v52  ;;  %v4296_v36 = vsel %vm17373_vm5, %v4294_v51, %v4295_v5  ;;  %v22161_v5 = vld [vmem:[#allocation6_spill] sm:$0xff] }
 0x241   : > { %v19701_v44 = vadd.f32 %v15626_v32, %v19382_v2  ;;  %v19704_v42 = vadd.f32 %v15690_v35, %v19376_v17  ;;  %7159 = vmatprep.mubr.bf16.mxu1 %v14534_v27  ;;  %16601 = vmatprep.mubr.bf16.mxu0 %v17053_v13  ;;  %v17056_v17 = vld [vmem:[%s17329_s16 + $0x304] sm:$0xff]   ;;  %v14535_v38 = vcombine.low %v4293_v37, %v4296_v36  ;;  %v22163_v32 = vld [vmem:[#allocation8_spill] sm:$0xff]  ;;  %v22164_v37 = vld [vmem:[#allocation9_spill] sm:$0xff]  ;;  %s21794_s16 = scalar_lea.vmem %s22110_s1, %s15063_s18 }
 0x243   : > { %v15627_v2 = vpop.f32.mrb[156].mxu0  ;;  %v15691_v47 = vpop.f32.mrb[156].mxu1 }
 0x244   : > { %v15628_v8 = vpop.f32.mrb[157].mxu0  ;;  %v15692_v4 = vpop.f32.mrb[157].mxu1 }
 0x245   : > { %v15629_v12 = vadd.f32 %v15628_v8, %v15627_v2  ;;  %v15693_v19 = vadd.f32 %v15692_v4, %v15691_v47  ;;  %v15630_v14 = vpop.f32.mrb[158].mxu0  ;;  %v15694_v33 = vpop.f32.mrb[158].mxu1  ;;  %v22165_v2 = vld [vmem:[#allocation10_spill] sm:$0xff] }
 0x246   : > { %v15631_v26 = vpop.f32.mrb[159].mxu0  ;;  %v15695_v6 = vpop.f32.mrb[159].mxu1 }
 0x247   : > { %v19720_v52 = vadd.f32 %v15629_v12, %v19401_v48  ;;  %v19723_v45 = vadd.f32 %v15693_v19, %v19405_v40  ;;  %v15632_v56 = vadd.f32 %v15631_v26, %v15630_v14  ;;  %v15696_v25 = vadd.f32 %v15695_v6, %v15694_v33  ;;  %v17064_v48 = vld [vmem:[%s22113_s4 + $0x28] sm:$0xff]  }
 0x248   : > { %7160 = vmatmul.mubr.bf16.gmra.mrb[8].mxu1 %v17054_v16  ;;  %16602 = vmatmul.mubr.bf16.gmra.mrb[8].mxu0 %v17055_v60 }
 0x249   : > { %v19726_v51 = vadd.f32 %v15632_v56, %v22161_v5  ;;  %v19729_v62 = vadd.f32 %v15696_v25, %v22162_v9  ;;  %7167 = vmatprep.mubr.bf16.mxu1 %v14535_v38  ;;  %16605 = vmatprep.mubr.bf16.mxu0 %v17056_v17 }
 0x24a   : > { %16619 = vmatprep.subr.bf16.mxu1 %v17064_v48 }
 0x24b   : > { %v15633_v40 = vpop.f32.mrb[160].mxu0  ;;  %v15697_v13 = vpop.f32.mrb[160].mxu1  ;;  %16620 = vmatpush3.bf16.msra.mxu1 %v17064_v48  ;;  %v22166_v48 = vld [vmem:[#allocation11_spill] sm:$0xff] }
 0x24c   : > { %v15634_v31 = vpop.f32.mrb[161].mxu0  ;;  %v15698_v59 = vpop.f32.mrb[161].mxu1 }
 0x24d   : > { %v15635_v23 = vadd.f32 %v15634_v31, %v15633_v40  ;;  %v15699_v22 = vadd.f32 %v15698_v59, %v15697_v13  ;;  %v15636_v11 = vpop.f32.mrb[162].mxu0  ;;  %v15700_v49 = vpop.f32.mrb[162].mxu1 }
 0x24e   : > { %v15637_v27 = vpop.f32.mrb[163].mxu0  ;;  %v15701_v0 = vpop.f32.mrb[163].mxu1 }
 0x24f   : > { %v19737_v39 = vadd.f32 %v15635_v23, %v19459_v57  ;;  %v19740_v35 = vadd.f32 %v15699_v22, %v22163_v32  ;;  %v15638_v16 = vadd.f32 %v15637_v27, %v15636_v11  ;;  %v15702_v60 = vadd.f32 %v15701_v0, %v15700_v49 }
 0x250   : > { %7168 = vmatmul.mubr.bf16.gmra.mrb[12].mxu1 %v17057_v41  ;;  %16606 = vmatmul.mubr.bf16.gmra.mrb[12].mxu0 %v17058_v1  ;;  %v17065_v1 = vld [vmem:[%s22113_s4 + $0x30] sm:$0xff]  }
 0x251   : > { %v19743_v36 = vadd.f32 %v15638_v16, %v22164_v37  ;;  %v19746_v47 = vadd.f32 %v15702_v60, %v22165_v2  ;;  %16621 = vmatprep.subr.bf16.mxu1 %v17065_v1 }
 0x252   : > { %16622 = vmatpush3.bf16.msra.mxu1 %v17065_v1 }
 0x253   : > { %v15639_v17 = vpop.f32.mrb[164].mxu0  ;;  %v15703_v8 = vpop.f32.mrb[164].mxu1 }
 0x254   : > { %v15640_v4 = vpop.f32.mrb[165].mxu0  ;;  %v15704_v12 = vpop.f32.mrb[165].mxu1 }
 0x255   : > { %v15641_v19 = vadd.f32 %v15640_v4, %v15639_v17  ;;  %v15705_v57 = vadd.f32 %v15704_v12, %v15703_v8  ;;  %v15642_v14 = vpop.f32.mrb[166].mxu0  ;;  %v15706_v33 = vpop.f32.mrb[166].mxu1 }
 0x256   : > { %v15643_v38 = vpop.f32.mrb[167].mxu0  ;;  %v15707_v26 = vpop.f32.mrb[167].mxu1 }
 0x257   : > { %v19749_v6 = vadd.f32 %v15641_v19, %v19517_v46  ;;  %v19752_v56 = vadd.f32 %v15705_v57, %v19525_v43  ;;  %v15644_v25 = vadd.f32 %v15643_v38, %v15642_v14  ;;  %v15708_v5 = vadd.f32 %v15707_v26, %v15706_v33 }
 0x259   : > { %v19755_v9 = vadd.f32 %v15644_v25, %v19528_v3  ;;  %v19758_v41 = vadd.f32 %v15708_v5, %v22166_v48  ;;  %v17066_v25 = vld [vmem:[%s22113_s4 + $0x38] sm:$0xff]  }
 0x25a   : > { %16623 = vmatprep.subr.bf16.mxu1 %v17066_v25 }
 0x25b   : > { %v15645_v40 = vpop.f32.mrb[168].mxu0  ;;  %v15709_v13 = vpop.f32.mrb[168].mxu1  ;;  %16624 = vmatpush3.bf16.msra.mxu1 %v17066_v25 }
 0x25c   : > { %v15646_v46 = vpop.f32.mrb[169].mxu0  ;;  %v15710_v31 = vpop.f32.mrb[169].mxu1 }
 0x25d   : > { %v15647_v43 = vadd.f32 %v15646_v46, %v15645_v40  ;;  %v15711_v59 = vadd.f32 %v15710_v31, %v15709_v13  ;;  %v15648_v23 = vpop.f32.mrb[170].mxu0  ;;  %v15712_v22 = vpop.f32.mrb[170].mxu1 }
 0x25e   : > { %v15649_v11 = vpop.f32.mrb[171].mxu0  ;;  %v15713_v3 = vpop.f32.mrb[171].mxu1 }
 0x25f   : > { %v19764_v49 = vadd.f32 %v15647_v43, %v19560_v53  ;;  %v19767_v27 = vadd.f32 %v15711_v59, %v19569_v29  ;;  %v15650_v0 = vadd.f32 %v15649_v11, %v15648_v23  ;;  %v15714_v32 = vadd.f32 %v15713_v3, %v15712_v22 }
 0x261   : > { %v19770_v16 = vadd.f32 %v15650_v0, %v19572_v18  ;;  %v19773_v60 = vadd.f32 %v15714_v32, %v19575_v20 }
 0x263   : > { %v15651_v37 = vpop.f32.mrb[172].mxu0  ;;  %v15715_v2 = vpop.f32.mrb[172].mxu1 }
 0x264   : > { %v15652_v17 = vpop.f32.mrb[173].mxu0  ;;  %v15716_v8 = vpop.f32.mrb[173].mxu1 }
 0x265   : > { %v15653_v4 = vadd.f32 %v15652_v17, %v15651_v37  ;;  %v15717_v12 = vadd.f32 %v15716_v8, %v15715_v2  ;;  %v15654_v19 = vpop.f32.mrb[174].mxu0  ;;  %v15718_v53 = vpop.f32.mrb[174].mxu1 }
 0x266   : > { %v15655_v57 = vpop.f32.mrb[175].mxu0  ;;  %v15719_v14 = vpop.f32.mrb[175].mxu1 }
 0x267   : > { %v19776_v29 = vadd.f32 %v15653_v4, %v19606_v54  ;;  %v19779_v33 = vadd.f32 %v15717_v12, %v19611_v63  ;;  %v15656_v18 = vadd.f32 %v15655_v57, %v15654_v19  ;;  %v15720_v38 = vadd.f32 %v15719_v14, %v15718_v53 }
 0x269   : > { %v19782_v20 = vadd.f32 %v15656_v18, %v19614_v50  ;;  %v19785_v26 = vadd.f32 %v15720_v38, %v19621_v7 }
 0x26b   : > { %v15721_v5 = vpop.f32.mrb[176].mxu1  ;;  %v15785_v48 = vpop.f32.mrb[176].mxu0 }
 0x26c   : > { %v15722_v54 = vpop.f32.mrb[177].mxu1  ;;  %v15786_v1 = vpop.f32.mrb[177].mxu0 }
 0x26d   : > { %v15723_v63 = vadd.f32 %v15722_v54, %v15721_v5  ;;  %v15787_v40 = vadd.f32 %v15786_v1, %v15785_v48  ;;  %v15724_v13 = vpop.f32.mrb[178].mxu1  ;;  %v15788_v46 = vpop.f32.mrb[178].mxu0 }
 0x26e   : > { %v15725_v31 = vpop.f32.mrb[179].mxu1  ;;  %v15789_v50 = vpop.f32.mrb[179].mxu0 }
 0x26f   : > { %v15726_v43 = vadd.f32 %v15725_v31, %v15724_v13  ;;  %v15790_v59 = vadd.f32 %v15789_v50, %v15788_v46  ;;  %v19791_v7 = vadd.f32 %v15723_v63, %v19638_v30  ;;  %v19794_v23 = vadd.f32 %v15787_v40, %v19641_v58 }
 0x271   : > { %v19797_v22 = vadd.f32 %v15726_v43, %v19644_v34  ;;  %v19800_v11 = vadd.f32 %v15790_v59, %v19647_v10 }
 0x273   : > { %v15727_v3 = vpop.f32.mrb[180].mxu1  ;;  %v15791_v0 = vpop.f32.mrb[180].mxu0 }
 0x274   : > { %v15728_v32 = vpop.f32.mrb[181].mxu1  ;;  %v15792_v37 = vpop.f32.mrb[181].mxu0 }
 0x275   : > { %v15729_v2 = vadd.f32 %v15728_v32, %v15727_v3  ;;  %v15793_v17 = vadd.f32 %v15792_v37, %v15791_v0  ;;  %v15730_v8 = vpop.f32.mrb[182].mxu1  ;;  %v15794_v4 = vpop.f32.mrb[182].mxu0 }
 0x276   : > { %v15731_v12 = vpop.f32.mrb[183].mxu1  ;;  %v15795_v30 = vpop.f32.mrb[183].mxu0 }
 0x277   : > { %v15732_v19 = vadd.f32 %v15731_v12, %v15730_v8  ;;  %v15796_v53 = vadd.f32 %v15795_v30, %v15794_v4  ;;  %v19803_v58 = vadd.f32 %v15729_v2, %v19664_v61  ;;  %v19806_v34 = vadd.f32 %v15793_v17, %v19667_v24 }
 0x279   : > { %v19809_v10 = vadd.f32 %v15732_v19, %v19670_v21  ;;  %v19812_v57 = vadd.f32 %v15796_v53, %v19673_v55 }
 0x27b   : > { %v15733_v14 = vpop.f32.mrb[184].mxu1  ;;  %v15797_v18 = vpop.f32.mrb[184].mxu0 }
 0x27c   : > { %v15734_v38 = vpop.f32.mrb[185].mxu1  ;;  %v15798_v25 = vpop.f32.mrb[185].mxu0 }
 0x27d   : > { %v15735_v5 = vadd.f32 %v15734_v38, %v15733_v14  ;;  %v15799_v48 = vadd.f32 %v15798_v25, %v15797_v18  ;;  %v15736_v54 = vpop.f32.mrb[186].mxu1  ;;  %v15800_v1 = vpop.f32.mrb[186].mxu0 }
 0x27e   : > { %v15737_v63 = vpop.f32.mrb[187].mxu1  ;;  %v15801_v61 = vpop.f32.mrb[187].mxu0 }
 0x27f   : > { %v15738_v40 = vadd.f32 %v15737_v63, %v15736_v54  ;;  %v15802_v13 = vadd.f32 %v15801_v61, %v15800_v1  ;;  %v19815_v24 = vadd.f32 %v15735_v5, %v19695_v15  ;;  %v19818_v21 = vadd.f32 %v15799_v48, %v19698_v28 }
 0x281   : > { %v19821_v55 = vadd.f32 %v15738_v40, %v19701_v44  ;;  %v19824_v46 = vadd.f32 %v15802_v13, %v19704_v42 }
 0x283   : > { %v15739_v31 = vpop.f32.mrb[188].mxu1  ;;  %v15803_v50 = vpop.f32.mrb[188].mxu0 }
 0x284   : > { %v15740_v43 = vpop.f32.mrb[189].mxu1  ;;  %v15804_v59 = vpop.f32.mrb[189].mxu0 }
 0x285   : > { %v15741_v3 = vadd.f32 %v15740_v43, %v15739_v31  ;;  %v15805_v0 = vadd.f32 %v15804_v59, %v15803_v50  ;;  %v15742_v32 = vpop.f32.mrb[190].mxu1  ;;  %v15806_v37 = vpop.f32.mrb[190].mxu0 }
 0x286   : > { %v15743_v2 = vpop.f32.mrb[191].mxu1  ;;  %v15807_v15 = vpop.f32.mrb[191].mxu0 }
 0x287   : > { %v15744_v17 = vadd.f32 %v15743_v2, %v15742_v32  ;;  %v15808_v8 = vadd.f32 %v15807_v15, %v15806_v37  ;;  %v19827_v28 = vadd.f32 %v15741_v3, %v19720_v52  ;;  %v19830_v44 = vadd.f32 %v15805_v0, %v19723_v45 }
 0x289   : > { %v19833_v42 = vadd.f32 %v15744_v17, %v19726_v51  ;;  %v19836_v4 = vadd.f32 %v15808_v8, %v19729_v62 }
 0x28b   : > { %v15745_v12 = vpop.f32.mrb[192].mxu1  ;;  %v15809_v30 = vpop.f32.mrb[192].mxu0 }
 0x28c   : > { %v15746_v19 = vpop.f32.mrb[193].mxu1  ;;  %v15810_v53 = vpop.f32.mrb[193].mxu0 }
 0x28d   : > { %v15747_v14 = vadd.f32 %v15746_v19, %v15745_v12  ;;  %v15811_v18 = vadd.f32 %v15810_v53, %v15809_v30  ;;  %v15748_v38 = vpop.f32.mrb[194].mxu1  ;;  %v15812_v25 = vpop.f32.mrb[194].mxu0 }
 0x28e   : > { %v15749_v5 = vpop.f32.mrb[195].mxu1  ;;  %v15813_v52 = vpop.f32.mrb[195].mxu0 }
 0x28f   : > { %v15750_v48 = vadd.f32 %v15749_v5, %v15748_v38  ;;  %v15814_v54 = vadd.f32 %v15813_v52, %v15812_v25  ;;  %v19839_v45 = vadd.f32 %v15747_v14, %v19737_v39  ;;  %v19842_v51 = vadd.f32 %v15811_v18, %v19740_v35 }
 0x291   : > { %v19845_v62 = vadd.f32 %v15750_v48, %v19743_v36  ;;  %v19848_v1 = vadd.f32 %v15814_v54, %v19746_v47 }
 0x293   : > { %v15751_v63 = vpop.f32.mrb[196].mxu1  ;;  %v15815_v61 = vpop.f32.mrb[196].mxu0 }
 0x294   : > { %v15752_v40 = vpop.f32.mrb[197].mxu1  ;;  %v15816_v13 = vpop.f32.mrb[197].mxu0 }
 0x295   : > { %v15753_v31 = vadd.f32 %v15752_v40, %v15751_v63  ;;  %v15817_v50 = vadd.f32 %v15816_v13, %v15815_v61  ;;  %v15754_v43 = vpop.f32.mrb[198].mxu1  ;;  %v15818_v59 = vpop.f32.mrb[198].mxu0 }
 0x296   : > { %v15755_v3 = vpop.f32.mrb[199].mxu1  ;;  %v15819_v39 = vpop.f32.mrb[199].mxu0 }
 0x297   : > { %v15756_v0 = vadd.f32 %v15755_v3, %v15754_v43  ;;  %v15820_v32 = vadd.f32 %v15819_v39, %v15818_v59  ;;  %v19851_v35 = vadd.f32 %v15753_v31, %v19749_v6  ;;  %v19854_v36 = vadd.f32 %v15817_v50, %v19752_v56 }
 0x299   : > { %v19857_v47 = vadd.f32 %v15756_v0, %v19755_v9  ;;  %v19860_v37 = vadd.f32 %v15820_v32, %v19758_v41 }
 0x29b   : > { %v15757_v2 = vpop.f32.mrb[200].mxu1  ;;  %v15821_v15 = vpop.f32.mrb[200].mxu0 }
 0x29c   : > { %v15758_v17 = vpop.f32.mrb[201].mxu1  ;;  %v15822_v8 = vpop.f32.mrb[201].mxu0 }
 0x29d   : > { %v15759_v12 = vadd.f32 %v15758_v17, %v15757_v2  ;;  %v15823_v30 = vadd.f32 %v15822_v8, %v15821_v15  ;;  %v15760_v19 = vpop.f32.mrb[202].mxu1  ;;  %v15824_v53 = vpop.f32.mrb[202].mxu0 }
 0x29e   : > { %v15761_v14 = vpop.f32.mrb[203].mxu1  ;;  %v15825_v6 = vpop.f32.mrb[203].mxu0 }
 0x29f   : > { %v15762_v18 = vadd.f32 %v15761_v14, %v15760_v19  ;;  %v15826_v38 = vadd.f32 %v15825_v6, %v15824_v53  ;;  %v19863_v56 = vadd.f32 %v15759_v12, %v19764_v49  ;;  %v19866_v9 = vadd.f32 %v15823_v30, %v19767_v27  ;;  %v17067_v14 = vld [vmem:[%s22116_s7 + $0x40] sm:$0xff]   ;;  %v17069_v6 = vld [vmem:[%s22116_s7 + $0x48] sm:$0xff]  }
 0x2a0   : > { %16041 = vmatprep.subr.bf16.mxu0 %v17067_v14 }
 0x2a1   : > { %v19869_v41 = vadd.f32 %v15762_v18, %v19770_v16  ;;  %v19872_v25 = vadd.f32 %v15826_v38, %v19773_v60 }
 0x2a3   : > { %v15763_v5 = vpop.f32.mrb[204].mxu1  ;;  %v15827_v52 = vpop.f32.mrb[204].mxu0 }
 0x2a4   : > { %v15764_v48 = vpop.f32.mrb[205].mxu1  ;;  %v15828_v54 = vpop.f32.mrb[205].mxu0 }
 0x2a5   : > { %v15765_v63 = vadd.f32 %v15764_v48, %v15763_v5  ;;  %v15829_v61 = vadd.f32 %v15828_v54, %v15827_v52  ;;  %v15766_v40 = vpop.f32.mrb[206].mxu1  ;;  %v15830_v13 = vpop.f32.mrb[206].mxu0  ;;  %v17070_v5 = vld [vmem:[%s22116_s7 + $0x8] sm:$0xff]  }
 0x2a6   : > { %v15767_v31 = vpop.f32.mrb[207].mxu1  ;;  %v15831_v49 = vpop.f32.mrb[207].mxu0 }
 0x2a7   : > { %v15768_v50 = vadd.f32 %v15767_v31, %v15766_v40  ;;  %v15832_v43 = vadd.f32 %v15831_v49, %v15830_v13  ;;  %v19875_v27 = vadd.f32 %v15765_v63, %v19776_v29  ;;  %v19878_v16 = vadd.f32 %v15829_v61, %v19779_v33  ;;  %v17071_v61 = vld [vmem:[%s22116_s7 + $0x50] sm:$0xff]  }
 0x2a9   : > { %v19881_v60 = vadd.f32 %v15768_v50, %v19782_v20  ;;  %v19884_v59 = vadd.f32 %v15832_v43, %v19785_v26 }
 0x2ab   : > { %v15833_v3 = vpop.f32.mrb[208].mxu0  ;;  %v15897_v39 = vpop.f32.mrb[208].mxu1 }
 0x2ac   : > { %v15834_v0 = vpop.f32.mrb[209].mxu0  ;;  %v15898_v32 = vpop.f32.mrb[209].mxu1 }
 0x2ad   : > { %v15835_v2 = vadd.f32 %v15834_v0, %v15833_v3  ;;  %v15899_v15 = vadd.f32 %v15898_v32, %v15897_v39  ;;  %v15836_v17 = vpop.f32.mrb[210].mxu0  ;;  %v15900_v8 = vpop.f32.mrb[210].mxu1  ;;  %v17072_v3 = vld [vmem:[%s22116_s7 + $0x10] sm:$0xff]  }
 0x2ae   : > { %v15837_v12 = vpop.f32.mrb[211].mxu0  ;;  %v15901_v29 = vpop.f32.mrb[211].mxu1 }
 0x2af   : > { %v19887_v30 = vadd.f32 %v15835_v2, %v19791_v7  ;;  %v15838_v33 = vadd.f32 %v15837_v12, %v15836_v17  ;;  %v15902_v19 = vadd.f32 %v15901_v29, %v15900_v8  ;;  %v19890_v20 = vadd.f32 %v15899_v15, %v19794_v23  ;;  %v17068_v7 = vld [vmem:[%s22116_s7] sm:$0xff]   ;;  %v17074_v17 = vld [vmem:[%s22116_s7 + $0x18] sm:$0xff]  }
 0x2b0   : > { %16042 = vmatpush3.bf16.msra.mxu0 %v17068_v7 }
 0x2b1   : > { %v19893_v26 = vadd.f32 %v15838_v33, %v19797_v22  ;;  %v19896_v53 = vadd.f32 %v15902_v19, %v19800_v11  ;;  %v17075_v22 = vld [vmem:[%s22116_s7 + $0xc0] sm:$0xff]   ;;  %16043 = vmatprep.subr.bf16.mxu0 %v17069_v6 }
 0x2b2   : > { %16153 = vmatprep.subr.bf16.mxu1 %v17075_v22 }
 0x2b3   : > { %v15839_v23 = vpop.f32.mrb[212].mxu0  ;;  %v15903_v18 = vpop.f32.mrb[212].mxu1 }
 0x2b4   : > { %v15840_v11 = vpop.f32.mrb[213].mxu0  ;;  %v15904_v38 = vpop.f32.mrb[213].mxu1  ;;  %16044 = vmatpush3.bf16.msra.mxu0 %v17070_v5 }
 0x2b5   : > { %v15841_v52 = vadd.f32 %v15840_v11, %v15839_v23  ;;  %v15905_v48 = vadd.f32 %v15904_v38, %v15903_v18  ;;  %v15842_v54 = vpop.f32.mrb[214].mxu0  ;;  %v15906_v63 = vpop.f32.mrb[214].mxu1  ;;  %16045 = vmatprep.subr.bf16.mxu0 %v17071_v61 }
 0x2b6   : > { %v15843_v40 = vpop.f32.mrb[215].mxu0  ;;  %v15907_v13 = vpop.f32.mrb[215].mxu1 }
 0x2b7   : > { %v19917_v31 = vadd.f32 %v15841_v52, %v19803_v58  ;;  %v15844_v49 = vadd.f32 %v15843_v40, %v15842_v54  ;;  %v15908_v50 = vadd.f32 %v15907_v13, %v15906_v63  ;;  %v19920_v43 = vadd.f32 %v15905_v48, %v19806_v34  ;;  %v17073_v58 = vld [vmem:[%s22116_s7 + $0x58] sm:$0xff]  }
 0x2b8   : > { %16046 = vmatpush3.bf16.msra.mxu0 %v17072_v3 }
 0x2b9   : > { %v19926_v39 = vadd.f32 %v15844_v49, %v19809_v10  ;;  %v19929_v0 = vadd.f32 %v15908_v50, %v19812_v57  ;;  %16047 = vmatprep.subr.bf16.mxu0 %v17073_v58 }
 0x2bb   : > { %v15845_v32 = vpop.f32.mrb[216].mxu0  ;;  %v15909_v2 = vpop.f32.mrb[216].mxu1 }
 0x2bc   : > { %v15846_v34 = vpop.f32.mrb[217].mxu0  ;;  %v15910_v15 = vpop.f32.mrb[217].mxu1  ;;  %16048 = vmatpush3.bf16.msra.mxu0 %v17074_v17 }
 0x2bd   : > { %v15847_v8 = vadd.f32 %v15846_v34, %v15845_v32  ;;  %v15911_v10 = vadd.f32 %v15910_v15, %v15909_v2  ;;  %v15848_v12 = vpop.f32.mrb[218].mxu0  ;;  %v15912_v29 = vpop.f32.mrb[218].mxu1 }
 0x2be   : > { %v15849_v57 = vpop.f32.mrb[219].mxu0  ;;  %v15913_v33 = vpop.f32.mrb[219].mxu1 }
 0x2bf   : > { %v19938_v19 = vadd.f32 %v15847_v8, %v19815_v24  ;;  %v15850_v14 = vadd.f32 %v15849_v57, %v15848_v12  ;;  %v15914_v7 = vadd.f32 %v15913_v33, %v15912_v29  ;;  %v19941_v6 = vadd.f32 %v15911_v10, %v19818_v21 }
 0x2c1   : > { %v19944_v23 = vadd.f32 %v15850_v14, %v19821_v55  ;;  %v19947_v18 = vadd.f32 %v15914_v7, %v19824_v46 }
 0x2c3   : > { %v15851_v22 = vpop.f32.mrb[220].mxu0  ;;  %v15915_v11 = vpop.f32.mrb[220].mxu1 }
 0x2c4   : > { %v15852_v38 = vpop.f32.mrb[221].mxu0  ;;  %v15916_v5 = vpop.f32.mrb[221].mxu1 }
 0x2c5   : > { %v15853_v52 = vadd.f32 %v15852_v38, %v15851_v22  ;;  %v15917_v48 = vadd.f32 %v15916_v5, %v15915_v11  ;;  %v15854_v24 = vpop.f32.mrb[222].mxu0  ;;  %v15918_v54 = vpop.f32.mrb[222].mxu1 }
 0x2c6   : > { %v15855_v63 = vpop.f32.mrb[223].mxu0  ;;  %v15919_v61 = vpop.f32.mrb[223].mxu1 }
 0x2c7   : > { %v19950_v21 = vadd.f32 %v15853_v52, %v19827_v28  ;;  %v15856_v40 = vadd.f32 %v15855_v63, %v15854_v24  ;;  %v15920_v13 = vadd.f32 %v15919_v61, %v15918_v54  ;;  %v19953_v55 = vadd.f32 %v15917_v48, %v19830_v44 }
 0x2c9   : > { %v19956_v46 = vadd.f32 %v15856_v40, %v19833_v42  ;;  %v19959_v49 = vadd.f32 %v15920_v13, %v19836_v4 }
 0x2cb   : > { %v15857_v50 = vpop.f32.mrb[224].mxu0  ;;  %v15921_v3 = vpop.f32.mrb[224].mxu1 }
 0x2cc   : > { %v15858_v58 = vpop.f32.mrb[225].mxu0  ;;  %v15922_v32 = vpop.f32.mrb[225].mxu1 }
 0x2cd   : > { %v15859_v2 = vadd.f32 %v15858_v58, %v15857_v50  ;;  %v15923_v34 = vadd.f32 %v15922_v32, %v15921_v3  ;;  %v15860_v15 = vpop.f32.mrb[226].mxu0  ;;  %v15924_v28 = vpop.f32.mrb[226].mxu1 }
 0x2ce   : > { %v15861_v17 = vpop.f32.mrb[227].mxu0  ;;  %v15925_v8 = vpop.f32.mrb[227].mxu1 }
 0x2cf   : > { %v19962_v10 = vadd.f32 %v15859_v2, %v19839_v45  ;;  %v15862_v44 = vadd.f32 %v15861_v17, %v15860_v15  ;;  %v15926_v12 = vadd.f32 %v15925_v8, %v15924_v28  ;;  %v19965_v42 = vadd.f32 %v15923_v34, %v19842_v51 }
 0x2d1   : > { %v19968_v4 = vadd.f32 %v15862_v44, %v19845_v62  ;;  %v19971_v29 = vadd.f32 %v15926_v12, %v19848_v1 }
 0x2d3   : > { %v15863_v57 = vpop.f32.mrb[228].mxu0  ;;  %v15927_v33 = vpop.f32.mrb[228].mxu1 }
 0x2d4   : > { %v15864_v14 = vpop.f32.mrb[229].mxu0  ;;  %v15928_v7 = vpop.f32.mrb[229].mxu1 }
 0x2d5   : > { %v15865_v22 = vadd.f32 %v15864_v14, %v15863_v57  ;;  %v15929_v11 = vadd.f32 %v15928_v7, %v15927_v33  ;;  %v15866_v38 = vpop.f32.mrb[230].mxu0  ;;  %v15930_v45 = vpop.f32.mrb[230].mxu1 }
 0x2d6   : > { %v15867_v5 = vpop.f32.mrb[231].mxu0  ;;  %v15931_v52 = vpop.f32.mrb[231].mxu1 }
 0x2d7   : > { %v19974_v48 = vadd.f32 %v15865_v22, %v19851_v35  ;;  %v15868_v51 = vadd.f32 %v15867_v5, %v15866_v38  ;;  %v15932_v24 = vadd.f32 %v15931_v52, %v15930_v45  ;;  %v19977_v62 = vadd.f32 %v15929_v11, %v19854_v36 }
 0x2d9   : > { %v19980_v1 = vadd.f32 %v15868_v51, %v19857_v47  ;;  %v19983_v54 = vadd.f32 %v15932_v24, %v19860_v37 }
 0x2db   : > { %v15869_v63 = vpop.f32.mrb[232].mxu0  ;;  %v15933_v61 = vpop.f32.mrb[232].mxu1 }
 0x2dc   : > { %v15870_v40 = vpop.f32.mrb[233].mxu0  ;;  %v15934_v13 = vpop.f32.mrb[233].mxu1 }
 0x2dd   : > { %v15871_v50 = vadd.f32 %v15870_v40, %v15869_v63  ;;  %v15935_v3 = vadd.f32 %v15934_v13, %v15933_v61  ;;  %v15872_v58 = vpop.f32.mrb[234].mxu0  ;;  %v15936_v35 = vpop.f32.mrb[234].mxu1 }
 0x2de   : > { %v15873_v32 = vpop.f32.mrb[235].mxu0  ;;  %v15937_v2 = vpop.f32.mrb[235].mxu1 }
 0x2df   : > { %v19986_v34 = vadd.f32 %v15871_v50, %v19863_v56  ;;  %v15874_v36 = vadd.f32 %v15873_v32, %v15872_v58  ;;  %v15938_v15 = vadd.f32 %v15937_v2, %v15936_v35  ;;  %v19989_v47 = vadd.f32 %v15935_v3, %v19866_v9 }
 0x2e1   : > { %v19992_v37 = vadd.f32 %v15874_v36, %v19869_v41  ;;  %v19995_v28 = vadd.f32 %v15938_v15, %v19872_v25 }
 0x2e3   : > { %v15875_v17 = vpop.f32.mrb[236].mxu0  ;;  %v15939_v8 = vpop.f32.mrb[236].mxu1 }
 0x2e4   : > { %v15876_v44 = vpop.f32.mrb[237].mxu0  ;;  %v15940_v12 = vpop.f32.mrb[237].mxu1 }
 0x2e5   : > { %v15877_v57 = vadd.f32 %v15876_v44, %v15875_v17  ;;  %v15941_v33 = vadd.f32 %v15940_v12, %v15939_v8  ;;  %v15878_v14 = vpop.f32.mrb[238].mxu0  ;;  %v15942_v56 = vpop.f32.mrb[238].mxu1 }
 0x2e6   : > { %v15879_v7 = vpop.f32.mrb[239].mxu0  ;;  %v15943_v22 = vpop.f32.mrb[239].mxu1 }
 0x2e7   : > { %v19998_v11 = vadd.f32 %v15877_v57, %v19875_v27  ;;  %v15880_v9 = vadd.f32 %v15879_v7, %v15878_v14  ;;  %v15944_v38 = vadd.f32 %v15943_v22, %v15942_v56  ;;  %v20001_v41 = vadd.f32 %v15941_v33, %v19878_v16 }
 0x2e9   : > { %v20004_v25 = vadd.f32 %v15880_v9, %v19881_v60  ;;  %v20007_v45 = vadd.f32 %v15944_v38, %v19884_v59 }
 0x2eb   : > { %v15945_v5 = vpop.f32.mrb[240].mxu1  ;;  %v16579_v52 = vpop.f32.mrb[240].mxu0 }
 0x2ec   : > { %v7219_v51 = vadd.f32 %v16579_v52, %v19920_v43  ;;  %v15946_v24 = vpop.f32.mrb[241].mxu1  ;;  %v7210_v63 = vpop.f32.mrb[241].mxu0 }
 0x2ed   : > { %v15947_v61 = vadd.f32 %v15946_v24, %v15945_v5  ;;  %v7211_v27 = vadd.f32 %v7210_v63, %v19890_v20  ;;  %v15948_v40 = vpop.f32.mrb[242].mxu1  ;;  %v16580_v13 = vpop.f32.mrb[242].mxu0 }
 0x2ee   : > { %v7222_v16 = vadd.f32 %v16580_v13, %v19929_v0  ;;  %v15949_v50 = vpop.f32.mrb[243].mxu1  ;;  %v7213_v3 = vpop.f32.mrb[243].mxu0  ;;  %v7339_v35 = vmax.f32 %v7219_v51, 0.0  ;;  %v17076_v0 = vld [vmem:[%s22116_s7 + $0x80] sm:$0xff]  }
 0x2ef   : > { %v15950_v60 = vadd.f32 %v15949_v50, %v15948_v40  ;;  %v7214_v58 = vadd.f32 %v7213_v3, %v19896_v53  ;;  %v20014_v59 = vadd.f32 %v15947_v61, %v19887_v30  ;;  %v7337_v43 = vmax.f32 %v7211_v27, 0.0 }
 0x2f0   : > { %v7340_v32 = vmax.f32 %v7222_v16, 0.0 }
 0x2f1   : > { %v7338_v2 = vmax.f32 %v7214_v58, 0.0  ;;  %v20017_v36 = vadd.f32 %v15950_v60, %v19893_v26 }
 0x2f2   : > { %v7370_v20 = vpack.c.bf16 %v7340_v32, %v7339_v35 }
 0x2f3   : > { %v7369_v15 = vpack.c.bf16 %v7338_v2, %v7337_v43  ;;  %v15951_v17 = vpop.f32.mrb[244].mxu1  ;;  %v16583_v8 = vpop.f32.mrb[244].mxu0 }
 0x2f4   : > { %v7235_v53 = vadd.f32 %v16583_v8, %v19953_v55  ;;  %v15952_v44 = vpop.f32.mrb[245].mxu1  ;;  %v7226_v30 = vpop.f32.mrb[245].mxu0 }
 0x2f5   : > { %v15953_v12 = vadd.f32 %v15952_v44, %v15951_v17  ;;  %v7227_v57 = vadd.f32 %v7226_v30, %v19941_v6  ;;  %v15954_v33 = vpop.f32.mrb[246].mxu1  ;;  %v16584_v14 = vpop.f32.mrb[246].mxu0  ;;  %16625 = vmatprep.mubr.bf16.mxu1 %v7369_v15 }
 0x2f6   : > { %v7238_v26 = vadd.f32 %v16584_v14, %v19959_v49  ;;  %v15955_v56 = vpop.f32.mrb[247].mxu1  ;;  %v7229_v7 = vpop.f32.mrb[247].mxu0  ;;  %16626 = vmatmul.mubr.bf16.vlgmr.msra.gmra.mrb[16].mxu1 %v7370_v20  ;;  %v7343_v55 = vmax.f32 %v7235_v53, 0.0 }
 0x2f7   : > { %v15956_v22 = vadd.f32 %v15955_v56, %v15954_v33  ;;  %v7230_v9 = vadd.f32 %v7229_v7, %v19947_v18  ;;  %v7122_v38 = vadd.f32 %v15953_v12, %v19917_v31  ;;  %16154 = vmatpush3.bf16.msra.mxu1 %v17076_v0  ;;  %v7341_v52 = vmax.f32 %v7227_v57, 0.0 }
 0x2f8   : > { %v7344_v5 = vmax.f32 %v7238_v26, 0.0 }
 0x2f9   : > { %v7342_v51 = vmax.f32 %v7230_v9, 0.0  ;;  %v7125_v6 = vadd.f32 %v15956_v22, %v19926_v39 }
 0x2fa   : > { %v7372_v24 = vpack.c.bf16 %v7344_v5, %v7343_v55 }
 0x2fb   : > { %v7371_v63 = vpack.c.bf16 %v7342_v51, %v7341_v52  ;;  %v15957_v61 = vpop.f32.mrb[248].mxu1  ;;  %v16587_v27 = vpop.f32.mrb[248].mxu0 }
 0x2fc   : > { %v7251_v49 = vadd.f32 %v16587_v27, %v19977_v62  ;;  %v15958_v40 = vpop.f32.mrb[249].mxu1  ;;  %v7242_v13 = vpop.f32.mrb[249].mxu0 }
 0x2fd   : > { %v15959_v16 = vadd.f32 %v15958_v40, %v15957_v61  ;;  %v7243_v18 = vadd.f32 %v7242_v13, %v19965_v42  ;;  %v15960_v50 = vpop.f32.mrb[250].mxu1  ;;  %v16588_v31 = vpop.f32.mrb[250].mxu0  ;;  %16629 = vmatprep.mubr.bf16.mxu1 %v7371_v63 }
 0x2fe   : > { %v7254_v3 = vadd.f32 %v16588_v31, %v19983_v54  ;;  %v15961_v60 = vpop.f32.mrb[251].mxu1  ;;  %v7245_v58 = vpop.f32.mrb[251].mxu0  ;;  %16630 = vmatmul.mubr.bf16.gmra.mrb[20].mxu1 %v7372_v24  ;;  %v7347_v43 = vmax.f32 %v7251_v49, 0.0 }
 0x2ff   : > { %v15962_v39 = vadd.f32 %v15961_v60, %v15960_v50  ;;  %v7246_v35 = vadd.f32 %v7245_v58, %v19971_v29  ;;  %v7130_v32 = vadd.f32 %v15959_v16, %v19938_v19  ;;  %v7345_v2 = vmax.f32 %v7243_v18, 0.0 }
 0x300   : > { %v7348_v62 = vmax.f32 %v7254_v3, 0.0 }
 0x301   : > { %v7346_v20 = vmax.f32 %v7246_v35, 0.0  ;;  %v20034_v15 = vadd.f32 %v15962_v39, %v19944_v23 }
 0x302   : > { %v7374_v42 = vpack.c.bf16 %v7348_v62, %v7347_v43 }
 0x303   : > { %v7373_v17 = vpack.c.bf16 %v7346_v20, %v7345_v2  ;;  %v15963_v8 = vpop.f32.mrb[252].mxu1  ;;  %v16591_v0 = vpop.f32.mrb[252].mxu0 }
 0x304   : > { %v7267_v54 = vadd.f32 %v16591_v0, %v20001_v41  ;;  %v15964_v53 = vpop.f32.mrb[253].mxu1  ;;  %v7258_v44 = vpop.f32.mrb[253].mxu0 }
 0x305   : > { %v15965_v30 = vadd.f32 %v15964_v53, %v15963_v8  ;;  %v7259_v29 = vadd.f32 %v7258_v44, %v19989_v47  ;;  %v15966_v12 = vpop.f32.mrb[254].mxu1  ;;  %v16592_v19 = vpop.f32.mrb[254].mxu0  ;;  %16633 = vmatprep.mubr.bf16.mxu1 %v7373_v17 }
 0x306   : > { %v7270_v57 = vadd.f32 %v16592_v19, %v20007_v45  ;;  %v15967_v33 = vpop.f32.mrb[255].mxu1  ;;  %v7261_v14 = vpop.f32.mrb[255].mxu0  ;;  %16634 = vmatmul.mubr.bf16.gmra.mrb[24].mxu1 %v7374_v42  ;;  %v7351_v7 = vmax.f32 %v7267_v54, 0.0 }
 0x307   : > { %v15968_v23 = vadd.f32 %v15967_v33, %v15966_v12  ;;  %v7262_v26 = vadd.f32 %v7261_v14, %v19995_v28  ;;  %v7138_v56 = vadd.f32 %v15965_v30, %v19950_v21  ;;  %v7349_v22 = vmax.f32 %v7259_v29, 0.0 }
 0x308   : > { %v7352_v41 = vmax.f32 %v7270_v57, 0.0 }
 0x309   : > { %v7350_v9 = vmax.f32 %v7262_v26, 0.0  ;;  %v7141_v55 = vadd.f32 %v15968_v23, %v19956_v46 }
 0x30a   : > { %v7376_v47 = vpack.c.bf16 %v7352_v41, %v7351_v7 }
 0x30b   : > { %v7375_v5 = vpack.c.bf16 %v7350_v9, %v7349_v22  ;;  %v15969_v52 = vpop.f32.mrb[0].mxu1  ;;  %v16595_v51 = vpop.f32.mrb[0].mxu0 }
 0x30c   : > { %v7283_v24 = vadd.f32 %v16595_v51, %v7122_v38  ;;  %v15970_v45 = vpop.f32.mrb[1].mxu1  ;;  %v7274_v63 = vpop.f32.mrb[1].mxu0 }
 0x30d   : > { %v15971_v61 = vadd.f32 %v15970_v45, %v15969_v52  ;;  %v7275_v27 = vadd.f32 %v7274_v63, %v20014_v59  ;;  %v15972_v49 = vpop.f32.mrb[2].mxu1  ;;  %v16596_v28 = vpop.f32.mrb[2].mxu0  ;;  %16637 = vmatprep.mubr.bf16.mxu1 %v7375_v5 }
 0x30e   : > { %v7286_v21 = vadd.f32 %v16596_v28, %v7125_v6  ;;  %v15973_v40 = vpop.f32.mrb[3].mxu1  ;;  %v7277_v13 = vpop.f32.mrb[3].mxu0  ;;  %16638 = vmatmul.mubr.bf16.gmra.mrb[28].mxu1 %v7376_v47  ;;  %v7355_v50 = vmax.f32 %v7283_v24, 0.0 }
 0x30f   : > { %v15974_v16 = vadd.f32 %v15973_v40, %v15972_v49  ;;  %v7278_v46 = vadd.f32 %v7277_v13, %v20017_v36  ;;  %v7146_v18 = vadd.f32 %v15971_v61, %v19962_v10  ;;  %v7353_v38 = vmax.f32 %v7275_v27, 0.0 }
 0x310   : > { %v7356_v31 = vmax.f32 %v7286_v21, 0.0 }
 0x311   : > { %v7354_v3 = vmax.f32 %v7278_v46, 0.0  ;;  %v7149_v60 = vadd.f32 %v15974_v16, %v19968_v4 }
 0x312   : > { %v7378_v58 = vpack.c.bf16 %v7356_v31, %v7355_v50 }
 0x313   : > { %v7377_v59 = vpack.c.bf16 %v7354_v3, %v7353_v38  ;;  %v15975_v39 = vpop.f32.mrb[4].mxu1  ;;  %v16599_v35 = vpop.f32.mrb[4].mxu0 }
 0x314   : > { %v7299_v43 = vadd.f32 %v16599_v35, %v7138_v56  ;;  %v15976_v6 = vpop.f32.mrb[5].mxu1  ;;  %v7290_v62 = vpop.f32.mrb[5].mxu0 }
 0x315   : > { %v15977_v2 = vadd.f32 %v15976_v6, %v15975_v39  ;;  %v7291_v20 = vadd.f32 %v7290_v62, %v7130_v32  ;;  %v15978_v42 = vpop.f32.mrb[6].mxu1  ;;  %v16600_v17 = vpop.f32.mrb[6].mxu0  ;;  %16641 = vmatprep.mubr.bf16.mxu1 %v7377_v59  ;;  %v17077_v62 = vld [vmem:[%s22116_s7 + $0xc8] sm:$0xff]  }
 0x316   : > { %v7302_v36 = vadd.f32 %v16600_v17, %v7141_v55  ;;  %v15979_v10 = vpop.f32.mrb[7].mxu1  ;;  %v7293_v8 = vpop.f32.mrb[7].mxu0  ;;  %16642 = vmatmul.mubr.bf16.gmra.mrb[32].mxu1 %v7378_v58  ;;  %v7359_v53 = vmax.f32 %v7299_v43, 0.0  ;;  %16155 = vmatprep.subr.bf16.mxu1 %v17077_v62  ;;  %v17079_v17 = vld [vmem:[%s22116_s7 + $0x60] sm:$0xff]  }
 0x317   : > { %v15980_v0 = vadd.f32 %v15979_v10, %v15978_v42  ;;  %v7294_v54 = vadd.f32 %v7293_v8, %v20034_v15  ;;  %v7154_v4 = vadd.f32 %v15977_v2, %v19974_v48  ;;  %v7357_v30 = vmax.f32 %v7291_v20, 0.0  ;;  %v17082_v2 = vld [vmem:[%s22116_s7 + $0x90] sm:$0xff]   ;;  %v17083_v42 = vld [vmem:[%s22116_s7 + $0xd8] sm:$0xff]   ;;  %16049 = vmatprep.subr.bf16.mxu0 %v17079_v17  ;;  %v17087_v8 = vld [vmem:[%s22116_s7 + $0xe0] sm:$0xff]  }
 0x318   : > { %v7360_v44 = vmax.f32 %v7302_v36, 0.0  ;;  %v17217_v20 = vmov 0   ;;  %v17080_v36 = vld [vmem:[%s22116_s7 + $0x20] sm:$0xff]   ;;  %v17084_v10 = vld [vmem:[%s22116_s7 + $0x98] sm:$0xff]  }
 0x319   : > { %v7358_v29 = vmax.f32 %v7294_v54, 0.0  ;;  %v7157_v12 = vadd.f32 %v15980_v0, %v19980_v1  ;;  %7710 = vst [vmem:[#allocation3 + $0x18] sm:$0xf] %v17217_v20  ;;  %7704 = vst [vmem:[#allocation3] sm:$0xf] %v17217_v20  ;;  %16050 = vmatpush3.bf16.msra.mxu0 %v17080_v36  ;;  %v17088_v0 = vld [vmem:[%s22116_s7 + $0xa0] sm:$0xff]  }
 0x31a   : > { %v7380_v19 = vpack.c.bf16 %v7360_v44, %v7359_v53  ;;  %7705 = vst [vmem:[#allocation3 + $0x4] sm:$0xf] %v17217_v20  ;;  %7706 = vst [vmem:[#allocation3 + $0x8] sm:$0x1] %v17217_v20  ;;  %v17085_v54 = vld [vmem:[%s22116_s7 + $0x68] sm:$0xff]  }
 0x31b   : > { %v7379_v32 = vpack.c.bf16 %v7358_v29, %v7357_v30  ;;  %v15981_v57 = vpop.f32.mrb[8].mxu1  ;;  %v16603_v33 = vpop.f32.mrb[8].mxu0  ;;  %7707 = vst [vmem:[#allocation3 + $0xc] sm:$0xf] %v17217_v20  ;;  %7708 = vst [vmem:[#allocation3 + $0x10] sm:$0xf] %v17217_v20  ;;  %16051 = vmatprep.subr.bf16.mxu0 %v17085_v54 }
 0x31c   : > { %v7315_v14 = vadd.f32 %v16603_v33, %v7154_v4  ;;  %v15982_v23 = vpop.f32.mrb[9].mxu1  ;;  %v7306_v26 = vpop.f32.mrb[9].mxu0  ;;  %7709 = vst [vmem:[#allocation3 + $0x14] sm:$0x1] %v17217_v20  ;;  %7711 = vst [vmem:[#allocation3 + $0x1c] sm:$0xf] %v17217_v20 }
 0x31d   : > { %v15983_v56 = vadd.f32 %v15982_v23, %v15981_v57  ;;  %v7307_v7 = vadd.f32 %v7306_v26, %v7146_v18  ;;  %v15984_v41 = vpop.f32.mrb[10].mxu1  ;;  %v16604_v22 = vpop.f32.mrb[10].mxu0  ;;  %16645 = vmatprep.mubr.bf16.mxu1 %v7379_v32  ;;  %7712 = vst [vmem:[#allocation3 + $0x20] sm:$0x1] %v17217_v20  ;;  %7713 = vst [vmem:[#allocation3 + $0x24] sm:$0xf] %v17217_v20 }
 0x31e   : > { %v7318_v15 = vadd.f32 %v16604_v22, %v7157_v12  ;;  %v15985_v48 = vpop.f32.mrb[11].mxu1  ;;  %v7309_v9 = vpop.f32.mrb[11].mxu0  ;;  %16646 = vmatmul.mubr.bf16.gmra.mrb[36].mxu1 %v7380_v19  ;;  %v7363_v5 = vmax.f32 %v7315_v14, 0.0  ;;  %7714 = vst [vmem:[#allocation3 + $0x28] sm:$0xf] %v17217_v20  ;;  %v17089_v4 = vld [vmem:[%s22116_s7 + $0xe8] sm:$0xff]  }
 0x31f   : > { %v15986_v55 = vadd.f32 %v15985_v48, %v15984_v41  ;;  %v7310_v47 = vadd.f32 %v7309_v9, %v7149_v60  ;;  %v7162_v1 = vadd.f32 %v15983_v56, %v19986_v34  ;;  %v7361_v51 = vmax.f32 %v7307_v7, 0.0  ;;  %7715 = vst [vmem:[#allocation3 + $0x2c] sm:$0x1] %v17217_v20  ;;  %7716 = vst [vmem:[#allocation3 + $0x30] sm:$0xf] %v17217_v20  ;;  %v17086_v53 = vld [vmem:[%s22116_s7 + $0x28] sm:$0xff]  }
 0x320   : > { %v7364_v52 = vmax.f32 %v7318_v15, 0.0  ;;  %7717 = vst [vmem:[#allocation3 + $0x34] sm:$0xf] %v17217_v20  ;;  %7718 = vst [vmem:[#allocation3 + $0x38] sm:$0x1] %v17217_v20  ;;  %v17090_v44 = vld [vmem:[%s22116_s7 + $0xa8] sm:$0xff]   ;;  %16052 = vmatpush3.bf16.msra.mxu0 %v17086_v53 }
 0x321   : > { %v7362_v24 = vmax.f32 %v7310_v47, 0.0  ;;  %v7165_v45 = vadd.f32 %v15986_v55, %v19992_v37  ;;  %7719 = vst [vmem:[#allocation3 + $0x3c] sm:$0xf] %v17217_v20  ;;  %7720 = vst [vmem:[#allocation3 + $0x40] sm:$0xf] %v17217_v20  ;;  %v17093_v30 = vld [vmem:[%s22116_s7 + $0xf0] sm:$0xff]  }
 0x322   : > { %v7382_v63 = vpack.c.bf16 %v7364_v52, %v7363_v5  ;;  %7721 = vst [vmem:[#allocation3 + $0x44] sm:$0x1] %v17217_v20  ;;  %7722 = vst [vmem:[#allocation3 + $0x48] sm:$0xf] %v17217_v20  ;;  %v17094_v29 = vld [vmem:[%s22116_s7 + $0xb0] sm:$0xff]   ;;  %v17095_v57 = vld [vmem:[%s22116_s7 + $0xf8] sm:$0xff]  }
 0x323   : > { %v7381_v61 = vpack.c.bf16 %v7362_v24, %v7361_v51  ;;  %v15987_v27 = vpop.f32.mrb[12].mxu1  ;;  %v16607_v49 = vpop.f32.mrb[12].mxu0  ;;  %7723 = vst [vmem:[#allocation3 + $0x4c] sm:$0xf] %v17217_v20  ;;  %7724 = vst [vmem:[#allocation3 + $0x50] sm:$0x1] %v17217_v20 }
 0x324   : > { %v15988_v28 = vpop.f32.mrb[13].mxu1  ;;  %v7322_v21 = vpop.f32.mrb[13].mxu0  ;;  %7725 = vst [vmem:[#allocation3 + $0x54] sm:$0xf] %v17217_v20  ;;  %7726 = vst [vmem:[#allocation3 + $0x58] sm:$0xf] %v17217_v20 }
 0x325   : > { %v15989_v40 = vadd.f32 %v15988_v28, %v15987_v27  ;;  %v7323_v13 = vadd.f32 %v7322_v21, %v7162_v1  ;;  %v15990_v16 = vpop.f32.mrb[14].mxu1  ;;  %v16608_v46 = vpop.f32.mrb[14].mxu0  ;;  %16649 = vmatprep.mubr.bf16.mxu1 %v7381_v61  ;;  %7727 = vst [vmem:[#allocation3 + $0x5c] sm:$0x1] %v17217_v20  ;;  %7728 = vst [vmem:[#allocation3 + $0x60] sm:$0xf] %v17217_v20 }
 0x326   : > { %v15991_v18 = vpop.f32.mrb[15].mxu1  ;;  %v7325_v50 = vpop.f32.mrb[15].mxu0  ;;  %16650 = vmatmul.mubr.bf16.gmra.mrb[40].mxu1 %v7382_v63  ;;  %7729 = vst [vmem:[#allocation3 + $0x64] sm:$0xf] %v17217_v20  ;;  %7730 = vst [vmem:[#allocation3 + $0x68] sm:$0x1] %v17217_v20 }
 0x327   : > { %v7170_v34 = vadd.f32 %v15989_v40, %v19998_v11  ;;  %v15992_v31 = vadd.f32 %v15991_v18, %v15990_v16  ;;  %v7326_v38 = vadd.f32 %v7325_v50, %v7165_v45  ;;  %v7365_v37 = vmax.f32 %v7323_v13, 0.0  ;;  %v17078_v11 = vld [vmem:[%s22116_s7 + $0x88] sm:$0xff]   ;;  %7731 = vst [vmem:[#allocation3 + $0x6c] sm:$0xf] %v17217_v20  ;;  %7732 = vst [vmem:[#allocation3 + $0x70] sm:$0xf] %v17217_v20 }
 0x328   : > { %16156 = vmatpush3.bf16.msra.mxu1 %v17078_v11  ;;  %7733 = vst [vmem:[#allocation3 + $0x74] sm:$0x1] %v17217_v20  ;;  %7734 = vst [vmem:[#allocation3 + $0x78] sm:$0xf] %v17217_v20  ;;  %v8530_v12 = vld [vmem:[#allocation3] sm:$0xf] }
 0x329   : > { %v7331_v3 = vadd.f32 %v16607_v49, %v7170_v34  ;;  %v7173_v60 = vadd.f32 %v15992_v31, %v20004_v25  ;;  %v7366_v58 = vmax.f32 %v7326_v38, 0.0  ;;  %v17081_v25 = vld [vmem:[%s22116_s7 + $0xd0] sm:$0xff]   ;;  %7735 = vst [vmem:[#allocation3 + $0x7c] sm:$0xf] %v17217_v20  ;;  %7736 = vst [vmem:[#allocation3 + $0x80] sm:$0x1] %v17217_v20 }
 0x32a   : > { %16157 = vmatprep.subr.bf16.mxu1 %v17081_v25  ;;  %7737 = vst [vmem:[#allocation3 + $0x84] sm:$0xf] %v17217_v20  ;;  %7738 = vst [vmem:[#allocation3 + $0x88] sm:$0xf] %v17217_v20  ;;  %v8531_v19 = vld [vmem:[#allocation3 + $0x4] sm:$0xf] }
 0x32b   : > { %v7334_v59 = vadd.f32 %v16608_v46, %v7173_v60  ;;  %v7383_v39 = vpack.c.bf16 %v7366_v58, %v7365_v37  ;;  %v7367_v35 = vmax.f32 %v7331_v3, 0.0  ;;  %7739 = vst [vmem:[#allocation3 + $0x8c] sm:$0x1] %v17217_v20  ;;  %7740 = vst [vmem:[#allocation3 + $0x90] sm:$0xf] %v17217_v20  ;;  %v17091_v32 = vld [vmem:[%s22116_s7 + $0x70] sm:$0xff]  }
 0x32c   : > { %7741 = vst [vmem:[#allocation3 + $0x94] sm:$0xf] %v17217_v20  ;;  %7742 = vst [vmem:[#allocation3 + $0x98] sm:$0x1] %v17217_v20  ;;  %16158 = vmatpush3.bf16.msra.mxu1 %v17082_v2  ;;  %v8582_v33 = vshrl.u32 %v8530_v12, 16  ;;  %v8585_v14 = vshll.u32 %v8530_v12, 16  ;;  %16053 = vmatprep.subr.bf16.mxu0 %v17091_v32 }
 0x32d   : > { %v7368_v43 = vmax.f32 %v7334_v59, 0.0  ;;  %16653 = vmatprep.mubr.bf16.mxu1 %v7383_v39  ;;  %7743 = vst [vmem:[#allocation3 + $0x9c] sm:$0xf] %v17217_v20  ;;  %7744 = vst [vmem:[#allocation3 + $0xa0] sm:$0xf] %v17217_v20  ;;  %16159 = vmatprep.subr.bf16.mxu1 %v17083_v42  ;;  %v17092_v23 = vld [vmem:[%s22116_s7 + $0x30] sm:$0xff]  }
 0x32e   : > { %7745 = vst [vmem:[#allocation3 + $0xa4] sm:$0x1] %v17217_v20  ;;  %7746 = vst [vmem:[#allocation3 + $0xa8] sm:$0xf] %v17217_v20  ;;  %v8591_v26 = vshll.u32 %v8531_v19, 16  ;;  %v8595_v56 = vshrl.u32 %v8531_v19, 16  ;;  %16054 = vmatpush3.bf16.msra.mxu0 %v17092_v23 }
 0x32f   : > { %v7384_v6 = vpack.c.bf16 %v7368_v43, %v7367_v35  ;;  %7747 = vst [vmem:[#allocation3 + $0xac] sm:$0xf] %v17217_v20  ;;  %7748 = vst [vmem:[#allocation3 + $0xb0] sm:$0x1] %v17217_v20  ;;  %v17096_v7 = vld [vmem:[%s22116_s7 + $0xb8] sm:$0xff]   ;;  %v8584_v22 = vrot.slane %v8582_v33, 4 }
 0x330   : > { %7749 = vst [vmem:[#allocation3 + $0xb4] sm:$0xf] %v17217_v20  ;;  %7750 = vst [vmem:[#allocation3 + $0xb8] sm:$0xf] %v17217_v20  ;;  %16160 = vmatpush3.bf16.msra.mxu1 %v17084_v10  ;;  %v8532_v41 = vld [vmem:[#allocation3 + $0x8] sm:$0x1] }
 0x331   : > { %16654 = vmatmul.mubr.bf16.gmra.mrb[44].mxu1 %v7384_v6  ;;  %7751 = vst [vmem:[#allocation3 + $0xbc] sm:$0x1] %v17217_v20  ;;  %7752 = vst [vmem:[#allocation3 + $0xc0] sm:$0xf] %v17217_v20  ;;  %16161 = vmatprep.subr.bf16.mxu1 %v17087_v8  ;;  %v8587_v15 = vrot.slane %v8585_v14, 5  ;;  %v8593_v48 = vrot.slane %v8591_v26, 5 }
 0x332   : > { %7753 = vst [vmem:[#allocation3 + $0xc4] sm:$0xf] %v17217_v20  ;;  %7754 = vst [vmem:[#allocation3 + $0xc8] sm:$0x1] %v17217_v20  ;;  %v8597_v9 = vrot.slane %v8595_v56, 4  ;;  %v8601_v55 = vshll.u32 %v8532_v41, 16 }
 0x333   : > { %7755 = vst [vmem:[#allocation3 + $0xcc] sm:$0xf] %v17217_v20  ;;  %7756 = vst [vmem:[#allocation3 + $0xd0] sm:$0xf] %v17217_v20  ;;  %v17097_v47 = vld [vmem:[%s22116_s7 + $0x78] sm:$0xff]   ;;  %v8588_v1 = vor.u32 %v8587_v15, %v8584_v22  ;;  %v17101_v49 = vld [vmem:[#allocation3] sm:$0xff]  }
 0x334   : > { %7757 = vst [vmem:[#allocation3 + $0xd4] sm:$0x1] %v17217_v20  ;;  %16162 = vmatpush3.bf16.msra.mxu1 %v17088_v0  ;;  %v17098_v5 = vld [vmem:[%s22116_s7 + $0x38] sm:$0xff]   ;;  %v8598_v51 = vor.u32 %v8597_v9, %v8593_v48  ;;  %v8603_v24 = vrot.slane %v8601_v55, 5  ;;  %16055 = vmatprep.subr.bf16.mxu0 %v17097_v47  ;;  %v17102_v21 = vld [vmem:[%s22116_s7 + $0x140] sm:$0xff]   ;;  %v17108_v13 = vld [vmem:[%s22116_s7 + $0x148] sm:$0xff]  }
 0x335   : > { %16163 = vmatprep.subr.bf16.mxu1 %v17089_v4  ;;  %v8589_v45 = vrot.slane %v8588_v1, 4  ;;  %16056 = vmatpush3.bf16.msra.mxu0 %v17098_v5  ;;  %v17103_v40 = vld [vmem:[%s22116_s7 + $0x100] sm:$0xff]   ;;  %v17109_v16 = vld [vmem:[%s22116_s7 + $0x108] sm:$0xff]   ;;  %v17114_v12 = vld [vmem:[%s22116_s7 + $0x150] sm:$0xff]  }
 0x336   : > { %v8599_v63 = vrot.slane %v8598_v51, 4  ;;  %16265 = vmatprep.subr.bf16.mxu0 %v17102_v21  ;;  %v9046_v46 = vld [vmem:[#allocation3 + $0x4] sm:$0xf]  ;;  %v20146_v50 = vld [vmem:[%s20143_s23] ss:$0 sm:$0xff]  ;;  %v17115_v19 = vld [vmem:[%s22116_s7 + $0x110] sm:$0xff]  }
 0x337   : > { %v8594_v61 = vsel %vm20119_vm11, %v8589_v45, %v8593_v48  ;;  %v9143_v18 = vrot.slane %v9046_v46, 5  ;;  %v9045_v34 = vld [vmem:[#allocation3] sm:$0xe]  ;;  %v9047_v31 = vld [vmem:[#allocation3 + $0x8] sm:$0x1]  ;;  %v17159_v46 = vld [vmem:[%s22116_s7 + $0x1b0] sm:$0xff]  }
 0x338   : > { %16164 = vmatpush3.bf16.msra.mxu1 %v17090_v44  ;;  %v8604_v27 = vsel %vm20119_vm11, %v8599_v63, %v8603_v24  ;;  %v20151_v3 = vld [vmem:[%s22115_s6] ss:$0 sm:$0xff]  ;;  %v14810_v58 = vrot.slane %v9045_v34, 9  ;;  %v9146_v39 = vrot.slane %v9047_v31, 5  ;;  %v8173_v5 = vld [vmem:[#allocation3 + $0x18] sm:$0xf] }
 0x339   : > { %16165 = vmatprep.subr.bf16.mxu1 %v17093_v30  ;;  %v14794_v28 = vcombine.low %v8594_v61, %v8604_v27  ;;  %v9145_v59 = vrot.slane %v9143_v18, 4 }
 0x33a   : > { %v20162_v36 = vsel %vm17551_vm8, %v14810_v58, %v9143_v18  ;;  %v8177_v18 = vld [vmem:[#allocation3 + $0x20] sm:$0x1] }
 0x33b   : > { %12013 = vmatprep.mubr.bf16.mxu0 %v14794_v28  ;;  %v20166_v10 = vsel %vm17551_vm8, %v9145_v59, %v9146_v39  ;;  %v8170_v59 = vld [vmem:[#allocation3 + $0x14] sm:$0x1] }
 0x33c   : > { %16166 = vmatpush3.bf16.msra.mxu1 %v17094_v29  ;;  %12014 = vmatmul.mubr.bf16.vlgmr.msra.gmra.mrb[16].mxu0 %v17101_v49  ;;  %v14826_v29 = vcombine.low %v20162_v36, %v20166_v10  ;;  %v8165_v49 = vld [vmem:[#allocation3 + $0xc] sm:$0xf]  ;;  %v8283_v1 = vld [vmem:[#allocation3 + $0xd4] sm:$0x1] }
 0x33d   : > { %16167 = vmatprep.subr.bf16.mxu1 %v17095_v57  ;;  %16266 = vmatpush3.bf16.msra.mxu0 %v17103_v40 }
 0x33e   : > { %16267 = vmatprep.subr.bf16.mxu0 %v17108_v13 }
 0x340   : > { %16168 = vmatpush3.bf16.msra.mxu1 %v17096_v7 }
 0x341   : > { %16268 = vmatpush3.bf16.msra.mxu0 %v17109_v16 }
 0x342   : > { %16269 = vmatprep.subr.bf16.mxu0 %v17114_v12 }
 0x345   : > { %16270 = vmatpush3.bf16.msra.mxu0 %v17115_v19 }
 0x3c9   : > { %v16627_v38 = vpop.f32.mrb[16].mxu1 }
 0x3ca   : > { %v7499_v37 = vadd.f32 %v16627_v38, %v20146_v50  ;;  %v7490_v60 = vpop.f32.mrb[17].mxu1  ;;  %v17120_v38 = vld [vmem:[%s22116_s7 + $0x158] sm:$0xff]  }
 0x3cb   : > { %v7491_v35 = vadd.f32 %v20146_v50, %v7490_v60  ;;  %v16628_v43 = vpop.f32.mrb[18].mxu1  ;;  %16271 = vmatprep.subr.bf16.mxu0 %v17120_v38 }
 0x3cc   : > { %v7626_v6 = vadd.f32 %v20151_v3, %v7499_v37  ;;  %v7502_v62 = vadd.f32 %v16628_v43, %v20146_v50  ;;  %v7493_v11 = vpop.f32.mrb[19].mxu1 }
 0x3cd   : > { %v7624_v25 = vadd.f32 %v20151_v3, %v7491_v35  ;;  %v7494_v2 = vadd.f32 %v20146_v50, %v7493_v11 }
 0x3ce   : > { %v7658_v20 = vmax.f32 %v7626_v6, 0.0  ;;  %v7627_v42 = vadd.f32 %v20151_v3, %v7502_v62 }
 0x3cf   : > { %v7656_v8 = vmax.f32 %v7624_v25, 0.0  ;;  %v7625_v0 = vadd.f32 %v20151_v3, %v7494_v2 }
 0x3d0   : > { %v15067_v54 = vpack.c.bf16 %v7658_v20, %v7658_v20  ;;  %v7659_v4 = vmax.f32 %v7627_v42, 0.0 }
 0x3d1   : > { %v15065_v53 = vpack.c.bf16 %v7656_v8, %v7656_v8  ;;  %v7657_v44 = vmax.f32 %v7625_v0, 0.0  ;;  %v16631_v30 = vpop.f32.mrb[20].mxu1 }
 0x3d2   : > { %v7859_v32 = vshrl.u32 %v15067_v54, 16  ;;  %v7862_v57 = vshll.u32 %v15067_v54, 16  ;;  %v15068_v33 = vpack.c.bf16 %v7659_v4, %v7659_v4  ;;  %v7515_v14 = vadd.f32 %v16631_v30, %v20146_v50  ;;  %v7506_v23 = vpop.f32.mrb[21].mxu1 }
 0x3d3   : > { %v7842_v26 = vshrl.u32 %v15065_v53, 16  ;;  %v7845_v56 = vshll.u32 %v15065_v53, 16  ;;  %v15066_v7 = vpack.c.bf16 %v7657_v44, %v7657_v44  ;;  %v7507_v41 = vadd.f32 %v20146_v50, %v7506_v23  ;;  %v16632_v22 = vpop.f32.mrb[22].mxu1 }
 0x3d4   : > { %v7861_v15 = vrot.slane %v7859_v32, 7  ;;  %v7867_v48 = vshrl.u32 %v15068_v33, 16  ;;  %v7870_v9 = vshll.u32 %v15068_v33, 16  ;;  %v7630_v55 = vadd.f32 %v20151_v3, %v7515_v14  ;;  %v7509_v47 = vpop.f32.mrb[23].mxu1 }
 0x3d5   : > { %v7844_v51 = vrot.slane %v7842_v26, 7  ;;  %v7850_v24 = vshrl.u32 %v15066_v7, 16  ;;  %v7853_v45 = vshll.u32 %v15066_v7, 16  ;;  %v7628_v63 = vadd.f32 %v20151_v3, %v7507_v41 }
 0x3d6   : > { %v7864_v61 = vor.u32 %v7862_v57, %v7861_v15  ;;  %v7865_v27 = vrot.slane %v7861_v15, 4  ;;  %v7869_v21 = vrot.slane %v7867_v48, 7  ;;  %v20193_v40 = vrot.slane %v7870_v9, 11  ;;  %v8187_v48 = vld [vmem:[#allocation3 + $0x30] sm:$0xf] }
 0x3d7   : > { %v7847_v13 = vor.u32 %v7845_v56, %v7844_v51  ;;  %v7848_v16 = vrot.slane %v7844_v51, 4  ;;  %v7852_v34 = vrot.slane %v7850_v24, 7  ;;  %v20201_v31 = vrot.slane %v7853_v45, 11  ;;  %v17121_v56 = vld [vmem:[%s22116_s7 + $0x118] sm:$0xff]  }
 0x3d8   : > { %v8174_v37 = vsel %vm20182_vm1, %v7864_v61, %v8173_v5  ;;  %v7872_v60 = vor.u32 %v7870_v9, %v7869_v21  ;;  %v7874_v58 = vrot.slane %v7869_v21, 4  ;;  %v7662_v39 = vmax.f32 %v7630_v55, 0.0  ;;  %16272 = vmatpush3.bf16.msra.mxu0 %v17121_v56 }
 0x3d9   : > { %8175 = vst [vmem:[#allocation3 + $0x18] sm:$0xf] %v8174_v37  ;;  %v8166_v35 = vsel %vm20182_vm1, %v7847_v13, %v8165_v49  ;;  %v7855_v43 = vor.u32 %v7853_v45, %v7852_v34  ;;  %v7857_v6 = vrot.slane %v7852_v34, 4  ;;  %v7660_v62 = vmax.f32 %v7628_v63, 0.0  ;;  %v16635_v11 = vpop.f32.mrb[24].mxu1 }
 0x3da   : > { %8167 = vst [vmem:[#allocation3 + $0xc] sm:$0xf] %v8166_v35  ;;  %v7873_v25 = vsel %vm20189_vm2, %v7865_v27, %v7872_v60  ;;  %v8178_v2 = vsel %vm20197_vm3, %v7874_v58, %v8177_v18  ;;  %v15071_v20 = vpack.c.bf16 %v7662_v39, %v7662_v39  ;;  %v7518_v42 = vadd.f32 %v16632_v22, %v20146_v50  ;;  %v7522_v8 = vpop.f32.mrb[25].mxu1  ;;  %v8180_v63 = vld [vmem:[#allocation3 + $0x24] sm:$0xf] }
 0x3db   : > { %8176 = vst [vmem:[#allocation3 + $0x1c] sm:$0xf] %v7873_v25  ;;  %8179 = vst [vmem:[#allocation3 + $0x20] sm:$0x1] %v8178_v2  ;;  %v7856_v0 = vsel %vm20189_vm2, %v7848_v16, %v7855_v43  ;;  %v8171_v54 = vsel %vm20197_vm3, %v7857_v6, %v8170_v59  ;;  %v15069_v4 = vpack.c.bf16 %v7660_v62, %v7660_v62  ;;  %v16636_v44 = vpop.f32.mrb[26].mxu1 }
 0x3dc   : > { %v7510_v53 = vadd.f32 %v20146_v50, %v7509_v47  ;;  %8168 = vst [vmem:[#allocation3 + $0x10] sm:$0xf] %v7856_v0  ;;  %8172 = vst [vmem:[#allocation3 + $0x14] sm:$0x1] %v8171_v54  ;;  %v7893_v30 = vshrl.u32 %v15071_v20, 16  ;;  %v7896_v12 = vshll.u32 %v15071_v20, 16  ;;  %v7631_v19 = vadd.f32 %v20151_v3, %v7518_v42 }
 0x3dd   : > { %v7531_v32 = vadd.f32 %v16635_v11, %v20146_v50  ;;  %v7525_v57 = vpop.f32.mrb[27].mxu1  ;;  %v7876_v33 = vshrl.u32 %v15069_v4, 16  ;;  %v7879_v14 = vshll.u32 %v15069_v4, 16  ;;  %v7523_v26 = vadd.f32 %v20146_v50, %v7522_v8  ;;  %v8184_v0 = vld [vmem:[#allocation3 + $0x2c] sm:$0x1] }
 0x3de   : > { %v7629_v23 = vadd.f32 %v20151_v3, %v7510_v53  ;;  %v20227_v7 = vrot.slane %v7893_v30, 7  ;;  %v7663_v41 = vmax.f32 %v7631_v19, 0.0  ;;  %v7534_v15 = vadd.f32 %v16636_v44, %v20146_v50 }
 0x3df   : > { %v7634_v22 = vadd.f32 %v20151_v3, %v7531_v32  ;;  %v20231_v9 = vrot.slane %v7876_v33, 7  ;;  %v7632_v47 = vadd.f32 %v20151_v3, %v7523_v26  ;;  %v20235_v5 = vadd.f32 %v20146_v50, %v7525_v57 }
 0x3e0   : > { %v7661_v55 = vmax.f32 %v7629_v23, 0.0  ;;  %v7898_v24 = vor.u32 %v7896_v12, %v20227_v7  ;;  %v7899_v45 = vrot.slane %v20227_v7, 4  ;;  %v15072_v61 = vpack.c.bf16 %v7663_v41, %v7663_v41 }
 0x3e1   : > { %v7666_v27 = vmax.f32 %v7634_v22, 0.0  ;;  %v9477_v49 = vld [vmem:[#allocation3 + $0xc] sm:$0xf]  ;;  %v7881_v21 = vor.u32 %v7879_v14, %v20231_v9  ;;  %v7882_v13 = vrot.slane %v20231_v9, 4  ;;  %v7664_v18 = vmax.f32 %v7632_v47, 0.0  ;;  %v20247_v34 = vpop.f32.mrb[28].mxu1 }
 0x3e2   : > { %v15070_v16 = vpack.c.bf16 %v7661_v55, %v7661_v55  ;;  %v9526_v38 = vshrl.u32 %v9477_v49, 16  ;;  %v9529_v37 = vshll.u32 %v9477_v49, 16  ;;  %v8338_v60 = vld [vmem:[#allocation3 + $0x20] sm:$0x1]  ;;  %v8188_v58 = vsel %vm20182_vm1, %v7898_v24, %v8187_v48  ;;  %v7538_v39 = vpop.f32.mrb[29].mxu1  ;;  %v17100_v7 = vld [vmem:[#allocation3 + $0x18] sm:$0xff]  }
 0x3e3   : > { %v7901_v59 = vshrl.u32 %v15072_v61, 16  ;;  %v8339_v35 = vsel %vm20239_vm4, %v20193_v40, %v8338_v60  ;;  %v8335_v43 = vld [vmem:[#allocation3 + $0x14] sm:$0x1]  ;;  %v9478_v6 = vld [vmem:[#allocation3 + $0x10] sm:$0xf]  ;;  %v8181_v62 = vsel %vm20182_vm1, %v7881_v21, %v8180_v63  ;;  %v7904_v11 = vshll.u32 %v15072_v61, 16 }
 0x3e4   : > { %8189 = vst [vmem:[#allocation3 + $0x30] sm:$0xf] %v8188_v58  ;;  %v7884_v25 = vshrl.u32 %v15070_v16, 16  ;;  %v20256_v2 = vrot.slane %v9526_v38, 4  ;;  %v20258_v20 = vrot.slane %v9529_v37, 5  ;;  %v8336_v42 = vsel %vm20239_vm4, %v20201_v31, %v8335_v43  ;;  %v16640_v54 = vpop.f32.mrb[30].mxu1 }
 0x3e5   : > { %8340 = vst [vmem:[#allocation3 + $0x20] sm:$0x1] %v8339_v35  ;;  %v9539_v8 = vshrl.u32 %v9478_v6, 16  ;;  %8182 = vst [vmem:[#allocation3 + $0x24] sm:$0xf] %v8181_v62  ;;  %v7903_v4 = vrot.slane %v7901_v59, 7  ;;  %v15075_v57 = vpack.c.bf16 %v7666_v27, %v7666_v27  ;;  %v15073_v33 = vpack.c.bf16 %v7664_v18, %v7664_v18 }
 0x3e6   : > { %v8191_v40 = vld [vmem:[#allocation3 + $0x38] sm:$0x1]  ;;  %8337 = vst [vmem:[#allocation3 + $0x14] sm:$0x1] %v8336_v42  ;;  %v20263_v53 = vrot.slane %v7904_v11, 11  ;;  %v7886_v44 = vrot.slane %v7884_v25, 7  ;;  %v7635_v14 = vadd.f32 %v20151_v3, %v7534_v15  ;;  %v7633_v21 = vadd.f32 %v20151_v3, %v20235_v5 }
 0x3e7   : > { %v7887_v30 = vshll.u32 %v15070_v16, 16  ;;  %v7541_v12 = vpop.f32.mrb[31].mxu1  ;;  %v17099_v19 = vld [vmem:[#allocation3 + $0xc] sm:$0xff]   ;;  %v20265_v32 = vrot.slane %v9539_v8, 4  ;;  %v7906_v31 = vor.u32 %v7904_v11, %v7903_v4  ;;  %v7908_v23 = vrot.slane %v7903_v4, 4  ;;  %v17124_v37 = vld [vmem:[%s22116_s7 + $0x1c0] sm:$0xff]  }
 0x3e8   : > { %v7891_v56 = vrot.slane %v7886_v44, 4  ;;  %12174 = vmatprep.mubr.bf16.mxu1 %v17099_v19  ;;  %v7927_v22 = vshrl.u32 %v15075_v57, 16  ;;  %v7930_v48 = vshll.u32 %v15075_v57, 16  ;;  %v7910_v9 = vshrl.u32 %v15073_v33, 16  ;;  %v8201_v63 = vld [vmem:[#allocation3 + $0x48] sm:$0xf]  ;;  %16377 = vmatprep.subr.bf16.mxu1 %v17124_v37 }
 0x3e9   : > { %v7889_v26 = vor.u32 %v7887_v30, %v7886_v44  ;;  %v20268_v41 = vrot.slane %v7887_v30, 11  ;;  %12175 = vmatmul.mubr.bf16.vlgmr.msra.gmra.mrb[48].mxu1 %v14826_v29  ;;  %v7907_v55 = vsel %vm20189_vm2, %v7899_v45, %v7906_v31  ;;  %v8192_v15 = vsel %vm20197_vm3, %v7908_v23, %v8191_v40  ;;  %v8194_v61 = vld [vmem:[#allocation3 + $0x3c] sm:$0xf]  ;;  %v16643_v27 = vpop.f32.mrb[32].mxu1  ;;  %v17128_v11 = vld [vmem:[%s22116_s7 + $0x160] sm:$0xff]  }
 0x3ea   : > { %v8185_v24 = vsel %vm20197_vm3, %v7891_v56, %v8184_v0  ;;  %12182 = vmatprep.mubr.bf16.mxu1 %v17100_v7  ;;  %8190 = vst [vmem:[#allocation3 + $0x34] sm:$0xf] %v7907_v55  ;;  %8193 = vst [vmem:[#allocation3 + $0x38] sm:$0x1] %v8192_v15  ;;  %v20281_v36 = vrot.slane %v7927_v22, 7  ;;  %v20283_v10 = vrot.slane %v7910_v9, 7  ;;  %v7539_v16 = vadd.f32 %v20146_v50, %v7538_v39 }
 0x3eb   : > { %v7890_v47 = vsel %vm20189_vm2, %v7882_v13, %v7889_v26  ;;  %8186 = vst [vmem:[#allocation3 + $0x2c] sm:$0x1] %v8185_v24  ;;  %v7913_v29 = vshll.u32 %v15073_v33, 16  ;;  %v7667_v45 = vmax.f32 %v7635_v14, 0.0  ;;  %v7554_v49 = vpop.f32.mrb[33].mxu1  ;;  %v7547_v13 = vadd.f32 %v20247_v34, %v20146_v50  ;;  %v17126_v34 = vld [vmem:[%s22116_s7 + $0x180] sm:$0xff]   ;;  %16273 = vmatprep.subr.bf16.mxu0 %v17128_v11 }
 0x3ec   : > { %8183 = vst [vmem:[#allocation3 + $0x28] sm:$0xf] %v7890_v47  ;;  %v7550_v18 = vadd.f32 %v16640_v54, %v20146_v50  ;;  %v16644_v38 = vpop.f32.mrb[34].mxu1  ;;  %v7932_v60 = vor.u32 %v7930_v48, %v20281_v36  ;;  %v7933_v58 = vrot.slane %v20281_v36, 4  ;;  %v7916_v5 = vrot.slane %v20283_v10, 4  ;;  %16378 = vmatpush3.bf16.msra.mxu1 %v17126_v34  ;;  %v17129_v30 = vld [vmem:[%s22116_s7 + $0x120] sm:$0xff]  }
 0x3ed   : > { %v7915_v59 = vor.u32 %v7913_v29, %v20283_v10  ;;  %v7557_v35 = vpop.f32.mrb[35].mxu1  ;;  %v15076_v39 = vpack.c.bf16 %v7667_v45, %v7667_v45  ;;  %v7665_v43 = vmax.f32 %v7633_v21, 0.0  ;;  %v7638_v6 = vadd.f32 %v20151_v3, %v7547_v13  ;;  %16274 = vmatpush3.bf16.msra.mxu0 %v17129_v30  ;;  %v8205_v9 = vld [vmem:[#allocation3 + $0x50] sm:$0x1]  ;;  %v8208_v11 = vld [vmem:[#allocation3 + $0x54] sm:$0xf] }
 0x3ee   : > { %v7636_v62 = vadd.f32 %v20151_v3, %v7539_v16  ;;  %v8202_v25 = vsel %vm20182_vm1, %v7932_v60, %v8201_v63  ;;  %v7639_v8 = vadd.f32 %v20151_v3, %v7550_v18  ;;  %v7542_v40 = vadd.f32 %v20146_v50, %v7541_v12  ;;  %v8198_v60 = vld [vmem:[#allocation3 + $0x44] sm:$0x1] }
 0x3ef   : > { %v8195_v42 = vsel %vm20182_vm1, %v7915_v59, %v8194_v61  ;;  %8203 = vst [vmem:[#allocation3 + $0x48] sm:$0xf] %v8202_v25  ;;  %v7935_v0 = vshrl.u32 %v15076_v39, 16  ;;  %v7938_v54 = vshll.u32 %v15076_v39, 16  ;;  %v15074_v4 = vpack.c.bf16 %v7665_v43, %v7665_v43  ;;  %v8215_v59 = vld [vmem:[#allocation3 + $0x60] sm:$0xf] }
 0x3f0   : > { %8196 = vst [vmem:[#allocation3 + $0x3c] sm:$0xf] %v8195_v42  ;;  %v7670_v44 = vmax.f32 %v7638_v6, 0.0  ;;  %v7668_v19 = vmax.f32 %v7636_v62, 0.0  ;;  %v7671_v57 = vmax.f32 %v7639_v8, 0.0  ;;  %v20316_v33 = vadd.f32 %v20151_v3, %v7542_v40 }
 0x3f1   : > { %v8344_v14 = vld [vmem:[#allocation3 + $0x38] sm:$0x1]  ;;  %v7563_v23 = vadd.f32 %v16643_v27, %v20146_v50  ;;  %v7555_v26 = vadd.f32 %v20146_v50, %v7554_v49  ;;  %v7566_v56 = vadd.f32 %v16644_v38, %v20146_v50  ;;  %v7937_v48 = vrot.slane %v7935_v0, 7  ;;  %v20328_v15 = vpop.f32.mrb[36].mxu1 }
 0x3f2   : > { %v8341_v31 = vld [vmem:[#allocation3 + $0x2c] sm:$0x1]  ;;  %v15079_v12 = vpack.c.bf16 %v7670_v44, %v7670_v44  ;;  %v8345_v7 = vsel %vm20239_vm4, %v20263_v53, %v8344_v14  ;;  %v7558_v55 = vadd.f32 %v20146_v50, %v7557_v35  ;;  %v20330_v47 = vrot.slane %v7938_v54, 11  ;;  %v20332_v27 = vpop.f32.mrb[37].mxu1 }
 0x3f3   : > { %v8342_v22 = vsel %vm20239_vm4, %v20268_v41, %v8341_v31  ;;  %8346 = vst [vmem:[#allocation3 + $0x38] sm:$0x1] %v8345_v7  ;;  %v7918_v24 = vshrl.u32 %v15074_v4, 16  ;;  %v7921_v63 = vshll.u32 %v15074_v4, 16  ;;  %v7940_v53 = vor.u32 %v7938_v54, %v7937_v48  ;;  %v20334_v41 = vpop.f32.mrb[38].mxu1 }
 0x3f4   : > { %8343 = vst [vmem:[#allocation3 + $0x2c] sm:$0x1] %v8342_v22  ;;  %v7961_v61 = vshrl.u32 %v15079_v12, 16  ;;  %v7942_v36 = vrot.slane %v7937_v48, 4  ;;  %v7964_v29 = vshll.u32 %v15079_v12, 16  ;;  %v15077_v45 = vpack.c.bf16 %v7668_v19, %v7668_v19  ;;  %v20338_v18 = vpop.f32.mrb[39].mxu1 }
 0x3f5   : > { %v7920_v49 = vrot.slane %v7918_v24, 7  ;;  %v20336_v21 = vrot.slane %v7921_v63, 11  ;;  %v15080_v16 = vpack.c.bf16 %v7671_v57, %v7671_v57  ;;  %v7941_v38 = vsel %vm20189_vm2, %v7933_v58, %v7940_v53 }
 0x3f6   : > { %v7963_v13 = vrot.slane %v7961_v61, 7  ;;  %v8206_v37 = vsel %vm20197_vm3, %v7942_v36, %v8205_v9  ;;  %v7944_v35 = vshrl.u32 %v15077_v45, 16  ;;  %v7947_v34 = vshll.u32 %v15077_v45, 16  ;;  %8204 = vst [vmem:[#allocation3 + $0x4c] sm:$0xf] %v7941_v38 }
 0x3f7   : > { %8207 = vst [vmem:[#allocation3 + $0x50] sm:$0x1] %v8206_v37  ;;  %v7923_v39 = vor.u32 %v7921_v63, %v7920_v49  ;;  %v7925_v43 = vrot.slane %v7920_v49, 4  ;;  %v7969_v42 = vshrl.u32 %v15080_v16, 16  ;;  %v7972_v8 = vshll.u32 %v15080_v16, 16 }
 0x3f8   : > { %v7966_v6 = vor.u32 %v7964_v29, %v7963_v13  ;;  %v7967_v62 = vrot.slane %v7963_v13, 4  ;;  %v20344_v25 = vrot.slane %v7944_v35, 7  ;;  %v7669_v58 = vmax.f32 %v20316_v33, 0.0  ;;  %v8219_v33 = vld [vmem:[#allocation3 + $0x68] sm:$0x1] }
 0x3f9   : > { %v7924_v40 = vsel %vm20189_vm2, %v7916_v5, %v7923_v39  ;;  %v8199_v0 = vsel %vm20197_vm3, %v7925_v43, %v8198_v60  ;;  %v7642_v4 = vadd.f32 %v20151_v3, %v7563_v23  ;;  %v20356_v44 = vpop.f32.mrb[40].mxu1  ;;  %v7971_v19 = vrot.slane %v7969_v42, 7  ;;  %v8212_v37 = vld [vmem:[#allocation3 + $0x5c] sm:$0x1] }
 0x3fa   : > { %v8216_v54 = vsel %vm20182_vm1, %v7966_v6, %v8215_v59  ;;  %8197 = vst [vmem:[#allocation3 + $0x40] sm:$0xf] %v7924_v40  ;;  %8200 = vst [vmem:[#allocation3 + $0x44] sm:$0x1] %v8199_v0  ;;  %v7949_v30 = vor.u32 %v7947_v34, %v20344_v25  ;;  %v7950_v10 = vrot.slane %v20344_v25, 4  ;;  %v20360_v57 = vrot.slane %v7972_v8, 11 }
 0x3fb   : > { %8217 = vst [vmem:[#allocation3 + $0x60] sm:$0xf] %v8216_v54  ;;  %v20362_v5 = vpop.f32.mrb[41].mxu1  ;;  %v15078_v14 = vpack.c.bf16 %v7669_v58, %v7669_v58  ;;  %v7674_v31 = vmax.f32 %v7642_v4, 0.0  ;;  %v7640_v12 = vadd.f32 %v20151_v3, %v7555_v26  ;;  %v7643_v23 = vadd.f32 %v20151_v3, %v7566_v56  ;;  %v17132_v26 = vld [vmem:[%s22116_s7 + $0x1c8] sm:$0xff]  }
 0x3fc   : > { %v20366_v7 = vpop.f32.mrb[42].mxu1  ;;  %v8209_v22 = vsel %vm20182_vm1, %v7949_v30, %v8208_v11  ;;  %v7974_v48 = vor.u32 %v7972_v8, %v7971_v19  ;;  %v7976_v9 = vrot.slane %v7971_v19, 4  ;;  %v7641_v24 = vadd.f32 %v20151_v3, %v7558_v55  ;;  %16379 = vmatprep.subr.bf16.mxu1 %v17132_v26  ;;  %v8229_v34 = vld [vmem:[#allocation3 + $0x78] sm:$0xf] }
 0x3fd   : > { %v20371_v63 = vpop.f32.mrb[43].mxu1  ;;  %8210 = vst [vmem:[#allocation3 + $0x54] sm:$0xf] %v8209_v22  ;;  %v7952_v61 = vshrl.u32 %v15078_v14, 16  ;;  %v7955_v53 = vshll.u32 %v15078_v14, 16  ;;  %v15083_v36 = vpack.c.bf16 %v7674_v31, %v7674_v31  ;;  %v7672_v29 = vmax.f32 %v7640_v12, 0.0 }
 0x3fe   : > { %v8350_v56 = vld [vmem:[#allocation3 + $0x50] sm:$0x1]  ;;  %v7975_v45 = vsel %vm20189_vm2, %v7967_v62, %v7974_v48  ;;  %v8220_v49 = vsel %vm20197_vm3, %v7976_v9, %v8219_v33  ;;  %v7675_v13 = vmax.f32 %v7643_v23, 0.0  ;;  %v7673_v55 = vmax.f32 %v7641_v24, 0.0  ;;  %v8222_v33 = vld [vmem:[#allocation3 + $0x6c] sm:$0xf] }
 0x3ff   : > { %v8351_v16 = vsel %vm20239_vm4, %v20330_v47, %v8350_v56  ;;  %8218 = vst [vmem:[#allocation3 + $0x64] sm:$0xf] %v7975_v45  ;;  %8221 = vst [vmem:[#allocation3 + $0x68] sm:$0x1] %v8220_v49  ;;  %v7954_v38 = vrot.slane %v7952_v61, 7  ;;  %v20383_v60 = vrot.slane %v7955_v53, 11  ;;  %v15081_v39 = vpack.c.bf16 %v7672_v29, %v7672_v29 }
 0x400   : > { %v7995_v59 = vshrl.u32 %v15083_v36, 16  ;;  %8352 = vst [vmem:[#allocation3 + $0x50] sm:$0x1] %v8351_v16  ;;  %v7998_v35 = vshll.u32 %v15083_v36, 16  ;;  %v15084_v43 = vpack.c.bf16 %v7675_v13, %v7675_v13  ;;  %v15082_v6 = vpack.c.bf16 %v7673_v55, %v7673_v55  ;;  %v8233_v14 = vld [vmem:[#allocation3 + $0x80] sm:$0x1] }
 0x401   : > { %v8347_v62 = vld [vmem:[#allocation3 + $0x44] sm:$0x1]  ;;  %v7957_v11 = vor.u32 %v7955_v53, %v7954_v38  ;;  %v7959_v25 = vrot.slane %v7954_v38, 4  ;;  %v7579_v47 = vadd.f32 %v20328_v15, %v20146_v50  ;;  %v7978_v58 = vshrl.u32 %v15081_v39, 16  ;;  %v17134_v22 = vld [vmem:[%s22116_s7 + $0x188] sm:$0xff]  }
 0x402   : > { %v7997_v42 = vrot.slane %v7995_v59, 7  ;;  %v8348_v8 = vsel %vm20239_vm4, %v20336_v21, %v8347_v62  ;;  %v7981_v40 = vshll.u32 %v15081_v39, 16  ;;  %v8003_v0 = vshrl.u32 %v15084_v43, 16  ;;  %v9048_v61 = vld [vmem:[#allocation3 + $0xc] sm:$0xe]  ;;  %16380 = vmatpush3.bf16.msra.mxu1 %v17134_v22 }
 0x403   : > { %8349 = vst [vmem:[#allocation3 + $0x44] sm:$0x1] %v8348_v8  ;;  %v7958_v54 = vsel %vm20189_vm2, %v7950_v10, %v7957_v11  ;;  %v8213_v4 = vsel %vm20197_vm3, %v7959_v25, %v8212_v37  ;;  %v7980_v15 = vrot.slane %v7978_v58, 7  ;;  %v8006_v12 = vshll.u32 %v15084_v43, 16  ;;  %v9049_v53 = vld [vmem:[#allocation3 + $0x10] sm:$0xf] }
 0x404   : > { %v8000_v30 = vor.u32 %v7998_v35, %v7997_v42  ;;  %v8001_v19 = vrot.slane %v7997_v42, 4  ;;  %8211 = vst [vmem:[#allocation3 + $0x58] sm:$0xf] %v7958_v54  ;;  %8214 = vst [vmem:[#allocation3 + $0x5c] sm:$0x1] %v8213_v4  ;;  %v8005_v31 = vrot.slane %v8003_v0, 7  ;;  %v7646_v9 = vadd.f32 %v20151_v3, %v7579_v47 }
 0x405   : > { %v7986_v21 = vshrl.u32 %v15082_v6, 16  ;;  %v20394_v23 = vpop.f32.mrb[44].mxu1  ;;  %v7989_v48 = vshll.u32 %v15082_v6, 16  ;;  %v7571_v24 = vadd.f32 %v20146_v50, %v20332_v27  ;;  %v7983_v26 = vor.u32 %v7981_v40, %v7980_v15  ;;  %v8226_v13 = vld [vmem:[#allocation3 + $0x74] sm:$0x1] }
 0x406   : > { %v8230_v10 = vsel %vm20182_vm1, %v8000_v30, %v8229_v34  ;;  %v20404_v36 = vpop.f32.mrb[45].mxu1  ;;  %v8356_v29 = vld [vmem:[#allocation3 + $0x68] sm:$0x1]  ;;  %v7984_v56 = vrot.slane %v7980_v15, 4  ;;  %v8008_v45 = vor.u32 %v8006_v12, %v8005_v31  ;;  %v8010_v49 = vrot.slane %v8005_v31, 4 }
 0x407   : > { %8231 = vst [vmem:[#allocation3 + $0x78] sm:$0xf] %v8230_v10  ;;  %v20406_v55 = vpop.f32.mrb[46].mxu1  ;;  %v8357_v16 = vsel %vm20239_vm4, %v20360_v57, %v8356_v29  ;;  %v14772_v38 = vrot.slane %v8006_v12, 11  ;;  %v7988_v27 = vrot.slane %v7986_v21, 7  ;;  %v20411_v37 = vrot.slane %v7989_v48, 11 }
 0x408   : > { %v9050_v59 = vld [vmem:[#allocation3 + $0x14] sm:$0x1]  ;;  %v20413_v35 = vpop.f32.mrb[47].mxu1  ;;  %8358 = vst [vmem:[#allocation3 + $0x68] sm:$0x1] %v8357_v16  ;;  %v8223_v34 = vsel %vm20182_vm1, %v7983_v26, %v8222_v33  ;;  %v8009_v39 = vsel %vm20189_vm2, %v8001_v19, %v8008_v45  ;;  %v8234_v43 = vsel %vm20197_vm3, %v8010_v49, %v8233_v14  ;;  %v7678_v6 = vmax.f32 %v7646_v9, 0.0 }
 0x409   : > { %8224 = vst [vmem:[#allocation3 + $0x6c] sm:$0xf] %v8223_v34  ;;  %8232 = vst [vmem:[#allocation3 + $0x7c] sm:$0xf] %v8009_v39  ;;  %v7991_v57 = vor.u32 %v7989_v48, %v7988_v27  ;;  %v7993_v62 = vrot.slane %v7988_v27, 4  ;;  %v7644_v11 = vadd.f32 %v20151_v3, %v7571_v24  ;;  %v14811_v25 = vrot.slane %v9048_v61, 9 }
 0x40a   : > { %8235 = vst [vmem:[#allocation3 + $0x80] sm:$0x1] %v8234_v43  ;;  %v15087_v42 = vpack.c.bf16 %v7678_v6, %v7678_v6  ;;  %v9150_v47 = vrot.slane %v9049_v53, 5  ;;  %v9153_v8 = vrot.slane %v9050_v59, 5  ;;  %v7582_v58 = vadd.f32 %v20334_v41, %v20146_v50  ;;  %v8533_v40 = vld [vmem:[#allocation3 + $0xc] sm:$0xf] }
 0x40b   : > { %v20424_v0 = vld [vmem:[#allocation3 + $0x10] sm:$0xf]  ;;  %v8353_v54 = vld [vmem:[#allocation3 + $0x5c] sm:$0x1]  ;;  %v7992_v4 = vsel %vm20189_vm2, %v7984_v56, %v7991_v57  ;;  %v8227_v30 = vsel %vm20197_vm3, %v7993_v62, %v8226_v13  ;;  %v7676_v19 = vmax.f32 %v7644_v11, 0.0  ;;  %v7574_v33 = vadd.f32 %v20146_v50, %v20338_v18  ;;  %v17104_v26 = vld [vmem:[#allocation3 + $0x24] sm:$0xff]  }
 0x40c   : > { %v8354_v14 = vsel %vm20239_vm4, %v20383_v60, %v8353_v54  ;;  %8225 = vst [vmem:[#allocation3 + $0x70] sm:$0xf] %v7992_v4  ;;  %8228 = vst [vmem:[#allocation3 + $0x74] sm:$0x1] %v8227_v30  ;;  %v8029_v41 = vshrl.u32 %v15087_v42, 16  ;;  %v8032_v15 = vshll.u32 %v15087_v42, 16  ;;  %v9151_v31 = vsel %vm17551_vm8, %v14811_v25, %v9150_v47 }
 0x40d   : > { %8355 = vst [vmem:[#allocation3 + $0x5c] sm:$0x1] %v8354_v14  ;;  %v15085_v12 = vpack.c.bf16 %v7676_v19, %v7676_v19  ;;  %v9152_v21 = vrot.slane %v9150_v47, 4  ;;  %v7647_v22 = vadd.f32 %v20151_v3, %v7582_v58  ;;  %v7645_v10 = vadd.f32 %v20151_v3, %v7574_v33  ;;  %v8243_v50 = vld [vmem:[#allocation3 + $0x90] sm:$0xf]  ;;  %v17136_v56 = vld [vmem:[%s22116_s7 + $0x168] sm:$0xff]  }
 0x40e   : > { %v20439_v48 = vrot.slane %v8029_v41, 7  ;;  %v8606_v18 = vshrl.u32 %v8533_v40, 16  ;;  %v8609_v9 = vshll.u32 %v8533_v40, 16  ;;  %v8615_v60 = vshll.u32 %v20424_v0, 16  ;;  %16275 = vmatprep.subr.bf16.mxu0 %v17136_v56  ;;  %v8236_v6 = vld [vmem:[#allocation3 + $0x84] sm:$0xf] }
 0x40f   : > { %v8012_v24 = vshrl.u32 %v15085_v12, 16  ;;  %v8015_v61 = vshll.u32 %v15085_v12, 16  ;;  %v9154_v53 = vsel %vm17551_vm8, %v9152_v21, %v9153_v8  ;;  %v7679_v29 = vmax.f32 %v7647_v22, 0.0  ;;  %v8535_v62 = vld [vmem:[#allocation3 + $0x14] sm:$0x1] }
 0x410   : > { %v8034_v3 = vor.u32 %v8032_v15, %v20439_v48  ;;  %v8035_v49 = vrot.slane %v20439_v48, 4  ;;  %v14827_v13 = vcombine.low %v9151_v31, %v9154_v53  ;;  %v7677_v16 = vmax.f32 %v7645_v10, 0.0  ;;  %v8247_v54 = vld [vmem:[#allocation3 + $0x98] sm:$0x1]  ;;  %v8240_v31 = vld [vmem:[#allocation3 + $0x8c] sm:$0x1] }
 0x411   : > { %v8362_v45 = vld [vmem:[#allocation3 + $0x80] sm:$0x1]  ;;  %v8014_v59 = vrot.slane %v8012_v24, 7  ;;  %v15088_v34 = vpack.c.bf16 %v7679_v29, %v7679_v29  ;;  %v8608_v39 = vrot.slane %v8606_v18, 4  ;;  %v8611_v11 = vrot.slane %v8609_v9, 5 }
 0x412   : > { %v8363_v27 = vsel %vm20239_vm4, %v14772_v38, %v8362_v45  ;;  %v8244_v43 = vsel %vm20182_vm1, %v8034_v3, %v8243_v50  ;;  %12183 = vmatmul.mubr.bf16.gmra.mrb[52].mxu1 %v14827_v13  ;;  %v15086_v57 = vpack.c.bf16 %v7677_v16, %v7677_v16  ;;  %v20453_v25 = vrot.slane %v8615_v60, 5  ;;  %v8536_v33 = vld [vmem:[#allocation3 + $0x18] sm:$0xf]  ;;  %v8537_v21 = vld [vmem:[#allocation3 + $0x1c] sm:$0xf] }
 0x413   : > { %8364 = vst [vmem:[#allocation3 + $0x80] sm:$0x1] %v8363_v27  ;;  %v8359_v42 = vld [vmem:[#allocation3 + $0x74] sm:$0x1]  ;;  %8245 = vst [vmem:[#allocation3 + $0x90] sm:$0xf] %v8244_v43  ;;  %v8017_v47 = vor.u32 %v8015_v61, %v8014_v59  ;;  %12190 = vmatprep.mubr.bf16.mxu1 %v17104_v26  ;;  %v8612_v19 = vor.u32 %v8611_v11, %v8608_v39 }
 0x414   : > { %v8018_v8 = vrot.slane %v8014_v59, 4  ;;  %v8037_v38 = vshrl.u32 %v15088_v34, 16  ;;  %v8040_v58 = vshll.u32 %v15088_v34, 16  ;;  %v8360_v40 = vsel %vm20239_vm4, %v20411_v37, %v8359_v42  ;;  %v8538_v50 = vld [vmem:[#allocation3 + $0x20] sm:$0x1]  ;;  %v17137_v11 = vld [vmem:[%s22116_s7 + $0x128] sm:$0xff]  }
 0x415   : > { %v8020_v4 = vshrl.u32 %v15086_v57, 16  ;;  %v8023_v30 = vshll.u32 %v15086_v57, 16  ;;  %8361 = vst [vmem:[#allocation3 + $0x74] sm:$0x1] %v8360_v40  ;;  %v8237_v14 = vsel %vm20182_vm1, %v8017_v47, %v8236_v6  ;;  %v8619_v12 = vshrl.u32 %v20424_v0, 16  ;;  %16276 = vmatpush3.bf16.msra.mxu0 %v17137_v11 }
 0x416   : > { %v8039_v41 = vrot.slane %v8037_v38, 7  ;;  %v20460_v15 = vrot.slane %v8040_v58, 11  ;;  %8238 = vst [vmem:[#allocation3 + $0x84] sm:$0xf] %v8237_v14  ;;  %v8613_v37 = vrot.slane %v8612_v19, 4  ;;  %v8625_v48 = vshll.u32 %v8535_v62, 16 }
 0x417   : > { %v8022_v22 = vrot.slane %v8020_v4, 7  ;;  %v20463_v10 = vrot.slane %v8023_v30, 11  ;;  %v8621_v60 = vrot.slane %v8619_v12, 4  ;;  %v8630_v24 = vshrl.u32 %v8536_v33, 16  ;;  %v9051_v13 = vld [vmem:[#allocation3 + $0x18] sm:$0xe] }
 0x418   : > { %v8042_v18 = vor.u32 %v8040_v58, %v8039_v41  ;;  %v8044_v9 = vrot.slane %v8039_v41, 4  ;;  %v8618_v29 = vsel %vm20119_vm11, %v8613_v37, %v20453_v25  ;;  %v8627_v26 = vrot.slane %v8625_v48, 5  ;;  %v20478_v6 = vld [vmem:[%s20143_s23] ss:$0 sm:$0xff]  ;;  %v9052_v62 = vld [vmem:[#allocation3 + $0x1c] sm:$0xf] }
 0x419   : > { %v8025_v61 = vor.u32 %v8023_v30, %v8022_v22  ;;  %v8027_v53 = vrot.slane %v8022_v22, 4  ;;  %v8622_v45 = vor.u32 %v8621_v60, %v20453_v25  ;;  %v8632_v3 = vrot.slane %v8630_v24, 4  ;;  %v17140_v58 = vld [vmem:[%s22116_s7 + $0x1d0] sm:$0xff]   ;;  %v20495_v4 = vld [vmem:[%s22115_s6] ss:$0 sm:$0xff] }
 0x41a   : > { %v8043_v0 = vsel %vm20189_vm2, %v8035_v49, %v8042_v18  ;;  %v8248_v56 = vsel %vm20197_vm3, %v8044_v9, %v8247_v54  ;;  %v8633_v59 = vshll.u32 %v8536_v33, 16  ;;  %v8639_v34 = vshll.u32 %v8537_v21, 16  ;;  %16381 = vmatprep.subr.bf16.mxu1 %v17140_v58  ;;  %v17142_v41 = vld [vmem:[%s22116_s7 + $0x190] sm:$0xff]  }
 0x41b   : > { %8246 = vst [vmem:[#allocation3 + $0x94] sm:$0xf] %v8043_v0  ;;  %8249 = vst [vmem:[#allocation3 + $0x98] sm:$0x1] %v8248_v56  ;;  %v8026_v16 = vsel %vm20189_vm2, %v8018_v8, %v8025_v61  ;;  %v8241_v27 = vsel %vm20197_vm3, %v8027_v53, %v8240_v31  ;;  %v8623_v49 = vrot.slane %v8622_v45, 4  ;;  %v8643_v39 = vshrl.u32 %v8537_v21, 16  ;;  %16382 = vmatpush3.bf16.msra.mxu1 %v17142_v41 }
 0x41c   : > { %8239 = vst [vmem:[#allocation3 + $0x88] sm:$0xf] %v8026_v16  ;;  %8242 = vst [vmem:[#allocation3 + $0x8c] sm:$0x1] %v8241_v27  ;;  %v8649_v43 = vshll.u32 %v8538_v50, 16  ;;  %v7595_v57 = vadd.f32 %v20478_v6, %v20356_v44  ;;  %v8635_v25 = vrot.slane %v8633_v59, 5  ;;  %v7587_v47 = vadd.f32 %v20478_v6, %v20362_v5 }
 0x41d   : > { %v8641_v42 = vrot.slane %v8639_v34, 5  ;;  %v9053_v8 = vld [vmem:[#allocation3 + $0x20] sm:$0x1]  ;;  %v14812_v38 = vrot.slane %v9051_v13, 9  ;;  %v8628_v40 = vsel %vm20119_vm11, %v8623_v49, %v8627_v26  ;;  %v8645_v44 = vrot.slane %v8643_v39, 4  ;;  %v17105_v31 = vld [vmem:[#allocation3 + $0xc] sm:$0xff]  }
 0x41e   : > { %v8651_v54 = vrot.slane %v8649_v43, 5  ;;  %v7650_v30 = vadd.f32 %v20495_v4, %v7595_v57  ;;  %v14795_v5 = vcombine.low %v8618_v29, %v8628_v40  ;;  %v8636_v19 = vor.u32 %v8635_v25, %v8632_v3  ;;  %v17144_v60 = vld [vmem:[%s22116_s7 + $0x170] sm:$0xff]   ;;  %v8539_v13 = vld [vmem:[#allocation3 + $0x24] sm:$0xf]  ;;  %v8540_v59 = vld [vmem:[#allocation3 + $0x28] sm:$0xf] }
 0x41f   : > { %v7648_v33 = vadd.f32 %v20495_v4, %v7587_v47  ;;  %v9157_v14 = vrot.slane %v9052_v62, 5  ;;  %v8646_v12 = vor.u32 %v8645_v44, %v8641_v42  ;;  %v9160_v22 = vrot.slane %v9053_v8, 5  ;;  %16277 = vmatprep.subr.bf16.mxu0 %v17144_v60  ;;  %v8257_v49 = vld [vmem:[#allocation3 + $0xa8] sm:$0xf]  ;;  %v17106_v25 = vld [vmem:[#allocation3 + $0x30] sm:$0xff]  }
 0x420   : > { %v7682_v21 = vmax.f32 %v7650_v30, 0.0  ;;  %v7598_v37 = vadd.f32 %v20478_v6, %v20366_v7  ;;  %12021 = vmatprep.mubr.bf16.mxu0 %v14795_v5  ;;  %v8637_v48 = vrot.slane %v8636_v19, 4  ;;  %v7590_v7 = vadd.f32 %v20478_v6, %v20371_v63  ;;  %v17107_v19 = vld [vmem:[#allocation3 + $0x18] sm:$0xff]   ;;  %v8261_v60 = vld [vmem:[#allocation3 + $0xb0] sm:$0x1] }
 0x421   : > { %v7680_v50 = vmax.f32 %v7648_v33, 0.0  ;;  %v9158_v18 = vsel %vm17551_vm8, %v14812_v38, %v9157_v14  ;;  %v9159_v9 = vrot.slane %v9157_v14, 4  ;;  %12022 = vmatmul.mubr.bf16.gmra.mrb[20].mxu0 %v17105_v31  ;;  %v8647_v61 = vrot.slane %v8646_v12, 4  ;;  %v17145_v12 = vld [vmem:[%s22116_s7 + $0x130] sm:$0xff]  }
 0x422   : > { %v8368_v24 = vld [vmem:[#allocation3 + $0x98] sm:$0x1]  ;;  %v15091_v53 = vpack.c.bf16 %v7682_v21, %v7682_v21  ;;  %v7651_v29 = vadd.f32 %v20495_v4, %v7598_v37  ;;  %v8642_v56 = vsel %vm20119_vm11, %v8637_v48, %v8641_v42  ;;  %v7649_v42 = vadd.f32 %v20495_v4, %v7590_v7  ;;  %16278 = vmatpush3.bf16.msra.mxu0 %v17145_v12 }
 0x423   : > { %v8369_v26 = vsel %vm20239_vm4, %v20460_v15, %v8368_v24  ;;  %v8365_v0 = vld [vmem:[#allocation3 + $0x8c] sm:$0x1]  ;;  %v15089_v45 = vpack.c.bf16 %v7680_v50, %v7680_v50  ;;  %v9161_v3 = vsel %vm17551_vm8, %v9159_v9, %v9160_v22  ;;  %v8652_v63 = vsel %vm20119_vm11, %v8647_v61, %v8651_v54  ;;  %v8250_v54 = vld [vmem:[#allocation3 + $0x9c] sm:$0xf] }
 0x424   : > { %8370 = vst [vmem:[#allocation3 + $0x98] sm:$0x1] %v8369_v26  ;;  %v8366_v16 = vsel %vm20239_vm4, %v20463_v10, %v8365_v0  ;;  %v8063_v27 = vshrl.u32 %v15091_v53, 16  ;;  %v8066_v15 = vshll.u32 %v15091_v53, 16  ;;  %v14796_v34 = vcombine.low %v8642_v56, %v8652_v63  ;;  %v8541_v50 = vld [vmem:[#allocation3 + $0x2c] sm:$0x1] }
 0x425   : > { %8367 = vst [vmem:[#allocation3 + $0x8c] sm:$0x1] %v8366_v16  ;;  %v8046_v39 = vshrl.u32 %v15089_v45, 16  ;;  %v8049_v43 = vshll.u32 %v15089_v45, 16  ;;  %v14828_v57 = vcombine.low %v9158_v18, %v9161_v3  ;;  %v7683_v11 = vmax.f32 %v7651_v29, 0.0 }
 0x426   : > { %v20524_v62 = vrot.slane %v8063_v27, 7  ;;  %v8654_v47 = vshrl.u32 %v8539_v13, 16  ;;  %12029 = vmatprep.mubr.bf16.mxu0 %v14796_v34  ;;  %v8657_v8 = vshll.u32 %v8539_v13, 16  ;;  %v8663_v38 = vshll.u32 %v8540_v59, 16  ;;  %v9054_v18 = vld [vmem:[#allocation3 + $0x24] sm:$0xe] }
 0x427   : > { %v20527_v10 = vrot.slane %v8046_v39, 7  ;;  %12191 = vmatmul.mubr.bf16.gmra.mrb[56].mxu1 %v14828_v57  ;;  %v8667_v58 = vshrl.u32 %v8540_v59, 16  ;;  %v15092_v30 = vpack.c.bf16 %v7683_v11, %v7683_v11  ;;  %v7681_v5 = vmax.f32 %v7649_v42, 0.0  ;;  %v9055_v29 = vld [vmem:[#allocation3 + $0x28] sm:$0xf]  ;;  %v17148_v27 = vld [vmem:[%s22116_s7 + $0x1d8] sm:$0xff]  }
 0x428   : > { %v8068_v40 = vor.u32 %v8066_v15, %v20524_v62  ;;  %v8069_v44 = vrot.slane %v20524_v62, 4  ;;  %12198 = vmatprep.mubr.bf16.mxu1 %v17106_v25  ;;  %v8656_v41 = vrot.slane %v8654_v47, 4  ;;  %v8659_v31 = vrot.slane %v8657_v8, 5  ;;  %v9056_v45 = vld [vmem:[#allocation3 + $0x2c] sm:$0x1]  ;;  %v17149_v39 = vld [vmem:[%s22116_s7 + $0x198] sm:$0xff]   ;;  %16383 = vmatprep.subr.bf16.mxu1 %v17148_v27 }
 0x429   : > { %v8051_v33 = vor.u32 %v8049_v43, %v20527_v10  ;;  %v8052_v14 = vrot.slane %v20527_v10, 4  ;;  %v8071_v22 = vshrl.u32 %v15092_v30, 16  ;;  %v8074_v37 = vshll.u32 %v15092_v30, 16  ;;  %12030 = vmatmul.mubr.bf16.gmra.mrb[24].mxu0 %v17107_v19  ;;  %v8254_v43 = vld [vmem:[#allocation3 + $0xa4] sm:$0x1]  ;;  %16384 = vmatpush3.bf16.msra.mxu1 %v17149_v39 }
 0x42a   : > { %v8258_v21 = vsel %vm20182_vm1, %v8068_v40, %v8257_v49  ;;  %v15090_v48 = vpack.c.bf16 %v7681_v5, %v7681_v5  ;;  %v8660_v24 = vor.u32 %v8659_v31, %v8656_v41  ;;  %v8665_v61 = vrot.slane %v8663_v38, 5  ;;  %v17150_v42 = vld [vmem:[%s22116_s7 + $0x1e0] sm:$0xff]   ;;  %v8543_v19 = vld [vmem:[#allocation3 + $0x34] sm:$0xf] }
 0x42b   : > { %8259 = vst [vmem:[#allocation3 + $0xa8] sm:$0xf] %v8258_v21  ;;  %v8251_v9 = vsel %vm20182_vm1, %v8051_v33, %v8250_v54  ;;  %v8669_v53 = vrot.slane %v8667_v58, 4  ;;  %v8073_v7 = vrot.slane %v8071_v22, 7  ;;  %v20540_v26 = vrot.slane %v8074_v37, 11  ;;  %v17152_v40 = vld [vmem:[%s22116_s7 + $0x1a0] sm:$0xff]   ;;  %16385 = vmatprep.subr.bf16.mxu1 %v17150_v42 }
 0x42c   : > { %8252 = vst [vmem:[#allocation3 + $0x9c] sm:$0xf] %v8251_v9  ;;  %v8054_v0 = vshrl.u32 %v15090_v48, 16  ;;  %v8057_v56 = vshll.u32 %v15090_v48, 16  ;;  %v8661_v3 = vrot.slane %v8660_v24, 4  ;;  %v8673_v16 = vshll.u32 %v8541_v50, 16 }
 0x42d   : > { %v8670_v13 = vor.u32 %v8669_v53, %v8665_v61  ;;  %v14813_v63 = vrot.slane %v9054_v18, 9  ;;  %v8076_v15 = vor.u32 %v8074_v37, %v8073_v7  ;;  %v8078_v59 = vrot.slane %v8073_v7, 4  ;;  %v8542_v58 = vld [vmem:[#allocation3 + $0x30] sm:$0xf]  ;;  %v17111_v21 = vld [vmem:[#allocation3 + $0x24] sm:$0xff]   ;;  %v17154_v18 = vld [vmem:[%s22116_s7 + $0x178] sm:$0xff]   ;;  %16386 = vmatpush3.bf16.msra.mxu1 %v17152_v40 }
 0x42e   : > { %v8056_v34 = vrot.slane %v8054_v0, 7  ;;  %v20545_v49 = vrot.slane %v8057_v56, 11  ;;  %v8666_v57 = vsel %vm20119_vm11, %v8661_v3, %v8665_v61  ;;  %v8675_v11 = vrot.slane %v8673_v16, 5  ;;  %v17110_v61 = vld [vmem:[#allocation3 + $0x3c] sm:$0xff]   ;;  %v9057_v7 = vld [vmem:[#allocation3 + $0x30] sm:$0xe]  ;;  %16279 = vmatprep.subr.bf16.mxu0 %v17154_v18 }
 0x42f   : > { %v8671_v62 = vrot.slane %v8670_v13, 4  ;;  %v9164_v25 = vrot.slane %v9055_v29, 5  ;;  %v8077_v47 = vsel %vm20189_vm2, %v8069_v44, %v8076_v15  ;;  %v8262_v10 = vsel %vm20197_vm3, %v8078_v59, %v8261_v60  ;;  %v17155_v15 = vld [vmem:[%s22116_s7 + $0x138] sm:$0xff]   ;;  %v8271_v40 = vld [vmem:[#allocation3 + $0xc0] sm:$0xf] }
 0x430   : > { %v8059_v8 = vor.u32 %v8057_v56, %v8056_v34  ;;  %v8061_v38 = vrot.slane %v8056_v34, 4  ;;  %8260 = vst [vmem:[#allocation3 + $0xac] sm:$0xf] %v8077_v47  ;;  %8263 = vst [vmem:[#allocation3 + $0xb0] sm:$0x1] %v8262_v10  ;;  %v9167_v5 = vrot.slane %v9056_v45, 5  ;;  %v7611_v12 = vadd.f32 %v20478_v6, %v20394_v23  ;;  %16280 = vmatpush3.bf16.msra.mxu0 %v17155_v15 }
 0x431   : > { %v8676_v54 = vsel %vm20119_vm11, %v8671_v62, %v8675_v11  ;;  %v9165_v30 = vsel %vm17551_vm8, %v14813_v63, %v9164_v25  ;;  %v9166_v44 = vrot.slane %v9164_v25, 4  ;;  %v7603_v37 = vadd.f32 %v20478_v6, %v20404_v36  ;;  %v9058_v47 = vld [vmem:[#allocation3 + $0x34] sm:$0xf]  ;;  %v9059_v18 = vld [vmem:[#allocation3 + $0x38] sm:$0x1] }
 0x432   : > { %v8060_v33 = vsel %vm20189_vm2, %v8052_v14, %v8059_v8  ;;  %v8255_v41 = vsel %vm20197_vm3, %v8061_v38, %v8254_v43  ;;  %v14797_v31 = vcombine.low %v8666_v57, %v8676_v54  ;;  %v7614_v48 = vadd.f32 %v20478_v6, %v20406_v55  ;;  %v8544_v14 = vld [vmem:[#allocation3 + $0x38] sm:$0x1] }
 0x433   : > { %8253 = vst [vmem:[#allocation3 + $0xa0] sm:$0xf] %v8060_v33  ;;  %8256 = vst [vmem:[#allocation3 + $0xa4] sm:$0x1] %v8255_v41  ;;  %v9168_v22 = vsel %vm17551_vm8, %v9166_v44, %v9167_v5  ;;  %v8678_v50 = vshrl.u32 %v8542_v58, 16  ;;  %v7654_v9 = vadd.f32 %v20495_v4, %v7611_v12  ;;  %v8681_v60 = vshll.u32 %v8542_v58, 16 }
 0x434   : > { %12037 = vmatprep.mubr.bf16.mxu0 %v14797_v31  ;;  %v14829_v23 = vcombine.low %v9165_v30, %v9168_v22  ;;  %v8687_v24 = vshll.u32 %v8543_v19, 16  ;;  %v7652_v53 = vadd.f32 %v20495_v4, %v7603_v37  ;;  %v7655_v36 = vadd.f32 %v20495_v4, %v7614_v48  ;;  %v8264_v5 = vld [vmem:[#allocation3 + $0xb4] sm:$0xf]  ;;  %v8279_v12 = vld [vmem:[#allocation3 + $0xcc] sm:$0xf] }
 0x435   : > { %12038 = vmatmul.mubr.bf16.gmra.mrb[28].mxu0 %v17111_v21  ;;  %v8680_v55 = vrot.slane %v8678_v50, 4  ;;  %v8691_v29 = vshrl.u32 %v8543_v19, 16  ;;  %v7686_v0 = vmax.f32 %v7654_v9, 0.0  ;;  %v8683_v56 = vrot.slane %v8681_v60, 5  ;;  %v8275_v48 = vld [vmem:[#allocation3 + $0xc8] sm:$0x1] }
 0x436   : > { %12199 = vmatmul.mubr.bf16.gmra.mrb[60].mxu1 %v14829_v23  ;;  %v8689_v45 = vrot.slane %v8687_v24, 5  ;;  %v8697_v3 = vshll.u32 %v8544_v14, 16  ;;  %v7684_v13 = vmax.f32 %v7652_v53, 0.0  ;;  %v7687_v16 = vmax.f32 %v7655_v36, 0.0 }
 0x437   : > { %12206 = vmatprep.mubr.bf16.mxu1 %v17110_v61  ;;  %v8693_v63 = vrot.slane %v8691_v29, 4  ;;  %v7606_v27 = vadd.f32 %v20478_v6, %v20413_v35  ;;  %v8374_v59 = vld [vmem:[#allocation3 + $0xb0] sm:$0x1]  ;;  %v15095_v34 = vpack.c.bf16 %v7686_v0, %v7686_v0  ;;  %v8684_v39 = vor.u32 %v8683_v56, %v8680_v55  ;;  %v8545_v29 = vld [vmem:[#allocation3 + $0x3c] sm:$0xf] }
 0x438   : > { %v8699_v43 = vrot.slane %v8697_v3, 5  ;;  %v14814_v57 = vrot.slane %v9057_v7, 9  ;;  %v8375_v62 = vsel %vm20239_vm4, %v20540_v26, %v8374_v59  ;;  %v15093_v11 = vpack.c.bf16 %v7684_v13, %v7684_v13  ;;  %v8546_v7 = vld [vmem:[#allocation3 + $0x40] sm:$0xf]  ;;  %v17113_v13 = vld [vmem:[#allocation3 + $0x30] sm:$0xff]  }
 0x439   : > { %v15096_v25 = vpack.c.bf16 %v7687_v16, %v7687_v16  ;;  %v8694_v42 = vor.u32 %v8693_v63, %v8689_v45  ;;  %8376 = vst [vmem:[#allocation3 + $0xb0] sm:$0x1] %v8375_v62  ;;  %v8097_v6 = vshrl.u32 %v15095_v34, 16  ;;  %v8100_v10 = vshll.u32 %v15095_v34, 16  ;;  %v8547_v16 = vld [vmem:[#allocation3 + $0x44] sm:$0x1] }
 0x43a   : > { %v8371_v35 = vld [vmem:[#allocation3 + $0xa4] sm:$0x1]  ;;  %v8685_v8 = vrot.slane %v8684_v39, 4  ;;  %v7653_v38 = vadd.f32 %v20495_v4, %v7606_v27  ;;  %v8080_v54 = vshrl.u32 %v15093_v11, 16  ;;  %v8083_v30 = vshll.u32 %v15093_v11, 16 }
 0x43b   : > { %v8372_v58 = vsel %vm20239_vm4, %v20545_v49, %v8371_v35  ;;  %v8105_v26 = vshrl.u32 %v15096_v25, 16  ;;  %v8099_v44 = vrot.slane %v8097_v6, 7  ;;  %v8108_v19 = vshll.u32 %v15096_v25, 16  ;;  %v8268_v34 = vld [vmem:[#allocation3 + $0xbc] sm:$0x1]  ;;  %v17112_v35 = vld [vmem:[#allocation3 + $0x48] sm:$0xff]  }
 0x43c   : > { %8373 = vst [vmem:[#allocation3 + $0xa4] sm:$0x1] %v8372_v58  ;;  %v8690_v33 = vsel %vm20119_vm11, %v8685_v8, %v8689_v45  ;;  %v8695_v41 = vrot.slane %v8694_v42, 4  ;;  %v20598_v31 = vrot.slane %v8080_v54, 7  ;;  %v7685_v21 = vmax.f32 %v7653_v38, 0.0  ;;  %v17156_v8 = vld [vmem:[%s22116_s7 + $0x1e8] sm:$0xff]  }
 0x43d   : > { %v8107_v4 = vrot.slane %v8105_v26, 7  ;;  %v9171_v22 = vrot.slane %v9058_v47, 5  ;;  %v8102_v37 = vor.u32 %v8100_v10, %v8099_v44  ;;  %v8103_v49 = vrot.slane %v8099_v44, 4  ;;  %v9060_v11 = vld [vmem:[#allocation3 + $0x3c] sm:$0xe]  ;;  %16387 = vmatprep.subr.bf16.mxu1 %v17156_v8 }
 0x43e   : > { %v20600_v14 = vrot.slane %v8108_v19, 11  ;;  %v8700_v50 = vsel %vm20119_vm11, %v8695_v41, %v8699_v43  ;;  %v8085_v23 = vor.u32 %v8083_v30, %v20598_v31  ;;  %v8086_v9 = vrot.slane %v20598_v31, 4  ;;  %v9061_v10 = vld [vmem:[#allocation3 + $0x40] sm:$0xf]  ;;  %v17157_v30 = vld [vmem:[%s22116_s7 + $0x1a8] sm:$0xff]   ;;  %v17158_v41 = vld [vmem:[%s22116_s7 + $0x1f0] sm:$0xff]  }
 0x43f   : > { %v8110_v60 = vor.u32 %v8108_v19, %v8107_v4  ;;  %v8112_v24 = vrot.slane %v8107_v4, 4  ;;  %v8272_v61 = vsel %vm20182_vm1, %v8102_v37, %v8271_v40  ;;  %v14798_v53 = vcombine.low %v8690_v33, %v8700_v50  ;;  %v9062_v33 = vld [vmem:[#allocation3 + $0x44] sm:$0x1]  ;;  %16388 = vmatpush3.bf16.msra.mxu1 %v17157_v30 }
 0x440   : > { %v15094_v36 = vpack.c.bf16 %v7685_v21, %v7685_v21  ;;  %v9172_v55 = vsel %vm17551_vm8, %v14814_v57, %v9171_v22  ;;  %8273 = vst [vmem:[#allocation3 + $0xc0] sm:$0xf] %v8272_v61  ;;  %v8265_v0 = vsel %vm20182_vm1, %v8085_v23, %v8264_v5  ;;  %v8280_v56 = vsel %vm20182_vm1, %v8085_v23, %v8279_v12  ;;  %v8550_v23 = vld [vmem:[#allocation3 + $0x50] sm:$0x1] }
 0x441   : > { %v8111_v45 = vsel %vm20189_vm2, %v8103_v49, %v8110_v60  ;;  %v8276_v3 = vsel %vm20197_vm3, %v8112_v24, %v8275_v48  ;;  %8266 = vst [vmem:[#allocation3 + $0xb4] sm:$0xf] %v8265_v0  ;;  %8281 = vst [vmem:[#allocation3 + $0xcc] sm:$0xf] %v8280_v56  ;;  %12045 = vmatprep.mubr.bf16.mxu0 %v14798_v53  ;;  %v9173_v15 = vrot.slane %v9171_v22, 4  ;;  %v9174_v59 = vrot.slane %v9059_v18, 5 }
 0x442   : > { %8274 = vst [vmem:[#allocation3 + $0xc4] sm:$0xf] %v8111_v45  ;;  %8277 = vst [vmem:[#allocation3 + $0xc8] sm:$0x1] %v8276_v3  ;;  %v8088_v63 = vshrl.u32 %v15094_v36, 16  ;;  %v8091_v27 = vshll.u32 %v15094_v36, 16  ;;  %12046 = vmatmul.mubr.bf16.gmra.mrb[32].mxu0 %v17113_v13  ;;  %16389 = vmatprep.subr.bf16.mxu1 %v17158_v41 }
 0x443   : > { %v8702_v39 = vshrl.u32 %v8545_v29, 16  ;;  %v8705_v43 = vshll.u32 %v8545_v29, 16  ;;  %v8711_v57 = vshll.u32 %v8546_v7, 16  ;;  %v8715_v62 = vshrl.u32 %v8546_v7, 16  ;;  %v8548_v22 = vld [vmem:[#allocation3 + $0x48] sm:$0xf]  ;;  %16390 = vmatpush3.bf16.msra.mxu1 %v17159_v46 }
 0x444   : > { %v8090_v25 = vrot.slane %v8088_v63, 7  ;;  %v20618_v42 = vrot.slane %v8091_v27, 7  ;;  %v9175_v47 = vsel %vm17551_vm8, %v9173_v15, %v9174_v59  ;;  %v8721_v6 = vshll.u32 %v8547_v16, 16  ;;  %v8549_v18 = vld [vmem:[#allocation3 + $0x4c] sm:$0xf]  ;;  %v17161_v56 = vld [vmem:[%s22116_s7 + $0x1f8] sm:$0xff]  }
 0x445   : > { %v14830_v38 = vcombine.low %v9172_v55, %v9175_v47  ;;  %v8704_v58 = vrot.slane %v8702_v39, 4  ;;  %v8707_v40 = vrot.slane %v8705_v43, 5  ;;  %v8713_v54 = vrot.slane %v8711_v57, 5  ;;  %v9063_v53 = vld [vmem:[#allocation3 + $0x48] sm:$0xe]  ;;  %v17117_v39 = vld [vmem:[#allocation3 + $0x3c] sm:$0xff]   ;;  %16391 = vmatprep.subr.bf16.mxu1 %v17161_v56 }
 0x446   : > { %v8093_v26 = vor.u32 %v8091_v27, %v8090_v25  ;;  %v8095_v44 = vrot.slane %v8090_v25, 4  ;;  %v8315_v5 = vrot.slane %v20618_v42, 4  ;;  %v8717_v19 = vrot.slane %v8715_v62, 4  ;;  %v9064_v36 = vld [vmem:[#allocation3 + $0x4c] sm:$0xf]  ;;  %v17162_v25 = vld [vmem:[%s22116_s7 + $0x1b8] sm:$0xff]  }
 0x447   : > { %12207 = vmatmul.mubr.bf16.gmra.mrb[64].mxu1 %v14830_v38  ;;  %v8708_v31 = vor.u32 %v8707_v40, %v8704_v58  ;;  %v8723_v12 = vrot.slane %v8721_v6, 5  ;;  %v14815_v4 = vrot.slane %v9060_v11, 9  ;;  %v9178_v21 = vrot.slane %v9061_v10, 5  ;;  %v9065_v63 = vld [vmem:[#allocation3 + $0x50] sm:$0x1]  ;;  %v17164_v47 = vld [vmem:[%s22116_s7 + $0x200] sm:$0xff]  }
 0x448   : > { %v8094_v37 = vsel %vm20189_vm2, %v8086_v9, %v8093_v26  ;;  %v8269_v49 = vsel %vm20197_vm3, %v8095_v44, %v8268_v34  ;;  %v8284_v48 = vsel %vm20197_vm3, %v8095_v44, %v8283_v1  ;;  %12214 = vmatprep.mubr.bf16.mxu1 %v17112_v35  ;;  %v8718_v50 = vor.u32 %v8717_v19, %v8713_v54  ;;  %v8551_v34 = vld [vmem:[#allocation3 + $0x54] sm:$0xf]  ;;  %v8552_v11 = vld [vmem:[#allocation3 + $0x58] sm:$0xf]  ;;  %v8553_v58 = vld [vmem:[#allocation3 + $0x5c] sm:$0x1] }
 0x449   : > { %v8380_v60 = vld [vmem:[#allocation3 + $0xc8] sm:$0x1]  ;;  %8267 = vst [vmem:[#allocation3 + $0xb8] sm:$0xf] %v8094_v37  ;;  %8270 = vst [vmem:[#allocation3 + $0xbc] sm:$0x1] %v8269_v49  ;;  %v9179_v28 = vsel %vm17551_vm8, %v14815_v4, %v9178_v21  ;;  %16392 = vmatpush3.bf16.msra.mxu1 %v17162_v25  ;;  %16657 = vmatprep.subr.bf16.mxu0 %v17164_v47 }
 0x44a   : > { %8282 = vst [vmem:[#allocation3 + $0xd0] sm:$0xf] %v8094_v37  ;;  %8285 = vst [vmem:[#allocation3 + $0xd4] sm:$0x1] %v8284_v48  ;;  %v8709_v24 = vrot.slane %v8708_v31, 4  ;;  %v9180_v9 = vrot.slane %v9178_v21, 4  ;;  %v8381_v55 = vsel %vm20239_vm4, %v20600_v14, %v8380_v60  ;;  %v9532_v21 = vor.u32 %v20258_v20, %v20256_v2 }
 0x44b   : > { %v9181_v61 = vrot.slane %v9062_v33, 5  ;;  %v8719_v29 = vrot.slane %v8718_v50, 4  ;;  %v8726_v7 = vshrl.u32 %v8548_v22, 16  ;;  %v8729_v0 = vshll.u32 %v8548_v22, 16  ;;  %8382 = vst [vmem:[#allocation3 + $0xc8] sm:$0x1] %v8381_v55 }
 0x44c   : > { %v8714_v45 = vsel %vm20119_vm11, %v8709_v24, %v8713_v54  ;;  %v8735_v13 = vshll.u32 %v8549_v18, 16  ;;  %v8739_v16 = vshrl.u32 %v8549_v18, 16  ;;  %v8745_v62 = vshll.u32 %v8550_v23, 16  ;;  %v17116_v35 = vld [vmem:[#allocation3 + $0x54] sm:$0xff]   ;;  %v9068_v50 = vld [vmem:[#allocation3 + $0x5c] sm:$0x1] }
 0x44d   : > { %v9182_v3 = vsel %vm17551_vm8, %v9180_v9, %v9181_v61  ;;  %v8724_v14 = vsel %vm20119_vm11, %v8719_v29, %v8723_v12  ;;  %v8728_v15 = vrot.slane %v8726_v7, 4  ;;  %v8731_v59 = vrot.slane %v8729_v0, 5  ;;  %v9066_v44 = vld [vmem:[#allocation3 + $0x54] sm:$0xe]  ;;  %v9067_v4 = vld [vmem:[#allocation3 + $0x58] sm:$0xf] }
 0x44e   : > { %v14831_v27 = vcombine.low %v9179_v28, %v9182_v3  ;;  %v14799_v1 = vcombine.low %v8714_v45, %v8724_v14  ;;  %v8737_v43 = vrot.slane %v8735_v13, 5  ;;  %v8741_v57 = vrot.slane %v8739_v16, 4  ;;  %v8554_v28 = vld [vmem:[#allocation3 + $0x60] sm:$0xf]  ;;  %v8555_v42 = vld [vmem:[#allocation3 + $0x64] sm:$0xf] }
 0x44f   : > { %v8732_v6 = vor.u32 %v8731_v59, %v8728_v15  ;;  %v14816_v10 = vrot.slane %v9063_v53, 9  ;;  %v9185_v8 = vrot.slane %v9064_v36, 5  ;;  %v9188_v38 = vrot.slane %v9065_v63, 5  ;;  %v17118_v29 = vld [vmem:[#allocation3 + $0x60] sm:$0xff]   ;;  %v17119_v7 = vld [vmem:[#allocation3 + $0x48] sm:$0xff]  }
 0x450   : > { %12053 = vmatprep.mubr.bf16.mxu0 %v14799_v1  ;;  %12215 = vmatmul.mubr.bf16.gmra.mrb[68].mxu1 %v14831_v27  ;;  %v8742_v40 = vor.u32 %v8741_v57, %v8737_v43  ;;  %v8747_v54 = vrot.slane %v8745_v62, 5  ;;  %v8750_v30 = vshrl.u32 %v8551_v34, 16  ;;  %v8753_v26 = vshll.u32 %v8551_v34, 16  ;;  %v8377_v19 = vld [vmem:[#allocation3 + $0xbc] sm:$0x1] }
 0x451   : > { %v8383_v33 = vld [vmem:[#allocation3 + $0xd4] sm:$0x1]  ;;  %12222 = vmatprep.mubr.bf16.mxu1 %v17116_v35  ;;  %12054 = vmatmul.mubr.bf16.gmra.mrb[36].mxu0 %v17117_v39  ;;  %v8733_v41 = vrot.slane %v8732_v6, 4  ;;  %v9186_v31 = vsel %vm17551_vm8, %v14816_v10, %v9185_v8  ;;  %v9187_v12 = vrot.slane %v9185_v8, 4  ;;  %v8378_v22 = vsel %vm20239_vm4, %v8315_v5, %v8377_v19  ;;  %v8556_v16 = vld [vmem:[#allocation3 + $0x68] sm:$0x1] }
 0x452   : > { %v8384_v37 = vsel %vm20239_vm4, %v8315_v5, %v8383_v33  ;;  %v8743_v49 = vrot.slane %v8742_v40, 4  ;;  %v8752_v48 = vrot.slane %v8750_v30, 4  ;;  %8379 = vst [vmem:[#allocation3 + $0xbc] sm:$0x1] %v8378_v22  ;;  %v8755_v60 = vrot.slane %v8753_v26, 5  ;;  %v17123_v22 = vld [vmem:[#allocation3 + $0x54] sm:$0xff]  }
 0x453   : > { %8385 = vst [vmem:[#allocation3 + $0xd4] sm:$0x1] %v8384_v37  ;;  %v8738_v18 = vsel %vm20119_vm11, %v8733_v41, %v8737_v43  ;;  %v9189_v23 = vsel %vm17551_vm8, %v9187_v12, %v9188_v38  ;;  %v8759_v24 = vshll.u32 %v8552_v11, 16  ;;  %v8763_v9 = vshrl.u32 %v8552_v11, 16  ;;  %v9069_v39 = vld [vmem:[#allocation3 + $0x60] sm:$0xe] }
 0x454   : > { %v8748_v51 = vsel %vm20119_vm11, %v8743_v49, %v8747_v54  ;;  %v14832_v5 = vcombine.low %v9186_v31, %v9189_v23  ;;  %v8769_v61 = vshll.u32 %v8553_v58, 16  ;;  %v8756_v36 = vor.u32 %v8755_v60, %v8752_v48  ;;  %v9070_v43 = vld [vmem:[#allocation3 + $0x64] sm:$0xf]  ;;  %v9071_v47 = vld [vmem:[#allocation3 + $0x68] sm:$0x1] }
 0x455   : > { %v14800_v53 = vcombine.low %v8738_v18, %v8748_v51  ;;  %v8761_v46 = vrot.slane %v8759_v24, 5  ;;  %v14817_v55 = vrot.slane %v9066_v44, 9  ;;  %v8765_v0 = vrot.slane %v8763_v9, 4  ;;  %v8557_v38 = vld [vmem:[#allocation3 + $0x6c] sm:$0xf] }
 0x456   : > { %v8771_v56 = vrot.slane %v8769_v61, 5  ;;  %v9192_v45 = vrot.slane %v9067_v4, 5  ;;  %v9195_v3 = vrot.slane %v9068_v50, 5  ;;  %v8757_v13 = vrot.slane %v8756_v36, 4  ;;  %v8558_v26 = vld [vmem:[#allocation3 + $0x70] sm:$0xf] }
 0x457   : > { %12061 = vmatprep.mubr.bf16.mxu0 %v14800_v53  ;;  %v8774_v63 = vshrl.u32 %v8554_v28, 16  ;;  %v8777_v14 = vshll.u32 %v8554_v28, 16  ;;  %v8783_v27 = vshll.u32 %v8555_v42, 16  ;;  %v8766_v15 = vor.u32 %v8765_v0, %v8761_v46  ;;  %v8559_v44 = vld [vmem:[#allocation3 + $0x74] sm:$0x1]  ;;  %v17122_v4 = vld [vmem:[#allocation3 + $0x6c] sm:$0xff]  }
 0x458   : > { %12223 = vmatmul.mubr.bf16.gmra.mrb[72].mxu1 %v14832_v5  ;;  %v9193_v59 = vsel %vm17551_vm8, %v14817_v55, %v9192_v45  ;;  %v9194_v34 = vrot.slane %v9192_v45, 4  ;;  %v8787_v1 = vshrl.u32 %v8555_v42, 16  ;;  %v8762_v57 = vsel %vm20119_vm11, %v8757_v13, %v8761_v46  ;;  %v9072_v24 = vld [vmem:[#allocation3 + $0x6c] sm:$0xe]  ;;  %v9073_v9 = vld [vmem:[#allocation3 + $0x70] sm:$0xf] }
 0x459   : > { %12230 = vmatprep.mubr.bf16.mxu1 %v17118_v29  ;;  %12062 = vmatmul.mubr.bf16.gmra.mrb[40].mxu0 %v17119_v7  ;;  %v8776_v62 = vrot.slane %v8774_v63, 4  ;;  %v8779_v11 = vrot.slane %v8777_v14, 5  ;;  %v8785_v25 = vrot.slane %v8783_v27, 5  ;;  %v8767_v35 = vrot.slane %v8766_v15, 4  ;;  %v9074_v61 = vld [vmem:[#allocation3 + $0x74] sm:$0x1] }
 0x45a   : > { %v9196_v6 = vsel %vm17551_vm8, %v9194_v34, %v9195_v3  ;;  %v8789_v10 = vrot.slane %v8787_v1, 4  ;;  %v8793_v8 = vshll.u32 %v8556_v16, 16  ;;  %v14818_v54 = vrot.slane %v9069_v39, 9  ;;  %v8560_v29 = vld [vmem:[#allocation3 + $0x78] sm:$0xf] }
 0x45b   : > { %v14833_v58 = vcombine.low %v9193_v59, %v9196_v6  ;;  %v8780_v40 = vor.u32 %v8779_v11, %v8776_v62  ;;  %v9199_v30 = vrot.slane %v9070_v43, 5  ;;  %v8772_v19 = vsel %vm20119_vm11, %v8767_v35, %v8771_v56  ;;  %v8561_v7 = vld [vmem:[#allocation3 + $0x7c] sm:$0xf]  ;;  %v8562_v13 = vld [vmem:[#allocation3 + $0x80] sm:$0x1] }
 0x45c   : > { %v8790_v33 = vor.u32 %v8789_v10, %v8785_v25  ;;  %v8795_v41 = vrot.slane %v8793_v8, 5  ;;  %v9202_v31 = vrot.slane %v9071_v47, 5  ;;  %v14801_v12 = vcombine.low %v8762_v57, %v8772_v19  ;;  %v9075_v15 = vld [vmem:[#allocation3 + $0x78] sm:$0xe]  ;;  %v9076_v10 = vld [vmem:[#allocation3 + $0x7c] sm:$0xf] }
 0x45d   : > { %v8781_v37 = vrot.slane %v8780_v40, 4  ;;  %v9200_v49 = vsel %vm17551_vm8, %v14818_v54, %v9199_v30  ;;  %v9201_v48 = vrot.slane %v9199_v30, 4  ;;  %v8798_v18 = vshrl.u32 %v8557_v38, 16  ;;  %v9077_v54 = vld [vmem:[#allocation3 + $0x80] sm:$0x1] }
 0x45e   : > { %v8791_v50 = vrot.slane %v8790_v33, 4  ;;  %v8801_v23 = vshll.u32 %v8557_v38, 16  ;;  %v8807_v60 = vshll.u32 %v8558_v26, 16  ;;  %12069 = vmatprep.mubr.bf16.mxu0 %v14801_v12  ;;  %v8811_v51 = vshrl.u32 %v8558_v26, 16  ;;  %v8563_v30 = vld [vmem:[#allocation3 + $0x84] sm:$0xf] }
 0x45f   : > { %v8786_v28 = vsel %vm20119_vm11, %v8781_v37, %v8785_v25  ;;  %v9203_v42 = vsel %vm17551_vm8, %v9201_v48, %v9202_v31  ;;  %v8817_v5 = vshll.u32 %v8559_v44, 16  ;;  %v8800_v46 = vrot.slane %v8798_v18, 4  ;;  %v17125_v26 = vld [vmem:[#allocation3 + $0x78] sm:$0xff]   ;;  %v17127_v44 = vld [vmem:[#allocation3 + $0x60] sm:$0xff]   ;;  %v8564_v12 = vld [vmem:[#allocation3 + $0x88] sm:$0xf] }
 0x460   : > { %12231 = vmatmul.mubr.bf16.gmra.mrb[76].mxu1 %v14833_v58  ;;  %v8796_v53 = vsel %vm20119_vm11, %v8791_v50, %v8795_v41  ;;  %v14834_v36 = vcombine.low %v9200_v49, %v9203_v42  ;;  %v8803_v55 = vrot.slane %v8801_v23, 5  ;;  %v8809_v56 = vrot.slane %v8807_v60, 5  ;;  %v8565_v48 = vld [vmem:[#allocation3 + $0x8c] sm:$0x1] }
 0x461   : > { %12238 = vmatprep.mubr.bf16.mxu1 %v17122_v4  ;;  %12070 = vmatmul.mubr.bf16.gmra.mrb[44].mxu0 %v17123_v22  ;;  %v14802_v0 = vcombine.low %v8786_v28, %v8796_v53  ;;  %v8813_v45 = vrot.slane %v8811_v51, 4  ;;  %v8819_v3 = vrot.slane %v8817_v5, 5  ;;  %v14819_v63 = vrot.slane %v9072_v24, 9  ;;  %v9078_v24 = vld [vmem:[#allocation3 + $0x84] sm:$0xe] }
 0x462   : > { %v8804_v16 = vor.u32 %v8803_v55, %v8800_v46  ;;  %v9206_v14 = vrot.slane %v9073_v9, 5  ;;  %v9209_v27 = vrot.slane %v9074_v61, 5  ;;  %v8822_v34 = vshrl.u32 %v8560_v29, 16  ;;  %v9079_v28 = vld [vmem:[#allocation3 + $0x88] sm:$0xf] }
 0x463   : > { %12077 = vmatprep.mubr.bf16.mxu0 %v14802_v0  ;;  %v8814_v59 = vor.u32 %v8813_v45, %v8809_v56  ;;  %v8825_v1 = vshll.u32 %v8560_v29, 16  ;;  %v8831_v39 = vshll.u32 %v8561_v7, 16  ;;  %v8835_v11 = vshrl.u32 %v8561_v7, 16  ;;  %v9080_v61 = vld [vmem:[#allocation3 + $0x8c] sm:$0x1] }
 0x464   : > { %v8805_v43 = vrot.slane %v8804_v16, 4  ;;  %v20697_v57 = vsel %vm17551_vm8, %v14819_v63, %v9206_v14  ;;  %v9208_v62 = vrot.slane %v9206_v14, 4  ;;  %v8824_v47 = vrot.slane %v8822_v34, 4  ;;  %v8566_v45 = vld [vmem:[#allocation3 + $0x90] sm:$0xf] }
 0x465   : > { %v8815_v25 = vrot.slane %v8814_v59, 4  ;;  %v8827_v35 = vrot.slane %v8825_v1, 5  ;;  %v8833_v6 = vrot.slane %v8831_v39, 5  ;;  %v8837_v58 = vrot.slane %v8835_v11, 4  ;;  %v8568_v39 = vld [vmem:[#allocation3 + $0x98] sm:$0x1] }
 0x466   : > { %v8810_v8 = vsel %vm20119_vm11, %v8805_v43, %v8809_v56  ;;  %v9210_v38 = vsel %vm17551_vm8, %v9208_v62, %v9209_v27  ;;  %v8841_v40 = vshll.u32 %v8562_v13, 16  ;;  %v14820_v31 = vrot.slane %v9075_v15, 9  ;;  %v8567_v27 = vld [vmem:[#allocation3 + $0x94] sm:$0xf]  ;;  %v17130_v43 = vld [vmem:[#allocation3 + $0x84] sm:$0xff]  }
 0x467   : > { %v8820_v19 = vsel %vm20119_vm11, %v8815_v25, %v8819_v3  ;;  %v14835_v33 = vcombine.low %v20697_v57, %v9210_v38  ;;  %v8828_v41 = vor.u32 %v8827_v35, %v8824_v47  ;;  %v8838_v22 = vor.u32 %v8837_v58, %v8833_v6  ;;  %v17131_v3 = vld [vmem:[#allocation3 + $0x6c] sm:$0xff]   ;;  %v9082_v38 = vld [vmem:[#allocation3 + $0x94] sm:$0xf] }
 0x468   : > { %12239 = vmatmul.mubr.bf16.gmra.mrb[80].mxu1 %v14834_v36  ;;  %v14803_v4 = vcombine.low %v8810_v8, %v8820_v19  ;;  %v8843_v37 = vrot.slane %v8841_v40, 5  ;;  %v9213_v49 = vrot.slane %v9076_v10, 5  ;;  %v9216_v18 = vrot.slane %v9077_v54, 5  ;;  %v9081_v47 = vld [vmem:[#allocation3 + $0x90] sm:$0xe] }
 0x469   : > { %12246 = vmatprep.mubr.bf16.mxu1 %v17125_v26  ;;  %12078 = vmatmul.mubr.bf16.gmra.mrb[48].mxu0 %v17127_v44  ;;  %v8829_v50 = vrot.slane %v8828_v41, 4  ;;  %v8846_v23 = vshrl.u32 %v8563_v30, 16  ;;  %v8849_v60 = vshll.u32 %v8563_v30, 16  ;;  %v8839_v42 = vrot.slane %v8838_v22, 4  ;;  %v9083_v26 = vld [vmem:[#allocation3 + $0x98] sm:$0x1] }
 0x46a   : > { %12085 = vmatprep.mubr.bf16.mxu0 %v14803_v4  ;;  %v20708_v51 = vsel %vm17551_vm8, %v14820_v31, %v9213_v49  ;;  %v9215_v5 = vrot.slane %v9213_v49, 4  ;;  %v8855_v9 = vshll.u32 %v8564_v12, 16  ;;  %v8859_v55 = vshrl.u32 %v8564_v12, 16  ;;  %v8569_v31 = vld [vmem:[#allocation3 + $0x9c] sm:$0xf] }
 0x46b   : > { %v8834_v53 = vsel %vm20119_vm11, %v8829_v50, %v8833_v6  ;;  %v8848_v36 = vrot.slane %v8846_v23, 4  ;;  %v8851_v46 = vrot.slane %v8849_v60, 5  ;;  %v8844_v29 = vsel %vm20119_vm11, %v8839_v42, %v8843_v37  ;;  %v8570_v49 = vld [vmem:[#allocation3 + $0xa0] sm:$0xf] }
 0x46c   : > { %v20716_v7 = vsel %vm17551_vm8, %v9215_v5, %v9216_v18  ;;  %v8857_v0 = vrot.slane %v8855_v9, 5  ;;  %v8865_v56 = vshll.u32 %v8565_v48, 16  ;;  %v14804_v13 = vcombine.low %v8834_v53, %v8844_v29  ;;  %v9084_v5 = vld [vmem:[#allocation3 + $0x9c] sm:$0xe]  ;;  %v17133_v29 = vld [vmem:[#allocation3 + $0x90] sm:$0xff]  }
 0x46d   : > { %v14836_v16 = vcombine.low %v20708_v51, %v20716_v7  ;;  %v8852_v63 = vor.u32 %v8851_v46, %v8848_v36  ;;  %v8861_v14 = vrot.slane %v8859_v55, 4  ;;  %v14821_v59 = vrot.slane %v9078_v24, 9  ;;  %v17135_v9 = vld [vmem:[#allocation3 + $0x78] sm:$0xff]   ;;  %v9085_v55 = vld [vmem:[#allocation3 + $0xa0] sm:$0xf] }
 0x46e   : > { %v8867_v15 = vrot.slane %v8865_v56, 5  ;;  %v9220_v34 = vrot.slane %v9079_v28, 5  ;;  %v9223_v1 = vrot.slane %v9080_v61, 5  ;;  %v8870_v11 = vshrl.u32 %v8566_v45, 16  ;;  %v8571_v28 = vld [vmem:[#allocation3 + $0xa4] sm:$0x1] }
 0x46f   : > { %v8853_v57 = vrot.slane %v8852_v63, 4  ;;  %v8862_v62 = vor.u32 %v8861_v14, %v8857_v0  ;;  %v8873_v25 = vshll.u32 %v8566_v45, 16  ;;  %v8879_v10 = vshll.u32 %v8567_v27, 16 }
 0x470   : > { %12247 = vmatmul.mubr.bf16.gmra.mrb[84].mxu1 %v14835_v33  ;;  %v20722_v35 = vsel %vm17551_vm8, %v14821_v59, %v9220_v34  ;;  %v9222_v6 = vrot.slane %v9220_v34, 4  ;;  %v8883_v8 = vshrl.u32 %v8567_v27, 16  ;;  %v8872_v54 = vrot.slane %v8870_v11, 4 }
 0x471   : > { %12254 = vmatprep.mubr.bf16.mxu1 %v17130_v43  ;;  %12086 = vmatmul.mubr.bf16.gmra.mrb[52].mxu0 %v17131_v3  ;;  %v8858_v58 = vsel %vm20119_vm11, %v8853_v57, %v8857_v0  ;;  %v8863_v40 = vrot.slane %v8862_v62, 4  ;;  %v8875_v30 = vrot.slane %v8873_v25, 5  ;;  %v8881_v19 = vrot.slane %v8879_v10, 5  ;;  %v9086_v3 = vld [vmem:[#allocation3 + $0xa4] sm:$0x1] }
 0x472   : > { %12093 = vmatprep.mubr.bf16.mxu0 %v14804_v13  ;;  %v20728_v44 = vsel %vm17551_vm8, %v9222_v6, %v9223_v1  ;;  %v8885_v33 = vrot.slane %v8883_v8, 4  ;;  %v8889_v41 = vshll.u32 %v8568_v39, 16  ;;  %v14822_v37 = vrot.slane %v9081_v47, 9  ;;  %v8573_v43 = vld [vmem:[#allocation3 + $0xac] sm:$0xf] }
 0x473   : > { %v8868_v12 = vsel %vm20119_vm11, %v8863_v40, %v8867_v15  ;;  %v14837_v4 = vcombine.low %v20722_v35, %v20728_v44  ;;  %v8876_v22 = vor.u32 %v8875_v30, %v8872_v54  ;;  %v9227_v23 = vrot.slane %v9082_v38, 5  ;;  %v8572_v15 = vld [vmem:[#allocation3 + $0xa8] sm:$0xf]  ;;  %v8574_v25 = vld [vmem:[#allocation3 + $0xb0] sm:$0x1] }
 0x474   : > { %v14805_v48 = vcombine.low %v8858_v58, %v8868_v12  ;;  %v8886_v50 = vor.u32 %v8885_v33, %v8881_v19  ;;  %v8891_v18 = vrot.slane %v8889_v41, 5  ;;  %v9230_v24 = vrot.slane %v9083_v26, 5  ;;  %v9087_v47 = vld [vmem:[#allocation3 + $0xa8] sm:$0xe]  ;;  %v9088_v58 = vld [vmem:[#allocation3 + $0xac] sm:$0xf] }
 0x475   : > { %v8877_v60 = vrot.slane %v8876_v22, 4  ;;  %v8894_v42 = vshrl.u32 %v8569_v31, 16  ;;  %v8897_v51 = vshll.u32 %v8569_v31, 16  ;;  %v20736_v53 = vsel %vm17551_vm8, %v14822_v37, %v9227_v23  ;;  %v9089_v12 = vld [vmem:[#allocation3 + $0xb0] sm:$0x1] }
 0x476   : > { %v8887_v61 = vrot.slane %v8886_v50, 4  ;;  %v9229_v36 = vrot.slane %v9227_v23, 4  ;;  %v8903_v46 = vshll.u32 %v8570_v49, 16  ;;  %v8907_v45 = vshrl.u32 %v8570_v49, 16  ;;  %v8575_v50 = vld [vmem:[#allocation3 + $0xb4] sm:$0xf] }
 0x477   : > { %v8882_v7 = vsel %vm20119_vm11, %v8877_v60, %v8881_v19  ;;  %v8896_v0 = vrot.slane %v8894_v42, 4  ;;  %v8899_v56 = vrot.slane %v8897_v51, 5  ;;  %v8913_v27 = vshll.u32 %v8571_v28, 16  ;;  %v17139_v23 = vld [vmem:[#allocation3 + $0x84] sm:$0xff]   ;;  %v8576_v51 = vld [vmem:[#allocation3 + $0xb8] sm:$0xf] }
 0x478   : > { %12255 = vmatmul.mubr.bf16.gmra.mrb[88].mxu1 %v14836_v16  ;;  %v8892_v13 = vsel %vm20119_vm11, %v8887_v61, %v8891_v18  ;;  %v20744_v63 = vsel %vm17551_vm8, %v9229_v36, %v9230_v24  ;;  %v8905_v14 = vrot.slane %v8903_v46, 5  ;;  %v8909_v39 = vrot.slane %v8907_v45, 4  ;;  %v17138_v18 = vld [vmem:[#allocation3 + $0x9c] sm:$0xff]  }
 0x479   : > { %12262 = vmatprep.mubr.bf16.mxu1 %v17133_v29  ;;  %12094 = vmatmul.mubr.bf16.gmra.mrb[56].mxu0 %v17135_v9  ;;  %v14806_v59 = vcombine.low %v8882_v7, %v8892_v13  ;;  %v14838_v34 = vcombine.low %v20736_v53, %v20744_v63  ;;  %v8900_v1 = vor.u32 %v8899_v56, %v8896_v0  ;;  %v8915_v16 = vrot.slane %v8913_v27, 5  ;;  %v8577_v29 = vld [vmem:[#allocation3 + $0xbc] sm:$0x1]  ;;  %v9090_v56 = vld [vmem:[#allocation3 + $0xb4] sm:$0xe] }
 0x47a   : > { %12101 = vmatprep.mubr.bf16.mxu0 %v14805_v48  ;;  %v14823_v57 = vrot.slane %v9084_v5, 9  ;;  %v9234_v62 = vrot.slane %v9085_v55, 5  ;;  %v9237_v11 = vrot.slane %v9086_v3, 5  ;;  %v8910_v10 = vor.u32 %v8909_v39, %v8905_v14  ;;  %v10422_v13 = vld [vmem:[#allocation3 + $0x18] sm:$0xf] }
 0x47b   : > { %v8901_v6 = vrot.slane %v8900_v1, 4  ;;  %v8918_v8 = vshrl.u32 %v8572_v15, 16  ;;  %v8921_v38 = vshll.u32 %v8572_v15, 16  ;;  %v8927_v30 = vshll.u32 %v8573_v43, 16  ;;  %v9092_v39 = vld [vmem:[#allocation3 + $0xbc] sm:$0x1] }
 0x47c   : > { %v20750_v40 = vsel %vm17551_vm8, %v14823_v57, %v9234_v62  ;;  %v9236_v54 = vrot.slane %v9234_v62, 4  ;;  %v8931_v26 = vshrl.u32 %v8573_v43, 16  ;;  %v8911_v33 = vrot.slane %v8910_v10, 4  ;;  %v20771_v43 = vpop.f32.mrb[16].mxu0  ;;  %v9991_v53 = vld [vmem:[#allocation3 + $0x14] sm:$0x1] }
 0x47d   : > { %v8906_v19 = vsel %vm20119_vm11, %v8901_v6, %v8905_v14  ;;  %v8920_v41 = vrot.slane %v8918_v8, 4  ;;  %v8923_v31 = vrot.slane %v8921_v38, 5  ;;  %v8929_v37 = vrot.slane %v8927_v30, 5  ;;  %v10423_v38 = vld [vmem:[#allocation3 + $0x1c] sm:$0xf] }
 0x47e   : > { %v20756_v22 = vsel %vm17551_vm8, %v9236_v54, %v9237_v11  ;;  %v8933_v49 = vrot.slane %v8931_v26, 4  ;;  %v8937_v48 = vshll.u32 %v8574_v25, 16  ;;  %v8916_v60 = vsel %vm20119_vm11, %v8911_v33, %v8915_v16  ;;  %v17141_v11 = vld [vmem:[#allocation3 + $0xa8] sm:$0xff]   ;;  %v17143_v25 = vld [vmem:[#allocation3 + $0x90] sm:$0xff]   ;;  %v10424_v33 = vld [vmem:[#allocation3 + $0x20] sm:$0x1] }
 0x47f   : > { %v14839_v24 = vcombine.low %v20750_v40, %v20756_v22  ;;  %v8924_v28 = vor.u32 %v8923_v31, %v8920_v41  ;;  %v14824_v42 = vrot.slane %v9087_v47, 9  ;;  %v14807_v5 = vcombine.low %v8906_v19, %v8916_v60 }
 0x480   : > { %12263 = vmatmul.mubr.bf16.gmra.mrb[92].mxu1 %v14837_v4  ;;  %v8934_v9 = vor.u32 %v8933_v49, %v8929_v37  ;;  %v8939_v61 = vrot.slane %v8937_v48, 5  ;;  %v9241_v36 = vrot.slane %v9088_v58, 5  ;;  %v9244_v55 = vrot.slane %v9089_v12, 5  ;;  %v9091_v4 = vld [vmem:[#allocation3 + $0xb8] sm:$0xf]  ;;  %v20783_v58 = vpop.f32.mrb[17].mxu0 }
 0x481   : > { %12270 = vmatprep.mubr.bf16.mxu1 %v17138_v18  ;;  %12102 = vmatmul.mubr.bf16.gmra.mrb[60].mxu0 %v17139_v23  ;;  %v8925_v46 = vrot.slane %v8924_v28, 4  ;;  %v8942_v7 = vshrl.u32 %v8575_v50, 16  ;;  %v8945_v0 = vshll.u32 %v8575_v50, 16  ;;  %v8951_v44 = vshll.u32 %v8576_v51, 16  ;;  %v9989_v49 = vld [vmem:[#allocation3 + $0xc] sm:$0xe] }
 0x482   : > { %12109 = vmatprep.mubr.bf16.mxu0 %v14806_v59  ;;  %v8935_v45 = vrot.slane %v8934_v9, 4  ;;  %v20767_v3 = vsel %vm17551_vm8, %v14824_v42, %v9241_v36  ;;  %v9243_v35 = vrot.slane %v9241_v36, 4  ;;  %v8955_v1 = vshrl.u32 %v8576_v51, 16  ;;  %v20785_v48 = vpop.f32.mrb[18].mxu0  ;;  %v9990_v28 = vld [vmem:[#allocation3 + $0x10] sm:$0xf] }
 0x483   : > { %v8930_v14 = vsel %vm20119_vm11, %v8925_v46, %v8929_v37  ;;  %v8944_v27 = vrot.slane %v8942_v7, 4  ;;  %v8947_v15 = vrot.slane %v8945_v0, 5  ;;  %v8953_v57 = vrot.slane %v8951_v44, 5  ;;  %v20794_v42 = vpop.f32.mrb[19].mxu0 }
 0x484   : > { %v8940_v59 = vsel %vm20119_vm11, %v8935_v45, %v8939_v61  ;;  %v20777_v16 = vsel %vm17551_vm8, %v9243_v35, %v9244_v55  ;;  %v8961_v62 = vshll.u32 %v8577_v29, 16  ;;  %v8957_v8 = vrot.slane %v8955_v1, 4  ;;  %v10425_v29 = vld [vmem:[#allocation3 + $0x24] sm:$0xf]  ;;  %v10426_v35 = vld [vmem:[#allocation3 + $0x28] sm:$0xf] }
 0x485   : > { %v20779_v47 = vcombine.low %v8930_v14, %v8940_v59  ;;  %v14840_v6 = vcombine.low %v20767_v3, %v20777_v16  ;;  %v8948_v10 = vor.u32 %v8947_v15, %v8944_v27  ;;  %v14825_v30 = vrot.slane %v9090_v56, 9  ;;  %v10427_v15 = vld [vmem:[#allocation3 + $0x2c] sm:$0x1]  ;;  %v17147_v59 = vld [vmem:[#allocation3 + $0x9c] sm:$0xff]  }
 0x486   : > { %v8963_v54 = vrot.slane %v8961_v62, 5  ;;  %v9248_v26 = vrot.slane %v9091_v4, 5  ;;  %v9251_v19 = vrot.slane %v9092_v39, 5  ;;  %v8958_v31 = vor.u32 %v8957_v8, %v8953_v57 }
 0x487   : > { %v8949_v41 = vrot.slane %v8948_v10, 4  ;;  %v10471_v12 = vshrl.u32 %v10422_v13, 16  ;;  %v10474_v37 = vshll.u32 %v10422_v13, 16  ;;  %v10480_v23 = vshll.u32 %v10423_v38, 16  ;;  %v17146_v10 = vld [vmem:[#allocation3 + $0xb4] sm:$0xff]  }
 0x488   : > { %12271 = vmatmul.mubr.bf16.gmra.mrb[96].mxu1 %v14838_v34  ;;  %v20792_v50 = vsel %vm17551_vm8, %v14825_v30, %v9248_v26  ;;  %v9250_v18 = vrot.slane %v9248_v26, 4  ;;  %v10484_v60 = vshrl.u32 %v10423_v38, 16  ;;  %v8959_v9 = vrot.slane %v8958_v31, 4  ;;  %v9479_v26 = vld [vmem:[#allocation3 + $0x14] sm:$0x1] }
 0x489   : > { %12278 = vmatprep.mubr.bf16.mxu1 %v17141_v11  ;;  %12110 = vmatmul.mubr.bf16.gmra.mrb[64].mxu0 %v17143_v25  ;;  %v8954_v51 = vsel %vm20119_vm11, %v8949_v41, %v8953_v57  ;;  %v10473_v61 = vrot.slane %v10471_v12, 4  ;;  %v10476_v36 = vrot.slane %v10474_v37, 5  ;;  %v10482_v34 = vrot.slane %v10480_v23, 5  ;;  %v9992_v12 = vld [vmem:[#allocation3 + $0x18] sm:$0xe] }
 0x48a   : > { %12117 = vmatprep.mubr.bf16.mxu0 %v14807_v5  ;;  %v20800_v63 = vsel %vm17551_vm8, %v9250_v18, %v9251_v19  ;;  %v10486_v46 = vrot.slane %v10484_v60, 4  ;;  %v10490_v55 = vshll.u32 %v10424_v33, 16  ;;  %v8964_v7 = vsel %vm20119_vm11, %v8959_v9, %v8963_v54  ;;  %v9993_v37 = vld [vmem:[#allocation3 + $0x1c] sm:$0xf]  ;;  %v10428_v23 = vld [vmem:[#allocation3 + $0x30] sm:$0xf] }
 0x48b   : > { %v14841_v0 = vcombine.low %v20792_v50, %v20800_v63  ;;  %v10477_v56 = vor.u32 %v10476_v36, %v10473_v61  ;;  %v14874_v45 = vrot.slane %v9989_v49, 9  ;;  %v20806_v44 = vcombine.low %v8954_v51, %v8964_v7  ;;  %v17206_v51 = vld [vmem:[#allocation3 + $0x10] sm:$0xf] }
 0x48c   : > { %v10487_v5 = vor.u32 %v10486_v46, %v10482_v34  ;;  %v10492_v4 = vrot.slane %v10490_v55, 5  ;;  %v10087_v13 = vrot.slane %v9990_v28, 5  ;;  %v10090_v27 = vrot.slane %v9991_v53, 5  ;;  %v10429_v55 = vld [vmem:[#allocation3 + $0x34] sm:$0xf] }
 0x48d   : > { %v10478_v14 = vrot.slane %v10477_v56, 4  ;;  %v10495_v1 = vshrl.u32 %v10425_v29, 16  ;;  %v10498_v39 = vshll.u32 %v10425_v29, 16  ;;  %v10504_v25 = vshll.u32 %v10426_v35, 16 }
 0x48e   : > { %v10488_v57 = vrot.slane %v10487_v5, 4  ;;  %v20810_v62 = vsel %vm17551_vm8, %v14874_v45, %v10087_v13  ;;  %v10089_v11 = vrot.slane %v10087_v13, 4  ;;  %v10508_v30 = vshrl.u32 %v10426_v35, 16 }
 0x48f   : > { %v10483_v8 = vsel %vm20119_vm11, %v10478_v14, %v10482_v34  ;;  %v10497_v38 = vrot.slane %v10495_v1, 4  ;;  %v10500_v54 = vrot.slane %v10498_v39, 5  ;;  %v10506_v41 = vrot.slane %v10504_v25, 5  ;;  %v17153_v1 = vld [vmem:[#allocation3 + $0xa8] sm:$0xff]   ;;  %v9481_v25 = vld [vmem:[#allocation3 + $0x1c] sm:$0xf] }
 0x490   : > { %12279 = vmatmul.mubr.bf16.gmra.mrb[100].mxu1 %v14839_v24  ;;  %v10493_v19 = vsel %vm20119_vm11, %v10488_v57, %v10492_v4  ;;  %v20821_v33 = vsel %vm17551_vm8, %v10089_v11, %v10090_v27  ;;  %v10514_v31 = vshll.u32 %v10427_v15, 16  ;;  %v10510_v22 = vrot.slane %v10508_v30, 4  ;;  %v9994_v24 = vld [vmem:[#allocation3 + $0x20] sm:$0x1]  ;;  %v10430_v4 = vld [vmem:[#allocation3 + $0x38] sm:$0x1] }
 0x491   : > { %12286 = vmatprep.mubr.bf16.mxu1 %v17146_v10  ;;  %12118 = vmatmul.mubr.bf16.gmra.mrb[68].mxu0 %v17147_v59  ;;  %v20823_v49 = vcombine.low %v10483_v8, %v10493_v19  ;;  %v14890_v18 = vcombine.low %v20810_v62, %v20821_v33  ;;  %v10501_v40 = vor.u32 %v10500_v54, %v10497_v38  ;;  %v9533_v28 = vrot.slane %v9532_v21, 4  ;;  %v9480_v27 = vld [vmem:[#allocation3 + $0x18] sm:$0xf]  ;;  %v17151_v15 = vld [vmem:[#allocation3 + $0xc0] sm:$0xff]   ;;  %v9998_v33 = vld [vmem:[#allocation3 + $0x30] sm:$0xe] }
 0x492   : > { %12125 = vmatprep.mubr.bf16.mxu0 %v20779_v47  ;;  %v10516_v60 = vrot.slane %v10514_v31, 5  ;;  %v9535_v9 = vshll.u32 %v17206_v51, 16  ;;  %v9545_v61 = vshll.u32 %v9479_v26, 16  ;;  %v10511_v53 = vor.u32 %v10510_v22, %v10506_v41  ;;  %v9482_v54 = vld [vmem:[#allocation3 + $0x20] sm:$0x1] }
 0x493   : > { %v10502_v36 = vrot.slane %v10501_v40, 4  ;;  %v14875_v34 = vrot.slane %v9992_v12, 9  ;;  %v10094_v46 = vrot.slane %v9993_v37, 5  ;;  %v10097_v56 = vrot.slane %v9994_v24, 5  ;;  %v9995_v31 = vld [vmem:[#allocation3 + $0x24] sm:$0xe] }
 0x494   : > { %v9537_v29 = vrot.slane %v9535_v9, 5  ;;  %v9547_v7 = vrot.slane %v9545_v61, 5  ;;  %v10519_v45 = vshrl.u32 %v10428_v23, 16  ;;  %v10512_v35 = vrot.slane %v10511_v53, 4  ;;  %v9996_v37 = vld [vmem:[#allocation3 + $0x28] sm:$0xf] }
 0x495   : > { %v10507_v47 = vsel %vm20119_vm11, %v10502_v36, %v10506_v41  ;;  %v20835_v2 = vsel %vm17551_vm8, %v14875_v34, %v10094_v46  ;;  %v10096_v20 = vrot.slane %v10094_v46, 4  ;;  %v10522_v14 = vshll.u32 %v10428_v23, 16  ;;  %v10431_v46 = vld [vmem:[#allocation3 + $0x3c] sm:$0xf] }
 0x496   : > { %v9538_v21 = vsel %vm20119_vm11, %v9533_v28, %v9537_v29  ;;  %v9542_v5 = vor.u32 %v20265_v32, %v9537_v29  ;;  %v10521_v13 = vrot.slane %v10519_v45, 4  ;;  %v10517_v39 = vsel %vm20119_vm11, %v10512_v35, %v10516_v60  ;;  %v9997_v60 = vld [vmem:[#allocation3 + $0x2c] sm:$0x1]  ;;  %v10432_v45 = vld [vmem:[#allocation3 + $0x40] sm:$0xf] }
 0x497   : > { %v20844_v59 = vsel %vm17551_vm8, %v10096_v20, %v10097_v56  ;;  %v10528_v57 = vshll.u32 %v10429_v55, 16  ;;  %v10532_v11 = vshrl.u32 %v10429_v55, 16  ;;  %v20849_v32 = vcombine.low %v10507_v47, %v10517_v39  ;;  %v17160_v47 = vld [vmem:[#allocation3 + $0xb4] sm:$0xff]   ;;  %v9484_v39 = vld [vmem:[#allocation3 + $0x28] sm:$0xf] }
 0x498   : > { %12287 = vmatmul.mubr.bf16.gmra.mrb[104].mxu1 %v14840_v6  ;;  %v9543_v10 = vrot.slane %v9542_v5, 4  ;;  %v14891_v8 = vcombine.low %v20835_v2, %v20844_v59  ;;  %v10524_v38 = vrot.slane %v10522_v14, 5  ;;  %v10538_v19 = vshll.u32 %v10430_v4, 16  ;;  %v10433_v4 = vld [vmem:[#allocation3 + $0x44] sm:$0x1]  ;;  %v17170_v2 = vld [vmem:[%s22116_s7 + $0x210] sm:$0xff]  }
 0x499   : > { %12294 = vmatprep.mubr.bf16.mxu1 %v17151_v15  ;;  %12126 = vmatmul.mubr.bf16.gmra.mrb[72].mxu0 %v17153_v1  ;;  %v10530_v30 = vrot.slane %v10528_v57, 5  ;;  %v10534_v26 = vrot.slane %v10532_v11, 4  ;;  %v9550_v41 = vshrl.u32 %v9480_v27, 16  ;;  %v9553_v6 = vshll.u32 %v9480_v27, 16  ;;  %v9483_v1 = vld [vmem:[#allocation3 + $0x24] sm:$0xf] }
 0x49a   : > { %12133 = vmatprep.mubr.bf16.mxu0 %v20806_v44  ;;  %v9548_v3 = vsel %vm20119_vm11, %v9543_v10, %v9547_v7  ;;  %v10525_v16 = vor.u32 %v10524_v38, %v10521_v13  ;;  %v9559_v12 = vshll.u32 %v9481_v25, 16  ;;  %v10540_v24 = vrot.slane %v10538_v19, 5  ;;  %v9485_v19 = vld [vmem:[#allocation3 + $0x2c] sm:$0x1] }
 0x49b   : > { %v20856_v40 = vcombine.low %v9538_v21, %v9548_v3  ;;  %v10535_v22 = vor.u32 %v10534_v26, %v10530_v30  ;;  %v9552_v23 = vrot.slane %v9550_v41, 4  ;;  %v9555_v51 = vrot.slane %v9553_v6, 5 }
 0x49c   : > { %v10526_v28 = vrot.slane %v10525_v16, 4  ;;  %v9561_v9 = vrot.slane %v9559_v12, 5  ;;  %v9563_v61 = vshrl.u32 %v9481_v25, 16  ;;  %v9569_v53 = vshll.u32 %v9482_v54, 16 }
 0x49d   : > { %v10536_v36 = vrot.slane %v10535_v22, 4  ;;  %v14876_v44 = vrot.slane %v9995_v31, 9  ;;  %v10101_v34 = vrot.slane %v9996_v37, 5  ;;  %v9556_v29 = vor.u32 %v9555_v51, %v9552_v23  ;;  %v9999_v22 = vld [vmem:[#allocation3 + $0x34] sm:$0xf] }
 0x49e   : > { %v10531_v55 = vsel %vm20119_vm11, %v10526_v28, %v10530_v30  ;;  %v9565_v7 = vrot.slane %v9563_v61, 4  ;;  %v10104_v56 = vrot.slane %v9997_v60, 5  ;;  %v9571_v20 = vrot.slane %v9569_v53, 5 }
 0x49f   : > { %v10541_v35 = vsel %vm20119_vm11, %v10536_v36, %v10540_v24  ;;  %v20864_v21 = vsel %vm17551_vm8, %v14876_v44, %v10101_v34  ;;  %v10103_v5 = vrot.slane %v10101_v34, 4  ;;  %v9557_v14 = vrot.slane %v9556_v29, 4  ;;  %v10000_v24 = vld [vmem:[#allocation3 + $0x38] sm:$0x1]  ;;  %v17167_v44 = vld [vmem:[%s22116_s7 + $0x208] sm:$0xff]  }
 0x4a0   : > { %12295 = vmatmul.mubr.bf16.gmra.mrb[108].mxu1 %v14841_v0  ;;  %v20869_v13 = vcombine.low %v10531_v55, %v10541_v35  ;;  %v9566_v27 = vor.u32 %v9565_v7, %v9561_v9  ;;  %v10543_v15 = vshrl.u32 %v10431_v46, 16  ;;  %v10546_v11 = vshll.u32 %v10431_v46, 16 }
 0x4a1   : > { %12496 = vmatprep.mubr.bf16.mxu1 %v20823_v49  ;;  %12134 = vmatmul.mubr.bf16.gmra.mrb[76].mxu0 %v17160_v47  ;;  %v20874_v57 = vsel %vm17551_vm8, %v10103_v5, %v10104_v56  ;;  %v10552_v25 = vshll.u32 %v10432_v45, 16  ;;  %v10556_v10 = vshrl.u32 %v10432_v45, 16  ;;  %v9562_v50 = vsel %vm20119_vm11, %v9557_v14, %v9561_v9  ;;  %v10434_v9 = vld [vmem:[#allocation3 + $0x48] sm:$0xf]  ;;  %v10435_v56 = vld [vmem:[#allocation3 + $0x4c] sm:$0xf] }
 0x4a2   : > { %12335 = vmatprep.mubr.bf16.mxu0 %v14890_v18  ;;  %v9567_v63 = vrot.slane %v9566_v27, 4  ;;  %v14892_v0 = vcombine.low %v20864_v21, %v20874_v57  ;;  %v10545_v49 = vrot.slane %v10543_v15, 4  ;;  %v10548_v38 = vrot.slane %v10546_v11, 5  ;;  %v17163_v18 = vld [vmem:[#allocation3 + $0x18] sm:$0xff]   ;;  %v17176_v21 = vld [vmem:[%s22116_s7 + $0x220] sm:$0xff]  }
 0x4a3   : > { %v10554_v54 = vrot.slane %v10552_v25, 5  ;;  %v10558_v30 = vrot.slane %v10556_v10, 4  ;;  %v10562_v26 = vshll.u32 %v10433_v4, 16  ;;  %v9574_v31 = vshrl.u32 %v9483_v1, 16  ;;  %v9486_v4 = vld [vmem:[#allocation3 + $0x30] sm:$0xf] }
 0x4a4   : > { %v9572_v41 = vsel %vm20119_vm11, %v9567_v63, %v9571_v20  ;;  %v9577_v3 = vshll.u32 %v9483_v1, 16  ;;  %v9583_v62 = vshll.u32 %v9484_v39, 16  ;;  %v10549_v6 = vor.u32 %v10548_v38, %v10545_v49  ;;  %v10436_v20 = vld [vmem:[#allocation3 + $0x50] sm:$0x1]  ;;  %v9487_v63 = vld [vmem:[#allocation3 + $0x34] sm:$0xf] }
 0x4a5   : > { %v20885_v16 = vcombine.low %v9562_v50, %v9572_v41  ;;  %v10559_v12 = vor.u32 %v10558_v30, %v10554_v54  ;;  %v10564_v37 = vrot.slane %v10562_v26, 5  ;;  %v9576_v23 = vrot.slane %v9574_v31, 4  ;;  %v17165_v49 = vld [vmem:[#allocation3 + $0x24] sm:$0xff]   ;;  %v9488_v26 = vld [vmem:[#allocation3 + $0x38] sm:$0x1] }
 0x4a6   : > { %v9579_v60 = vrot.slane %v9577_v3, 5  ;;  %v9585_v28 = vrot.slane %v9583_v62, 5  ;;  %v9587_v51 = vshrl.u32 %v9484_v39, 16  ;;  %v10550_v61 = vrot.slane %v10549_v6, 4 }
 0x4a7   : > { %v10560_v36 = vrot.slane %v10559_v12, 4  ;;  %v9593_v53 = vshll.u32 %v9485_v19, 16  ;;  %v14877_v34 = vrot.slane %v9998_v33, 9  ;;  %v10108_v29 = vrot.slane %v9999_v22, 5  ;;  %v10001_v33 = vld [vmem:[#allocation3 + $0x3c] sm:$0xe] }
 0x4a8   : > { %12497 = vmatmul.mubr.bf16.vlgmr.msra.gmra.mrb[112].mxu1 %v17163_v18  ;;  %v9580_v46 = vor.u32 %v9579_v60, %v9576_v23  ;;  %v9589_v55 = vrot.slane %v9587_v51, 4  ;;  %v10111_v7 = vrot.slane %v10000_v24, 5  ;;  %v10555_v45 = vsel %vm20119_vm11, %v10550_v61, %v10554_v54  ;;  %v10002_v18 = vld [vmem:[#allocation3 + $0x40] sm:$0xf]  ;;  %v10003_v24 = vld [vmem:[#allocation3 + $0x44] sm:$0x1] }
 0x4a9   : > { %12504 = vmatprep.mubr.bf16.mxu1 %v20849_v32  ;;  %12336 = vmatmul.mubr.bf16.vlgmr.msra.gmra.mrb[80].mxu0 %v20856_v40  ;;  %v10565_v47 = vsel %vm20119_vm11, %v10560_v36, %v10564_v37  ;;  %v9595_v35 = vrot.slane %v9593_v53, 5  ;;  %v10567_v5 = vshrl.u32 %v10434_v9, 16  ;;  %v17207_v32 = vld [vmem:[%s22116_s7 + $0x200] sm:$0xff]   ;;  %v20906_v15 = vsel %vm17551_vm8, %v14877_v34, %v10108_v29  ;;  %v17173_v23 = vld [vmem:[%s22116_s7 + $0x218] sm:$0xff]   ;;  %v10437_v61 = vld [vmem:[#allocation3 + $0x54] sm:$0xf] }
 0x4aa   : > { %12343 = vmatprep.mubr.bf16.mxu0 %v14891_v8  ;;  %16658 = vmatpush3.bf16.msra.mxu0 %v17207_v32  ;;  %v20902_v40 = vcombine.low %v10555_v45, %v10565_v47  ;;  %v9581_v14 = vrot.slane %v9580_v46, 4  ;;  %v9590_v27 = vor.u32 %v9589_v55, %v9585_v28  ;;  %v10110_v1 = vrot.slane %v10108_v29, 4  ;;  %v10438_v46 = vld [vmem:[#allocation3 + $0x58] sm:$0xf] }
 0x4ab   : > { %16659 = vmatprep.subr.bf16.mxu0 %v17167_v44  ;;  %v10569_v39 = vrot.slane %v10567_v5, 4  ;;  %v10570_v11 = vshll.u32 %v10434_v9, 16  ;;  %v10576_v25 = vshll.u32 %v10435_v56, 16  ;;  %v10580_v10 = vshrl.u32 %v10435_v56, 16 }
 0x4ac   : > { %v9586_v59 = vsel %vm20119_vm11, %v9581_v14, %v9585_v28  ;;  %v9591_v8 = vrot.slane %v9590_v27, 4  ;;  %v10586_v50 = vshll.u32 %v10436_v20, 16  ;;  %v20915_v38 = vsel %vm17551_vm8, %v10110_v1, %v10111_v7  ;;  %v10439_v20 = vld [vmem:[#allocation3 + $0x5c] sm:$0x1] }
 0x4ad   : > { %v10572_v54 = vrot.slane %v10570_v11, 5  ;;  %v10578_v30 = vrot.slane %v10576_v25, 5  ;;  %v9598_v19 = vshrl.u32 %v9486_v4, 16  ;;  %v14893_v31 = vcombine.low %v20906_v15, %v20915_v38  ;;  %v17166_v11 = vld [vmem:[#allocation3 + $0x30] sm:$0xff]   ;;  %v10440_v15 = vld [vmem:[#allocation3 + $0x60] sm:$0xf] }
 0x4ae   : > { %v9596_v41 = vsel %vm20119_vm11, %v9591_v8, %v9595_v35  ;;  %16660 = vmatpush3.bf16.msra.mxu0 %v17167_v44  ;;  %v10582_v3 = vrot.slane %v10580_v10, 4  ;;  %v10588_v62 = vrot.slane %v10586_v50, 5  ;;  %v9601_v22 = vshll.u32 %v9486_v4, 16  ;;  %v9489_v4 = vld [vmem:[#allocation3 + $0x3c] sm:$0xf] }
 0x4af   : > { %v20921_v6 = vcombine.low %v9586_v59, %v9596_v41  ;;  %v10573_v12 = vor.u32 %v10572_v54, %v10569_v39  ;;  %v9600_v37 = vrot.slane %v9598_v19, 4  ;;  %16661 = vmatprep.subr.bf16.mxu0 %v17170_v2  ;;  %v9607_v28 = vshll.u32 %v9487_v63, 16  ;;  %v9490_v39 = vld [vmem:[#allocation3 + $0x40] sm:$0xf]  ;;  %v9491_v10 = vld [vmem:[#allocation3 + $0x44] sm:$0x1] }
 0x4b0   : > { %12505 = vmatmul.mubr.bf16.gmra.mrb[116].mxu1 %v17165_v49  ;;  %v10583_v60 = vor.u32 %v10582_v3, %v10578_v30  ;;  %v9611_v51 = vshrl.u32 %v9487_v63, 16  ;;  %v9617_v9 = vshll.u32 %v9488_v26, 16  ;;  %v9603_v53 = vrot.slane %v9601_v22, 5  ;;  %v17179_v26 = vld [vmem:[%s22116_s7 + $0x228] sm:$0xff]   ;;  %v17168_v38 = vld [vmem:[#allocation3 + $0x3c] sm:$0xff]  }
 0x4b1   : > { %12512 = vmatprep.mubr.bf16.mxu1 %v20869_v13  ;;  %12344 = vmatmul.mubr.bf16.gmra.mrb[84].mxu0 %v20885_v16  ;;  %v10574_v36 = vrot.slane %v10573_v12, 4  ;;  %v14878_v44 = vrot.slane %v10001_v33, 9  ;;  %v10115_v34 = vrot.slane %v10002_v18, 5  ;;  %v9609_v29 = vrot.slane %v9607_v28, 5  ;;  %v10005_v33 = vld [vmem:[#allocation3 + $0x4c] sm:$0xf] }
 0x4b2   : > { %12351 = vmatprep.mubr.bf16.mxu0 %v14892_v0  ;;  %v10584_v55 = vrot.slane %v10583_v60, 4  ;;  %v9613_v7 = vrot.slane %v9611_v51, 4  ;;  %v9619_v56 = vrot.slane %v9617_v9, 5  ;;  %16662 = vmatpush3.bf16.msra.mxu0 %v17170_v2  ;;  %v9604_v13 = vor.u32 %v9603_v53, %v9600_v37 }
 0x4b3   : > { %v10579_v45 = vsel %vm20119_vm11, %v10574_v36, %v10578_v30  ;;  %v20935_v16 = vsel %vm17551_vm8, %v14878_v44, %v10115_v34  ;;  %v10117_v47 = vrot.slane %v10115_v34, 4  ;;  %16663 = vmatprep.subr.bf16.mxu0 %v17173_v23  ;;  %v10118_v35 = vrot.slane %v10003_v24, 5  ;;  %v10004_v30 = vld [vmem:[#allocation3 + $0x48] sm:$0xe]  ;;  %v10006_v24 = vld [vmem:[#allocation3 + $0x50] sm:$0x1] }
 0x4b4   : > { %v10589_v57 = vsel %vm20119_vm11, %v10584_v55, %v10588_v62  ;;  %v9614_v0 = vor.u32 %v9613_v7, %v9609_v29  ;;  %v10591_v5 = vshrl.u32 %v10437_v61, 16  ;;  %v9605_v14 = vrot.slane %v9604_v13, 4 }
 0x4b5   : > { %v20942_v32 = vcombine.low %v10579_v45, %v10589_v57  ;;  %v10594_v27 = vshll.u32 %v10437_v61, 16  ;;  %v10600_v1 = vshll.u32 %v10438_v46, 16  ;;  %v20946_v2 = vsel %vm17551_vm8, %v10117_v47, %v10118_v35  ;;  %v9492_v35 = vld [vmem:[#allocation3 + $0x48] sm:$0xf] }
 0x4b6   : > { %v9615_v25 = vrot.slane %v9614_v0, 4  ;;  %v10593_v59 = vrot.slane %v10591_v5, 4  ;;  %v10604_v8 = vshrl.u32 %v10438_v46, 16  ;;  %16664 = vmatpush3.bf16.msra.mxu0 %v17173_v23  ;;  %v9610_v50 = vsel %vm20119_vm11, %v9605_v14, %v9609_v29  ;;  %v10442_v0 = vld [vmem:[#allocation3 + $0x68] sm:$0x1] }
 0x4b7   : > { %v14894_v63 = vcombine.low %v20935_v16, %v20946_v2  ;;  %v10596_v49 = vrot.slane %v10594_v27, 5  ;;  %v10602_v54 = vrot.slane %v10600_v1, 5  ;;  %16665 = vmatprep.subr.bf16.mxu0 %v17176_v21  ;;  %v10610_v3 = vshll.u32 %v10439_v20, 16 }
 0x4b8   : > { %12513 = vmatmul.mubr.bf16.gmra.mrb[120].mxu1 %v17166_v11  ;;  %v9620_v19 = vsel %vm20119_vm11, %v9615_v25, %v9619_v56  ;;  %v10606_v41 = vrot.slane %v10604_v8, 4  ;;  %v9622_v62 = vshrl.u32 %v9489_v4, 16  ;;  %v9625_v37 = vshll.u32 %v9489_v4, 16  ;;  %v10441_v56 = vld [vmem:[#allocation3 + $0x64] sm:$0xf] }
 0x4b9   : > { %12520 = vmatprep.mubr.bf16.mxu1 %v20902_v40  ;;  %12352 = vmatmul.mubr.bf16.gmra.mrb[88].mxu0 %v20921_v6  ;;  %v14861_v18 = vcombine.low %v9610_v50, %v9620_v19  ;;  %v10597_v12 = vor.u32 %v10596_v49, %v10593_v59  ;;  %v9631_v22 = vshll.u32 %v9490_v39, 16  ;;  %v10612_v60 = vrot.slane %v10610_v3, 5  ;;  %v17182_v6 = vld [vmem:[%s22116_s7 + $0x230] sm:$0xff]  }
 0x4ba   : > { %12359 = vmatprep.mubr.bf16.mxu0 %v14893_v31  ;;  %v10607_v23 = vor.u32 %v10606_v41, %v10602_v54  ;;  %v9624_v28 = vrot.slane %v9622_v62, 4  ;;  %v9635_v51 = vshrl.u32 %v9490_v39, 16  ;;  %16666 = vmatpush3.bf16.msra.mxu0 %v17176_v21  ;;  %v9627_v61 = vrot.slane %v9625_v37, 5  ;;  %v17185_v39 = vld [vmem:[%s22116_s7 + $0x238] sm:$0xff]   ;;  %v9494_v19 = vld [vmem:[#allocation3 + $0x50] sm:$0x1] }
 0x4bb   : > { %v10598_v9 = vrot.slane %v10597_v12, 4  ;;  %v9633_v36 = vrot.slane %v9631_v22, 5  ;;  %v9641_v40 = vshll.u32 %v9491_v10, 16  ;;  %16667 = vmatprep.subr.bf16.mxu0 %v17179_v26  ;;  %v14879_v34 = vrot.slane %v10004_v30, 9  ;;  %v9493_v10 = vld [vmem:[#allocation3 + $0x4c] sm:$0xf] }
 0x4bc   : > { %v10608_v53 = vrot.slane %v10607_v23, 4  ;;  %v9637_v44 = vrot.slane %v9635_v51, 4  ;;  %v10122_v46 = vrot.slane %v10005_v33, 5  ;;  %v9628_v55 = vor.u32 %v9627_v61, %v9624_v28  ;;  %v20967_v45 = vpop.f32.mrb[48].mxu1  ;;  %v10007_v41 = vld [vmem:[#allocation3 + $0x54] sm:$0xe] }
 0x4bd   : > { %v10603_v31 = vsel %vm20119_vm11, %v10598_v9, %v10602_v54  ;;  %v9643_v29 = vrot.slane %v9641_v40, 5  ;;  %v10125_v7 = vrot.slane %v10006_v24, 5  ;;  %v20975_v20 = vpop.f32.mrb[49].mxu1  ;;  %v10615_v14 = vshrl.u32 %v10440_v15, 16  ;;  %v10008_v24 = vld [vmem:[#allocation3 + $0x58] sm:$0xf] }
 0x4be   : > { %v10613_v13 = vsel %vm20119_vm11, %v10608_v53, %v10612_v60  ;;  %v9638_v47 = vor.u32 %v9637_v44, %v9633_v36  ;;  %v20973_v21 = vsel %vm17551_vm8, %v14879_v34, %v10122_v46  ;;  %v10124_v57 = vrot.slane %v10122_v46, 4  ;;  %16668 = vmatpush3.bf16.msra.mxu0 %v17179_v26  ;;  %v20977_v1 = vpop.f32.mrb[50].mxu1  ;;  %v10009_v9 = vld [vmem:[#allocation3 + $0x5c] sm:$0x1]  ;;  %v17169_v40 = vld [vmem:[#allocation3 + $0x48] sm:$0xff]  }
 0x4bf   : > { %v14927_v5 = vcombine.low %v10603_v31, %v10613_v13  ;;  %v9629_v4 = vrot.slane %v9628_v55, 4  ;;  %v10618_v27 = vshll.u32 %v10440_v15, 16  ;;  %16669 = vmatprep.subr.bf16.mxu0 %v17182_v6  ;;  %v10624_v59 = vshll.u32 %v10441_v56, 16  ;;  %v20984_v50 = vpop.f32.mrb[51].mxu1  ;;  %v10444_v55 = vld [vmem:[#allocation3 + $0x70] sm:$0xf] }
 0x4c0   : > { %12521 = vmatmul.mubr.bf16.gmra.mrb[124].mxu1 %v17168_v38  ;;  %v9639_v11 = vrot.slane %v9638_v47, 4  ;;  %v10126_v25 = vsel %vm17551_vm8, %v10124_v57, %v10125_v7  ;;  %v10628_v8 = vshrl.u32 %v10441_v56, 16  ;;  %v10617_v30 = vrot.slane %v10615_v14, 4  ;;  %v10445_v13 = vld [vmem:[#allocation3 + $0x74] sm:$0x1] }
 0x4c1   : > { %12528 = vmatprep.mubr.bf16.mxu1 %v20942_v32  ;;  %12360 = vmatmul.mubr.bf16.gmra.mrb[92].mxu0 %v14861_v18  ;;  %v9634_v49 = vsel %vm20119_vm11, %v9629_v4, %v9633_v36  ;;  %v14895_v54 = vcombine.low %v20973_v21, %v10126_v25  ;;  %v10620_v26 = vrot.slane %v10618_v27, 5  ;;  %v10626_v62 = vrot.slane %v10624_v59, 5  ;;  %v10443_v36 = vld [vmem:[#allocation3 + $0x6c] sm:$0xf]  ;;  %v9495_v4 = vld [vmem:[#allocation3 + $0x54] sm:$0xf] }
 0x4c2   : > { %12367 = vmatprep.mubr.bf16.mxu0 %v14894_v63  ;;  %v9644_v3 = vsel %vm20119_vm11, %v9639_v11, %v9643_v29  ;;  %v10630_v33 = vrot.slane %v10628_v8, 4  ;;  %v10634_v32 = vshll.u32 %v10442_v0, 16  ;;  %16670 = vmatpush3.bf16.msra.mxu0 %v17182_v6  ;;  %v9646_v37 = vshrl.u32 %v9492_v35, 16 }
 0x4c3   : > { %v14862_v18 = vcombine.low %v9634_v49, %v9644_v3  ;;  %v10621_v12 = vor.u32 %v10620_v26, %v10617_v30  ;;  %v9649_v22 = vshll.u32 %v9492_v35, 16  ;;  %16671 = vmatprep.subr.bf16.mxu0 %v17185_v39  ;;  %v9655_v28 = vshll.u32 %v9493_v10, 16 }
 0x4c4   : > { %v10631_v23 = vor.u32 %v10630_v33, %v10626_v62  ;;  %v10636_v60 = vrot.slane %v10634_v32, 5  ;;  %v9659_v51 = vshrl.u32 %v9493_v10, 16  ;;  %v9648_v2 = vrot.slane %v9646_v37, 4  ;;  %v9496_v10 = vld [vmem:[#allocation3 + $0x58] sm:$0xf] }
 0x4c5   : > { %v10622_v16 = vrot.slane %v10621_v12, 4  ;;  %v9651_v63 = vrot.slane %v9649_v22, 5  ;;  %v9665_v61 = vshll.u32 %v9494_v19, 16  ;;  %v9657_v44 = vrot.slane %v9655_v28, 5  ;;  %v17171_v12 = vld [vmem:[#allocation3 + $0x54] sm:$0xff]  }
 0x4c6   : > { %v10632_v53 = vrot.slane %v10631_v23, 4  ;;  %v9661_v6 = vrot.slane %v9659_v51, 4  ;;  %v14880_v34 = vrot.slane %v10007_v41, 9  ;;  %16672 = vmatpush3.bf16.msra.mxu0 %v17185_v39  ;;  %v10129_v31 = vrot.slane %v10008_v24, 5  ;;  %v10010_v41 = vld [vmem:[#allocation3 + $0x60] sm:$0xe] }
 0x4c7   : > { %v10627_v46 = vsel %vm20119_vm11, %v10622_v16, %v10626_v62  ;;  %v9652_v15 = vor.u32 %v9651_v63, %v9648_v2  ;;  %v9667_v38 = vrot.slane %v9665_v61, 5  ;;  %v10132_v56 = vrot.slane %v10009_v9, 5  ;;  %v10446_v2 = vld [vmem:[#allocation3 + $0x78] sm:$0xf] }
 0x4c8   : > { %12529 = vmatmul.mubr.bf16.gmra.mrb[128].mxu1 %v17169_v40  ;;  %v10637_v29 = vsel %vm20119_vm11, %v10632_v53, %v10636_v60  ;;  %v9662_v7 = vor.u32 %v9661_v6, %v9657_v44  ;;  %v10639_v47 = vshrl.u32 %v10443_v36, 16  ;;  %v10130_v0 = vsel %vm17551_vm8, %v14880_v34, %v10129_v31  ;;  %v10012_v60 = vld [vmem:[#allocation3 + $0x68] sm:$0x1] }
 0x4c9   : > { %12536 = vmatprep.mubr.bf16.mxu1 %v14927_v5  ;;  %12368 = vmatmul.mubr.bf16.gmra.mrb[96].mxu0 %v14862_v18  ;;  %v14928_v21 = vcombine.low %v10627_v46, %v10637_v29  ;;  %v9653_v57 = vrot.slane %v9652_v15, 4  ;;  %v10131_v35 = vrot.slane %v10129_v31, 4  ;;  %v10642_v39 = vshll.u32 %v10443_v36, 16  ;;  %v10011_v18 = vld [vmem:[#allocation3 + $0x64] sm:$0xf] }
 0x4ca   : > { %12375 = vmatprep.mubr.bf16.mxu0 %v14895_v54  ;;  %v9663_v14 = vrot.slane %v9662_v7, 4  ;;  %v10641_v27 = vrot.slane %v10639_v47, 4  ;;  %v10648_v11 = vshll.u32 %v10444_v55, 16  ;;  %v10652_v5 = vshrl.u32 %v10444_v55, 16  ;;  %v9497_v54 = vld [vmem:[#allocation3 + $0x5c] sm:$0x1] }
 0x4cb   : > { %v9658_v25 = vsel %vm20119_vm11, %v9653_v57, %v9657_v44  ;;  %v10133_v59 = vsel %vm17551_vm8, %v10131_v35, %v10132_v56  ;;  %v10658_v8 = vshll.u32 %v10445_v13, 16  ;;  %v10644_v26 = vrot.slane %v10642_v39, 5  ;;  %v10447_v31 = vld [vmem:[#allocation3 + $0x7c] sm:$0xf]  ;;  %v10448_v13 = vld [vmem:[#allocation3 + $0x80] sm:$0x1] }
 0x4cc   : > { %v9668_v49 = vsel %vm20119_vm11, %v9663_v14, %v9667_v38  ;;  %v14896_v30 = vcombine.low %v10130_v0, %v10133_v59  ;;  %v10650_v19 = vrot.slane %v10648_v11, 5  ;;  %v10654_v62 = vrot.slane %v10652_v5, 4  ;;  %v17172_v59 = vld [vmem:[#allocation3 + $0x60] sm:$0xff]  }
 0x4cd   : > { %v14863_v3 = vcombine.low %v9658_v25, %v9668_v49  ;;  %v10660_v33 = vrot.slane %v10658_v8, 5  ;;  %v9670_v32 = vshrl.u32 %v9495_v4, 16  ;;  %v10645_v37 = vor.u32 %v10644_v26, %v10641_v27  ;;  %v9499_v25 = vld [vmem:[#allocation3 + $0x64] sm:$0xf] }
 0x4ce   : > { %v9673_v22 = vshll.u32 %v9495_v4, 16  ;;  %v9679_v24 = vshll.u32 %v9496_v10, 16  ;;  %v9683_v23 = vshrl.u32 %v9496_v10, 16  ;;  %v10655_v28 = vor.u32 %v10654_v62, %v10650_v19  ;;  %v9498_v4 = vld [vmem:[#allocation3 + $0x60] sm:$0xf] }
 0x4cf   : > { %v9672_v51 = vrot.slane %v9670_v32, 4  ;;  %v9689_v9 = vshll.u32 %v9497_v54, 16  ;;  %v14881_v16 = vrot.slane %v10010_v41, 9  ;;  %v10646_v63 = vrot.slane %v10645_v37, 4  ;;  %v10014_v62 = vld [vmem:[#allocation3 + $0x70] sm:$0xf] }
 0x4d0   : > { %12537 = vmatmul.mubr.bf16.gmra.mrb[132].mxu1 %v17171_v12  ;;  %v9675_v61 = vrot.slane %v9673_v22, 5  ;;  %v9681_v36 = vrot.slane %v9679_v24, 5  ;;  %v9685_v40 = vrot.slane %v9683_v23, 4  ;;  %v10656_v53 = vrot.slane %v10655_v28, 4  ;;  %v10015_v37 = vld [vmem:[#allocation3 + $0x74] sm:$0x1] }
 0x4d1   : > { %12544 = vmatprep.mubr.bf16.mxu1 %v14928_v21  ;;  %12376 = vmatmul.mubr.bf16.gmra.mrb[100].mxu0 %v14863_v3  ;;  %v9691_v44 = vrot.slane %v9689_v9, 5  ;;  %v10136_v6 = vrot.slane %v10011_v18, 5  ;;  %v10139_v34 = vrot.slane %v10012_v60, 5  ;;  %v10651_v46 = vsel %vm20119_vm11, %v10646_v63, %v10650_v19  ;;  %v10013_v3 = vld [vmem:[#allocation3 + $0x6c] sm:$0xe] }
 0x4d2   : > { %12383 = vmatprep.mubr.bf16.mxu0 %v14896_v30  ;;  %v9676_v15 = vor.u32 %v9675_v61, %v9672_v51  ;;  %v9686_v38 = vor.u32 %v9685_v40, %v9681_v36  ;;  %v10663_v55 = vshrl.u32 %v10446_v2, 16  ;;  %v10661_v29 = vsel %vm20119_vm11, %v10656_v53, %v10660_v33  ;;  %v9500_v30 = vld [vmem:[#allocation3 + $0x68] sm:$0x1]  ;;  %v10449_v28 = vld [vmem:[#allocation3 + $0x84] sm:$0xf] }
 0x4d3   : > { %v10137_v7 = vsel %vm17551_vm8, %v14881_v16, %v10136_v6  ;;  %v10138_v56 = vrot.slane %v10136_v6, 4  ;;  %v10666_v47 = vshll.u32 %v10446_v2, 16  ;;  %v14929_v21 = vcombine.low %v10651_v46, %v10661_v29  ;;  %v10450_v63 = vld [vmem:[#allocation3 + $0x88] sm:$0xf] }
 0x4d4   : > { %v9677_v57 = vrot.slane %v9676_v15, 4  ;;  %v9687_v0 = vrot.slane %v9686_v38, 4  ;;  %v10665_v35 = vrot.slane %v10663_v55, 4  ;;  %v10672_v39 = vshll.u32 %v10447_v31, 16 }
 0x4d5   : > { %v10140_v14 = vsel %vm17551_vm8, %v10138_v56, %v10139_v34  ;;  %v10668_v27 = vrot.slane %v10666_v47, 5  ;;  %v10676_v11 = vshrl.u32 %v10447_v31, 16  ;;  %v10682_v49 = vshll.u32 %v10448_v13, 16  ;;  %v10451_v31 = vld [vmem:[#allocation3 + $0x8c] sm:$0x1] }
 0x4d6   : > { %v9682_v5 = vsel %vm20119_vm11, %v9677_v57, %v9681_v36  ;;  %v9692_v8 = vsel %vm20119_vm11, %v9687_v0, %v9691_v44  ;;  %v14897_v10 = vcombine.low %v10137_v7, %v10140_v14  ;;  %v10674_v54 = vrot.slane %v10672_v39, 5  ;;  %v17174_v7 = vld [vmem:[#allocation3 + $0x6c] sm:$0xff]  }
 0x4d7   : > { %v14864_v26 = vcombine.low %v9682_v5, %v9692_v8  ;;  %v10669_v19 = vor.u32 %v10668_v27, %v10665_v35  ;;  %v10678_v41 = vrot.slane %v10676_v11, 4  ;;  %v10684_v33 = vrot.slane %v10682_v49, 5  ;;  %v9501_v57 = vld [vmem:[#allocation3 + $0x6c] sm:$0xf]  ;;  %v9503_v49 = vld [vmem:[#allocation3 + $0x74] sm:$0x1] }
 0x4d8   : > { %12545 = vmatmul.mubr.bf16.gmra.mrb[136].mxu1 %v17172_v59  ;;  %v9694_v32 = vshrl.u32 %v9498_v4, 16  ;;  %v9697_v18 = vshll.u32 %v9498_v4, 16  ;;  %v9703_v12 = vshll.u32 %v9499_v25, 16  ;;  %v9707_v23 = vshrl.u32 %v9499_v25, 16  ;;  %v9502_v59 = vld [vmem:[#allocation3 + $0x70] sm:$0xf] }
 0x4d9   : > { %12552 = vmatprep.mubr.bf16.mxu1 %v14929_v21  ;;  %12384 = vmatmul.mubr.bf16.gmra.mrb[104].mxu0 %v14864_v26  ;;  %v10670_v22 = vrot.slane %v10669_v19, 4  ;;  %v10679_v24 = vor.u32 %v10678_v41, %v10674_v54  ;;  %v9713_v60 = vshll.u32 %v9500_v30, 16  ;;  %v14882_v2 = vrot.slane %v10013_v3, 9  ;;  %v10016_v26 = vld [vmem:[#allocation3 + $0x78] sm:$0xe] }
 0x4da   : > { %12391 = vmatprep.mubr.bf16.mxu0 %v14897_v10  ;;  %v9696_v51 = vrot.slane %v9694_v32, 4  ;;  %v9699_v9 = vrot.slane %v9697_v18, 5  ;;  %v9705_v16 = vrot.slane %v9703_v12, 5  ;;  %v9709_v40 = vrot.slane %v9707_v23, 4 }
 0x4db   : > { %v10675_v61 = vsel %vm20119_vm11, %v10670_v22, %v10674_v54  ;;  %v10680_v36 = vrot.slane %v10679_v24, 4  ;;  %v9715_v53 = vrot.slane %v9713_v60, 5  ;;  %v10143_v6 = vrot.slane %v10014_v62, 5  ;;  %v10017_v62 = vld [vmem:[#allocation3 + $0x7c] sm:$0xf] }
 0x4dc   : > { %v9700_v44 = vor.u32 %v9699_v9, %v9696_v51  ;;  %v10146_v34 = vrot.slane %v10015_v37, 5  ;;  %v10687_v46 = vshrl.u32 %v10449_v28, 16  ;;  %v9710_v38 = vor.u32 %v9709_v40, %v9705_v16  ;;  %v10018_v37 = vld [vmem:[#allocation3 + $0x80] sm:$0x1] }
 0x4dd   : > { %v10685_v15 = vsel %vm20119_vm11, %v10680_v36, %v10684_v33  ;;  %v10690_v55 = vshll.u32 %v10449_v28, 16  ;;  %v10696_v29 = vshll.u32 %v10450_v63, 16  ;;  %v10144_v47 = vsel %vm17551_vm8, %v14882_v2, %v10143_v6  ;;  %v10452_v28 = vld [vmem:[#allocation3 + $0x90] sm:$0xf] }
 0x4de   : > { %v14930_v56 = vcombine.low %v10675_v61, %v10685_v15  ;;  %v9701_v13 = vrot.slane %v9700_v44, 4  ;;  %v10145_v21 = vrot.slane %v10143_v6, 4  ;;  %v9711_v0 = vrot.slane %v9710_v38, 4  ;;  %v17175_v61 = vld [vmem:[#allocation3 + $0x78] sm:$0xff]  }
 0x4df   : > { %v10689_v35 = vrot.slane %v10687_v46, 4  ;;  %v10692_v4 = vrot.slane %v10690_v55, 5  ;;  %v10698_v14 = vrot.slane %v10696_v29, 5  ;;  %v10700_v11 = vshrl.u32 %v10450_v63, 16  ;;  %v10453_v63 = vld [vmem:[#allocation3 + $0x94] sm:$0xf] }
 0x4e0   : > { %12553 = vmatmul.mubr.bf16.gmra.mrb[140].mxu1 %v17174_v7  ;;  %v9706_v27 = vsel %vm20119_vm11, %v9701_v13, %v9705_v16  ;;  %v10147_v39 = vsel %vm17551_vm8, %v10145_v21, %v10146_v34  ;;  %v10706_v25 = vshll.u32 %v10451_v31, 16  ;;  %v9716_v5 = vsel %vm20119_vm11, %v9711_v0, %v9715_v53  ;;  %v10454_v15 = vld [vmem:[#allocation3 + $0x98] sm:$0x1] }
 0x4e1   : > { %12560 = vmatprep.mubr.bf16.mxu1 %v14930_v56  ;;  %v14898_v8 = vcombine.low %v10144_v47, %v10147_v39  ;;  %v10693_v10 = vor.u32 %v10692_v4, %v10689_v35  ;;  %v9718_v30 = vshrl.u32 %v9501_v57, 16  ;;  %v14865_v19 = vcombine.low %v9706_v27, %v9716_v5  ;;  %v9504_v13 = vld [vmem:[#allocation3 + $0x78] sm:$0xf]  ;;  %v9505_v4 = vld [vmem:[#allocation3 + $0x7c] sm:$0xf] }
 0x4e2   : > { %v10702_v54 = vrot.slane %v10700_v11, 4  ;;  %v10708_v41 = vrot.slane %v10706_v25, 5  ;;  %v9721_v3 = vshll.u32 %v9501_v57, 16  ;;  %v9727_v18 = vshll.u32 %v9502_v59, 16 }
 0x4e3   : > { %v10694_v33 = vrot.slane %v10693_v10, 4  ;;  %v9720_v32 = vrot.slane %v9718_v30, 4  ;;  %v9731_v12 = vshrl.u32 %v9502_v59, 16  ;;  %12392 = vmatmul.mubr.bf16.gmra.mrb[108].mxu0 %v14865_v19  ;;  %v9737_v23 = vshll.u32 %v9503_v49, 16  ;;  %v9506_v49 = vld [vmem:[#allocation3 + $0x80] sm:$0x1] }
 0x4e4   : > { %v10703_v22 = vor.u32 %v10702_v54, %v10698_v14  ;;  %v9723_v24 = vrot.slane %v9721_v3, 5  ;;  %v14883_v60 = vrot.slane %v10016_v26, 9  ;;  %12399 = vmatprep.mubr.bf16.mxu0 %v14898_v8  ;;  %v9729_v9 = vrot.slane %v9727_v18, 5  ;;  %v17177_v19 = vld [vmem:[#allocation3 + $0x84] sm:$0xff]  }
 0x4e5   : > { %v10699_v51 = vsel %vm20119_vm11, %v10694_v33, %v10698_v14  ;;  %v9733_v16 = vrot.slane %v9731_v12, 4  ;;  %v10150_v2 = vrot.slane %v10017_v62, 5  ;;  %v9739_v53 = vrot.slane %v9737_v23, 5  ;;  %v21035_v31 = vpop.f32.mrb[52].mxu1  ;;  %v10019_v62 = vld [vmem:[#allocation3 + $0x84] sm:$0xe] }
 0x4e6   : > { %v10704_v36 = vrot.slane %v10703_v22, 4  ;;  %v9724_v40 = vor.u32 %v9723_v24, %v9720_v32  ;;  %v10153_v44 = vrot.slane %v10018_v37, 5  ;;  %v10711_v38 = vshrl.u32 %v10452_v28, 16  ;;  %v21039_v47 = vpop.f32.mrb[53].mxu1  ;;  %v10020_v33 = vld [vmem:[#allocation3 + $0x88] sm:$0xf] }
 0x4e7   : > { %v9734_v6 = vor.u32 %v9733_v16, %v9729_v9  ;;  %v10151_v34 = vsel %vm17551_vm8, %v14883_v60, %v10150_v2  ;;  %v10152_v46 = vrot.slane %v10150_v2, 4  ;;  %v10714_v7 = vshll.u32 %v10452_v28, 16  ;;  %v21043_v14 = vpop.f32.mrb[54].mxu1  ;;  %v10021_v22 = vld [vmem:[#allocation3 + $0x8c] sm:$0x1] }
 0x4e8   : > { %12561 = vmatmul.mubr.bf16.gmra.mrb[144].mxu1 %v17175_v61  ;;  %v10709_v55 = vsel %vm20119_vm11, %v10704_v36, %v10708_v41  ;;  %v9725_v29 = vrot.slane %v9724_v40, 4  ;;  %v10720_v56 = vshll.u32 %v10453_v63, 16  ;;  %v10713_v35 = vrot.slane %v10711_v38, 4  ;;  %v21047_v59 = vpop.f32.mrb[55].mxu1  ;;  %v10456_v61 = vld [vmem:[#allocation3 + $0xa0] sm:$0xf] }
 0x4e9   : > { %v14931_v21 = vcombine.low %v10699_v51, %v10709_v55  ;;  %v9735_v57 = vrot.slane %v9734_v6, 4  ;;  %v10154_v0 = vsel %vm17551_vm8, %v10152_v46, %v10153_v44  ;;  %v10716_v11 = vrot.slane %v10714_v7, 5  ;;  %v10455_v51 = vld [vmem:[#allocation3 + $0x9c] sm:$0xf] }
 0x4ea   : > { %v9730_v27 = vsel %vm20119_vm11, %v9725_v29, %v9729_v9  ;;  %v14899_v39 = vcombine.low %v10151_v34, %v10154_v0  ;;  %v10722_v25 = vrot.slane %v10720_v56, 5  ;;  %v10724_v8 = vshrl.u32 %v10453_v63, 16 }
 0x4eb   : > { %12568 = vmatprep.mubr.bf16.mxu1 %v14931_v21  ;;  %v9740_v5 = vsel %vm20119_vm11, %v9735_v57, %v9739_v53  ;;  %v10730_v10 = vshll.u32 %v10454_v15, 16  ;;  %v9742_v30 = vshrl.u32 %v9504_v13, 16  ;;  %v10717_v54 = vor.u32 %v10716_v11, %v10713_v35  ;;  %v10457_v57 = vld [vmem:[#allocation3 + $0xa4] sm:$0x1] }
 0x4ec   : > { %v14866_v26 = vcombine.low %v9730_v27, %v9740_v5  ;;  %v9745_v41 = vshll.u32 %v9504_v13, 16  ;;  %v9751_v3 = vshll.u32 %v9505_v4, 16  ;;  %v10726_v32 = vrot.slane %v10724_v8, 4  ;;  %v9507_v35 = vld [vmem:[#allocation3 + $0x84] sm:$0xf] }
 0x4ed   : > { %v10732_v18 = vrot.slane %v10730_v10, 5  ;;  %v9744_v12 = vrot.slane %v9742_v30, 4  ;;  %v9755_v37 = vshrl.u32 %v9505_v4, 16  ;;  %v10718_v24 = vrot.slane %v10717_v54, 4  ;;  %v9509_v5 = vld [vmem:[#allocation3 + $0x8c] sm:$0x1] }
 0x4ee   : > { %12400 = vmatmul.mubr.bf16.gmra.mrb[112].mxu0 %v14866_v26  ;;  %v9747_v23 = vrot.slane %v9745_v41, 5  ;;  %v9753_v60 = vrot.slane %v9751_v3, 5  ;;  %v9761_v28 = vshll.u32 %v9506_v49, 16  ;;  %v10727_v9 = vor.u32 %v10726_v32, %v10722_v25  ;;  %v17178_v10 = vld [vmem:[#allocation3 + $0x90] sm:$0xff]  }
 0x4ef   : > { %12407 = vmatprep.mubr.bf16.mxu0 %v14899_v39  ;;  %v9757_v16 = vrot.slane %v9755_v37, 4  ;;  %v14884_v2 = vrot.slane %v10019_v62, 9  ;;  %v10157_v63 = vrot.slane %v10020_v33, 5  ;;  %v10723_v36 = vsel %vm20119_vm11, %v10718_v24, %v10722_v25  ;;  %v9508_v25 = vld [vmem:[#allocation3 + $0x88] sm:$0xf] }
 0x4f0   : > { %12569 = vmatmul.mubr.bf16.gmra.mrb[148].mxu1 %v17177_v19  ;;  %v9748_v40 = vor.u32 %v9747_v23, %v9744_v12  ;;  %v9763_v53 = vrot.slane %v9761_v28, 5  ;;  %v10160_v44 = vrot.slane %v10021_v22, 5  ;;  %v10728_v6 = vrot.slane %v10727_v9, 4  ;;  %v10022_v19 = vld [vmem:[#allocation3 + $0x90] sm:$0xe] }
 0x4f1   : > { %v9758_v34 = vor.u32 %v9757_v16, %v9753_v60  ;;  %v10158_v46 = vsel %vm17551_vm8, %v14884_v2, %v10157_v63  ;;  %v10159_v15 = vrot.slane %v10157_v63, 4  ;;  %v10735_v55 = vshrl.u32 %v10455_v51, 16  ;;  %v10023_v33 = vld [vmem:[#allocation3 + $0x94] sm:$0xf]  ;;  %v10024_v24 = vld [vmem:[#allocation3 + $0x98] sm:$0x1] }
 0x4f2   : > { %v9749_v38 = vrot.slane %v9748_v40, 4  ;;  %v10738_v29 = vshll.u32 %v10455_v51, 16  ;;  %v10744_v7 = vshll.u32 %v10456_v61, 16  ;;  %v10733_v56 = vsel %vm20119_vm11, %v10728_v6, %v10732_v18 }
 0x4f3   : > { %v9759_v13 = vrot.slane %v9758_v34, 4  ;;  %v10161_v21 = vsel %vm17551_vm8, %v10159_v15, %v10160_v44  ;;  %v10748_v0 = vshrl.u32 %v10456_v61, 16  ;;  %v14932_v4 = vcombine.low %v10723_v36, %v10733_v56 }
 0x4f4   : > { %v9754_v27 = vsel %vm20119_vm11, %v9749_v38, %v9753_v60  ;;  %v14900_v39 = vcombine.low %v10158_v46, %v10161_v21  ;;  %v10737_v11 = vrot.slane %v10735_v55, 4  ;;  %v10740_v49 = vrot.slane %v10738_v29, 5  ;;  %v21063_v32 = vpop.f32.mrb[20].mxu0  ;;  %v10458_v29 = vld [vmem:[#allocation3 + $0xa8] sm:$0xf] }
 0x4f5   : > { %v9764_v8 = vsel %vm20119_vm11, %v9759_v13, %v9763_v53  ;;  %v10746_v30 = vrot.slane %v10744_v7, 5  ;;  %v10750_v26 = vrot.slane %v10748_v0, 4  ;;  %12576 = vmatprep.mubr.bf16.mxu1 %v14932_v4  ;;  %v10754_v41 = vshll.u32 %v10457_v57, 16  ;;  %v21065_v23 = vpop.f32.mrb[21].mxu0  ;;  %v21082_v0 = vld [vmem:[%s22117_s8] ss:$0 sm:$0xff] }
 0x4f6   : > { %v14867_v54 = vcombine.low %v9754_v27, %v9764_v8  ;;  %v9766_v3 = vshrl.u32 %v9507_v35, 16  ;;  %v9769_v62 = vshll.u32 %v9507_v35, 16  ;;  %v10741_v18 = vor.u32 %v10740_v49, %v10737_v11  ;;  %v21067_v16 = vpop.f32.mrb[22].mxu0  ;;  %v17180_v49 = vld [vmem:[#allocation3 + $0x9c] sm:$0xff]  }
 0x4f7   : > { %v10751_v12 = vor.u32 %v10750_v26, %v10746_v30  ;;  %v9775_v37 = vshll.u32 %v9508_v25, 16  ;;  %v9779_v22 = vshrl.u32 %v9508_v25, 16  ;;  %v10756_v60 = vrot.slane %v10754_v41, 5  ;;  %v21069_v40 = vpop.f32.mrb[23].mxu0  ;;  %v10459_v25 = vld [vmem:[#allocation3 + $0xac] sm:$0xf] }
 0x4f8   : > { %12408 = vmatmul.mubr.bf16.gmra.mrb[116].mxu0 %v14867_v54  ;;  %12577 = vmatmul.mubr.bf16.gmra.mrb[152].mxu1 %v17178_v10  ;;  %v9768_v28 = vrot.slane %v9766_v3, 4  ;;  %v9771_v51 = vrot.slane %v9769_v62, 5  ;;  %v9785_v9 = vshll.u32 %v9509_v5, 16  ;;  %v10742_v2 = vrot.slane %v10741_v18, 4  ;;  %v9510_v54 = vld [vmem:[#allocation3 + $0x90] sm:$0xf] }
 0x4f9   : > { %12415 = vmatprep.mubr.bf16.mxu0 %v14900_v39  ;;  %v10752_v63 = vrot.slane %v10751_v12, 4  ;;  %v9777_v61 = vrot.slane %v9775_v37, 5  ;;  %v9781_v36 = vrot.slane %v9779_v22, 4  ;;  %v14885_v6 = vrot.slane %v10022_v19, 9 }
 0x4fa   : > { %v9772_v53 = vor.u32 %v9771_v51, %v9768_v28  ;;  %v9787_v44 = vrot.slane %v9785_v9, 5  ;;  %v10164_v34 = vrot.slane %v10023_v33, 5  ;;  %v10747_v46 = vsel %vm20119_vm11, %v10742_v2, %v10746_v30  ;;  %v21075_v7 = vpop.f32.mrb[56].mxu1  ;;  %v9511_v33 = vld [vmem:[#allocation3 + $0x94] sm:$0xf] }
 0x4fb   : > { %v10757_v15 = vsel %vm20119_vm11, %v10752_v63, %v10756_v60  ;;  %v9782_v38 = vor.u32 %v9781_v36, %v9777_v61  ;;  %v10167_v55 = vrot.slane %v10024_v24, 5  ;;  %v21084_v35 = vpop.f32.mrb[57].mxu1  ;;  %v16059_v27 = vadd.f32 %v20783_v58, %v20771_v43  ;;  %v10460_v58 = vld [vmem:[#allocation3 + $0xb0] sm:$0x1]  ;;  %v9512_v60 = vld [vmem:[#allocation3 + $0x98] sm:$0x1] }
 0x4fc   : > { %v14933_v56 = vcombine.low %v10747_v46, %v10757_v15  ;;  %v9773_v13 = vrot.slane %v9772_v53, 4  ;;  %v10165_v21 = vsel %vm17551_vm8, %v14885_v6, %v10164_v34  ;;  %v10166_v57 = vrot.slane %v10164_v34, 4  ;;  %v21092_v5 = vpop.f32.mrb[58].mxu1  ;;  %v10026_v6 = vld [vmem:[#allocation3 + $0xa0] sm:$0xf] }
 0x4fd   : > { %v9783_v4 = vrot.slane %v9782_v38, 4  ;;  %v16062_v39 = vadd.f32 %v20794_v42, %v20785_v48  ;;  %v16171_v11 = vadd.f32 %v20975_v20, %v20967_v45  ;;  %v16174_v43 = vadd.f32 %v20984_v50, %v20977_v1  ;;  %v21100_v48 = vpop.f32.mrb[24].mxu0  ;;  %v21102_v42 = vpop.f32.mrb[59].mxu1 }
 0x4fe   : > { %12584 = vmatprep.mubr.bf16.mxu1 %v14933_v56  ;;  %v9778_v8 = vsel %vm20119_vm11, %v9773_v13, %v9777_v61  ;;  %v10168_v10 = vsel %vm17551_vm8, %v10166_v57, %v10167_v55  ;;  %v10759_v30 = vshrl.u32 %v10458_v29, 16  ;;  %v12016_v26 = vadd.f32 %v16059_v27, %v21082_v0  ;;  %v21108_v41 = vpop.f32.mrb[25].mxu0  ;;  %v10027_v55 = vld [vmem:[#allocation3 + $0xa4] sm:$0x1]  ;;  %v10025_v57 = vld [vmem:[#allocation3 + $0x9c] sm:$0xe] }
 0x4ff   : > { %v9788_v45 = vsel %vm20119_vm11, %v9783_v4, %v9787_v44  ;;  %v14901_v20 = vcombine.low %v10165_v21, %v10168_v10  ;;  %v12019_v19 = vadd.f32 %v16062_v39, %v21082_v0  ;;  %v10762_v50 = vshll.u32 %v10458_v29, 16  ;;  %v21110_v18 = vpop.f32.mrb[26].mxu0 }
 0x500   : > { %v14868_v3 = vcombine.low %v9778_v8, %v9788_v45  ;;  %12585 = vmatmul.mubr.bf16.gmra.mrb[156].mxu1 %v17180_v49  ;;  %v10761_v1 = vrot.slane %v10759_v30, 4  ;;  %v10768_v62 = vshll.u32 %v10459_v25, 16  ;;  %v21112_v12 = vadd.f32 %v16171_v11, %v12016_v26  ;;  %v21116_v28 = vpop.f32.mrb[27].mxu0 }
 0x501   : > { %v21114_v37 = vadd.f32 %v16174_v43, %v12019_v19  ;;  %v10772_v22 = vshrl.u32 %v10459_v25, 16  ;;  %v10778_v24 = vshll.u32 %v10460_v58, 16  ;;  %v10764_v51 = vrot.slane %v10762_v50, 5  ;;  %v9513_v50 = vld [vmem:[#allocation3 + $0x9c] sm:$0xf] }
 0x502   : > { %22178 = vst [vmem:[#allocation6_spill] sm:$0xff] %v21112_v12  ;;  %12416 = vmatmul.mubr.bf16.gmra.mrb[120].mxu0 %v14868_v3  ;;  %v10770_v9 = vrot.slane %v10768_v62, 5  ;;  %v9790_v2 = vshrl.u32 %v9510_v54, 16  ;;  %v9793_v63 = vshll.u32 %v9510_v54, 16  ;;  %v9799_v53 = vshll.u32 %v9511_v33, 16 }
 0x503   : > { %22179 = vst [vmem:[#allocation7_spill] sm:$0xff] %v21114_v37  ;;  %12423 = vmatprep.mubr.bf16.mxu0 %v14901_v20  ;;  %v10774_v61 = vrot.slane %v10772_v22, 4  ;;  %v10780_v36 = vrot.slane %v10778_v24, 5  ;;  %v9803_v44 = vshrl.u32 %v9511_v33, 16  ;;  %v10765_v34 = vor.u32 %v10764_v51, %v10761_v1  ;;  %v10463_v54 = vld [vmem:[#allocation3 + $0xbc] sm:$0x1] }
 0x504   : > { %v9792_v46 = vrot.slane %v9790_v2, 4  ;;  %v9795_v15 = vrot.slane %v9793_v63, 5  ;;  %v9809_v38 = vshll.u32 %v9512_v60, 16  ;;  %v9801_v56 = vrot.slane %v9799_v53, 5  ;;  %v17187_v22 = vld [vmem:[%s22118_s9] sm:$0xff]  }
 0x505   : > { %v10775_v29 = vor.u32 %v10774_v61, %v10770_v9  ;;  %v9805_v13 = vrot.slane %v9803_v44, 4  ;;  %v21120_v21 = vadd.f32 %v21039_v47, %v21035_v31  ;;  %v10766_v4 = vrot.slane %v10765_v34, 4  ;;  %v10461_v31 = vld [vmem:[#allocation3 + $0xb4] sm:$0xf]  ;;  %v10462_v47 = vld [vmem:[#allocation3 + $0xb8] sm:$0xf]  ;;  %16705 = vmatprep.subr.bf16.mxu1 %v17187_v22 }
 0x506   : > { %v9796_v27 = vor.u32 %v9795_v15, %v9792_v46  ;;  %v9811_v39 = vrot.slane %v9809_v38, 5  ;;  %v10171_v8 = vrot.slane %v10026_v6, 5  ;;  %v10174_v10 = vrot.slane %v10027_v55, 5  ;;  %v9514_v2 = vld [vmem:[#allocation3 + $0xa0] sm:$0xf]  ;;  %16706 = vmatpush3.bf16.msra.mxu1 %v17187_v22 }
 0x507   : > { %v10776_v11 = vrot.slane %v10775_v29, 4  ;;  %v9806_v25 = vor.u32 %v9805_v13, %v9801_v56  ;;  %v14886_v43 = vrot.slane %v10025_v57, 9  ;;  %v21124_v58 = vadd.f32 %v21047_v59, %v21043_v14  ;;  %v9515_v53 = vld [vmem:[#allocation3 + $0xa4] sm:$0x1] }
 0x508   : > { %v9797_v49 = vrot.slane %v9796_v27, 4  ;;  %v21128_v30 = vadd.f32 %v21065_v23, %v21063_v32  ;;  %v10771_v45 = vsel %vm20119_vm11, %v10766_v4, %v10770_v9  ;;  %v10173_v19 = vrot.slane %v10171_v8, 4  ;;  %v21134_v3 = vpop.f32.mrb[28].mxu0  ;;  %v17181_v32 = vld [vmem:[#allocation3 + $0xa8] sm:$0xff]  }
 0x509   : > { %v10781_v20 = vsel %vm20119_vm11, %v10776_v11, %v10780_v36  ;;  %v9807_v26 = vrot.slane %v9806_v25, 4  ;;  %v10172_v59 = vsel %vm17551_vm8, %v14886_v43, %v10171_v8  ;;  %v21142_v23 = vadd.f32 %v21069_v40, %v21067_v16  ;;  %v21144_v62 = vpop.f32.mrb[60].mxu1  ;;  %v21146_v33 = vpop.f32.mrb[29].mxu0  ;;  %v10028_v4 = vld [vmem:[#allocation3 + $0xa8] sm:$0xe] }
 0x50a   : > { %v14934_v1 = vcombine.low %v10771_v45, %v10781_v20  ;;  %v9802_v14 = vsel %vm20119_vm11, %v9797_v49, %v9801_v56  ;;  %v10175_v60 = vsel %vm17551_vm8, %v10173_v19, %v10174_v10  ;;  %v10783_v51 = vshrl.u32 %v10461_v31, 16  ;;  %v21155_v16 = vpop.f32.mrb[61].mxu1  ;;  %v21157_v40 = vpop.f32.mrb[30].mxu0  ;;  %v10029_v8 = vld [vmem:[#allocation3 + $0xac] sm:$0xf] }
 0x50b   : > { %v9812_v24 = vsel %vm20119_vm11, %v9807_v26, %v9811_v39  ;;  %v10786_v9 = vshll.u32 %v10461_v31, 16  ;;  %v14902_v61 = vcombine.low %v10172_v59, %v10175_v60  ;;  %v10792_v36 = vshll.u32 %v10462_v47, 16  ;;  %v21159_v44 = vpop.f32.mrb[62].mxu1  ;;  %v21161_v6 = vpop.f32.mrb[31].mxu0 }
 0x50c   : > { %12592 = vmatprep.mubr.bf16.mxu1 %v14934_v1  ;;  %v14869_v63 = vcombine.low %v9802_v14, %v9812_v24  ;;  %v10785_v34 = vrot.slane %v10783_v51, 4  ;;  %v10796_v15 = vshrl.u32 %v10462_v47, 16  ;;  %v10802_v38 = vshll.u32 %v10463_v54, 16  ;;  %v21163_v55 = vpop.f32.mrb[63].mxu1  ;;  %v10030_v47 = vld [vmem:[#allocation3 + $0xb0] sm:$0x1] }
 0x50d   : > { %12593 = vmatmul.mubr.bf16.gmra.mrb[160].mxu1 %v17181_v32  ;;  %v10788_v46 = vrot.slane %v10786_v9, 5  ;;  %v10794_v29 = vrot.slane %v10792_v36, 5  ;;  %v9814_v56 = vshrl.u32 %v9513_v50, 16  ;;  %v9817_v13 = vshll.u32 %v9513_v50, 16  ;;  %v10464_v24 = vld [vmem:[#allocation3 + $0xc0] sm:$0xf] }
 0x50e   : > { %12424 = vmatmul.mubr.bf16.gmra.mrb[124].mxu0 %v14869_v63  ;;  %v9823_v57 = vshll.u32 %v9514_v2, 16  ;;  %v10798_v39 = vrot.slane %v10796_v15, 4  ;;  %v10804_v11 = vrot.slane %v10802_v38, 5  ;;  %v9827_v25 = vshrl.u32 %v9514_v2, 16  ;;  %v10465_v36 = vld [vmem:[#allocation3 + $0xc4] sm:$0xf] }
 0x50f   : > { %12431 = vmatprep.mubr.bf16.mxu0 %v14902_v61  ;;  %v10789_v27 = vor.u32 %v10788_v46, %v10785_v34  ;;  %v9816_v10 = vrot.slane %v9814_v56, 4  ;;  %v9819_v49 = vrot.slane %v9817_v13, 5  ;;  %v9833_v31 = vshll.u32 %v9515_v53, 16  ;;  %v9516_v15 = vld [vmem:[#allocation3 + $0xa8] sm:$0xf] }
 0x510   : > { %v9825_v43 = vrot.slane %v9823_v57, 5  ;;  %v10799_v20 = vor.u32 %v10798_v39, %v10794_v29  ;;  %v9829_v26 = vrot.slane %v9827_v25, 4  ;;  %v21167_v19 = vadd.f32 %v21084_v35, %v21075_v7  ;;  %v10031_v39 = vld [vmem:[#allocation3 + $0xb4] sm:$0xe] }
 0x511   : > { %v10790_v45 = vrot.slane %v10789_v27, 4  ;;  %v9820_v54 = vor.u32 %v9819_v49, %v9816_v10  ;;  %v9835_v1 = vrot.slane %v9833_v31, 5  ;;  %v10178_v14 = vrot.slane %v10029_v8, 5 }
 0x512   : > { %v10800_v59 = vrot.slane %v10799_v20, 4  ;;  %v9830_v32 = vor.u32 %v9829_v26, %v9825_v43  ;;  %v14887_v50 = vrot.slane %v10028_v4, 9  ;;  %v10181_v22 = vrot.slane %v10030_v47, 5 }
 0x513   : > { %v10795_v60 = vsel %vm20119_vm11, %v10790_v45, %v10794_v29  ;;  %v9821_v51 = vrot.slane %v9820_v54, 4  ;;  %v10180_v9 = vrot.slane %v10178_v14, 4  ;;  %v21173_v2 = vadd.f32 %v21102_v42, %v21092_v5  ;;  %v10466_v42 = vld [vmem:[#allocation3 + $0xc8] sm:$0x1]  ;;  %v9518_v29 = vld [vmem:[#allocation3 + $0xb0] sm:$0x1] }
 0x514   : > { %v10805_v7 = vsel %vm20119_vm11, %v10800_v59, %v10804_v11  ;;  %v9831_v35 = vrot.slane %v9830_v32, 4  ;;  %v21179_v63 = vadd.f32 %v21108_v41, %v21100_v48  ;;  %v21183_v61 = vadd.f32 %v21116_v28, %v21110_v18  ;;  %v17183_v18 = vld [vmem:[#allocation3 + $0xb4] sm:$0xff]   ;;  %v9517_v28 = vld [vmem:[#allocation3 + $0xac] sm:$0xf] }
 0x515   : > { %v14935_v53 = vcombine.low %v10795_v60, %v10805_v7  ;;  %v10179_v34 = vsel %vm17551_vm8, %v14887_v50, %v10178_v14  ;;  %v10182_v5 = vsel %vm17551_vm8, %v10180_v9, %v10181_v22  ;;  %v10807_v46 = vshrl.u32 %v10464_v24, 16  ;;  %v21193_v56 = vpop.f32.mrb[32].mxu0  ;;  %v10033_v7 = vld [vmem:[#allocation3 + $0xbc] sm:$0x1] }
 0x516   : > { %v9826_v38 = vsel %vm20119_vm11, %v9821_v51, %v9825_v43  ;;  %v9836_v48 = vsel %vm20119_vm11, %v9831_v35, %v9835_v1  ;;  %v14903_v41 = vcombine.low %v10179_v34, %v10182_v5  ;;  %v10810_v4 = vshll.u32 %v10464_v24, 16  ;;  %v21195_v11 = vpop.f32.mrb[33].mxu0  ;;  %v10032_v43 = vld [vmem:[#allocation3 + $0xb8] sm:$0xf]  ;;  %v17188_v1 = vld [vmem:[%s22118_s9 + $0x8] sm:$0xff]  }
 0x517   : > { %12600 = vmatprep.mubr.bf16.mxu1 %v14935_v53  ;;  %v14870_v13 = vcombine.low %v9826_v38, %v9836_v48  ;;  %v10809_v57 = vrot.slane %v10807_v46, 4  ;;  %v10816_v27 = vshll.u32 %v10465_v36, 16  ;;  %v10820_v25 = vshrl.u32 %v10465_v36, 16  ;;  %v21197_v31 = vpop.f32.mrb[34].mxu0  ;;  %16707 = vmatprep.subr.bf16.mxu1 %v17188_v1 }
 0x518   : > { %12601 = vmatmul.mubr.bf16.gmra.mrb[164].mxu1 %v17183_v18  ;;  %v10826_v8 = vshll.u32 %v10466_v42, 16  ;;  %v9838_v10 = vshrl.u32 %v9516_v15, 16  ;;  %v9841_v49 = vshll.u32 %v9516_v15, 16  ;;  %v10812_v47 = vrot.slane %v10810_v4, 5  ;;  %v21199_v54 = vpop.f32.mrb[35].mxu0 }
 0x519   : > { %12432 = vmatmul.mubr.bf16.gmra.mrb[128].mxu0 %v14870_v13  ;;  %v10818_v45 = vrot.slane %v10816_v27, 5  ;;  %v9847_v20 = vshll.u32 %v9517_v28, 16  ;;  %v9851_v26 = vshrl.u32 %v9517_v28, 16  ;;  %v10822_v14 = vrot.slane %v10820_v25, 4  ;;  %16708 = vmatpush3.bf16.msra.mxu1 %v17188_v1 }
 0x51a   : > { %12439 = vmatprep.mubr.bf16.mxu0 %v14903_v41  ;;  %v10828_v59 = vrot.slane %v10826_v8, 5  ;;  %v9840_v32 = vrot.slane %v9838_v10, 4  ;;  %v9843_v50 = vrot.slane %v9841_v49, 5  ;;  %v21204_v22 = vpop.f32.mrb[64].mxu1  ;;  %v10813_v24 = vor.u32 %v10812_v47, %v10809_v57  ;;  %v10467_v57 = vld [vmem:[#allocation3 + $0xcc] sm:$0xf] }
 0x51b   : > { %v9849_v60 = vrot.slane %v9847_v20, 5  ;;  %v9853_v51 = vrot.slane %v9851_v26, 4  ;;  %v9857_v9 = vshll.u32 %v9518_v29, 16  ;;  %v21206_v35 = vpop.f32.mrb[65].mxu1  ;;  %v10823_v36 = vor.u32 %v10822_v14, %v10818_v45  ;;  %v10469_v10 = vld [vmem:[#allocation3 + $0xd4] sm:$0x1] }
 0x51c   : > { %v9844_v53 = vor.u32 %v9843_v50, %v9840_v32  ;;  %v21210_v34 = vadd.f32 %v21155_v16, %v21144_v62  ;;  %v14888_v5 = vrot.slane %v10031_v39, 9  ;;  %v21212_v42 = vpop.f32.mrb[66].mxu1  ;;  %v10814_v46 = vrot.slane %v10813_v24, 4  ;;  %v9519_v20 = vld [vmem:[#allocation3 + $0xb4] sm:$0xf] }
 0x51d   : > { %v9854_v15 = vor.u32 %v9853_v51, %v9849_v60  ;;  %v9859_v38 = vrot.slane %v9857_v9, 5  ;;  %v10185_v48 = vrot.slane %v10032_v43, 5  ;;  %v21214_v41 = vpop.f32.mrb[67].mxu1  ;;  %v10824_v18 = vrot.slane %v10823_v36, 4  ;;  %v9520_v26 = vld [vmem:[#allocation3 + $0xb8] sm:$0xf] }
 0x51e   : > { %v9845_v28 = vrot.slane %v9844_v53, 4  ;;  %v10188_v29 = vrot.slane %v10033_v7, 5  ;;  %v21218_v13 = vadd.f32 %v21163_v55, %v21159_v44  ;;  %v10819_v62 = vsel %vm20119_vm11, %v10814_v46, %v10818_v45  ;;  %v10468_v55 = vld [vmem:[#allocation3 + $0xd0] sm:$0xf]  ;;  %v21242_v24 = vld [vmem:[#allocation3 + $0xc4] sm:$0xf] }
 0x51f   : > { %v9855_v16 = vrot.slane %v9854_v15, 4  ;;  %v10186_v4 = vsel %vm17551_vm8, %v14888_v5, %v10185_v48  ;;  %v10187_v27 = vrot.slane %v10185_v48, 4  ;;  %v10829_v39 = vsel %vm20119_vm11, %v10824_v18, %v10828_v59 }
 0x520   : > { %v9850_v25 = vsel %vm20119_vm11, %v9845_v28, %v9849_v60  ;;  %v21230_v8 = vadd.f32 %v21146_v33, %v21134_v3  ;;  %v21234_v44 = vadd.f32 %v21161_v6, %v21157_v40  ;;  %v14936_v49 = vcombine.low %v10819_v62, %v10829_v39  ;;  %v17184_v3 = vld [vmem:[#allocation3 + $0xc0] sm:$0xff]   ;;  %v9521_v33 = vld [vmem:[#allocation3 + $0xbc] sm:$0x1] }
 0x521   : > { %v9860_v43 = vsel %vm20119_vm11, %v9855_v16, %v9859_v38  ;;  %v10189_v47 = vsel %vm17551_vm8, %v10187_v27, %v10188_v29  ;;  %v10831_v45 = vshrl.u32 %v10467_v57, 16  ;;  %v10834_v6 = vshll.u32 %v10467_v57, 16 }
 0x522   : > { %v14871_v1 = vcombine.low %v9850_v25, %v9860_v43  ;;  %v14904_v14 = vcombine.low %v10186_v4, %v10189_v47  ;;  %12608 = vmatprep.mubr.bf16.mxu1 %v14936_v49  ;;  %v10840_v32 = vshll.u32 %v10468_v55, 16  ;;  %v10844_v50 = vshrl.u32 %v10468_v55, 16  ;;  %v10036_v49 = vld [vmem:[#allocation3 + $0xc8] sm:$0x1] }
 0x523   : > { %v21240_v59 = vpop.f32.mrb[68].mxu1  ;;  %v10833_v40 = vrot.slane %v10831_v45, 4  ;;  %12609 = vmatmul.mubr.bf16.gmra.mrb[168].mxu1 %v17184_v3  ;;  %v10850_v9 = vshll.u32 %v10469_v10, 16  ;;  %v9862_v7 = vshrl.u32 %v9519_v20, 16  ;;  %v9865_v36 = vshll.u32 %v9519_v20, 16 }
 0x524   : > { %v21244_v60 = vpop.f32.mrb[69].mxu1  ;;  %v21246_v51 = vpop.f32.mrb[36].mxu0  ;;  %12440 = vmatmul.mubr.bf16.gmra.mrb[132].mxu0 %v14871_v1  ;;  %v9871_v53 = vshll.u32 %v9520_v26, 16  ;;  %v10836_v15 = vrot.slane %v10834_v6, 5  ;;  %v10842_v38 = vrot.slane %v10840_v32, 5  ;;  %v10846_v48 = vrot.slane %v10844_v50, 4 }
 0x525   : > { %v21248_v5 = vpop.f32.mrb[70].mxu1  ;;  %v21250_v46 = vpop.f32.mrb[37].mxu0  ;;  %12447 = vmatprep.mubr.bf16.mxu0 %v14904_v14  ;;  %v9875_v18 = vshrl.u32 %v9520_v26, 16  ;;  %v10852_v57 = vrot.slane %v10850_v9, 5  ;;  %v9864_v62 = vrot.slane %v9862_v7, 4  ;;  %v9867_v16 = vrot.slane %v9865_v36, 5 }
 0x526   : > { %v21252_v28 = vpop.f32.mrb[71].mxu1  ;;  %v21254_v29 = vpop.f32.mrb[38].mxu0  ;;  %v9873_v4 = vrot.slane %v9871_v53, 5  ;;  %v10837_v39 = vor.u32 %v10836_v15, %v10833_v40  ;;  %v10847_v25 = vor.u32 %v10846_v48, %v10842_v38  ;;  %v9881_v10 = vshll.u32 %v9521_v33, 16  ;;  %v10034_v3 = vld [vmem:[#allocation3 + $0xc0] sm:$0xe] }
 0x527   : > { %v21256_v27 = vpop.f32.mrb[39].mxu0  ;;  %v9877_v55 = vrot.slane %v9875_v18, 4  ;;  %v9868_v43 = vor.u32 %v9867_v16, %v9864_v62  ;;  %v21260_v47 = vadd.f32 %v21206_v35, %v21204_v22  ;;  %v10192_v45 = vrot.slane %v21242_v24, 5  ;;  %v17189_v40 = vld [vmem:[%s22118_s9 + $0x10] sm:$0xff]   ;;  %v9522_v50 = vld [vmem:[#allocation3 + $0xc0] sm:$0xf] }
 0x528   : > { %v10838_v20 = vrot.slane %v10837_v39, 4  ;;  %v10848_v26 = vrot.slane %v10847_v25, 4  ;;  %v9883_v14 = vrot.slane %v9881_v10, 5  ;;  %v10195_v33 = vrot.slane %v10036_v49, 5  ;;  %v9523_v36 = vld [vmem:[#allocation3 + $0xc4] sm:$0xf]  ;;  %16709 = vmatprep.subr.bf16.mxu1 %v17189_v40 }
 0x529   : > { %v9878_v1 = vor.u32 %v9877_v55, %v9873_v4  ;;  %v9869_v6 = vrot.slane %v9868_v43, 4  ;;  %v10194_v32 = vrot.slane %v10192_v45, 4  ;;  %v21274_v7 = vadd.f32 %v21214_v41, %v21212_v42  ;;  %16710 = vmatpush3.bf16.msra.mxu1 %v17189_v40  ;;  %v17186_v25 = vld [vmem:[#allocation3 + $0xcc] sm:$0xff]   ;;  %v10935_v49 = vld [vmem:[#allocation3 + $0x1c] sm:$0xf] }
 0x52a   : > { %v10843_v22 = vsel %vm20119_vm11, %v10838_v20, %v10842_v38  ;;  %v10853_v35 = vsel %vm20119_vm11, %v10848_v26, %v10852_v57  ;;  %v14889_v18 = vrot.slane %v10034_v3, 9  ;;  %v21282_v38 = vadd.f32 %v21195_v11, %v21193_v56  ;;  %v9524_v57 = vld [vmem:[#allocation3 + $0xc8] sm:$0x1] }
 0x52b   : > { %v21266_v9 = vpop.f32.mrb[72].mxu1  ;;  %v9879_v24 = vrot.slane %v9878_v1, 4  ;;  %v14937_v48 = vcombine.low %v10843_v22, %v10853_v35  ;;  %v10196_v62 = vsel %vm17551_vm8, %v10194_v32, %v10195_v33  ;;  %v9874_v42 = vsel %vm20119_vm11, %v9869_v6, %v9873_v4  ;;  %v10936_v4 = vld [vmem:[#allocation3 + $0x20] sm:$0x1] }
 0x52c   : > { %v16206_v53 = vpop.f32.mrb[73].mxu1  ;;  %v21276_v15 = vpop.f32.mrb[40].mxu0  ;;  %v21290_v55 = vadd.f32 %v21199_v54, %v21197_v31  ;;  %v9886_v10 = vshrl.u32 %v9522_v50, 16  ;;  %v10193_v20 = vsel %vm17551_vm8, %v14889_v18, %v10192_v45  ;;  %v9889_v26 = vshll.u32 %v9522_v50, 16 }
 0x52d   : > { %v16208_v16 = vpop.f32.mrb[74].mxu1  ;;  %v16094_v39 = vpop.f32.mrb[41].mxu0  ;;  %v9884_v41 = vsel %vm20119_vm11, %v9879_v24, %v9883_v14  ;;  %12616 = vmatprep.mubr.bf16.mxu1 %v14937_v48  ;;  %v9895_v1 = vshll.u32 %v9523_v36, 16  ;;  %v14905_v40 = vcombine.low %v10193_v20, %v10196_v62  ;;  %v9899_v6 = vshrl.u32 %v9523_v36, 16  ;;  %v10934_v24 = vld [vmem:[#allocation3 + $0x18] sm:$0xe] }
 0x52e   : > { %v16209_v43 = vpop.f32.mrb[75].mxu1  ;;  %v16096_v56 = vpop.f32.mrb[42].mxu0  ;;  %v14872_v11 = vcombine.low %v9874_v42, %v9884_v41  ;;  %12617 = vmatmul.mubr.bf16.gmra.mrb[172].mxu1 %v17186_v25  ;;  %v9888_v14 = vrot.slane %v9886_v10, 4  ;;  %v9905_v32 = vshll.u32 %v9524_v57, 16  ;;  %v9891_v31 = vrot.slane %v9889_v26, 5 }
 0x52f   : > { %v16097_v3 = vpop.f32.mrb[43].mxu0  ;;  %v9897_v54 = vrot.slane %v9895_v1, 5  ;;  %v21296_v33 = vadd.f32 %v21244_v60, %v21240_v59  ;;  %v9901_v22 = vrot.slane %v9899_v6, 4  ;;  %v11032_v35 = vrot.slane %v10935_v49, 5  ;;  %v10938_v41 = vld [vmem:[#allocation3 + $0x28] sm:$0xf] }
 0x530   : > { %12448 = vmatmul.mubr.bf16.gmra.mrb[136].mxu0 %v14872_v11  ;;  %v11035_v45 = vrot.slane %v10936_v4, 5  ;;  %v9892_v50 = vor.u32 %v9891_v31, %v9888_v14  ;;  %v21300_v48 = vadd.f32 %v21252_v28, %v21248_v5  ;;  %v21304_v36 = vadd.f32 %v21250_v46, %v21246_v51  ;;  %v10941_v20 = vld [vmem:[#allocation3 + $0x34] sm:$0xf] }
 0x531   : > { %12455 = vmatprep.mubr.bf16.mxu0 %v14905_v40  ;;  %v21308_v18 = vadd.f32 %v21256_v27, %v21254_v29  ;;  %v9902_v60 = vor.u32 %v9901_v22, %v9897_v54  ;;  %v9907_v62 = vrot.slane %v9905_v32, 5  ;;  %v11034_v10 = vrot.slane %v11032_v35, 4  ;;  %v10939_v29 = vld [vmem:[#allocation3 + $0x2c] sm:$0x1]  ;;  %v10942_v32 = vld [vmem:[#allocation3 + $0x38] sm:$0x1] }
 0x532   : > { %v9893_v25 = vrot.slane %v9892_v50, 4  ;;  %v14938_v28 = vrot.slane %v10934_v24, 9  ;;  %v21313_v27 = vadd.f32 %v16206_v53, %v21266_v9  ;;  %v11039_v4 = vrot.slane %v10938_v41, 5  ;;  %v10940_v41 = vld [vmem:[#allocation3 + $0x30] sm:$0xe] }
 0x533   : > { %v16211_v59 = vpop.f32.mrb[76].mxu1  ;;  %v9903_v5 = vrot.slane %v9902_v60, 4  ;;  %v11036_v46 = vsel %vm17551_vm8, %v11034_v10, %v11035_v45  ;;  %v11046_v22 = vrot.slane %v10941_v20, 5  ;;  %v21321_v50 = vadd.f32 %v16209_v43, %v16208_v16  ;;  %v10944_v43 = vld [vmem:[#allocation3 + $0x40] sm:$0xf] }
 0x534   : > { %v16212_v57 = vpop.f32.mrb[77].mxu1  ;;  %v16099_v42 = vpop.f32.mrb[44].mxu0  ;;  %v9898_v40 = vsel %vm20119_vm11, %v9893_v25, %v9897_v54  ;;  %v11033_v6 = vsel %vm17551_vm8, %v14938_v28, %v11032_v35  ;;  %v21324_v45 = vadd.f32 %v16094_v39, %v21276_v15  ;;  %v11042_v53 = vrot.slane %v10939_v29, 5  ;;  %v10937_v54 = vld [vmem:[#allocation3 + $0x24] sm:$0xe]  ;;  %v17190_v39 = vld [vmem:[%s22118_s9 + $0x18] sm:$0xff]  }
 0x535   : > { %v16214_v49 = vpop.f32.mrb[78].mxu1  ;;  %v16100_v11 = vpop.f32.mrb[45].mxu0  ;;  %v9908_v14 = vsel %vm20119_vm11, %v9903_v5, %v9907_v62  ;;  %v14954_v9 = vcombine.low %v11033_v6, %v11036_v46  ;;  %v21326_v24 = vadd.f32 %v16097_v3, %v16096_v56  ;;  %v11049_v60 = vrot.slane %v10942_v32, 5  ;;  %16711 = vmatprep.subr.bf16.mxu1 %v17190_v39 }
 0x536   : > { %v16215_v26 = vpop.f32.mrb[79].mxu1  ;;  %v16102_v51 = vpop.f32.mrb[46].mxu0  ;;  %v14873_v31 = vcombine.low %v9898_v40, %v9908_v14  ;;  %v21328_v52 = vadd.f32 %v16212_v57, %v16211_v59  ;;  %v11041_v35 = vrot.slane %v11039_v4, 4  ;;  %v11048_v16 = vrot.slane %v11046_v22, 4  ;;  %v10947_v59 = vld [vmem:[#allocation3 + $0x4c] sm:$0xf]  ;;  %16712 = vmatpush3.bf16.msra.mxu1 %v17190_v39 }
 0x537   : > { %v16103_v1 = vpop.f32.mrb[47].mxu0  ;;  %v14939_v56 = vrot.slane %v10937_v54, 9  ;;  %v21335_v57 = vadd.f32 %v16215_v26, %v16214_v49  ;;  %v21337_v28 = vadd.f32 %v16100_v11, %v16099_v42  ;;  %v14940_v29 = vrot.slane %v10940_v41, 9  ;;  %v10945_v14 = vld [vmem:[#allocation3 + $0x44] sm:$0x1] }
 0x538   : > { %12456 = vmatmul.mubr.bf16.gmra.mrb[140].mxu0 %v14873_v31  ;;  %v11043_v3 = vsel %vm17551_vm8, %v11041_v35, %v11042_v53  ;;  %v11050_v40 = vsel %vm17551_vm8, %v11048_v16, %v11049_v60  ;;  %v21341_v6 = vadd.f32 %v16103_v1, %v16102_v51  ;;  %v10948_v53 = vld [vmem:[#allocation3 + $0x50] sm:$0x1]  ;;  %v11060_v11 = vrot.slane %v10947_v59, 5  ;;  %v10943_v51 = vld [vmem:[#allocation3 + $0x3c] sm:$0xe] }
 0x539   : > { %16673 = vmatprep.mubr.bf16.mxu0 %v14954_v9  ;;  %v11040_v31 = vsel %vm17551_vm8, %v14939_v56, %v11039_v4  ;;  %v11053_v9 = vrot.slane %v10944_v43, 5  ;;  %v11047_v42 = vsel %vm17551_vm8, %v14940_v29, %v11046_v22  ;;  %v11056_v54 = vrot.slane %v10945_v14, 5  ;;  %v10946_v39 = vld [vmem:[#allocation3 + $0x48] sm:$0xe]  ;;  %v21355_v59 = vld [vmem:[#allocation3 + $0x58] sm:$0xf] }
 0x53a   : > { %v14955_v49 = vcombine.low %v11040_v31, %v11043_v3  ;;  %v14956_v26 = vcombine.low %v11047_v42, %v11050_v40  ;;  %v11063_v1 = vrot.slane %v10948_v53, 5  ;;  %v11062_v3 = vrot.slane %v11060_v11, 4  ;;  %v10951_v53 = vld [vmem:[#allocation3 + $0x5c] sm:$0x1] }
 0x53b   : > { %v16217_v62 = vpop.f32.mrb[80].mxu1  ;;  %v11055_v43 = vrot.slane %v11053_v9, 4  ;;  %v14941_v29 = vrot.slane %v10943_v51, 9  ;;  %v21365_v40 = vadd.f32 %v21128_v30, %v21082_v0  ;;  %v21369_v14 = vadd.f32 %v21142_v23, %v21082_v0 }
 0x53c   : > { %v16218_v25 = vpop.f32.mrb[81].mxu1  ;;  %v16105_v10 = vpop.f32.mrb[48].mxu0  ;;  %v11064_v31 = vsel %vm17551_vm8, %v11062_v3, %v11063_v1  ;;  %v21387_v1 = vadd.f32 %v21179_v63, %v21082_v0  ;;  %v10949_v3 = vld [vmem:[#allocation3 + $0x54] sm:$0xe]  ;;  %v21405_v63 = vadd.f32 %v21282_v38, %v21082_v0 }
 0x53d   : > { %v16220_v5 = vpop.f32.mrb[82].mxu1  ;;  %v16106_v15 = vpop.f32.mrb[49].mxu0  ;;  %v21347_v35 = vadd.f32 %v16218_v25, %v16217_v62  ;;  %v11054_v42 = vsel %vm17551_vm8, %v14941_v29, %v11053_v9  ;;  %v21391_v9 = vadd.f32 %v21183_v61, %v21082_v0  ;;  %v10952_v61 = vld [vmem:[#allocation3 + $0x60] sm:$0xe]  ;;  %v21407_v29 = vld [vmem:[#allocation3 + $0x7c] sm:$0xf] }
 0x53e   : > { %v16221_v20 = vpop.f32.mrb[83].mxu1  ;;  %v16108_v46 = vpop.f32.mrb[50].mxu0  ;;  %v21351_v41 = vadd.f32 %v16106_v15, %v16105_v10 }
 0x53f   : > { %v16109_v32 = vpop.f32.mrb[51].mxu0  ;;  %v21349_v60 = vadd.f32 %v16221_v20, %v16220_v5  ;;  %v11057_v5 = vsel %vm17551_vm8, %v11055_v43, %v11056_v54  ;;  %v21359_v20 = vld [vmem:[#allocation3 + $0x64] sm:$0xf]  ;;  %v10954_v54 = vld [vmem:[#allocation3 + $0x68] sm:$0x1] }
 0x540   : > { %16674 = vmatmul.mubr.bf16.vlgmr.msra.gmra.mrb[144].mxu0 %v14955_v49  ;;  %v21353_v4 = vadd.f32 %v16109_v32, %v16108_v46  ;;  %v14942_v32 = vrot.slane %v10946_v39, 9  ;;  %v11074_v43 = vrot.slane %v21359_v20, 5  ;;  %v21411_v20 = vadd.f32 %v21290_v55, %v21082_v0 }
 0x541   : > { %16677 = vmatprep.mubr.bf16.mxu0 %v14956_v26  ;;  %v11067_v26 = vrot.slane %v21355_v59, 5  ;;  %v21393_v59 = vld [vmem:[#allocation3 + $0x70] sm:$0xf] }
 0x542   : > { %v11061_v23 = vsel %vm17551_vm8, %v14942_v32, %v11060_v11  ;;  %v21397_v11 = vadd.f32 %v21230_v8, %v21082_v0  ;;  %v21415_v8 = vadd.f32 %v21304_v36, %v21082_v0  ;;  %v11081_v55 = vrot.slane %v21393_v59, 5 }
 0x543   : > { %v16223_v16 = vpop.f32.mrb[84].mxu1  ;;  %v11069_v38 = vrot.slane %v11067_v26, 4 }
 0x544   : > { %v16224_v56 = vpop.f32.mrb[85].mxu1  ;;  %v16111_v22 = vpop.f32.mrb[52].mxu0 }
 0x545   : > { %v16226_v62 = vpop.f32.mrb[86].mxu1  ;;  %v16112_v25 = vpop.f32.mrb[53].mxu0  ;;  %v21361_v10 = vadd.f32 %v16224_v56, %v16223_v16  ;;  %v14957_v16 = vcombine.low %v11054_v42, %v11057_v5  ;;  %v14958_v56 = vcombine.low %v11061_v23, %v11064_v31  ;;  %v21423_v31 = vadd.f32 %v21324_v45, %v21082_v0  ;;  %v10955_v23 = vld [vmem:[#allocation3 + $0x6c] sm:$0xe] }
 0x546   : > { %v16227_v15 = vpop.f32.mrb[87].mxu1  ;;  %v16114_v46 = vpop.f32.mrb[54].mxu0  ;;  %v21378_v30 = vadd.f32 %v16112_v25, %v16111_v22  ;;  %v11070_v22 = vrot.slane %v10951_v53, 5  ;;  %v11077_v25 = vrot.slane %v10954_v54, 5  ;;  %v11076_v53 = vrot.slane %v11074_v43, 4 }
 0x547   : > { %22180 = vst [vmem:[#allocation8_spill] sm:$0xff] %v21361_v10  ;;  %v16115_v49 = vpop.f32.mrb[55].mxu0  ;;  %v21376_v51 = vadd.f32 %v16227_v15, %v16226_v62  ;;  %v21401_v62 = vadd.f32 %v21234_v44, %v21082_v0  ;;  %v21419_v44 = vadd.f32 %v21308_v18, %v21082_v0  ;;  %v10957_v15 = vld [vmem:[#allocation3 + $0x74] sm:$0x1] }
 0x548   : > { %v21383_v39 = vadd.f32 %v16115_v49, %v16114_v46  ;;  %16678 = vmatmul.mubr.bf16.gmra.mrb[148].mxu0 %v14957_v16  ;;  %v10960_v49 = vld [vmem:[#allocation3 + $0x80] sm:$0x1]  ;;  %v14943_v16 = vrot.slane %v10949_v3, 9  ;;  %v11071_v18 = vsel %vm17551_vm8, %v11069_v38, %v11070_v22  ;;  %v11078_v59 = vsel %vm17551_vm8, %v11076_v53, %v11077_v25  ;;  %v10961_v53 = vld [vmem:[#allocation3 + $0x84] sm:$0xe] }
 0x549   : > { %22181 = vst [vmem:[#allocation9_spill] sm:$0xff] %v21376_v51  ;;  %16681 = vmatprep.mubr.bf16.mxu0 %v14958_v56  ;;  %v11088_v56 = vrot.slane %v21407_v29, 5  ;;  %v14944_v51 = vrot.slane %v10952_v61, 9  ;;  %v11084_v10 = vrot.slane %v10957_v15, 5  ;;  %v21439_v3 = vadd.f32 %v21326_v24, %v21082_v0  ;;  %v10958_v29 = vld [vmem:[#allocation3 + $0x78] sm:$0xe] }
 0x54a   : > { %v11068_v22 = vsel %vm17551_vm8, %v14943_v16, %v11067_v26  ;;  %v11091_v38 = vrot.slane %v10960_v49, 5  ;;  %v21445_v61 = vadd.f32 %v21337_v28, %v21082_v0  ;;  %v11083_v15 = vrot.slane %v11081_v55, 4  ;;  %v17191_v24 = vld [vmem:[%s22118_s9 + $0x20] sm:$0xff]  }
 0x54b   : > { %v16229_v5 = vpop.f32.mrb[88].mxu1  ;;  %v14959_v25 = vcombine.low %v11068_v22, %v11071_v18  ;;  %v14945_v26 = vrot.slane %v10955_v23, 9  ;;  %v11090_v16 = vrot.slane %v11088_v56, 4  ;;  %v21456_v28 = vadd.f32 %v21341_v6, %v21082_v0  ;;  %16713 = vmatprep.subr.bf16.mxu1 %v17191_v24 }
 0x54c   : > { %v16230_v46 = vpop.f32.mrb[89].mxu1  ;;  %v16117_v32 = vpop.f32.mrb[56].mxu0  ;;  %v14946_v18 = vrot.slane %v10958_v29, 9  ;;  %v21466_v23 = vadd.f32 %v21353_v4, %v21082_v0  ;;  %16714 = vmatpush3.bf16.msra.mxu1 %v17191_v24  ;;  %v14947_v29 = vrot.slane %v10961_v53, 9 }
 0x54d   : > { %v21426_v42 = vadd.f32 %v16230_v46, %v16229_v5  ;;  %v16232_v36 = vpop.f32.mrb[90].mxu1  ;;  %v16118_v54 = vpop.f32.mrb[57].mxu0  ;;  %v10962_v5 = vld [vmem:[#allocation3 + $0x88] sm:$0xf]  ;;  %v11082_v6 = vsel %vm17551_vm8, %v14945_v26, %v11081_v55 }
 0x54e   : > { %v16233_v37 = vpop.f32.mrb[91].mxu1  ;;  %v21431_v12 = vadd.f32 %v16118_v54, %v16117_v32  ;;  %v16120_v45 = vpop.f32.mrb[58].mxu0  ;;  %v11095_v49 = vrot.slane %v10962_v5, 5 }
 0x54f   : > { %22182 = vst [vmem:[#allocation10_spill] sm:$0xff] %v21426_v42  ;;  %v21435_v46 = vadd.f32 %v16233_v37, %v16232_v36  ;;  %v16121_v42 = vpop.f32.mrb[59].mxu0  ;;  %v11075_v37 = vsel %vm17551_vm8, %v14944_v51, %v11074_v43  ;;  %v10963_v36 = vld [vmem:[#allocation3 + $0x8c] sm:$0x1]  ;;  %v21460_v51 = vadd.f32 %v21351_v41, %v21082_v0  ;;  %v11085_v43 = vsel %vm17551_vm8, %v11083_v15, %v11084_v10  ;;  %v21472_v41 = vld [vmem:[#allocation3 + $0x90] sm:$0xe] }
 0x550   : > { %v16122_v32 = vadd.f32 %v16121_v42, %v16120_v45  ;;  %v14960_v54 = vcombine.low %v11075_v37, %v11078_v59  ;;  %v21452_v42 = vld [vmem:[#allocation3 + $0x94] sm:$0xf]  ;;  %16682 = vmatmul.mubr.bf16.gmra.mrb[152].mxu0 %v14959_v25  ;;  %v11092_v59 = vsel %vm17551_vm8, %v11090_v16, %v11091_v38  ;;  %v11098_v5 = vrot.slane %v10963_v36, 5  ;;  %v10966_v37 = vld [vmem:[#allocation3 + $0x98] sm:$0x1] }
 0x551   : > { %v11089_v10 = vsel %vm17551_vm8, %v14946_v18, %v11088_v56  ;;  %v21482_v38 = vld [vmem:[%s22117_s8] ss:$0 sm:$0xff]  ;;  %v11097_v24 = vrot.slane %v11095_v49, 4  ;;  %v14948_v0 = vrot.slane %v21472_v41, 9 }
 0x552   : > { %16685 = vmatprep.mubr.bf16.mxu0 %v14960_v54  ;;  %v14961_v54 = vcombine.low %v11082_v6, %v11085_v43  ;;  %v12088_v36 = vadd.f32 %v21482_v38, %v21378_v30  ;;  %v14962_v16 = vcombine.low %v11089_v10, %v11092_v59  ;;  %v12091_v18 = vadd.f32 %v21482_v38, %v21383_v39 }
 0x553   : > { %v16235_v45 = vpop.f32.mrb[92].mxu1  ;;  %v11105_v30 = vrot.slane %v10966_v37, 5  ;;  %v12096_v59 = vadd.f32 %v21482_v38, %v21431_v12  ;;  %v21501_v39 = vadd.f32 %v21120_v21, %v21365_v40  ;;  %v21511_v10 = vadd.f32 %v21167_v19, %v21387_v1 }
 0x554   : > { %v16236_v22 = vpop.f32.mrb[93].mxu1  ;;  %v16123_v25 = vpop.f32.mrb[60].mxu0  ;;  %v21519_v21 = vadd.f32 %v21210_v34, %v21397_v11  ;;  %v21527_v40 = vadd.f32 %v21260_v47, %v21405_v63  ;;  %v21531_v19 = vadd.f32 %v21274_v7, %v21411_v20  ;;  %v21535_v1 = vadd.f32 %v21296_v33, %v21415_v8  ;;  %v10968_v7 = vld [vmem:[#allocation3 + $0xa0] sm:$0xf]  ;;  %v10971_v63 = vld [vmem:[#allocation3 + $0xac] sm:$0xf] }
 0x555   : > { %v21477_v4 = vadd.f32 %v16236_v22, %v16235_v45  ;;  %v16238_v15 = vpop.f32.mrb[94].mxu1  ;;  %v16124_v55 = vpop.f32.mrb[61].mxu0  ;;  %v11096_v45 = vsel %vm17551_vm8, %v14947_v29, %v11095_v49  ;;  %v11099_v22 = vsel %vm17551_vm8, %v11097_v24, %v11098_v5  ;;  %v21505_v49 = vadd.f32 %v21124_v58, %v21369_v14 }
 0x556   : > { %v16239_v26 = vpop.f32.mrb[95].mxu1  ;;  %v16125_v56 = vadd.f32 %v16124_v55, %v16123_v25  ;;  %v16126_v53 = vpop.f32.mrb[62].mxu0  ;;  %v22184_v25 = vrot.slane %v21452_v42, 5  ;;  %v12099_v5 = vadd.f32 %v21482_v38, %v16122_v32  ;;  %v21515_v29 = vadd.f32 %v21173_v2, %v21391_v9 }
 0x557   : > { %22183 = vst [vmem:[#allocation11_spill] sm:$0xff] %v21477_v4  ;;  %v21490_v43 = vadd.f32 %v16239_v26, %v16238_v15  ;;  %v16127_v6 = vpop.f32.mrb[63].mxu0  ;;  %v21523_v58 = vadd.f32 %v21218_v13, %v21401_v62  ;;  %v21539_v34 = vadd.f32 %v21300_v48, %v21419_v44  ;;  %v21543_v13 = vadd.f32 %v21313_v27, %v21423_v31  ;;  %v22185_v31 = vld [vmem:[#allocation8_spill] sm:$0xff] }
 0x558   : > { %v16128_v4 = vadd.f32 %v16127_v6, %v16126_v53  ;;  %v11104_v55 = vrot.slane %v22184_v25, 4  ;;  %v12104_v41 = vadd.f32 %v21482_v38, %v16125_v56  ;;  %16686 = vmatmul.mubr.bf16.gmra.mrb[156].mxu0 %v14961_v54  ;;  %v21547_v47 = vadd.f32 %v21321_v50, %v21439_v3  ;;  %v10972_v54 = vld [vmem:[#allocation3 + $0xb0] sm:$0x1] }
 0x559   : > { %16689 = vmatprep.mubr.bf16.mxu0 %v14962_v16  ;;  %v21553_v33 = vadd.f32 %v21328_v52, %v21445_v61  ;;  %v21557_v48 = vadd.f32 %v21335_v57, %v21456_v28  ;;  %v21561_v27 = vadd.f32 %v21347_v35, %v21460_v51  ;;  %v21565_v44 = vadd.f32 %v21349_v60, %v21466_v23  ;;  %v22186_v52 = vld [vmem:[#allocation9_spill] sm:$0xff]  ;;  %v10969_v61 = vld [vmem:[#allocation3 + $0xa4] sm:$0x1] }
 0x55a   : > { %v21568_v3 = vadd.f32 %v22185_v31, %v12088_v36  ;;  %v21571_v32 = vadd.f32 %v22186_v52, %v12091_v18  ;;  %v11106_v57 = vsel %vm17551_vm8, %v11104_v55, %v11105_v30  ;;  %v22187_v51 = vld [vmem:[#allocation10_spill] sm:$0xff]  ;;  %v21581_v15 = vadd.f32 %v21435_v46, %v12099_v5  ;;  %v10967_v46 = vld [vmem:[#allocation3 + $0x9c] sm:$0xe]  ;;  %v10970_v55 = vld [vmem:[#allocation3 + $0xa8] sm:$0xe] }
 0x55b   : > { %v16241_v12 = vpop.f32.mrb[96].mxu1  ;;  %v21578_v37 = vadd.f32 %v22187_v51, %v12096_v59  ;;  %v14963_v60 = vcombine.low %v11096_v45, %v11099_v22  ;;  %v11109_v23 = vrot.slane %v10968_v7, 5  ;;  %v22188_v24 = vmov %v22184_v25  ;;  %v10975_v52 = vld [vmem:[#allocation3 + $0xbc] sm:$0x1] }
 0x55c   : > { %v16242_v2 = vpop.f32.mrb[97].mxu1  ;;  %v16129_v14 = vpop.f32.mrb[64].mxu0  ;;  %v11103_v26 = vsel %vm17551_vm8, %v14948_v0, %v22188_v24  ;;  %v11116_v56 = vrot.slane %v10971_v63, 5  ;;  %v12107_v53 = vadd.f32 %v21482_v38, %v16128_v4  ;;  %v11112_v30 = vrot.slane %v10969_v61, 5 }
 0x55d   : > { %v21549_v9 = vadd.f32 %v16242_v2, %v16241_v12  ;;  %v16244_v11 = vpop.f32.mrb[98].mxu1  ;;  %v16130_v62 = vpop.f32.mrb[65].mxu0  ;;  %v14964_v6 = vcombine.low %v11103_v26, %v11106_v57  ;;  %v11119_v25 = vrot.slane %v10972_v54, 5  ;;  %v11111_v22 = vrot.slane %v11109_v23, 4  ;;  %v10974_v12 = vld [vmem:[#allocation3 + $0xb8] sm:$0xf] }
 0x55e   : > { %v16245_v50 = vpop.f32.mrb[99].mxu1  ;;  %v16131_v20 = vadd.f32 %v16130_v62, %v16129_v14  ;;  %v16132_v8 = vpop.f32.mrb[66].mxu0  ;;  %v22189_v16 = vld [vmem:[#allocation11_spill] sm:$0xff]  ;;  %v11118_v5 = vrot.slane %v11116_v56, 4  ;;  %v14949_v14 = vrot.slane %v10967_v46, 9  ;;  %v11123_v51 = vrot.slane %v10974_v12, 5 }
 0x55f   : > { %v21575_v35 = vadd.f32 %v16245_v50, %v16244_v11  ;;  %v16133_v28 = vpop.f32.mrb[67].mxu0  ;;  %v21589_v18 = vadd.f32 %v22189_v16, %v12104_v41  ;;  %v21594_v41 = vadd.f32 %v21490_v43, %v12107_v53  ;;  %v11113_v7 = vsel %vm17551_vm8, %v11111_v22, %v11112_v30  ;;  %v10977_v11 = vld [vmem:[#allocation3 + $0xc4] sm:$0xf]  ;;  %v17192_v43 = vld [vmem:[%s22118_s9 + $0x28] sm:$0xff]   ;;  %v10973_v46 = vld [vmem:[#allocation3 + $0xb4] sm:$0xe] }
 0x560   : > { %v16134_v36 = vadd.f32 %v16133_v28, %v16132_v8  ;;  %16690 = vmatmul.mubr.bf16.gmra.mrb[160].mxu0 %v14963_v60  ;;  %v14950_v8 = vrot.slane %v10970_v55, 9  ;;  %v11120_v31 = vsel %vm17551_vm8, %v11118_v5, %v11119_v25  ;;  %v11110_v28 = vsel %vm17551_vm8, %v14949_v14, %v11109_v23  ;;  %v10978_v60 = vld [vmem:[#allocation3 + $0xc8] sm:$0x1]  ;;  %16715 = vmatprep.subr.bf16.mxu1 %v17192_v43  ;;  %v10976_v22 = vld [vmem:[#allocation3 + $0xc0] sm:$0xe] }
 0x561   : > { %16693 = vmatprep.mubr.bf16.mxu0 %v14964_v6  ;;  %v14965_v24 = vcombine.low %v11110_v28, %v11113_v7  ;;  %v11130_v53 = vrot.slane %v10977_v11, 5  ;;  %v12112_v16 = vadd.f32 %v21482_v38, %v16131_v20  ;;  %v11126_v30 = vrot.slane %v10975_v52, 5  ;;  %16716 = vmatpush3.bf16.msra.mxu1 %v17192_v43 }
 0x562   : > { %v11117_v26 = vsel %vm17551_vm8, %v14950_v8, %v11116_v56  ;;  %v11133_v25 = vrot.slane %v10978_v60, 5  ;;  %v11125_v23 = vrot.slane %v11123_v51, 4  ;;  %v12115_v5 = vadd.f32 %v21482_v38, %v16134_v36  ;;  %v10980_v56 = vld [vmem:[#allocation3 + $0xd0] sm:$0xf]  ;;  %v10981_v36 = vld [vmem:[#allocation3 + $0xd4] sm:$0x1] }
 0x563   : > { %v16247_v45 = vpop.f32.mrb[100].mxu1  ;;  %v14966_v6 = vcombine.low %v11117_v26, %v11120_v31  ;;  %v14951_v14 = vrot.slane %v10973_v46, 9  ;;  %v14952_v8 = vrot.slane %v10976_v22, 9 }
 0x564   : > { %v16248_v59 = vpop.f32.mrb[101].mxu1  ;;  %v16135_v42 = vpop.f32.mrb[68].mxu0  ;;  %v11127_v7 = vsel %vm17551_vm8, %v11125_v23, %v11126_v30  ;;  %v21629_v26 = vadd.f32 %v21575_v35, %v12115_v5  ;;  %v10979_v30 = vld [vmem:[#allocation3 + $0xcc] sm:$0xe] }
 0x565   : > { %v21591_v0 = vadd.f32 %v16248_v59, %v16247_v45  ;;  %v16250_v2 = vpop.f32.mrb[102].mxu1  ;;  %v16136_v4 = vpop.f32.mrb[69].mxu0  ;;  %v11124_v43 = vsel %vm17551_vm8, %v14951_v14, %v11123_v51 }
 0x566   : > { %v16251_v62 = vpop.f32.mrb[103].mxu1  ;;  %v16137_v63 = vadd.f32 %v16136_v4, %v16135_v42  ;;  %v16138_v50 = vpop.f32.mrb[70].mxu0  ;;  %v11132_v42 = vrot.slane %v11130_v53, 4  ;;  %v21616_v4 = vadd.f32 %v21549_v9, %v12112_v16  ;;  %v11137_v9 = vrot.slane %v10980_v56, 5 }
 0x567   : > { %v21600_v57 = vadd.f32 %v16251_v62, %v16250_v2  ;;  %v16139_v61 = vpop.f32.mrb[71].mxu0  ;;  %v14967_v60 = vcombine.low %v11124_v43, %v11127_v7 }
 0x568   : > { %v21607_v54 = vadd.f32 %v16139_v61, %v16138_v50  ;;  %16694 = vmatmul.mubr.bf16.gmra.mrb[164].mxu0 %v14965_v24  ;;  %v11134_v31 = vsel %vm17551_vm8, %v11132_v42, %v11133_v25  ;;  %v11131_v24 = vsel %vm17551_vm8, %v14952_v8, %v11130_v53  ;;  %v11139_v25 = vrot.slane %v11137_v9, 4 }
 0x569   : > { %16697 = vmatprep.mubr.bf16.mxu0 %v14966_v6  ;;  %v14968_v16 = vcombine.low %v11131_v24, %v11134_v31  ;;  %v11140_v6 = vrot.slane %v10981_v36, 5  ;;  %v14953_v42 = vrot.slane %v10979_v30, 9 }
 0x56b   : > { %v16253_v45 = vpop.f32.mrb[104].mxu1  ;;  %v11141_v35 = vsel %vm17551_vm8, %v11139_v25, %v11140_v6  ;;  %v11138_v14 = vsel %vm17551_vm8, %v14953_v42, %v11137_v9 }
 0x56c   : > { %v16254_v55 = vpop.f32.mrb[105].mxu1  ;;  %v16141_v59 = vpop.f32.mrb[72].mxu0 }
 0x56d   : > { %v21613_v12 = vadd.f32 %v16254_v55, %v16253_v45  ;;  %v16256_v20 = vpop.f32.mrb[106].mxu1  ;;  %v16142_v2 = vpop.f32.mrb[73].mxu0  ;;  %v12120_v45 = vadd.f32 %v21482_v38, %v16137_v63  ;;  %v12123_v63 = vadd.f32 %v21482_v38, %v21607_v54 }
 0x56e   : > { %v16257_v11 = vpop.f32.mrb[107].mxu1  ;;  %v16143_v62 = vadd.f32 %v16142_v2, %v16141_v59  ;;  %v16144_v50 = vpop.f32.mrb[74].mxu0 }
 0x56f   : > { %v21622_v52 = vadd.f32 %v16257_v11, %v16256_v20  ;;  %v16145_v61 = vpop.f32.mrb[75].mxu0  ;;  %v21641_v11 = vadd.f32 %v21591_v0, %v12120_v45  ;;  %v17193_v0 = vld [vmem:[%s22118_s9 + $0x30] sm:$0xff]   ;;  %v22191_v45 = vld [vmem:[#allocation7_spill] sm:$0xff] }
 0x570   : > { %v16146_v28 = vadd.f32 %v16145_v61, %v16144_v50  ;;  %16698 = vmatmul.mubr.bf16.gmra.mrb[168].mxu0 %v14967_v60  ;;  %v14969_v50 = vcombine.low %v11138_v14, %v11141_v35  ;;  %v21644_v61 = vadd.f32 %v21600_v57, %v12123_v63  ;;  %v12128_v30 = vadd.f32 %v21482_v38, %v16143_v62 }
 0x571   : > { %16701 = vmatprep.mubr.bf16.mxu0 %v14968_v16  ;;  %16717 = vmatprep.subr.bf16.mxu1 %v17193_v0 }
 0x572   : > { %16718 = vmatpush3.bf16.msra.mxu1 %v17193_v0  ;;  %v21658_v35 = vadd.f32 %v21613_v12, %v12128_v30 }
 0x573   : > { %v16259_v46 = vpop.f32.mrb[108].mxu1 }
 0x574   : > { %v16260_v23 = vpop.f32.mrb[109].mxu1  ;;  %v16147_v51 = vpop.f32.mrb[76].mxu0 }
 0x575   : > { %v21632_v22 = vadd.f32 %v16260_v23, %v16259_v46  ;;  %v16262_v55 = vpop.f32.mrb[110].mxu1  ;;  %v16148_v59 = vpop.f32.mrb[77].mxu0  ;;  %v22190_v46 = vld [vmem:[#allocation6_spill] sm:$0xff] }
 0x576   : > { %v16263_v53 = vpop.f32.mrb[111].mxu1  ;;  %v16149_v5 = vadd.f32 %v16148_v59, %v16147_v51  ;;  %v16150_v56 = vpop.f32.mrb[78].mxu0 }
 0x577   : > { %v16264_v20 = vadd.f32 %v16263_v53, %v16262_v55  ;;  %v16151_v2 = vpop.f32.mrb[79].mxu0  ;;  %v12131_v55 = vadd.f32 %v21482_v38, %v16146_v28 }
 0x578   : > { %v16152_v7 = vadd.f32 %v16151_v2, %v16150_v56  ;;  %16702 = vmatmul.mubr.bf16.gmra.mrb[172].mxu0 %v14969_v50  ;;  %v12136_v28 = vadd.f32 %v21482_v38, %v16149_v5 }
 0x57a   : > { %v12139_v30 = vadd.f32 %v21482_v38, %v16152_v7  ;;  %v17194_v38 = vld [vmem:[%s22118_s9 + $0x38] sm:$0xff]  }
 0x57b   : > { %v16393_v8 = vpop.f32.mrb[112].mxu1  ;;  %16719 = vmatprep.subr.bf16.mxu1 %v17194_v38 }
 0x57c   : > { %v16394_v31 = vpop.f32.mrb[113].mxu1  ;;  %v16281_v36 = vpop.f32.mrb[80].mxu0  ;;  %16720 = vmatpush3.bf16.msra.mxu1 %v17194_v38 }
 0x57d   : > { %v21646_v43 = vadd.f32 %v16394_v31, %v16393_v8  ;;  %v16396_v60 = vpop.f32.mrb[114].mxu1  ;;  %v16282_v17 = vpop.f32.mrb[81].mxu0 }
 0x57e   : > { %v16397_v9 = vpop.f32.mrb[115].mxu1  ;;  %v16283_v24 = vadd.f32 %v16282_v17, %v16281_v36  ;;  %v16284_v16 = vpop.f32.mrb[82].mxu0 }
 0x57f   : > { %v21651_v54 = vadd.f32 %v16397_v9, %v16396_v60  ;;  %v16285_v6 = vpop.f32.mrb[83].mxu0  ;;  %v21662_v60 = vadd.f32 %v21622_v52, %v12131_v55 }
 0x580   : > { %v12338_v25 = vadd.f32 %v16283_v24, %v22190_v46  ;;  %v16286_v57 = vadd.f32 %v16285_v6, %v16284_v16 }
 0x582   : > { %v12341_v23 = vadd.f32 %v16286_v57, %v22191_v45 }
 0x583   : > { %v16399_v51 = vpop.f32.mrb[116].mxu1 }
 0x584   : > { %v16400_v59 = vpop.f32.mrb[117].mxu1  ;;  %v16287_v42 = vpop.f32.mrb[84].mxu0 }
 0x585   : > { %v16401_v53 = vadd.f32 %v16400_v59, %v16399_v51  ;;  %v16402_v56 = vpop.f32.mrb[118].mxu1  ;;  %v16288_v2 = vpop.f32.mrb[85].mxu0  ;;  %v21672_v59 = vadd.f32 %v16264_v20, %v12139_v30 }
 0x586   : > { %v16403_v14 = vpop.f32.mrb[119].mxu1  ;;  %v16289_v62 = vadd.f32 %v16288_v2, %v16287_v42  ;;  %v16290_v63 = vpop.f32.mrb[86].mxu0 }
 0x587   : > { %v16404_v50 = vadd.f32 %v16403_v14, %v16402_v56  ;;  %v16291_v8 = vpop.f32.mrb[87].mxu0 }
 0x588   : > { %v12346_v31 = vadd.f32 %v16289_v62, %v21501_v39  ;;  %v16292_v36 = vadd.f32 %v16291_v8, %v16290_v63  ;;  %v21668_v39 = vadd.f32 %v21632_v22, %v12136_v28 }
 0x58a   : > { %v12349_v17 = vadd.f32 %v16292_v36, %v21505_v49  ;;  %v21677_v7 = vadd.f32 %v16401_v53, %v12346_v31 }
 0x58b   : > { %v16405_v12 = vpop.f32.mrb[120].mxu1 }
 0x58c   : > { %v16406_v9 = vpop.f32.mrb[121].mxu1  ;;  %v16293_v24 = vpop.f32.mrb[88].mxu0  ;;  %v21684_v53 = vadd.f32 %v16404_v50, %v12349_v17 }
 0x58d   : > { %v16407_v16 = vadd.f32 %v16406_v9, %v16405_v12  ;;  %v16408_v0 = vpop.f32.mrb[122].mxu1  ;;  %v16294_v6 = vpop.f32.mrb[89].mxu0  ;;  %v21681_v12 = vadd.f32 %v21646_v43, %v12338_v25 }
 0x58e   : > { %v16409_v46 = vpop.f32.mrb[123].mxu1  ;;  %v16295_v57 = vadd.f32 %v16294_v6, %v16293_v24  ;;  %v16296_v45 = vpop.f32.mrb[90].mxu0 }
 0x58f   : > { %v16410_v52 = vadd.f32 %v16409_v46, %v16408_v0  ;;  %v16297_v51 = vpop.f32.mrb[91].mxu0 }
 0x590   : > { %v12354_v5 = vadd.f32 %v16295_v57, %v21511_v10  ;;  %v16298_v55 = vadd.f32 %v16297_v51, %v16296_v45  ;;  %v21687_v57 = vadd.f32 %v21651_v54, %v12341_v23 }
 0x592   : > { %v12357_v49 = vadd.f32 %v16298_v55, %v21515_v29  ;;  %v21692_v17 = vadd.f32 %v16407_v16, %v12354_v5 }
 0x593   : > { %v16411_v42 = vpop.f32.mrb[124].mxu1 }
 0x594   : > { %v16412_v56 = vpop.f32.mrb[125].mxu1  ;;  %v16299_v2 = vpop.f32.mrb[92].mxu0 }
 0x595   : > { %v16413_v22 = vadd.f32 %v16412_v56, %v16411_v42  ;;  %v16414_v14 = vpop.f32.mrb[126].mxu1  ;;  %v16300_v62 = vpop.f32.mrb[93].mxu0 }
 0x596   : > { %v16415_v63 = vpop.f32.mrb[127].mxu1  ;;  %v16301_v8 = vadd.f32 %v16300_v62, %v16299_v2  ;;  %v16302_v10 = vpop.f32.mrb[94].mxu0  ;;  %v21697_v62 = vadd.f32 %v16410_v52, %v12357_v49 }
 0x597   : > { %v16416_v36 = vadd.f32 %v16415_v63, %v16414_v14  ;;  %v16303_v29 = vpop.f32.mrb[95].mxu0 }
 0x598   : > { %v12362_v20 = vadd.f32 %v16301_v8, %v21519_v21  ;;  %v16304_v28 = vadd.f32 %v16303_v29, %v16302_v10 }
 0x59a   : > { %v12365_v9 = vadd.f32 %v16304_v28, %v21523_v58  ;;  %v21689_v45 = vadd.f32 %v16413_v22, %v12362_v20 }
 0x59b   : > { %v16417_v31 = vpop.f32.mrb[128].mxu1 }
 0x59c   : > { %v16418_v24 = vpop.f32.mrb[129].mxu1  ;;  %v16305_v0 = vpop.f32.mrb[96].mxu0  ;;  %v21695_v56 = vadd.f32 %v16416_v36, %v12365_v9 }
 0x59d   : > { %v16419_v6 = vadd.f32 %v16418_v24, %v16417_v31  ;;  %v16420_v30 = vpop.f32.mrb[130].mxu1  ;;  %v16306_v46 = vpop.f32.mrb[97].mxu0 }
 0x59e   : > { %v16421_v21 = vpop.f32.mrb[131].mxu1  ;;  %v16307_v51 = vadd.f32 %v16306_v46, %v16305_v0  ;;  %v16308_v55 = vpop.f32.mrb[98].mxu0 }
 0x59f   : > { %v16422_v43 = vadd.f32 %v16421_v21, %v16420_v30  ;;  %v16309_v25 = vpop.f32.mrb[99].mxu0 }
 0x5a0   : > { %v12370_v58 = vadd.f32 %v16307_v51, %v21527_v40  ;;  %v16310_v50 = vadd.f32 %v16309_v25, %v16308_v55 }
 0x5a2   : > { %v12373_v42 = vadd.f32 %v16310_v50, %v21531_v19  ;;  %v21700_v20 = vadd.f32 %v16419_v6, %v12370_v58 }
 0x5a3   : > { %v16423_v2 = vpop.f32.mrb[132].mxu1 }
 0x5a4   : > { %v16424_v38 = vpop.f32.mrb[133].mxu1  ;;  %v16311_v54 = vpop.f32.mrb[100].mxu0  ;;  %v21707_v30 = vadd.f32 %v16422_v43, %v12373_v42 }
 0x5a5   : > { %v16425_v23 = vadd.f32 %v16424_v38, %v16423_v2  ;;  %v16426_v22 = vpop.f32.mrb[134].mxu1  ;;  %v16312_v14 = vpop.f32.mrb[101].mxu0 }
 0x5a6   : > { %v16427_v63 = vpop.f32.mrb[135].mxu1  ;;  %v16313_v8 = vadd.f32 %v16312_v14, %v16311_v54  ;;  %v16314_v10 = vpop.f32.mrb[102].mxu0 }
 0x5a7   : > { %v16428_v29 = vadd.f32 %v16427_v63, %v16426_v22  ;;  %v16315_v40 = vpop.f32.mrb[103].mxu0 }
 0x5a8   : > { %v12378_v16 = vadd.f32 %v16313_v8, %v21535_v1  ;;  %v16316_v5 = vadd.f32 %v16315_v40, %v16314_v10 }
 0x5aa   : > { %v12381_v19 = vadd.f32 %v16316_v5, %v21539_v34  ;;  %v21703_v36 = vadd.f32 %v16425_v23, %v12378_v16 }
 0x5ab   : > { %v16429_v28 = vpop.f32.mrb[136].mxu1 }
 0x5ac   : > { %v16430_v9 = vpop.f32.mrb[137].mxu1  ;;  %v16317_v31 = vpop.f32.mrb[104].mxu0  ;;  %v21705_v24 = vadd.f32 %v16428_v29, %v12381_v19 }
 0x5ad   : > { %v16431_v52 = vadd.f32 %v16430_v9, %v16429_v28  ;;  %v16432_v49 = vpop.f32.mrb[138].mxu1  ;;  %v16318_v0 = vpop.f32.mrb[105].mxu0 }
 0x5ae   : > { %v16433_v46 = vpop.f32.mrb[139].mxu1  ;;  %v16319_v21 = vadd.f32 %v16318_v0, %v16317_v31  ;;  %v16320_v1 = vpop.f32.mrb[106].mxu0 }
 0x5af   : > { %v16434_v51 = vadd.f32 %v16433_v46, %v16432_v49  ;;  %v16321_v6 = vpop.f32.mrb[107].mxu0 }
 0x5b0   : > { %v12386_v55 = vadd.f32 %v16319_v21, %v21543_v13  ;;  %v16322_v34 = vadd.f32 %v16321_v6, %v16320_v1 }
 0x5b2   : > { %v12389_v25 = vadd.f32 %v16322_v34, %v21547_v47  ;;  %v21711_v58 = vadd.f32 %v16431_v52, %v12386_v55 }
 0x5b3   : > { %v16435_v50 = vpop.f32.mrb[140].mxu1 }
 0x5b4   : > { %v16436_v2 = vpop.f32.mrb[141].mxu1  ;;  %v21713_v23 = vadd.f32 %v16434_v51, %v12389_v25 }
 0x5b5   : > { %v16437_v38 = vadd.f32 %v16436_v2, %v16435_v50  ;;  %v16438_v54 = vpop.f32.mrb[142].mxu1 }
 0x5b6   : > { %v16439_v43 = vpop.f32.mrb[143].mxu1  ;;  %v16323_v42 = vpop.f32.mrb[108].mxu0 }
 0x5b7   : > { %v16440_v22 = vadd.f32 %v16439_v43, %v16438_v54  ;;  %v16324_v14 = vpop.f32.mrb[109].mxu0 }
 0x5b8   : > { %v16325_v63 = vadd.f32 %v16324_v14, %v16323_v42  ;;  %v16326_v8 = vpop.f32.mrb[110].mxu0 }
 0x5b9   : > { %v16327_v10 = vpop.f32.mrb[111].mxu0 }
 0x5ba   : > { %v12394_v13 = vadd.f32 %v16325_v63, %v21553_v33  ;;  %v16328_v29 = vadd.f32 %v16327_v10, %v16326_v8 }
 0x5bb   : > { %v16441_v40 = vpop.f32.mrb[144].mxu1 }
 0x5bc   : > { %v16442_v47 = vpop.f32.mrb[145].mxu1  ;;  %v12397_v16 = vadd.f32 %v16328_v29, %v21557_v48  ;;  %v21717_v28 = vadd.f32 %v16437_v38, %v12394_v13 }
 0x5bd   : > { %v16443_v5 = vadd.f32 %v16442_v47, %v16441_v40  ;;  %v16444_v19 = vpop.f32.mrb[146].mxu1 }
 0x5be   : > { %v16445_v9 = vpop.f32.mrb[147].mxu1  ;;  %v21719_v52 = vadd.f32 %v16440_v22, %v12397_v16 }
 0x5bf   : > { %v16446_v31 = vadd.f32 %v16445_v9, %v16444_v19 }
 0x5c1   : > { %v16329_v49 = vpop.f32.mrb[112].mxu0 }
 0x5c2   : > { %v16330_v0 = vpop.f32.mrb[113].mxu0 }
 0x5c3   : > { %v16331_v46 = vadd.f32 %v16330_v0, %v16329_v49  ;;  %v16332_v21 = vpop.f32.mrb[114].mxu0  ;;  %v16447_v1 = vpop.f32.mrb[148].mxu1 }
 0x5c4   : > { %v16333_v51 = vpop.f32.mrb[115].mxu0  ;;  %v16448_v33 = vpop.f32.mrb[149].mxu1 }
 0x5c5   : > { %v12402_v6 = vadd.f32 %v16331_v46, %v21561_v27  ;;  %v16334_v55 = vadd.f32 %v16333_v51, %v16332_v21  ;;  %v16449_v34 = vadd.f32 %v16448_v33, %v16447_v1  ;;  %v16450_v48 = vpop.f32.mrb[150].mxu1 }
 0x5c6   : > { %v16451_v25 = vpop.f32.mrb[151].mxu1 }
 0x5c7   : > { %v12405_v50 = vadd.f32 %v16334_v55, %v21565_v44  ;;  %v16452_v2 = vadd.f32 %v16451_v25, %v16450_v48  ;;  %v21723_v38 = vadd.f32 %v16443_v5, %v12402_v6 }
 0x5c9   : > { %v21725_v54 = vadd.f32 %v16446_v31, %v12405_v50 }
 0x5cb   : > { %v16335_v43 = vpop.f32.mrb[116].mxu0  ;;  %v16453_v42 = vpop.f32.mrb[152].mxu1 }
 0x5cc   : > { %v16336_v22 = vpop.f32.mrb[117].mxu0  ;;  %v16454_v14 = vpop.f32.mrb[153].mxu1 }
 0x5cd   : > { %v16337_v63 = vadd.f32 %v16336_v22, %v16335_v43  ;;  %v16338_v8 = vpop.f32.mrb[118].mxu0  ;;  %v16455_v10 = vadd.f32 %v16454_v14, %v16453_v42  ;;  %v16456_v13 = vpop.f32.mrb[154].mxu1 }
 0x5ce   : > { %v16339_v27 = vpop.f32.mrb[119].mxu0  ;;  %v16457_v29 = vpop.f32.mrb[155].mxu1 }
 0x5cf   : > { %v12410_v40 = vadd.f32 %v16337_v63, %v21568_v3  ;;  %v16340_v47 = vadd.f32 %v16339_v27, %v16338_v8  ;;  %v16458_v16 = vadd.f32 %v16457_v29, %v16456_v13 }
 0x5d1   : > { %v12413_v44 = vadd.f32 %v16340_v47, %v21571_v32  ;;  %v21729_v5 = vadd.f32 %v16449_v34, %v12410_v40  ;;  %v17195_v32 = vld [vmem:[%s22120_s11] sm:$0xff]   ;;  %v17196_v34 = vld [vmem:[%s22120_s11 + $0x8] sm:$0xff]  }
 0x5d2   : > { %16753 = vmatprep.subr.bf16.mxu0 %v17195_v32 }
 0x5d3   : > { %v16459_v19 = vpop.f32.mrb[156].mxu1  ;;  %v21731_v9 = vadd.f32 %v16452_v2, %v12413_v44  ;;  %16754 = vmatpush3.bf16.msra.mxu0 %v17195_v32  ;;  %v17199_v44 = vld [vmem:[%s22120_s11 + $0x20] sm:$0xff]  }
 0x5d4   : > { %v16460_v31 = vpop.f32.mrb[157].mxu1  ;;  %16755 = vmatprep.subr.bf16.mxu0 %v17196_v34 }
 0x5d5   : > { %v16341_v49 = vpop.f32.mrb[120].mxu0  ;;  %v16461_v0 = vadd.f32 %v16460_v31, %v16459_v19  ;;  %v16462_v46 = vpop.f32.mrb[158].mxu1 }
 0x5d6   : > { %v16342_v21 = vpop.f32.mrb[121].mxu0  ;;  %v16463_v1 = vpop.f32.mrb[159].mxu1 }
 0x5d7   : > { %v16343_v51 = vadd.f32 %v16342_v21, %v16341_v49  ;;  %v16344_v33 = vpop.f32.mrb[122].mxu0  ;;  %v16464_v6 = vadd.f32 %v16463_v1, %v16462_v46  ;;  %16756 = vmatpush3.bf16.msra.mxu0 %v17196_v34  ;;  %v17200_v46 = vld [vmem:[%s22120_s11 + $0x28] sm:$0xff]  }
 0x5d8   : > { %v16345_v55 = vpop.f32.mrb[123].mxu0 }
 0x5d9   : > { %v12418_v3 = vadd.f32 %v16343_v51, %v21578_v37  ;;  %v16346_v48 = vadd.f32 %v16345_v55, %v16344_v33  ;;  %v17197_v37 = vld [vmem:[%s22120_s11 + $0x10] sm:$0xff]  }
 0x5da   : > { %16757 = vmatprep.subr.bf16.mxu0 %v17197_v37  ;;  %v17201_v51 = vld [vmem:[%s22120_s11 + $0x30] sm:$0xff]  }
 0x5db   : > { %v12421_v25 = vadd.f32 %v16346_v48, %v21581_v15  ;;  %v21741_v50 = vadd.f32 %v16455_v10, %v12418_v3  ;;  %v17198_v15 = vld [vmem:[%s22120_s11 + $0x18] sm:$0xff]   ;;  %16758 = vmatpush3.bf16.msra.mxu0 %v17197_v37 }
 0x5dc   : > { %16759 = vmatprep.subr.bf16.mxu0 %v17198_v15 }
 0x5dd   : > { %v21743_v2 = vadd.f32 %v16458_v16, %v12421_v25 }
 0x5df   : > { %16760 = vmatpush3.bf16.msra.mxu0 %v17198_v15 }
 0x5e0   : > { %v16465_v43 = vpop.f32.mrb[160].mxu1  ;;  %16761 = vmatprep.subr.bf16.mxu0 %v17199_v44 }
 0x5e1   : > { %v16347_v42 = vpop.f32.mrb[124].mxu0  ;;  %v16466_v22 = vpop.f32.mrb[161].mxu1 }
 0x5e2   : > { %v16348_v14 = vpop.f32.mrb[125].mxu0  ;;  %v16467_v63 = vadd.f32 %v16466_v22, %v16465_v43  ;;  %v16468_v8 = vpop.f32.mrb[162].mxu1 }
 0x5e3   : > { %v16349_v10 = vadd.f32 %v16348_v14, %v16347_v42  ;;  %v16350_v13 = vpop.f32.mrb[126].mxu0  ;;  %v16469_v27 = vpop.f32.mrb[163].mxu1  ;;  %16762 = vmatpush3.bf16.msra.mxu0 %v17199_v44 }
 0x5e4   : > { %v16351_v29 = vpop.f32.mrb[127].mxu0  ;;  %v16470_v40 = vadd.f32 %v16469_v27, %v16468_v8  ;;  %16763 = vmatprep.subr.bf16.mxu0 %v17200_v46 }
 0x5e5   : > { %v12426_v47 = vadd.f32 %v16349_v10, %v21589_v18  ;;  %v16352_v16 = vadd.f32 %v16351_v29, %v16350_v13 }
 0x5e7   : > { %v12429_v19 = vadd.f32 %v16352_v16, %v21594_v41  ;;  %v21756_v31 = vadd.f32 %v16461_v0, %v12426_v47  ;;  %16764 = vmatpush3.bf16.msra.mxu0 %v17200_v46 }
 0x5e8   : > { %16765 = vmatprep.subr.bf16.mxu0 %v17201_v51 }
 0x5e9   : > { %v21758_v49 = vadd.f32 %v16464_v6, %v12429_v19 }
 0x5eb   : > { %v16471_v21 = vpop.f32.mrb[164].mxu1  ;;  %16766 = vmatpush3.bf16.msra.mxu0 %v17201_v51 }
 0x5ec   : > { %v16353_v18 = vpop.f32.mrb[128].mxu0  ;;  %v16472_v1 = vpop.f32.mrb[165].mxu1 }
 0x5ed   : > { %v16354_v41 = vpop.f32.mrb[129].mxu0  ;;  %v16473_v0 = vadd.f32 %v16472_v1, %v16471_v21  ;;  %v16474_v33 = vpop.f32.mrb[166].mxu1 }
 0x5ee   : > { %v16355_v55 = vadd.f32 %v16354_v41, %v16353_v18  ;;  %v16356_v6 = vpop.f32.mrb[130].mxu0  ;;  %v16475_v3 = vpop.f32.mrb[167].mxu1 }
 0x5ef   : > { %v16357_v48 = vpop.f32.mrb[131].mxu0  ;;  %v16476_v32 = vadd.f32 %v16475_v3, %v16474_v33 }
 0x5f0   : > { %v12434_v34 = vadd.f32 %v16355_v55, %v21616_v4  ;;  %v16358_v25 = vadd.f32 %v16357_v48, %v16356_v6 }
 0x5f2   : > { %v12437_v37 = vadd.f32 %v16358_v25, %v21629_v26  ;;  %v21768_v43 = vadd.f32 %v16467_v63, %v12434_v34 }
 0x5f4   : > { %v21770_v42 = vadd.f32 %v16470_v40, %v12437_v37 }
 0x5f6   : > { %v16477_v15 = vpop.f32.mrb[168].mxu1 }
 0x5f7   : > { %v16359_v22 = vpop.f32.mrb[132].mxu0  ;;  %v16478_v8 = vpop.f32.mrb[169].mxu1 }
 0x5f8   : > { %v16360_v14 = vpop.f32.mrb[133].mxu0  ;;  %v16479_v27 = vadd.f32 %v16478_v8, %v16477_v15  ;;  %v16480_v29 = vpop.f32.mrb[170].mxu1 }
 0x5f9   : > { %v16361_v10 = vadd.f32 %v16360_v14, %v16359_v22  ;;  %v16362_v13 = vpop.f32.mrb[134].mxu0  ;;  %v16481_v16 = vpop.f32.mrb[171].mxu1 }
 0x5fa   : > { %v16363_v47 = vpop.f32.mrb[135].mxu0  ;;  %v16482_v19 = vadd.f32 %v16481_v16, %v16480_v29 }
 0x5fb   : > { %v12442_v4 = vadd.f32 %v16361_v10, %v21641_v11  ;;  %v16364_v44 = vadd.f32 %v16363_v47, %v16362_v13  ;;  %v11225_v47 = vld [vmem:[%s21794_s16 + $0x18] sm:$0xff] }
 0x5fd   : > { %v12445_v26 = vadd.f32 %v16364_v44, %v21644_v61  ;;  %v21774_v63 = vadd.f32 %v16473_v0, %v12442_v4  ;;  %v11222_v4 = vld [vmem:[%s21794_s16] sm:$0xff] }
 0x5ff   : > { %v21776_v40 = vadd.f32 %v16476_v32, %v12445_v26 }
 0x601   : > { %v16483_v46 = vpop.f32.mrb[172].mxu1 }
 0x602   : > { %v16484_v18 = vpop.f32.mrb[173].mxu1 }
 0x603   : > { %v16365_v21 = vpop.f32.mrb[136].mxu0  ;;  %v16485_v51 = vadd.f32 %v16484_v18, %v16483_v46  ;;  %v16486_v41 = vpop.f32.mrb[174].mxu1  ;;  %v11224_v46 = vld [vmem:[%s21794_s16 + $0x10] sm:$0xff] }
 0x604   : > { %v16366_v1 = vpop.f32.mrb[137].mxu0  ;;  %v16487_v6 = vpop.f32.mrb[175].mxu1 }
 0x605   : > { %v16367_v33 = vadd.f32 %v16366_v1, %v16365_v21  ;;  %v16368_v55 = vpop.f32.mrb[138].mxu0  ;;  %v16488_v11 = vadd.f32 %v16487_v6, %v16486_v41  ;;  %v11229_v6 = vld [vmem:[%s21794_s16 + $0x38] sm:$0xff] }
 0x606   : > { %v16369_v3 = vpop.f32.mrb[139].mxu0 }
 0x607   : > { %v12450_v48 = vadd.f32 %v16367_v33, %v21658_v35  ;;  %v16370_v61 = vadd.f32 %v16369_v3, %v16368_v55 }
 0x609   : > { %v12453_v0 = vadd.f32 %v16370_v61, %v21662_v60  ;;  %v21780_v32 = vadd.f32 %v16479_v27, %v12450_v48  ;;  %v11227_v61 = vld [vmem:[%s21794_s16 + $0x28] sm:$0xff] }
 0x60b   : > { %v21782_v34 = vadd.f32 %v16482_v19, %v12453_v0  ;;  %v16371_v25 = vpop.f32.mrb[140].mxu0  ;;  %v11223_v19 = vld [vmem:[%s21794_s16 + $0x8] sm:$0xff] }
 0x60c   : > { %v16372_v37 = vpop.f32.mrb[141].mxu0 }
 0x60d   : > { %v16373_v22 = vadd.f32 %v16372_v37, %v16371_v25  ;;  %v16374_v15 = vpop.f32.mrb[142].mxu0  ;;  %v11228_v25 = vld [vmem:[%s21794_s16 + $0x30] sm:$0xff] }
 0x60e   : > { %v16375_v14 = vpop.f32.mrb[143].mxu0 }
 0x60f   : > { %v12458_v8 = vadd.f32 %v16373_v22, %v21668_v39  ;;  %v16376_v10 = vadd.f32 %v16375_v14, %v16374_v15 }
 0x611   : > { %v12461_v13 = vadd.f32 %v16376_v10, %v21672_v59  ;;  %v21787_v29 = vadd.f32 %v16485_v51, %v12458_v8 }
 0x613   : > { %v16675_v35 = vpop.f32.mrb[144].mxu0  ;;  %v21796_v60 = vadd.f32 %v16488_v11, %v12461_v13  ;;  %v11226_v11 = vld [vmem:[%s21794_s16 + $0x20] sm:$0xff] }
 0x614   : > { %v12668_v39 = vadd.f32 %v16675_v35, %v21677_v7  ;;  %v12659_v27 = vpop.f32.mrb[145].mxu0  ;;  %v11233_v35 = vld [vmem:[%s21794_s16 + $0x58] sm:$0xff] }
 0x615   : > { %v12660_v59 = vadd.f32 %v12659_v27, %v21681_v12  ;;  %v16676_v16 = vpop.f32.mrb[146].mxu0  ;;  %v11230_v27 = vld [vmem:[%s21794_s16 + $0x40] sm:$0xff] }
 0x616   : > { %v12671_v44 = vadd.f32 %v16676_v16, %v21684_v53  ;;  %v12662_v26 = vpop.f32.mrb[147].mxu0  ;;  %v21812_v12 = vadd.f32 %v12668_v39, %v11224_v46 }
 0x617   : > { %v12663_v21 = vadd.f32 %v12662_v26, %v21687_v57  ;;  %v21808_v1 = vadd.f32 %v12660_v59, %v11222_v4  ;;  %v11232_v4 = vld [vmem:[%s21794_s16 + $0x50] sm:$0xff] }
 0x618   : > { %v21806_v18 = vadd.f32 %v12671_v44, %v11225_v47  ;;  %v11231_v47 = vld [vmem:[%s21794_s16 + $0x48] sm:$0xff] }
 0x619   : > { %v21810_v7 = vadd.f32 %v12663_v21, %v11223_v19 }
 0x61a   : > { %v12819_v41 = vpack.c.bf16 %v21806_v18, %v21812_v12 }
 0x61b   : > { %v16679_v51 = vpop.f32.mrb[148].mxu0  ;;  %v12818_v53 = vpack.c.bf16 %v21810_v7, %v21808_v1 }
 0x61c   : > { %v12684_v33 = vadd.f32 %v16679_v51, %v21689_v45  ;;  %v12675_v57 = vpop.f32.mrb[149].mxu0 }
 0x61d   : > { %v12676_v55 = vadd.f32 %v12675_v57, %v21692_v17  ;;  %v16680_v3 = vpop.f32.mrb[150].mxu0  ;;  %16721 = vmatprep.mubr.bf16.mxu1 %v12818_v53  ;;  %v11234_v57 = vld [vmem:[%s21794_s16 + $0x60] sm:$0xff] }
 0x61e   : > { %v12687_v48 = vadd.f32 %v16680_v3, %v21695_v56  ;;  %v12678_v0 = vpop.f32.mrb[151].mxu0  ;;  %16722 = vmatmul.mubr.bf16.vlgmr.msra.gmra.mrb[176].mxu1 %v12819_v41  ;;  %v21832_v15 = vadd.f32 %v12684_v33, %v11228_v25  ;;  %v11237_v41 = vld [vmem:[%s21794_s16 + $0x78] sm:$0xff] }
 0x61f   : > { %v12679_v37 = vadd.f32 %v12678_v0, %v21697_v62  ;;  %v21828_v45 = vadd.f32 %v12676_v55, %v11226_v11  ;;  %v11236_v11 = vld [vmem:[%s21794_s16 + $0x70] sm:$0xff] }
 0x620   : > { %v21826_v22 = vadd.f32 %v12687_v48, %v11229_v6  ;;  %v11235_v6 = vld [vmem:[%s21794_s16 + $0x68] sm:$0xff] }
 0x621   : > { %v21830_v17 = vadd.f32 %v12679_v37, %v11227_v61 }
 0x622   : > { %v12821_v8 = vpack.c.bf16 %v21826_v22, %v21832_v15 }
 0x623   : > { %v16683_v14 = vpop.f32.mrb[152].mxu0  ;;  %v12820_v56 = vpack.c.bf16 %v21830_v17, %v21828_v45 }
 0x624   : > { %v12700_v10 = vadd.f32 %v16683_v14, %v21703_v36  ;;  %v12691_v62 = vpop.f32.mrb[153].mxu0 }
 0x625   : > { %v12692_v13 = vadd.f32 %v12691_v62, %v21700_v20  ;;  %v16684_v39 = vpop.f32.mrb[154].mxu0  ;;  %16725 = vmatprep.mubr.bf16.mxu1 %v12820_v56  ;;  %v11238_v62 = vld [vmem:[%s21794_s16 + $0x80] sm:$0xff] }
 0x626   : > { %v12703_v59 = vadd.f32 %v16684_v39, %v21705_v24  ;;  %v12694_v16 = vpop.f32.mrb[155].mxu0  ;;  %16726 = vmatmul.mubr.bf16.gmra.mrb[180].mxu1 %v12821_v8  ;;  %v21852_v26 = vadd.f32 %v12700_v10, %v11232_v4  ;;  %v11241_v8 = vld [vmem:[%s21794_s16 + $0x98] sm:$0xff] }
 0x627   : > { %v12695_v44 = vadd.f32 %v12694_v16, %v21707_v30  ;;  %v21848_v36 = vadd.f32 %v12692_v13, %v11230_v27  ;;  %v11240_v27 = vld [vmem:[%s21794_s16 + $0x90] sm:$0xff] }
 0x628   : > { %v21846_v19 = vadd.f32 %v12703_v59, %v11233_v35  ;;  %v11239_v35 = vld [vmem:[%s21794_s16 + $0x88] sm:$0xff] }
 0x629   : > { %v21850_v20 = vadd.f32 %v12695_v44, %v11231_v47 }
 0x62a   : > { %v12823_v21 = vpack.c.bf16 %v21846_v19, %v21852_v26 }
 0x62b   : > { %v16687_v46 = vpop.f32.mrb[156].mxu0  ;;  %v12822_v24 = vpack.c.bf16 %v21850_v20, %v21848_v36 }
 0x62c   : > { %v12716_v51 = vadd.f32 %v16687_v46, %v21717_v28  ;;  %v12707_v30 = vpop.f32.mrb[157].mxu0 }
 0x62d   : > { %v12708_v53 = vadd.f32 %v12707_v30, %v21711_v58  ;;  %v16688_v33 = vpop.f32.mrb[158].mxu0  ;;  %16729 = vmatprep.mubr.bf16.mxu1 %v12822_v24  ;;  %v11242_v30 = vld [vmem:[%s21794_s16 + $0xa0] sm:$0xff] }
 0x62e   : > { %v12719_v55 = vadd.f32 %v16688_v33, %v21719_v52  ;;  %v12710_v3 = vpop.f32.mrb[159].mxu0  ;;  %16730 = vmatmul.mubr.bf16.gmra.mrb[184].mxu1 %v12823_v21  ;;  %v21872_v0 = vadd.f32 %v12716_v51, %v11236_v11  ;;  %v11245_v21 = vld [vmem:[%s21794_s16 + $0xb8] sm:$0xff] }
 0x62f   : > { %v12711_v48 = vadd.f32 %v12710_v3, %v21713_v23  ;;  %v21868_v28 = vadd.f32 %v12708_v53, %v11234_v57  ;;  %v11244_v57 = vld [vmem:[%s21794_s16 + $0xb0] sm:$0xff] }
 0x630   : > { %v21866_v61 = vadd.f32 %v12719_v55, %v11237_v41  ;;  %v11243_v41 = vld [vmem:[%s21794_s16 + $0xa8] sm:$0xff] }
 0x631   : > { %v21870_v58 = vadd.f32 %v12711_v48, %v11235_v6 }
 0x632   : > { %v12825_v37 = vpack.c.bf16 %v21866_v61, %v21872_v0 }
 0x633   : > { %v16691_v25 = vpop.f32.mrb[160].mxu0  ;;  %v12824_v52 = vpack.c.bf16 %v21870_v58, %v21868_v28 }
 0x634   : > { %v12732_v14 = vadd.f32 %v16691_v25, %v21729_v5  ;;  %v12723_v23 = vpop.f32.mrb[161].mxu0 }
 0x635   : > { %v12724_v56 = vadd.f32 %v12723_v23, %v21723_v38  ;;  %v16692_v10 = vpop.f32.mrb[162].mxu0  ;;  %16733 = vmatprep.mubr.bf16.mxu1 %v12824_v52  ;;  %v11246_v23 = vld [vmem:[%s21794_s16 + $0xc0] sm:$0xff] }
 0x636   : > { %v12735_v13 = vadd.f32 %v16692_v10, %v21731_v9  ;;  %v12726_v39 = vpop.f32.mrb[163].mxu0  ;;  %16734 = vmatmul.mubr.bf16.gmra.mrb[188].mxu1 %v12825_v37  ;;  %v21892_v16 = vadd.f32 %v12732_v14, %v11240_v27  ;;  %v11249_v37 = vld [vmem:[%s21794_s16 + $0xd8] sm:$0xff] }
 0x637   : > { %v12727_v59 = vadd.f32 %v12726_v39, %v21725_v54  ;;  %v21888_v5 = vadd.f32 %v12724_v56, %v11238_v62  ;;  %v11248_v62 = vld [vmem:[%s21794_s16 + $0xd0] sm:$0xff] }
 0x638   : > { %v21886_v47 = vadd.f32 %v12735_v13, %v11241_v8  ;;  %v11247_v8 = vld [vmem:[%s21794_s16 + $0xc8] sm:$0xff] }
 0x639   : > { %v21890_v38 = vadd.f32 %v12727_v59, %v11239_v35 }
 0x63a   : > { %v12827_v44 = vpack.c.bf16 %v21886_v47, %v21892_v16 }
 0x63b   : > { %v16695_v4 = vpop.f32.mrb[164].mxu0  ;;  %v12826_v9 = vpack.c.bf16 %v21890_v38, %v21888_v5 }
 0x63c   : > { %v12748_v46 = vadd.f32 %v16695_v4, %v21756_v31  ;;  %v12739_v54 = vpop.f32.mrb[165].mxu0 }
 0x63d   : > { %v12740_v24 = vadd.f32 %v12739_v54, %v21741_v50  ;;  %v16696_v51 = vpop.f32.mrb[166].mxu0  ;;  %16737 = vmatprep.mubr.bf16.mxu1 %v12826_v9  ;;  %v11250_v54 = vld [vmem:[%s21794_s16 + $0xe0] sm:$0xff] }
 0x63e   : > { %v12751_v53 = vadd.f32 %v16696_v51, %v21758_v49  ;;  %v12742_v33 = vpop.f32.mrb[167].mxu0  ;;  %16738 = vmatmul.mubr.bf16.gmra.mrb[192].mxu1 %v12827_v44  ;;  %v21912_v3 = vadd.f32 %v12748_v46, %v11244_v57  ;;  %v11253_v44 = vld [vmem:[%s21794_s16 + $0xf8] sm:$0xff] }
 0x63f   : > { %v12743_v55 = vadd.f32 %v12742_v33, %v21743_v2  ;;  %v21908_v31 = vadd.f32 %v12740_v24, %v11242_v30  ;;  %v11252_v30 = vld [vmem:[%s21794_s16 + $0xf0] sm:$0xff] }
 0x640   : > { %v21906_v6 = vadd.f32 %v12751_v53, %v11245_v21  ;;  %v11251_v21 = vld [vmem:[%s21794_s16 + $0xe8] sm:$0xff] }
 0x641   : > { %v21910_v50 = vadd.f32 %v12743_v55, %v11243_v41  ;;  %v21964_v55 = vld [vmem:[%s22119_s10] ss:$0 sm:$0xff] }
 0x642   : > { %v12829_v48 = vpack.c.bf16 %v21906_v6, %v21912_v3 }
 0x643   : > { %v16699_v11 = vpop.f32.mrb[168].mxu0  ;;  %v12828_v49 = vpack.c.bf16 %v21910_v50, %v21908_v31 }
 0x644   : > { %v12764_v25 = vadd.f32 %v16699_v11, %v21774_v63  ;;  %v12755_v2 = vpop.f32.mrb[169].mxu0 }
 0x645   : > { %v12756_v52 = vadd.f32 %v12755_v2, %v21768_v43  ;;  %v16700_v14 = vpop.f32.mrb[170].mxu0  ;;  %16741 = vmatprep.mubr.bf16.mxu1 %v12828_v49 }
 0x646   : > { %v12767_v56 = vadd.f32 %v16700_v14, %v21776_v40  ;;  %v12758_v10 = vpop.f32.mrb[171].mxu0  ;;  %16742 = vmatmul.mubr.bf16.gmra.mrb[196].mxu1 %v12829_v48  ;;  %v21932_v39 = vadd.f32 %v12764_v25, %v11248_v62 }
 0x647   : > { %v12759_v13 = vadd.f32 %v12758_v10, %v21770_v42  ;;  %v21928_v63 = vadd.f32 %v12756_v52, %v11246_v23 }
 0x648   : > { %v21926_v35 = vadd.f32 %v12767_v56, %v11249_v37 }
 0x649   : > { %v21930_v43 = vadd.f32 %v12759_v13, %v11247_v8 }
 0x64a   : > { %v12831_v59 = vpack.c.bf16 %v21926_v35, %v21932_v39 }
 0x64b   : > { %v16703_v27 = vpop.f32.mrb[172].mxu0  ;;  %v12830_v40 = vpack.c.bf16 %v21930_v43, %v21928_v63 }
 0x64c   : > { %v12780_v4 = vadd.f32 %v16703_v27, %v21787_v29  ;;  %v12771_v42 = vpop.f32.mrb[173].mxu0 }
 0x64d   : > { %v12772_v9 = vadd.f32 %v12771_v42, %v21780_v32  ;;  %v16704_v46 = vpop.f32.mrb[174].mxu0  ;;  %16745 = vmatprep.mubr.bf16.mxu1 %v12830_v40 }
 0x64e   : > { %v12783_v24 = vadd.f32 %v16704_v46, %v21796_v60  ;;  %v12774_v51 = vpop.f32.mrb[175].mxu0  ;;  %16746 = vmatmul.mubr.bf16.gmra.mrb[200].mxu1 %v12831_v59  ;;  %v21952_v57 = vadd.f32 %v12780_v4, %v11252_v30 }
 0x64f   : > { %v12775_v53 = vadd.f32 %v12774_v51, %v21782_v34  ;;  %v21948_v33 = vadd.f32 %v12772_v9, %v11250_v54  ;;  %v17202_v34 = vld [vmem:[%s22120_s11 + $0x38] sm:$0xff]  }
 0x650   : > { %v21946_v41 = vadd.f32 %v12783_v24, %v11253_v44  ;;  %16767 = vmatprep.subr.bf16.mxu0 %v17202_v34 }
 0x651   : > { %v21950_v29 = vadd.f32 %v12775_v53, %v11251_v21  ;;  %16768 = vmatpush3.bf16.msra.mxu0 %v17202_v34 }
 0x652   : > { %v12833_v60 = vpack.c.bf16 %v21946_v41, %v21952_v57 }
 0x653   : > { %v12832_v32 = vpack.c.bf16 %v21950_v29, %v21948_v33 }
 0x655   : > { %16749 = vmatprep.mubr.bf16.mxu1 %v12832_v32 }
 0x656   : > { %16750 = vmatmul.mubr.bf16.gmra.mrb[204].mxu1 %v12833_v60 }
 0x6f1   : > { %v16723_v11 = vpop.f32.mrb[176].mxu1 }
 0x6f2   : > { %v12948_v49 = vadd.f32 %v16723_v11, %v21964_v55  ;;  %v12939_v48 = vpop.f32.mrb[177].mxu1 }
 0x6f3   : > { %v12940_v25 = vadd.f32 %v21964_v55, %v12939_v48  ;;  %v16724_v2 = vpop.f32.mrb[178].mxu1 }
 0x6f4   : > { %v13068_v52 = vmax.f32 %v12948_v49, 0.0  ;;  %v12951_v37 = vadd.f32 %v16724_v2, %v21964_v55  ;;  %v12942_v14 = vpop.f32.mrb[179].mxu1 }
 0x6f5   : > { %v13066_v23 = vmax.f32 %v12940_v25, 0.0  ;;  %v12943_v56 = vadd.f32 %v21964_v55, %v12942_v14 }
 0x6f6   : > { %v13069_v8 = vmax.f32 %v12951_v37, 0.0  ;;  %v13100_v62 = vmin.f32 %v13068_v52, 6.0 }
 0x6f7   : > { %v13067_v10 = vmax.f32 %v12943_v56, 0.0  ;;  %v13098_v27 = vmin.f32 %v13066_v23, 6.0 }
 0x6f8   : > { %v13101_v13 = vmin.f32 %v13069_v8, 6.0 }
 0x6f9   : > { %v13099_v40 = vmin.f32 %v13067_v10, 6.0  ;;  %v16727_v59 = vpop.f32.mrb[180].mxu1 }
 0x6fa   : > { %v13131_v4 = vpack.c.bf16 %v13101_v13, %v13100_v62  ;;  %v12964_v42 = vadd.f32 %v16727_v59, %v21964_v55  ;;  %v12955_v9 = vpop.f32.mrb[181].mxu1 }
 0x6fb   : > { %v13130_v44 = vpack.c.bf16 %v13099_v40, %v13098_v27  ;;  %v12956_v46 = vadd.f32 %v21964_v55, %v12955_v9  ;;  %v16728_v54 = vpop.f32.mrb[182].mxu1 }
 0x6fc   : > { %v13072_v24 = vmax.f32 %v12964_v42, 0.0  ;;  %v12967_v21 = vadd.f32 %v16728_v54, %v21964_v55  ;;  %v12958_v51 = vpop.f32.mrb[183].mxu1 }
 0x6fd   : > { %v13070_v30 = vmax.f32 %v12956_v46, 0.0  ;;  %v12959_v53 = vadd.f32 %v21964_v55, %v12958_v51  ;;  %16769 = vmatprep.mubr.bf16.mxu0 %v13130_v44 }
 0x6fe   : > { %v13073_v32 = vmax.f32 %v12967_v21, 0.0  ;;  %16770 = vmatmul.mubr.bf16.vlgmr.msra.gmra.mrb[176].mxu0 %v13131_v4  ;;  %v13104_v34 = vmin.f32 %v13072_v24, 6.0 }
 0x6ff   : > { %v13071_v60 = vmax.f32 %v12959_v53, 0.0  ;;  %v13102_v49 = vmin.f32 %v13070_v30, 6.0 }
 0x700   : > { %v13105_v11 = vmin.f32 %v13073_v32, 6.0 }
 0x701   : > { %v13103_v48 = vmin.f32 %v13071_v60, 6.0  ;;  %v16731_v25 = vpop.f32.mrb[184].mxu1 }
 0x702   : > { %v13133_v2 = vpack.c.bf16 %v13105_v11, %v13104_v34  ;;  %v12980_v52 = vadd.f32 %v16731_v25, %v21964_v55  ;;  %v12971_v37 = vpop.f32.mrb[185].mxu1 }
 0x703   : > { %v13132_v14 = vpack.c.bf16 %v13103_v48, %v13102_v49  ;;  %v12972_v23 = vadd.f32 %v21964_v55, %v12971_v37  ;;  %v16732_v56 = vpop.f32.mrb[186].mxu1 }
 0x704   : > { %v13076_v8 = vmax.f32 %v12980_v52, 0.0  ;;  %v12983_v10 = vadd.f32 %v16732_v56, %v21964_v55  ;;  %v12974_v62 = vpop.f32.mrb[187].mxu1 }
 0x705   : > { %v13074_v13 = vmax.f32 %v12972_v23, 0.0  ;;  %v12975_v27 = vadd.f32 %v21964_v55, %v12974_v62  ;;  %16773 = vmatprep.mubr.bf16.mxu0 %v13132_v14 }
 0x706   : > { %v13077_v40 = vmax.f32 %v12983_v10, 0.0  ;;  %16774 = vmatmul.mubr.bf16.gmra.mrb[180].mxu0 %v13133_v2  ;;  %v13108_v4 = vmin.f32 %v13076_v8, 6.0 }
 0x707   : > { %v13075_v59 = vmax.f32 %v12975_v27, 0.0  ;;  %v13106_v9 = vmin.f32 %v13074_v13, 6.0 }
 0x708   : > { %v13109_v42 = vmin.f32 %v13077_v40, 6.0 }
 0x709   : > { %v13107_v44 = vmin.f32 %v13075_v59, 6.0  ;;  %v16735_v46 = vpop.f32.mrb[188].mxu1 }
 0x70a   : > { %v13135_v54 = vpack.c.bf16 %v13109_v42, %v13108_v4  ;;  %v12996_v24 = vadd.f32 %v16735_v46, %v21964_v55  ;;  %v12987_v21 = vpop.f32.mrb[189].mxu1 }
 0x70b   : > { %v13134_v51 = vpack.c.bf16 %v13107_v44, %v13106_v9  ;;  %v12988_v30 = vadd.f32 %v21964_v55, %v12987_v21  ;;  %v16736_v53 = vpop.f32.mrb[190].mxu1 }
 0x70c   : > { %v13080_v32 = vmax.f32 %v12996_v24, 0.0  ;;  %v12999_v60 = vadd.f32 %v16736_v53, %v21964_v55  ;;  %v12990_v34 = vpop.f32.mrb[191].mxu1 }
 0x70d   : > { %v13078_v11 = vmax.f32 %v12988_v30, 0.0  ;;  %v12991_v49 = vadd.f32 %v21964_v55, %v12990_v34  ;;  %16777 = vmatprep.mubr.bf16.mxu0 %v13134_v51 }
 0x70e   : > { %v13081_v48 = vmax.f32 %v12999_v60, 0.0  ;;  %16778 = vmatmul.mubr.bf16.gmra.mrb[184].mxu0 %v13135_v54  ;;  %v13112_v2 = vmin.f32 %v13080_v32, 6.0 }
 0x70f   : > { %v13079_v25 = vmax.f32 %v12991_v49, 0.0  ;;  %v13110_v37 = vmin.f32 %v13078_v11, 6.0 }
 0x710   : > { %v13113_v52 = vmin.f32 %v13081_v48, 6.0 }
 0x711   : > { %v13111_v14 = vmin.f32 %v13079_v25, 6.0  ;;  %v16739_v23 = vpop.f32.mrb[192].mxu1 }
 0x712   : > { %v13137_v56 = vpack.c.bf16 %v13113_v52, %v13112_v2  ;;  %v13012_v8 = vadd.f32 %v16739_v23, %v21964_v55  ;;  %v13003_v10 = vpop.f32.mrb[193].mxu1 }
 0x713   : > { %v13136_v62 = vpack.c.bf16 %v13111_v14, %v13110_v37  ;;  %v13004_v13 = vadd.f32 %v21964_v55, %v13003_v10  ;;  %v16740_v27 = vpop.f32.mrb[194].mxu1 }
 0x714   : > { %v13084_v40 = vmax.f32 %v13012_v8, 0.0  ;;  %v13015_v59 = vadd.f32 %v16740_v27, %v21964_v55  ;;  %v13006_v4 = vpop.f32.mrb[195].mxu1 }
 0x715   : > { %v13082_v42 = vmax.f32 %v13004_v13, 0.0  ;;  %v13007_v9 = vadd.f32 %v21964_v55, %v13006_v4  ;;  %16781 = vmatprep.mubr.bf16.mxu0 %v13136_v62 }
 0x716   : > { %v13085_v44 = vmax.f32 %v13015_v59, 0.0  ;;  %16782 = vmatmul.mubr.bf16.gmra.mrb[188].mxu0 %v13137_v56  ;;  %v13116_v54 = vmin.f32 %v13084_v40, 6.0 }
 0x717   : > { %v13083_v46 = vmax.f32 %v13007_v9, 0.0  ;;  %v13114_v21 = vmin.f32 %v13082_v42, 6.0 }
 0x718   : > { %v13117_v24 = vmin.f32 %v13085_v44, 6.0 }
 0x719   : > { %v13115_v51 = vmin.f32 %v13083_v46, 6.0  ;;  %v16743_v30 = vpop.f32.mrb[196].mxu1 }
 0x71a   : > { %v13139_v53 = vpack.c.bf16 %v13117_v24, %v13116_v54  ;;  %v13028_v32 = vadd.f32 %v16743_v30, %v21964_v55  ;;  %v13019_v60 = vpop.f32.mrb[197].mxu1 }
 0x71b   : > { %v13138_v34 = vpack.c.bf16 %v13115_v51, %v13114_v21  ;;  %v13020_v11 = vadd.f32 %v21964_v55, %v13019_v60  ;;  %v16744_v49 = vpop.f32.mrb[198].mxu1 }
 0x71c   : > { %v13088_v48 = vmax.f32 %v13028_v32, 0.0  ;;  %v13031_v25 = vadd.f32 %v16744_v49, %v21964_v55  ;;  %v13022_v2 = vpop.f32.mrb[199].mxu1 }
 0x71d   : > { %v13086_v52 = vmax.f32 %v13020_v11, 0.0  ;;  %v13023_v37 = vadd.f32 %v21964_v55, %v13022_v2  ;;  %16785 = vmatprep.mubr.bf16.mxu0 %v13138_v34 }
 0x71e   : > { %v13089_v14 = vmax.f32 %v13031_v25, 0.0  ;;  %16786 = vmatmul.mubr.bf16.gmra.mrb[192].mxu0 %v13139_v53  ;;  %v13120_v56 = vmin.f32 %v13088_v48, 6.0 }
 0x71f   : > { %v13087_v23 = vmax.f32 %v13023_v37, 0.0  ;;  %v13118_v10 = vmin.f32 %v13086_v52, 6.0 }
 0x720   : > { %v13121_v8 = vmin.f32 %v13089_v14, 6.0 }
 0x721   : > { %v13119_v62 = vmin.f32 %v13087_v23, 6.0  ;;  %v16747_v13 = vpop.f32.mrb[200].mxu1 }
 0x722   : > { %v13141_v27 = vpack.c.bf16 %v13121_v8, %v13120_v56  ;;  %v13044_v40 = vadd.f32 %v16747_v13, %v21964_v55  ;;  %v13035_v59 = vpop.f32.mrb[201].mxu1 }
 0x723   : > { %v13140_v4 = vpack.c.bf16 %v13119_v62, %v13118_v10  ;;  %v13036_v42 = vadd.f32 %v21964_v55, %v13035_v59  ;;  %v16748_v9 = vpop.f32.mrb[202].mxu1 }
 0x724   : > { %v13092_v44 = vmax.f32 %v13044_v40, 0.0  ;;  %v13047_v46 = vadd.f32 %v16748_v9, %v21964_v55  ;;  %v13038_v54 = vpop.f32.mrb[203].mxu1 }
 0x725   : > { %v13090_v24 = vmax.f32 %v13036_v42, 0.0  ;;  %v13039_v21 = vadd.f32 %v21964_v55, %v13038_v54  ;;  %16789 = vmatprep.mubr.bf16.mxu0 %v13140_v4 }
 0x726   : > { %v13093_v51 = vmax.f32 %v13047_v46, 0.0  ;;  %16790 = vmatmul.mubr.bf16.gmra.mrb[196].mxu0 %v13141_v27  ;;  %v13124_v53 = vmin.f32 %v13092_v44, 6.0  ;;  %v22001_v44 = vld [vmem:[%s22121_s12] ss:$0 sm:$0xff] }
 0x727   : > { %v13091_v30 = vmax.f32 %v13039_v21, 0.0  ;;  %v13122_v60 = vmin.f32 %v13090_v24, 6.0 }
 0x728   : > { %v13125_v32 = vmin.f32 %v13093_v51, 6.0 }
 0x729   : > { %v13123_v34 = vmin.f32 %v13091_v30, 6.0  ;;  %v16751_v11 = vpop.f32.mrb[204].mxu1 }
 0x72a   : > { %v13143_v49 = vpack.c.bf16 %v13125_v32, %v13124_v53  ;;  %v13060_v48 = vadd.f32 %v16751_v11, %v21964_v55  ;;  %v13051_v25 = vpop.f32.mrb[205].mxu1 }
 0x72b   : > { %v13142_v2 = vpack.c.bf16 %v13123_v34, %v13122_v60  ;;  %v13052_v52 = vadd.f32 %v21964_v55, %v13051_v25  ;;  %v16752_v37 = vpop.f32.mrb[206].mxu1 }
 0x72c   : > { %v13096_v14 = vmax.f32 %v13060_v48, 0.0  ;;  %v13063_v23 = vadd.f32 %v16752_v37, %v21964_v55  ;;  %v13054_v56 = vpop.f32.mrb[207].mxu1 }
 0x72d   : > { %v13094_v8 = vmax.f32 %v13052_v52, 0.0  ;;  %v13055_v10 = vadd.f32 %v21964_v55, %v13054_v56  ;;  %16793 = vmatprep.mubr.bf16.mxu0 %v13142_v2 }
 0x72e   : > { %v13097_v62 = vmax.f32 %v13063_v23, 0.0  ;;  %16794 = vmatmul.mubr.bf16.gmra.mrb[200].mxu0 %v13143_v49  ;;  %v13128_v27 = vmin.f32 %v13096_v14, 6.0 }
 0x72f   : > { %v13095_v13 = vmax.f32 %v13055_v10, 0.0  ;;  %v13126_v59 = vmin.f32 %v13094_v8, 6.0 }
 0x730   : > { %v13129_v40 = vmin.f32 %v13097_v62, 6.0 }
 0x731   : > { %v13127_v4 = vmin.f32 %v13095_v13, 6.0 }
 0x732   : > { %v13145_v42 = vpack.c.bf16 %v13129_v40, %v13128_v27 }
 0x733   : > { %v13144_v9 = vpack.c.bf16 %v13127_v4, %v13126_v59 }
 0x735   : > { %16797 = vmatprep.mubr.bf16.mxu0 %v13144_v9 }
 0x736   : > { %16798 = vmatmul.mubr.bf16.gmra.mrb[204].mxu0 %v13145_v42 }
 0x7d1   : > { %v16771_v46 = vpop.f32.mrb[176].mxu0 }
 0x7d2   : > { %v13260_v55 = vadd.f32 %v16771_v46, %v22001_v44  ;;  %v13251_v54 = vpop.f32.mrb[177].mxu0 }
 0x7d3   : > { %v13252_v24 = vadd.f32 %v22001_v44, %v13251_v54  ;;  %v16772_v21 = vpop.f32.mrb[178].mxu0 }
 0x7d4   : > { %v13380_v51 = vadd.f32 %v13260_v55, %v21812_v12  ;;  %v13263_v30 = vadd.f32 %v16772_v21, %v22001_v44  ;;  %v13254_v53 = vpop.f32.mrb[179].mxu0 }
 0x7d5   : > { %v13378_v32 = vadd.f32 %v13252_v24, %v21808_v1  ;;  %v13255_v60 = vadd.f32 %v22001_v44, %v13254_v53 }
 0x7d6   : > { %13412 = vst [vmem:[%s22009_s14 + $0x10] sm:$0xff] %v13380_v51  ;;  %v13381_v34 = vadd.f32 %v13263_v30, %v21806_v18 }
 0x7d7   : > { %13410 = vst [vmem:[%s22009_s14] sm:$0xff] %v13378_v32  ;;  %v13379_v11 = vadd.f32 %v13255_v60, %v21810_v7 }
 0x7d8   : > { %13413 = vst [vmem:[%s22009_s14 + $0x18] sm:$0xff] %v13381_v34 }
 0x7d9   : > { %13411 = vst [vmem:[%s22009_s14 + $0x8] sm:$0xff] %v13379_v11  ;;  %v16775_v12 = vpop.f32.mrb[180].mxu0 }
 0x7da   : > { %v13276_v49 = vadd.f32 %v16775_v12, %v22001_v44  ;;  %v13267_v48 = vpop.f32.mrb[181].mxu0 }
 0x7db   : > { %v13268_v1 = vadd.f32 %v22001_v44, %v13267_v48  ;;  %v16776_v25 = vpop.f32.mrb[182].mxu0 }
 0x7dc   : > { %v13384_v2 = vadd.f32 %v13276_v49, %v21832_v15  ;;  %v13279_v52 = vadd.f32 %v16776_v25, %v22001_v44  ;;  %v13270_v18 = vpop.f32.mrb[183].mxu0 }
 0x7dd   : > { %v13382_v37 = vadd.f32 %v13268_v1, %v21828_v45  ;;  %v13271_v7 = vadd.f32 %v22001_v44, %v13270_v18 }
 0x7de   : > { %13416 = vst [vmem:[%s22009_s14 + $0x30] sm:$0xff] %v13384_v2  ;;  %v13385_v14 = vadd.f32 %v13279_v52, %v21826_v22 }
 0x7df   : > { %13414 = vst [vmem:[%s22009_s14 + $0x20] sm:$0xff] %v13382_v37  ;;  %v13383_v23 = vadd.f32 %v13271_v7, %v21830_v17 }
 0x7e0   : > { %13417 = vst [vmem:[%s22009_s14 + $0x38] sm:$0xff] %v13385_v14 }
 0x7e1   : > { %13415 = vst [vmem:[%s22009_s14 + $0x28] sm:$0xff] %v13383_v23  ;;  %v16779_v15 = vpop.f32.mrb[184].mxu0 }
 0x7e2   : > { %v13292_v56 = vadd.f32 %v16779_v15, %v22001_v44  ;;  %v13283_v8 = vpop.f32.mrb[185].mxu0 }
 0x7e3   : > { %v13284_v45 = vadd.f32 %v22001_v44, %v13283_v8  ;;  %v16780_v10 = vpop.f32.mrb[186].mxu0 }
 0x7e4   : > { %v13388_v62 = vadd.f32 %v13292_v56, %v21852_v26  ;;  %v13295_v13 = vadd.f32 %v16780_v10, %v22001_v44  ;;  %v13286_v22 = vpop.f32.mrb[187].mxu0 }
 0x7e5   : > { %v13386_v27 = vadd.f32 %v13284_v45, %v21848_v36  ;;  %v13287_v17 = vadd.f32 %v22001_v44, %v13286_v22 }
 0x7e6   : > { %13420 = vst [vmem:[%s22009_s14 + $0x50] sm:$0xff] %v13388_v62  ;;  %v13389_v40 = vadd.f32 %v13295_v13, %v21846_v19 }
 0x7e7   : > { %13418 = vst [vmem:[%s22009_s14 + $0x40] sm:$0xff] %v13386_v27  ;;  %v13387_v59 = vadd.f32 %v13287_v17, %v21850_v20 }
 0x7e8   : > { %13421 = vst [vmem:[%s22009_s14 + $0x58] sm:$0xff] %v13389_v40 }
 0x7e9   : > { %13419 = vst [vmem:[%s22009_s14 + $0x48] sm:$0xff] %v13387_v59  ;;  %v16783_v26 = vpop.f32.mrb[188].mxu0 }
 0x7ea   : > { %v13308_v4 = vadd.f32 %v16783_v26, %v22001_v44  ;;  %v13299_v42 = vpop.f32.mrb[189].mxu0 }
 0x7eb   : > { %v13300_v36 = vadd.f32 %v22001_v44, %v13299_v42  ;;  %v16784_v9 = vpop.f32.mrb[190].mxu0 }
 0x7ec   : > { %v13392_v46 = vadd.f32 %v13308_v4, %v21872_v0  ;;  %v13311_v55 = vadd.f32 %v16784_v9, %v22001_v44  ;;  %v13302_v19 = vpop.f32.mrb[191].mxu0 }
 0x7ed   : > { %v13390_v54 = vadd.f32 %v13300_v36, %v21868_v28  ;;  %v13303_v20 = vadd.f32 %v22001_v44, %v13302_v19 }
 0x7ee   : > { %13424 = vst [vmem:[%s22009_s14 + $0x70] sm:$0xff] %v13392_v46  ;;  %v13393_v24 = vadd.f32 %v13311_v55, %v21866_v61 }
 0x7ef   : > { %13422 = vst [vmem:[%s22009_s14 + $0x60] sm:$0xff] %v13390_v54  ;;  %v13391_v21 = vadd.f32 %v13303_v20, %v21870_v58 }
 0x7f0   : > { %13425 = vst [vmem:[%s22009_s14 + $0x78] sm:$0xff] %v13393_v24 }
 0x7f1   : > { %13423 = vst [vmem:[%s22009_s14 + $0x68] sm:$0xff] %v13391_v21  ;;  %v16787_v0 = vpop.f32.mrb[192].mxu0 }
 0x7f2   : > { %v13324_v51 = vadd.f32 %v16787_v0, %v22001_v44  ;;  %v13315_v30 = vpop.f32.mrb[193].mxu0 }
 0x7f3   : > { %v13316_v28 = vadd.f32 %v22001_v44, %v13315_v30  ;;  %v16788_v53 = vpop.f32.mrb[194].mxu0 }
 0x7f4   : > { %v13396_v32 = vadd.f32 %v13324_v51, %v21892_v16  ;;  %v13327_v60 = vadd.f32 %v16788_v53, %v22001_v44  ;;  %v13318_v61 = vpop.f32.mrb[195].mxu0 }
 0x7f5   : > { %v13394_v34 = vadd.f32 %v13316_v28, %v21888_v5  ;;  %v13319_v58 = vadd.f32 %v22001_v44, %v13318_v61 }
 0x7f6   : > { %13428 = vst [vmem:[%s22009_s14 + $0x90] sm:$0xff] %v13396_v32  ;;  %v13397_v11 = vadd.f32 %v13327_v60, %v21886_v47 }
 0x7f7   : > { %13426 = vst [vmem:[%s22009_s14 + $0x80] sm:$0xff] %v13394_v34  ;;  %v13395_v12 = vadd.f32 %v13319_v58, %v21890_v38 }
 0x7f8   : > { %13429 = vst [vmem:[%s22009_s14 + $0x98] sm:$0xff] %v13397_v11 }
 0x7f9   : > { %13427 = vst [vmem:[%s22009_s14 + $0x88] sm:$0xff] %v13395_v12  ;;  %v16791_v16 = vpop.f32.mrb[196].mxu0 }
 0x7fa   : > { %v13340_v49 = vadd.f32 %v16791_v16, %v22001_v44  ;;  %v13331_v48 = vpop.f32.mrb[197].mxu0 }
 0x7fb   : > { %v13332_v5 = vadd.f32 %v22001_v44, %v13331_v48  ;;  %v16792_v1 = vpop.f32.mrb[198].mxu0 }
 0x7fc   : > { %v13400_v25 = vadd.f32 %v13340_v49, %v21912_v3  ;;  %v13343_v2 = vadd.f32 %v16792_v1, %v22001_v44  ;;  %v13334_v47 = vpop.f32.mrb[199].mxu0 }
 0x7fd   : > { %v13398_v52 = vadd.f32 %v13332_v5, %v21908_v31  ;;  %v13335_v38 = vadd.f32 %v22001_v44, %v13334_v47 }
 0x7fe   : > { %13432 = vst [vmem:[%s22009_s14 + $0xb0] sm:$0xff] %v13400_v25  ;;  %v13401_v18 = vadd.f32 %v13343_v2, %v21906_v6 }
 0x7ff   : > { %13430 = vst [vmem:[%s22009_s14 + $0xa0] sm:$0xff] %v13398_v52  ;;  %v13399_v37 = vadd.f32 %v13335_v38, %v21910_v50 }
 0x800   : > { %13433 = vst [vmem:[%s22009_s14 + $0xb8] sm:$0xff] %v13401_v18 }
 0x801   : > { %13431 = vst [vmem:[%s22009_s14 + $0xa8] sm:$0xff] %v13399_v37  ;;  %v16795_v3 = vpop.f32.mrb[200].mxu0 }
 0x802   : > { %v13356_v7 = vadd.f32 %v16795_v3, %v22001_v44  ;;  %v13347_v14 = vpop.f32.mrb[201].mxu0 }
 0x803   : > { %v13348_v31 = vadd.f32 %v22001_v44, %v13347_v14  ;;  %v16796_v23 = vpop.f32.mrb[202].mxu0 }
 0x804   : > { %v13404_v15 = vadd.f32 %v13356_v7, %v21932_v39  ;;  %v13359_v56 = vadd.f32 %v16796_v23, %v22001_v44  ;;  %v13350_v6 = vpop.f32.mrb[203].mxu0 }
 0x805   : > { %v13402_v8 = vadd.f32 %v13348_v31, %v21928_v63  ;;  %v13351_v50 = vadd.f32 %v22001_v44, %v13350_v6 }
 0x806   : > { %13436 = vst [vmem:[%s22009_s14 + $0xd0] sm:$0xff] %v13404_v15  ;;  %v13405_v45 = vadd.f32 %v13359_v56, %v21926_v35 }
 0x807   : > { %13434 = vst [vmem:[%s22009_s14 + $0xc0] sm:$0xff] %v13402_v8  ;;  %v13403_v10 = vadd.f32 %v13351_v50, %v21930_v43 }
 0x808   : > { %13437 = vst [vmem:[%s22009_s14 + $0xd8] sm:$0xff] %v13405_v45 }
 0x809   : > { %13435 = vst [vmem:[%s22009_s14 + $0xc8] sm:$0xff] %v13403_v10  ;;  %v16799_v39 = vpop.f32.mrb[204].mxu0 }
 0x80a   : > { %v13372_v62 = vadd.f32 %v16799_v39, %v22001_v44  ;;  %v13363_v13 = vpop.f32.mrb[205].mxu0 }
 0x80b   : > { %v13364_v63 = vadd.f32 %v22001_v44, %v13363_v13  ;;  %v16800_v22 = vpop.f32.mrb[206].mxu0 }
 0x80c   : > { %v13408_v27 = vadd.f32 %v13372_v62, %v21952_v57  ;;  %v13375_v17 = vadd.f32 %v16800_v22, %v22001_v44  ;;  %v13366_v35 = vpop.f32.mrb[207].mxu0 }
 0x80d   : > { %v13406_v40 = vadd.f32 %v13364_v63, %v21948_v33  ;;  %v13367_v43 = vadd.f32 %v22001_v44, %v13366_v35 }
 0x80e   : > { %13440 = vst [vmem:[%s22009_s14 + $0xf0] sm:$0xff] %v13408_v27  ;;  %v13409_v59 = vadd.f32 %v13375_v17, %v21946_v41 }
 0x80f   : > { %13438 = vst [vmem:[%s22009_s14 + $0xe0] sm:$0xff] %v13406_v40  ;;  %v13407_v26 = vadd.f32 %v13367_v43, %v21950_v29 }
 0x810   : > { %13441 = vst [vmem:[%s22009_s14 + $0xf8] sm:$0xff] %v13409_v59 }
 0x811   : > { %13439 = vst [vmem:[%s22009_s14 + $0xe8] sm:$0xff] %v13407_v26 }
 0x812 PF: > { %s23_s25 = sadd.s32 1, %s17215_s25  }
 0x813   : > { %p20_p4 = scmp.ge.s32.totalorder %s23_s25, 4  }
 0x815   :  { %22 = sbr.rel (!%p20_p4) target bundleno = 1 (0x1), region = 115 }

</bundles_post_ra>
